<compile_context>
chip_gen: v6e
topology: v6e:2x2x1
jax: 0.10.0
libtpu: 0.0.40
codegen_flags: <defaults>
</compile_context>

<pallas_src>
import math

import jax
import jax.numpy as jnp
import numpy as np
from jax.experimental import pallas as pl
from jax.experimental.pallas import tpu as pltpu

DIM_INPUT = 1024
DIM_LATENT = 32
_STRIDE = 4
_MAX_ROWS_PER_BLOCK = 512          # batch-row tile (multiple of 8) for large B
_LAYER_KEYS = ("c1", "c2", "c3", "c4", "fm", "fv", "t1", "t2", "t3", "t4")


# ---------------------------------------------------------------------------
# Fused Pallas kernel: the whole VAE forward in one launch.
# ---------------------------------------------------------------------------
def _vae_fused_kernel(
    x_ref, eps_ref,
    c1_w, c1_b, c2_w, c2_b, c3_w, c3_b, c4_w, c4_b,
    fm_w, fm_b, fv_w, fv_b,
    t1_w, t1_b, t2_w, t2_b, t3_w, t3_b, t4_w, t4_b,
    recon_ref, moy_ref, logvar_ref,
):
    def dense_layer(h, w_ref, b_ref, act):
        # bf16 MXU matmul, f32 accumulate, f32 epilogue (bias + nonlinearity).
        y = jnp.dot(h.astype(jnp.bfloat16), w_ref[...],
                    preferred_element_type=jnp.float32)
        y = y + b_ref[...]                       # (1, N) broadcast over rows
        if act == "relu":
            y = jnp.maximum(y, 0.0)
        elif act == "sigmoid":
            y = jax.nn.sigmoid(y)
        return y

    # ---- encoder ----------------------------------------------------------
    h = x_ref[...]                                   # (bb, 1024) f32
    h = dense_layer(h, c1_w, c1_b, "relu")           # (bb, 254*4)
    h = dense_layer(h, c2_w, c2_b, "relu")           # (bb, 61*8)
    h = dense_layer(h, c3_w, c3_b, "relu")           # (bb, 13*16)
    h = dense_layer(h, c4_w, c4_b, "relu")           # (bb, 32)

    # ---- latent heads + reparametrization ----------------------------------
    moy = dense_layer(h, fm_w, fm_b, "none")         # (bb, 32)
    logvar = dense_layer(h, fv_w, fv_b, "none")      # (bb, 32)
    moy_ref[...] = moy
    logvar_ref[...] = logvar
    z = moy + eps_ref[...] * jnp.exp(0.5 * logvar)   # (bb, 32)

    # ---- decoder ------------------------------------------------------------
    d = dense_layer(z, t1_w, t1_b, "relu")           # (bb, 13*16)
    d = dense_layer(d, t2_w, t2_b, "relu")           # (bb, 61*8)
    d = dense_layer(d, t3_w, t3_b, "relu")           # (bb, 253*4)
    recon_ref[...] = dense_layer(d, t4_w, t4_b, "sigmoid")   # (bb, 1024)


# ---------------------------------------------------------------------------
# Parameters (deterministic, PyTorch-default-style uniform init)
# ---------------------------------------------------------------------------
def init_params(key):
    keys = jax.random.split(key, 20)
    u = lambda k, shape, bnd: jax.random.uniform(k, shape, jnp.float32, -bnd, bnd)
    p = {}
    conv_shapes = [(4, 1, 11), (8, 4, 11), (16, 8, 11), (32, 16, 11)]
    for i, (co, ci, k) in enumerate(conv_shapes, start=1):
        bnd = 1.0 / math.sqrt(ci * k)
        p[f"conv{i}_w"] = u(keys[2 * i - 2], (co, ci, k), bnd)
        p[f"conv{i}_b"] = u(keys[2 * i - 1], (co,), bnd)
    bnd = 1.0 / math.sqrt(DIM_LATENT)
    p["fc_moy_w"] = u(keys[8], (DIM_LATENT, DIM_LATENT), bnd)   # (out, in) like torch
    p["fc_moy_b"] = u(keys[9], (DIM_LATENT,), bnd)
    p["fc_var_w"] = u(keys[10], (DIM_LATENT, DIM_LATENT), bnd)
    p["fc_var_b"] = u(keys[11], (DIM_LATENT,), bnd)
    convt_shapes = [(32, 16, 13), (16, 8, 13), (8, 4, 13), (4, 1, 16)]
    for i, (ci, co, k) in enumerate(convt_shapes, start=1):
        bnd = 1.0 / math.sqrt(ci * k)
        p[f"convt{i}_w"] = u(keys[10 + 2 * i], (ci, co, k), bnd)
        p[f"convt{i}_b"] = u(keys[11 + 2 * i], (co,), bnd)
    return p


# ---------------------------------------------------------------------------
# One-time host-side prep: turn every conv layer into a dense operator.
# Activation convention: flat row vector v[pos * C + c] (time-major).
# ---------------------------------------------------------------------------
def _conv1d_dense(w, b, lin, stride):
    """nn.Conv1d(padding=0) as a (Lin*Cin, Lout*Cout) dense matrix + bias."""
    w = np.asarray(w, np.float32)
    b = np.asarray(b, np.float32)
    cout, cin, k = w.shape
    lout = (lin - k) // stride + 1
    m = np.zeros((lin, cin, lout, cout), np.float32)
    t = np.arange(lout)
    for kk in range(k):
        m[stride * t + kk, :, t, :] = w[:, :, kk].T          # (cin, cout)
    return m.reshape(lin * cin, lout * cout), np.tile(b, lout), lout


def _convtranspose1d_dense(w, b, lin, stride):
    """nn.ConvTranspose1d(padding=0, output_padding=0) as a dense matrix."""
    w = np.asarray(w, np.float32)
    b = np.asarray(b, np.float32)
    cin, cout, k = w.shape
    lout = (lin - 1) * stride + k
    m = np.zeros((lin, cin, lout, cout), np.float32)
    i = np.arange(lin)
    for kk in range(k):
        m[i, :, stride * i + kk, :] = w[:, :, kk]            # (cin, cout)
    return m.reshape(lin * cin, lout * cout), np.tile(b, lout), lout


def prepare_dense_params(params):
    """bf16 dense layer operators + f32 (1, N) biases, built once at init."""
    dense = {}

    def put(name, mat, bias):
        dense[name + "_w"] = jnp.asarray(mat, jnp.bfloat16)
        dense[name + "_b"] = jnp.asarray(np.asarray(bias, np.float32))[None, :]

    lin = DIM_INPUT
    for i in range(1, 5):
        mat, bias, lin = _conv1d_dense(
            params[f"conv{i}_w"], params[f"conv{i}_b"], lin, _STRIDE)
        put(f"c{i}", mat, bias)

    put("fm", np.asarray(params["fc_moy_w"], np.float32).T, params["fc_moy_b"])
    put("fv", np.asarray(params["fc_var_w"], np.float32).T, params["fc_var_b"])

    lin = 1
    for i in range(1, 5):
        mat, bias, lin = _convtranspose1d_dense(
            params[f"convt{i}_w"], params[f"convt{i}_b"], lin, _STRIDE)
        put(f"t{i}", mat, bias)
    assert lin == DIM_INPUT
    return dense


# ---------------------------------------------------------------------------
# Forward pass (matches VAELow.forward; eps ~ N(0,1) supplied by host)
# ---------------------------------------------------------------------------
@jax.jit
def vae_low_forward(dense, states, eps):
    states = states.astype(jnp.float32).reshape(-1, DIM_INPUT)
    eps = eps.astype(jnp.float32).reshape(-1, DIM_LATENT)
    batch = states.shape[0]

    bb = batch if batch <= _MAX_ROWS_PER_BLOCK else _MAX_ROWS_PER_BLOCK
    n_tiles = -(-batch // bb)
    padded = n_tiles * bb
    if padded != batch:
        states = jnp.pad(states, ((0, padded - batch), (0, 0)))
        eps = jnp.pad(eps, ((0, padded - batch), (0, 0)))

    weight_args = []
    weight_specs = []
    for name in _LAYER_KEYS:
        for suffix in ("_w", "_b"):
            arr = dense[name + suffix]
            weight_args.append(arr)
            # Full-array block, constant index_map -> resident across the grid.
            weight_specs.append(pl.BlockSpec(arr.shape, lambda i: (0, 0)))

    row_map = lambda i: (i, 0)
    in_specs = [pl.BlockSpec((bb, DIM_INPUT), row_map),
                pl.BlockSpec((bb, DIM_LATENT), row_map)] + weight_specs
    out_specs = (pl.BlockSpec((bb, DIM_INPUT), row_map),
                 pl.BlockSpec((bb, DIM_LATENT), row_map),
                 pl.BlockSpec((bb, DIM_LATENT), row_map))
    out_shape = (jax.ShapeDtypeStruct((padded, DIM_INPUT), jnp.float32),
                 jax.ShapeDtypeStruct((padded, DIM_LATENT), jnp.float32),
                 jax.ShapeDtypeStruct((padded, DIM_LATENT), jnp.float32))

    recon, moy, logvar = pl.pallas_call(
        _vae_fused_kernel,
        grid=(n_tiles,),
        in_specs=in_specs,
        out_specs=out_specs,
        out_shape=out_shape,
        compiler_params=pltpu.CompilerParams(
            dimension_semantics=("parallel",),
            vmem_limit_bytes=32 * 1024 * 1024,
        ),
    )(states, eps, *weight_args)

    if padded != batch:
        recon, moy, logvar = recon[:batch], moy[:batch], logvar[:batch]
    return recon, moy, logvar


if __name__ == "__main__":
    key = jax.random.PRNGKey(0)
    k_x, k_eps, k_p = jax.random.split(key, 3)

    params = init_params(k_p)
    dense_params = prepare_dense_params(params)

    x = jax.random.normal(k_x, (2, DIM_INPUT), jnp.float32)       # batch=2, seq=1024
    eps = jax.random.normal(k_eps, (2, DIM_LATENT), jnp.float32)  # reparam noise

    recon, moy, logvar = vae_low_forward(dense_params, x, eps)
    jax.block_until_ready((recon, moy, logvar))

    assert recon.shape == (2, DIM_INPUT)
    assert moy.shape == (2, DIM_LATENT)
    assert logvar.shape == (2, DIM_LATENT)
    assert bool(jnp.all(jnp.isfinite(recon)))
    assert bool(jnp.all(jnp.isfinite(moy)))
    assert bool(jnp.all(jnp.isfinite(logvar)))
    assert bool(jnp.all((recon >= 0.0) & (recon <= 1.0)))         # sigmoid output
    print("KERNEL_OK")
</pallas_src>

<mosaic_0001>
module attributes {stable_mosaic.version = 11 : i64} {
  func.func @_vae_fused_kernel(%arg0: i32, %arg1: memref<2x1024xf32, #tpu.memory_space<vmem>>, %arg2: memref<2x32xf32, #tpu.memory_space<vmem>>, %arg3: memref<1024x1016xbf16, #tpu.memory_space<vmem>>, %arg4: memref<1x1016xf32, #tpu.memory_space<vmem>>, %arg5: memref<1016x488xbf16, #tpu.memory_space<vmem>>, %arg6: memref<1x488xf32, #tpu.memory_space<vmem>>, %arg7: memref<488x208xbf16, #tpu.memory_space<vmem>>, %arg8: memref<1x208xf32, #tpu.memory_space<vmem>>, %arg9: memref<208x32xbf16, #tpu.memory_space<vmem>>, %arg10: memref<1x32xf32, #tpu.memory_space<vmem>>, %arg11: memref<32x32xbf16, #tpu.memory_space<vmem>>, %arg12: memref<1x32xf32, #tpu.memory_space<vmem>>, %arg13: memref<32x32xbf16, #tpu.memory_space<vmem>>, %arg14: memref<1x32xf32, #tpu.memory_space<vmem>>, %arg15: memref<32x208xbf16, #tpu.memory_space<vmem>>, %arg16: memref<1x208xf32, #tpu.memory_space<vmem>>, %arg17: memref<208x488xbf16, #tpu.memory_space<vmem>>, %arg18: memref<1x488xf32, #tpu.memory_space<vmem>>, %arg19: memref<488x1012xbf16, #tpu.memory_space<vmem>>, %arg20: memref<1x1012xf32, #tpu.memory_space<vmem>>, %arg21: memref<1012x1024xbf16, #tpu.memory_space<vmem>>, %arg22: memref<1x1024xf32, #tpu.memory_space<vmem>>, %arg23: memref<2x1024xf32, #tpu.memory_space<vmem>>, %arg24: memref<2x32xf32, #tpu.memory_space<vmem>>, %arg25: memref<2x32xf32, #tpu.memory_space<vmem>>) attributes {dimension_semantics = [#tpu.dimension_semantics<parallel>], iteration_bounds = array<i64: 1>, scalar_prefetch = 0 : i64, scratch_operands = 0 : i64, tpu.core_type = #tpu.core_type<tc>, window_params = [{transform_indices = @transform_0, window_bounds = array<i64: 2, 1024>}, {transform_indices = @transform_1, window_bounds = array<i64: 2, 32>}, {pipeline_mode = #tpu.pipeline_mode<synchronous>, transform_indices = @transform_2, window_bounds = array<i64: 1024, 1016>}, {pipeline_mode = #tpu.pipeline_mode<synchronous>, transform_indices = @transform_3, window_bounds = array<i64: 1, 1016>}, {pipeline_mode = #tpu.pipeline_mode<synchronous>, transform_indices = @transform_4, window_bounds = array<i64: 1016, 488>}, {pipeline_mode = #tpu.pipeline_mode<synchronous>, transform_indices = @transform_5, window_bounds = array<i64: 1, 488>}, {pipeline_mode = #tpu.pipeline_mode<synchronous>, transform_indices = @transform_6, window_bounds = array<i64: 488, 208>}, {pipeline_mode = #tpu.pipeline_mode<synchronous>, transform_indices = @transform_7, window_bounds = array<i64: 1, 208>}, {pipeline_mode = #tpu.pipeline_mode<synchronous>, transform_indices = @transform_8, window_bounds = array<i64: 208, 32>}, {pipeline_mode = #tpu.pipeline_mode<synchronous>, transform_indices = @transform_9, window_bounds = array<i64: 1, 32>}, {pipeline_mode = #tpu.pipeline_mode<synchronous>, transform_indices = @transform_10, window_bounds = array<i64: 32, 32>}, {pipeline_mode = #tpu.pipeline_mode<synchronous>, transform_indices = @transform_11, window_bounds = array<i64: 1, 32>}, {pipeline_mode = #tpu.pipeline_mode<synchronous>, transform_indices = @transform_12, window_bounds = array<i64: 32, 32>}, {pipeline_mode = #tpu.pipeline_mode<synchronous>, transform_indices = @transform_13, window_bounds = array<i64: 1, 32>}, {pipeline_mode = #tpu.pipeline_mode<synchronous>, transform_indices = @transform_14, window_bounds = array<i64: 32, 208>}, {pipeline_mode = #tpu.pipeline_mode<synchronous>, transform_indices = @transform_15, window_bounds = array<i64: 1, 208>}, {pipeline_mode = #tpu.pipeline_mode<synchronous>, transform_indices = @transform_16, window_bounds = array<i64: 208, 488>}, {pipeline_mode = #tpu.pipeline_mode<synchronous>, transform_indices = @transform_17, window_bounds = array<i64: 1, 488>}, {pipeline_mode = #tpu.pipeline_mode<synchronous>, transform_indices = @transform_18, window_bounds = array<i64: 488, 1012>}, {pipeline_mode = #tpu.pipeline_mode<synchronous>, transform_indices = @transform_19, window_bounds = array<i64: 1, 1012>}, {pipeline_mode = #tpu.pipeline_mode<synchronous>, transform_indices = @transform_20, window_bounds = array<i64: 1012, 1024>}, {pipeline_mode = #tpu.pipeline_mode<synchronous>, transform_indices = @transform_21, window_bounds = array<i64: 1, 1024>}, {transform_indices = @transform_22, window_bounds = array<i64: 2, 1024>}, {transform_indices = @transform_23, window_bounds = array<i64: 2, 32>}, {transform_indices = @transform_24, window_bounds = array<i64: 2, 32>}]} {
    %c0 = arith.constant 0 : index
    %c0_0 = arith.constant 0 : index
    %0 = vector.load %arg1[%c0, %c0_0] : memref<2x1024xf32, #tpu.memory_space<vmem>>, vector<2x1024xf32>
    %1 = arith.truncf %0 : vector<2x1024xf32> to vector<2x1024xbf16>
    %c0_1 = arith.constant 0 : index
    %c0_2 = arith.constant 0 : index
    %2 = vector.load %arg3[%c0_1, %c0_2] : memref<1024x1016xbf16, #tpu.memory_space<vmem>>, vector<1024x1016xbf16>
    %cst = arith.constant dense<0.000000e+00> : vector<2x1016xf32>
    %3 = tpu.matmul %1, %2, %cst {dimension_numbers = #tpu.dot_dimension_numbers<[1], [0], [0], [1], [0, 0, 1, 1], [], []>} : vector<2x1024xbf16>, vector<1024x1016xbf16>, vector<2x1016xf32> -> vector<2x1016xf32>
    %c0_3 = arith.constant 0 : index
    %c0_4 = arith.constant 0 : index
    %4 = vector.load %arg4[%c0_3, %c0_4] : memref<1x1016xf32, #tpu.memory_space<vmem>>, vector<1x1016xf32>
    %5 = vector.broadcast %4 : vector<1x1016xf32> to vector<2x1016xf32>
    %6 = arith.addf %3, %5 : vector<2x1016xf32>
    %cst_5 = arith.constant 0.000000e+00 : f32
    %7 = vector.broadcast %cst_5 : f32 to vector<2x1016xf32>
    %8 = arith.maximumf %6, %7 : vector<2x1016xf32>
    %9 = arith.truncf %8 : vector<2x1016xf32> to vector<2x1016xbf16>
    %c0_6 = arith.constant 0 : index
    %c0_7 = arith.constant 0 : index
    %10 = vector.load %arg5[%c0_6, %c0_7] : memref<1016x488xbf16, #tpu.memory_space<vmem>>, vector<1016x488xbf16>
    %cst_8 = arith.constant dense<0.000000e+00> : vector<2x488xf32>
    %11 = tpu.matmul %9, %10, %cst_8 {dimension_numbers = #tpu.dot_dimension_numbers<[1], [0], [0], [1], [0, 0, 1, 1], [], []>} : vector<2x1016xbf16>, vector<1016x488xbf16>, vector<2x488xf32> -> vector<2x488xf32>
    %c0_9 = arith.constant 0 : index
    %c0_10 = arith.constant 0 : index
    %12 = vector.load %arg6[%c0_9, %c0_10] : memref<1x488xf32, #tpu.memory_space<vmem>>, vector<1x488xf32>
    %13 = vector.broadcast %12 : vector<1x488xf32> to vector<2x488xf32>
    %14 = arith.addf %11, %13 : vector<2x488xf32>
    %cst_11 = arith.constant 0.000000e+00 : f32
    %15 = vector.broadcast %cst_11 : f32 to vector<2x488xf32>
    %16 = arith.maximumf %14, %15 : vector<2x488xf32>
    %17 = arith.truncf %16 : vector<2x488xf32> to vector<2x488xbf16>
    %c0_12 = arith.constant 0 : index
    %c0_13 = arith.constant 0 : index
    %18 = vector.load %arg7[%c0_12, %c0_13] : memref<488x208xbf16, #tpu.memory_space<vmem>>, vector<488x208xbf16>
    %cst_14 = arith.constant dense<0.000000e+00> : vector<2x208xf32>
    %19 = tpu.matmul %17, %18, %cst_14 {dimension_numbers = #tpu.dot_dimension_numbers<[1], [0], [0], [1], [0, 0, 1, 1], [], []>} : vector<2x488xbf16>, vector<488x208xbf16>, vector<2x208xf32> -> vector<2x208xf32>
    %c0_15 = arith.constant 0 : index
    %c0_16 = arith.constant 0 : index
    %20 = vector.load %arg8[%c0_15, %c0_16] : memref<1x208xf32, #tpu.memory_space<vmem>>, vector<1x208xf32>
    %21 = vector.broadcast %20 : vector<1x208xf32> to vector<2x208xf32>
    %22 = arith.addf %19, %21 : vector<2x208xf32>
    %cst_17 = arith.constant 0.000000e+00 : f32
    %23 = vector.broadcast %cst_17 : f32 to vector<2x208xf32>
    %24 = arith.maximumf %22, %23 : vector<2x208xf32>
    %25 = arith.truncf %24 : vector<2x208xf32> to vector<2x208xbf16>
    %c0_18 = arith.constant 0 : index
    %c0_19 = arith.constant 0 : index
    %26 = vector.load %arg9[%c0_18, %c0_19] : memref<208x32xbf16, #tpu.memory_space<vmem>>, vector<208x32xbf16>
    %cst_20 = arith.constant dense<0.000000e+00> : vector<2x32xf32>
    %27 = tpu.matmul %25, %26, %cst_20 {dimension_numbers = #tpu.dot_dimension_numbers<[1], [0], [0], [1], [0, 0, 1, 1], [], []>} : vector<2x208xbf16>, vector<208x32xbf16>, vector<2x32xf32> -> vector<2x32xf32>
    %c0_21 = arith.constant 0 : index
    %c0_22 = arith.constant 0 : index
    %28 = vector.load %arg10[%c0_21, %c0_22] : memref<1x32xf32, #tpu.memory_space<vmem>>, vector<1x32xf32>
    %29 = vector.broadcast %28 : vector<1x32xf32> to vector<2x32xf32>
    %30 = arith.addf %27, %29 : vector<2x32xf32>
    %cst_23 = arith.constant 0.000000e+00 : f32
    %31 = vector.broadcast %cst_23 : f32 to vector<2x32xf32>
    %32 = arith.maximumf %30, %31 : vector<2x32xf32>
    %33 = arith.truncf %32 : vector<2x32xf32> to vector<2x32xbf16>
    %c0_24 = arith.constant 0 : index
    %c0_25 = arith.constant 0 : index
    %34 = vector.load %arg11[%c0_24, %c0_25] : memref<32x32xbf16, #tpu.memory_space<vmem>>, vector<32x32xbf16>
    %cst_26 = arith.constant dense<0.000000e+00> : vector<2x32xf32>
    %35 = tpu.matmul %33, %34, %cst_26 {dimension_numbers = #tpu.dot_dimension_numbers<[1], [0], [0], [1], [0, 0, 1, 1], [], []>} : vector<2x32xbf16>, vector<32x32xbf16>, vector<2x32xf32> -> vector<2x32xf32>
    %c0_27 = arith.constant 0 : index
    %c0_28 = arith.constant 0 : index
    %36 = vector.load %arg12[%c0_27, %c0_28] : memref<1x32xf32, #tpu.memory_space<vmem>>, vector<1x32xf32>
    %37 = vector.broadcast %36 : vector<1x32xf32> to vector<2x32xf32>
    %38 = arith.addf %35, %37 : vector<2x32xf32>
    %39 = arith.truncf %32 : vector<2x32xf32> to vector<2x32xbf16>
    %c0_29 = arith.constant 0 : index
    %c0_30 = arith.constant 0 : index
    %40 = vector.load %arg13[%c0_29, %c0_30] : memref<32x32xbf16, #tpu.memory_space<vmem>>, vector<32x32xbf16>
    %cst_31 = arith.constant dense<0.000000e+00> : vector<2x32xf32>
    %41 = tpu.matmul %39, %40, %cst_31 {dimension_numbers = #tpu.dot_dimension_numbers<[1], [0], [0], [1], [0, 0, 1, 1], [], []>} : vector<2x32xbf16>, vector<32x32xbf16>, vector<2x32xf32> -> vector<2x32xf32>
    %c0_32 = arith.constant 0 : index
    %c0_33 = arith.constant 0 : index
    %42 = vector.load %arg14[%c0_32, %c0_33] : memref<1x32xf32, #tpu.memory_space<vmem>>, vector<1x32xf32>
    %43 = vector.broadcast %42 : vector<1x32xf32> to vector<2x32xf32>
    %44 = arith.addf %41, %43 : vector<2x32xf32>
    %c0_34 = arith.constant 0 : index
    %c0_35 = arith.constant 0 : index
    %45 = vector.load %arg24[%c0_34, %c0_35] : memref<2x32xf32, #tpu.memory_space<vmem>>, vector<2x32xf32>
    tpu.vector_store %arg24[%c0_34, %c0_35], %38 {strides = array<i32>} : memref<2x32xf32, #tpu.memory_space<vmem>>, vector<2x32xf32>,
    %c0_36 = arith.constant 0 : index
    %c0_37 = arith.constant 0 : index
    %46 = vector.load %arg25[%c0_36, %c0_37] : memref<2x32xf32, #tpu.memory_space<vmem>>, vector<2x32xf32>
    tpu.vector_store %arg25[%c0_36, %c0_37], %44 {strides = array<i32>} : memref<2x32xf32, #tpu.memory_space<vmem>>, vector<2x32xf32>,
    %c0_38 = arith.constant 0 : index
    %c0_39 = arith.constant 0 : index
    %47 = vector.load %arg2[%c0_38, %c0_39] : memref<2x32xf32, #tpu.memory_space<vmem>>, vector<2x32xf32>
    %cst_40 = arith.constant 5.000000e-01 : f32
    %48 = vector.broadcast %cst_40 : f32 to vector<2x32xf32>
    %49 = arith.mulf %48, %44 : vector<2x32xf32>
    %50 = math.exp %49 : vector<2x32xf32>
    %51 = arith.mulf %47, %50 : vector<2x32xf32>
    %52 = arith.addf %38, %51 : vector<2x32xf32>
    %53 = arith.truncf %52 : vector<2x32xf32> to vector<2x32xbf16>
    %c0_41 = arith.constant 0 : index
    %c0_42 = arith.constant 0 : index
    %54 = vector.load %arg15[%c0_41, %c0_42] : memref<32x208xbf16, #tpu.memory_space<vmem>>, vector<32x208xbf16>
    %cst_43 = arith.constant dense<0.000000e+00> : vector<2x208xf32>
    %55 = tpu.matmul %53, %54, %cst_43 {dimension_numbers = #tpu.dot_dimension_numbers<[1], [0], [0], [1], [0, 0, 1, 1], [], []>} : vector<2x32xbf16>, vector<32x208xbf16>, vector<2x208xf32> -> vector<2x208xf32>
    %c0_44 = arith.constant 0 : index
    %c0_45 = arith.constant 0 : index
    %56 = vector.load %arg16[%c0_44, %c0_45] : memref<1x208xf32, #tpu.memory_space<vmem>>, vector<1x208xf32>
    %57 = vector.broadcast %56 : vector<1x208xf32> to vector<2x208xf32>
    %58 = arith.addf %55, %57 : vector<2x208xf32>
    %cst_46 = arith.constant 0.000000e+00 : f32
    %59 = vector.broadcast %cst_46 : f32 to vector<2x208xf32>
    %60 = arith.maximumf %58, %59 : vector<2x208xf32>
    %61 = arith.truncf %60 : vector<2x208xf32> to vector<2x208xbf16>
    %c0_47 = arith.constant 0 : index
    %c0_48 = arith.constant 0 : index
    %62 = vector.load %arg17[%c0_47, %c0_48] : memref<208x488xbf16, #tpu.memory_space<vmem>>, vector<208x488xbf16>
    %cst_49 = arith.constant dense<0.000000e+00> : vector<2x488xf32>
    %63 = tpu.matmul %61, %62, %cst_49 {dimension_numbers = #tpu.dot_dimension_numbers<[1], [0], [0], [1], [0, 0, 1, 1], [], []>} : vector<2x208xbf16>, vector<208x488xbf16>, vector<2x488xf32> -> vector<2x488xf32>
    %c0_50 = arith.constant 0 : index
    %c0_51 = arith.constant 0 : index
    %64 = vector.load %arg18[%c0_50, %c0_51] : memref<1x488xf32, #tpu.memory_space<vmem>>, vector<1x488xf32>
    %65 = vector.broadcast %64 : vector<1x488xf32> to vector<2x488xf32>
    %66 = arith.addf %63, %65 : vector<2x488xf32>
    %cst_52 = arith.constant 0.000000e+00 : f32
    %67 = vector.broadcast %cst_52 : f32 to vector<2x488xf32>
    %68 = arith.maximumf %66, %67 : vector<2x488xf32>
    %69 = arith.truncf %68 : vector<2x488xf32> to vector<2x488xbf16>
    %c0_53 = arith.constant 0 : index
    %c0_54 = arith.constant 0 : index
    %70 = vector.load %arg19[%c0_53, %c0_54] : memref<488x1012xbf16, #tpu.memory_space<vmem>>, vector<488x1012xbf16>
    %cst_55 = arith.constant dense<0.000000e+00> : vector<2x1012xf32>
    %71 = tpu.matmul %69, %70, %cst_55 {dimension_numbers = #tpu.dot_dimension_numbers<[1], [0], [0], [1], [0, 0, 1, 1], [], []>} : vector<2x488xbf16>, vector<488x1012xbf16>, vector<2x1012xf32> -> vector<2x1012xf32>
    %c0_56 = arith.constant 0 : index
    %c0_57 = arith.constant 0 : index
    %72 = vector.load %arg20[%c0_56, %c0_57] : memref<1x1012xf32, #tpu.memory_space<vmem>>, vector<1x1012xf32>
    %73 = vector.broadcast %72 : vector<1x1012xf32> to vector<2x1012xf32>
    %74 = arith.addf %71, %73 : vector<2x1012xf32>
    %cst_58 = arith.constant 0.000000e+00 : f32
    %75 = vector.broadcast %cst_58 : f32 to vector<2x1012xf32>
    %76 = arith.maximumf %74, %75 : vector<2x1012xf32>
    %77 = arith.truncf %76 : vector<2x1012xf32> to vector<2x1012xbf16>
    %c0_59 = arith.constant 0 : index
    %c0_60 = arith.constant 0 : index
    %78 = vector.load %arg21[%c0_59, %c0_60] : memref<1012x1024xbf16, #tpu.memory_space<vmem>>, vector<1012x1024xbf16>
    %cst_61 = arith.constant dense<0.000000e+00> : vector<2x1024xf32>
    %79 = tpu.matmul %77, %78, %cst_61 {dimension_numbers = #tpu.dot_dimension_numbers<[1], [0], [0], [1], [0, 0, 1, 1], [], []>} : vector<2x1012xbf16>, vector<1012x1024xbf16>, vector<2x1024xf32> -> vector<2x1024xf32>
    %c0_62 = arith.constant 0 : index
    %c0_63 = arith.constant 0 : index
    %80 = vector.load %arg22[%c0_62, %c0_63] : memref<1x1024xf32, #tpu.memory_space<vmem>>, vector<1x1024xf32>
    %81 = vector.broadcast %80 : vector<1x1024xf32> to vector<2x1024xf32>
    %82 = arith.addf %79, %81 : vector<2x1024xf32>
    %83 = arith.negf %82 : vector<2x1024xf32>
    %84 = math.exp %83 : vector<2x1024xf32>
    %cst_64 = arith.constant 1.000000e+00 : f32
    %85 = vector.broadcast %cst_64 : f32 to vector<2x1024xf32>
    %86 = arith.addf %85, %84 : vector<2x1024xf32>
    %87 = arith.divf %85, %86 : vector<2x1024xf32>
    %c0_65 = arith.constant 0 : index
    %c0_66 = arith.constant 0 : index
    %88 = vector.load %arg23[%c0_65, %c0_66] : memref<2x1024xf32, #tpu.memory_space<vmem>>, vector<2x1024xf32>
    tpu.vector_store %arg23[%c0_65, %c0_66], %87 {strides = array<i32>} : memref<2x1024xf32, #tpu.memory_space<vmem>>, vector<2x1024xf32>,
    return
  }
  func.func @transform_0(%arg0: i32) -> (i32, i32) {
    %c0_i32 = arith.constant 0 : i32
    %c0_i32_0 = arith.constant 0 : i32
    return %arg0, %c0_i32 : i32, i32
  }
  func.func @transform_1(%arg0: i32) -> (i32, i32) {
    %c0_i32 = arith.constant 0 : i32
    %c0_i32_0 = arith.constant 0 : i32
    return %arg0, %c0_i32 : i32, i32
  }
  func.func @transform_2(%arg0: i32) -> (i32, i32) {
    %c0_i32 = arith.constant 0 : i32
    %c0_i32_0 = arith.constant 0 : i32
    %c0_i32_1 = arith.constant 0 : i32
    return %c0_i32, %c0_i32_0 : i32, i32
  }
  func.func @transform_3(%arg0: i32) -> (i32, i32) {
    %c0_i32 = arith.constant 0 : i32
    %c0_i32_0 = arith.constant 0 : i32
    %c0_i32_1 = arith.constant 0 : i32
    return %c0_i32, %c0_i32_0 : i32, i32
  }
  func.func @transform_4(%arg0: i32) -> (i32, i32) {
    %c0_i32 = arith.constant 0 : i32
    %c0_i32_0 = arith.constant 0 : i32
    %c0_i32_1 = arith.constant 0 : i32
    return %c0_i32, %c0_i32_0 : i32, i32
  }
  func.func @transform_5(%arg0: i32) -> (i32, i32) {
    %c0_i32 = arith.constant 0 : i32
    %c0_i32_0 = arith.constant 0 : i32
    %c0_i32_1 = arith.constant 0 : i32
    return %c0_i32, %c0_i32_0 : i32, i32
  }
  func.func @transform_6(%arg0: i32) -> (i32, i32) {
    %c0_i32 = arith.constant 0 : i32
    %c0_i32_0 = arith.constant 0 : i32
    %c0_i32_1 = arith.constant 0 : i32
    return %c0_i32, %c0_i32_0 : i32, i32
  }
  func.func @transform_7(%arg0: i32) -> (i32, i32) {
    %c0_i32 = arith.constant 0 : i32
    %c0_i32_0 = arith.constant 0 : i32
    %c0_i32_1 = arith.constant 0 : i32
    return %c0_i32, %c0_i32_0 : i32, i32
  }
  func.func @transform_8(%arg0: i32) -> (i32, i32) {
    %c0_i32 = arith.constant 0 : i32
    %c0_i32_0 = arith.constant 0 : i32
    %c0_i32_1 = arith.constant 0 : i32
    return %c0_i32, %c0_i32_0 : i32, i32
  }
  func.func @transform_9(%arg0: i32) -> (i32, i32) {
    %c0_i32 = arith.constant 0 : i32
    %c0_i32_0 = arith.constant 0 : i32
    %c0_i32_1 = arith.constant 0 : i32
    return %c0_i32, %c0_i32_0 : i32, i32
  }
  func.func @transform_10(%arg0: i32) -> (i32, i32) {
    %c0_i32 = arith.constant 0 : i32
    %c0_i32_0 = arith.constant 0 : i32
    %c0_i32_1 = arith.constant 0 : i32
    return %c0_i32, %c0_i32_0 : i32, i32
  }
  func.func @transform_11(%arg0: i32) -> (i32, i32) {
    %c0_i32 = arith.constant 0 : i32
    %c0_i32_0 = arith.constant 0 : i32
    %c0_i32_1 = arith.constant 0 : i32
    return %c0_i32, %c0_i32_0 : i32, i32
  }
  func.func @transform_12(%arg0: i32) -> (i32, i32) {
    %c0_i32 = arith.constant 0 : i32
    %c0_i32_0 = arith.constant 0 : i32
    %c0_i32_1 = arith.constant 0 : i32
    return %c0_i32, %c0_i32_0 : i32, i32
  }
  func.func @transform_13(%arg0: i32) -> (i32, i32) {
    %c0_i32 = arith.constant 0 : i32
    %c0_i32_0 = arith.constant 0 : i32
    %c0_i32_1 = arith.constant 0 : i32
    return %c0_i32, %c0_i32_0 : i32, i32
  }
  func.func @transform_14(%arg0: i32) -> (i32, i32) {
    %c0_i32 = arith.constant 0 : i32
    %c0_i32_0 = arith.constant 0 : i32
    %c0_i32_1 = arith.constant 0 : i32
    return %c0_i32, %c0_i32_0 : i32, i32
  }
  func.func @transform_15(%arg0: i32) -> (i32, i32) {
    %c0_i32 = arith.constant 0 : i32
    %c0_i32_0 = arith.constant 0 : i32
    %c0_i32_1 = arith.constant 0 : i32
    return %c0_i32, %c0_i32_0 : i32, i32
  }
  func.func @transform_16(%arg0: i32) -> (i32, i32) {
    %c0_i32 = arith.constant 0 : i32
    %c0_i32_0 = arith.constant 0 : i32
    %c0_i32_1 = arith.constant 0 : i32
    return %c0_i32, %c0_i32_0 : i32, i32
  }
  func.func @transform_17(%arg0: i32) -> (i32, i32) {
    %c0_i32 = arith.constant 0 : i32
    %c0_i32_0 = arith.constant 0 : i32
    %c0_i32_1 = arith.constant 0 : i32
    return %c0_i32, %c0_i32_0 : i32, i32
  }
  func.func @transform_18(%arg0: i32) -> (i32, i32) {
    %c0_i32 = arith.constant 0 : i32
    %c0_i32_0 = arith.constant 0 : i32
    %c0_i32_1 = arith.constant 0 : i32
    return %c0_i32, %c0_i32_0 : i32, i32
  }
  func.func @transform_19(%arg0: i32) -> (i32, i32) {
    %c0_i32 = arith.constant 0 : i32
    %c0_i32_0 = arith.constant 0 : i32
    %c0_i32_1 = arith.constant 0 : i32
    return %c0_i32, %c0_i32_0 : i32, i32
  }
  func.func @transform_20(%arg0: i32) -> (i32, i32) {
    %c0_i32 = arith.constant 0 : i32
    %c0_i32_0 = arith.constant 0 : i32
    %c0_i32_1 = arith.constant 0 : i32
    return %c0_i32, %c0_i32_0 : i32, i32
  }
  func.func @transform_21(%arg0: i32) -> (i32, i32) {
    %c0_i32 = arith.constant 0 : i32
    %c0_i32_0 = arith.constant 0 : i32
    %c0_i32_1 = arith.constant 0 : i32
    return %c0_i32, %c0_i32_0 : i32, i32
  }
  func.func @transform_22(%arg0: i32) -> (i32, i32) {
    %c0_i32 = arith.constant 0 : i32
    %c0_i32_0 = arith.constant 0 : i32
    return %arg0, %c0_i32 : i32, i32
  }
  func.func @transform_23(%arg0: i32) -> (i32, i32) {
    %c0_i32 = arith.constant 0 : i32
    %c0_i32_0 = arith.constant 0 : i32
    return %arg0, %c0_i32 : i32, i32
  }
  func.func @transform_24(%arg0: i32) -> (i32, i32) {
    %c0_i32 = arith.constant 0 : i32
    %c0_i32_0 = arith.constant 0 : i32
    return %arg0, %c0_i32 : i32, i32
  }
}

</mosaic_0001>

<bundles_post_ra>
// kernel: vae_low_forward.1
= control target key start
LH: loop header
LB: loop body
LE: loop exit
PB: predicated region body
PF: predicated region fallthrough
CT: control target
= control target key end

     0   :  { %s20924_s0 = inlined_call_operand.vmem [shape: f32[2,1024], index: 0, kind: input, shape index: {}]   ;;  %s20925_s1 = inlined_call_operand.vmem [shape: f32[2,32], index: 1, kind: input, shape index: {}]   ;;  %s20926_s2 = inlined_call_operand.vmem [shape: bf16[1024,1016], index: 2, kind: input, shape index: {}]   ;;  %s20927_s3 = inlined_call_operand.vmem [shape: f32[1,1016], index: 3, kind: input, shape index: {}]   ;;  %s20928_s4 = inlined_call_operand.vmem [shape: bf16[1016,488], index: 4, kind: input, shape index: {}]   ;;  %s20929_s5 = inlined_call_operand.vmem [shape: f32[1,488], index: 5, kind: input, shape index: {}]   ;;  %s20930_s6 = inlined_call_operand.vmem [shape: bf16[488,208], index: 6, kind: input, shape index: {}]   ;;  %s20931_s7 = inlined_call_operand.vmem [shape: f32[1,208], index: 7, kind: input, shape index: {}]   ;;  %s20932_s8 = inlined_call_operand.vmem [shape: bf16[208,32], index: 8, kind: input, shape index: {}]   ;;  %s20933_s9 = inlined_call_operand.vmem [shape: f32[1,32], index: 9, kind: input, shape index: {}]   ;;  %s20934_s10 = inlined_call_operand.vmem [shape: bf16[32,32], index: 10, kind: input, shape index: {}]   ;;  %s20935_s11 = inlined_call_operand.vmem [shape: f32[1,32], index: 11, kind: input, shape index: {}]   ;;  %s20936_s12 = inlined_call_operand.vmem [shape: bf16[32,32], index: 12, kind: input, shape index: {}]   ;;  %s20937_s13 = inlined_call_operand.vmem [shape: f32[1,32], index: 13, kind: input, shape index: {}]   ;;  %s20938_s14 = inlined_call_operand.vmem [shape: bf16[32,208], index: 14, kind: input, shape index: {}]   ;;  %s20939_s15 = inlined_call_operand.vmem [shape: f32[1,208], index: 15, kind: input, shape index: {}]   ;;  %s20940_s16 = inlined_call_operand.vmem [shape: bf16[208,488], index: 16, kind: input, shape index: {}]   ;;  %s20941_s17 = inlined_call_operand.vmem [shape: f32[1,488], index: 17, kind: input, shape index: {}]   ;;  %s20942_s18 = inlined_call_operand.vmem [shape: bf16[488,1012], index: 18, kind: input, shape index: {}]   ;;  %s20943_s19 = inlined_call_operand.vmem [shape: f32[1,1012], index: 19, kind: input, shape index: {}]   ;;  %s20944_s20 = inlined_call_operand.vmem [shape: bf16[1012,1024], index: 20, kind: input, shape index: {}]   ;;  %s20945_s21 = inlined_call_operand.vmem [shape: f32[1,1024], index: 21, kind: input, shape index: {}]   ;;  %s20946_s22 = inlined_call_operand.hbm [shape: f32[2,1024], index: 22, kind: output, shape index: {0}]   ;;  %s20947_s23 = inlined_call_operand.hbm [shape: f32[2,32], index: 23, kind: output, shape index: {1}]   ;;  %s20948_s24 = inlined_call_operand.hbm [shape: f32[2,32], index: 24, kind: output, shape index: {2}]  }
   0x1   :  { %20955 = sst [smem:[#allocation9_spill]] %s20924_s0 }
   0x2   :  { %20956 = sst [smem:[#allocation10_spill]] %s20925_s1 }
   0x3   :  { %20957 = sst [smem:[#allocation11_spill]] %s20926_s2 }
   0x4   :  { %20958 = sst [smem:[#allocation12_spill]] %s20927_s3 }
   0x5   :  { %20959 = sst [smem:[#allocation13_spill]] %s20928_s4 }
   0x6   :  { %20960 = sst [smem:[#allocation14_spill]] %s20929_s5 }
   0x7   :  { %20961 = sst [smem:[#allocation15_spill]] %s20930_s6 }
   0x8   :  { %20962 = sst [smem:[#allocation16_spill]] %s20931_s7 }
   0x9   :  { %20963 = sst [smem:[#allocation17_spill]] %s20932_s8 }
   0xa   :  { %30 = vsyncpa [#allocation3], 0  ;;  %s20964_s27 = sld [smem:[#allocation11_spill]]  ;;  %v15310_v32 = vmov 1983009808   ;;  %v85_v34 = vlaneseq }
   0xb   :  { %v83_v33 = vunpack.c.l.s4 %v15310_v32  ;;  %s20965_s28 = sld [smem:[#allocation9_spill]] }
   0xc   :  { %v15508_v44 = vshrl.u32 %v85_v34, 7  ;;  %s20966_s1 = sld [smem:[#allocation12_spill]] }
   0xd   :  { %v84_v43 = vunpack.c.0.s8 %v83_v33 }
   0xf   :  { %v15523_v53 = vsub.s32 %v84_v43, %v15508_v44 }
  0x10   :  { %v187_v0 = vld [vmem:[%s20964_s27 + $0x1c0] sm:$0xff] }
  0x11   :  { %v191_v1 = vld [vmem:[%s20964_s27 + $0x1e0] sm:$0xff] }
  0x12   :  { %v315_v2 = vld [vmem:[%s20964_s27 + $0x5c0] sm:$0xff]  ;;  %v12942_v3 = vcombine.high %v187_v0, %v191_v1  ;;  %v12941_v5 = vcombine.low %v187_v0, %v191_v1 }
  0x13   :  { %v319_v4 = vld [vmem:[%s20964_s27 + $0x5e0] sm:$0xff] }
  0x14   :  { %v179_v6 = vld [vmem:[%s20964_s27 + $0x180] sm:$0xff]  ;;  %v13070_v8 = vcombine.high %v315_v2, %v319_v4  ;;  %v13069_v9 = vcombine.low %v315_v2, %v319_v4  ;;  %3245 = vmatprep.subr.bf16.mxu0 %v12942_v3 }
  0x15   :  { %v183_v7 = vld [vmem:[%s20964_s27 + $0x1a0] sm:$0xff]  ;;  %3246 = vmatpush1.bf16.msra.mxu0 %v12941_v5 }
  0x16   :  { %v12934_v10 = vcombine.high %v179_v6, %v183_v7  ;;  %v307_v11 = vld [vmem:[%s20964_s27 + $0x580] sm:$0xff]  ;;  %3286 = vmatprep.subr.bf16.mxu1 %v13070_v8  ;;  %v12933_v18 = vcombine.low %v179_v6, %v183_v7 }
  0x17   :  { %v311_v12 = vld [vmem:[%s20964_s27 + $0x5a0] sm:$0xff]  ;;  %3287 = vmatpush1.bf16.msra.mxu1 %v13069_v9 }
  0x18   :  { %v171_v13 = vld [vmem:[%s20964_s27 + $0x140] sm:$0xff]  ;;  %v13062_v14 = vcombine.high %v307_v11, %v311_v12  ;;  %3247 = vmatprep.subr.bf16.mxu0 %v12934_v10  ;;  %v13061_v19 = vcombine.low %v307_v11, %v311_v12 }
  0x19   :  { %v175_v15 = vld [vmem:[%s20964_s27 + $0x160] sm:$0xff]  ;;  %3248 = vmatpush1.bf16.msra.mxu0 %v12933_v18 }
  0x1a   :  { %v299_v16 = vld [vmem:[%s20964_s27 + $0x540] sm:$0xff]  ;;  %v12926_v20 = vcombine.high %v171_v13, %v175_v15  ;;  %3288 = vmatprep.subr.bf16.mxu1 %v13062_v14  ;;  %v12925_v26 = vcombine.low %v171_v13, %v175_v15 }
  0x1b   :  { %v303_v17 = vld [vmem:[%s20964_s27 + $0x560] sm:$0xff]  ;;  %3289 = vmatpush1.bf16.msra.mxu1 %v13061_v19 }
  0x1c   :  { %v13054_v21 = vcombine.high %v299_v16, %v303_v17  ;;  %v163_v22 = vld [vmem:[%s20964_s27 + $0x100] sm:$0xff]  ;;  %3249 = vmatprep.subr.bf16.mxu0 %v12926_v20  ;;  %v13053_v27 = vcombine.low %v299_v16, %v303_v17 }
  0x1d   :  { %v167_v23 = vld [vmem:[%s20964_s27 + $0x120] sm:$0xff]  ;;  %3250 = vmatpush1.bf16.msra.mxu0 %v12925_v26 }
  0x1e   :  { %v291_v24 = vld [vmem:[%s20964_s27 + $0x500] sm:$0xff]  ;;  %v12918_v28 = vcombine.high %v163_v22, %v167_v23  ;;  %3290 = vmatprep.subr.bf16.mxu1 %v13054_v21  ;;  %v12917_v37 = vcombine.low %v163_v22, %v167_v23 }
  0x1f   :  { %v295_v25 = vld [vmem:[%s20964_s27 + $0x520] sm:$0xff]  ;;  %3291 = vmatpush1.bf16.msra.mxu1 %v13053_v27 }
  0x20   :  { %v13046_v29 = vcombine.high %v291_v24, %v295_v25  ;;  %v155_v30 = vld [vmem:[%s20964_s27 + $0xc0] sm:$0xff]  ;;  %3251 = vmatprep.subr.bf16.mxu0 %v12918_v28  ;;  %v13045_v38 = vcombine.low %v291_v24, %v295_v25 }
  0x21   :  { %v159_v31 = vld [vmem:[%s20964_s27 + $0xe0] sm:$0xff]  ;;  %3252 = vmatpush1.bf16.msra.mxu0 %v12917_v37 }
  0x22   :  { %v283_v35 = vld [vmem:[%s20964_s27 + $0x4c0] sm:$0xff]  ;;  %v12910_v39 = vcombine.high %v155_v30, %v159_v31  ;;  %3292 = vmatprep.subr.bf16.mxu1 %v13046_v29  ;;  %v12909_v47 = vcombine.low %v155_v30, %v159_v31 }
  0x23   :  { %v287_v36 = vld [vmem:[%s20964_s27 + $0x4e0] sm:$0xff]  ;;  %3293 = vmatpush1.bf16.msra.mxu1 %v13045_v38 }
  0x24   :  { %v13038_v40 = vcombine.high %v283_v35, %v287_v36  ;;  %v147_v41 = vld [vmem:[%s20964_s27 + $0x80] sm:$0xff]  ;;  %3253 = vmatprep.subr.bf16.mxu0 %v12910_v39  ;;  %v13037_v48 = vcombine.low %v283_v35, %v287_v36 }
  0x25   :  { %v151_v42 = vld [vmem:[%s20964_s27 + $0xa0] sm:$0xff]  ;;  %3254 = vmatpush1.bf16.msra.mxu0 %v12909_v47 }
  0x26   :  { %v275_v45 = vld [vmem:[%s20964_s27 + $0x480] sm:$0xff]  ;;  %v12902_v49 = vcombine.high %v147_v41, %v151_v42  ;;  %3294 = vmatprep.subr.bf16.mxu1 %v13038_v40  ;;  %v12901_v56 = vcombine.low %v147_v41, %v151_v42 }
  0x27   :  { %v279_v46 = vld [vmem:[%s20964_s27 + $0x4a0] sm:$0xff]  ;;  %3295 = vmatpush1.bf16.msra.mxu1 %v13037_v48 }
  0x28   :  { %v13030_v50 = vcombine.high %v275_v45, %v279_v46  ;;  %v139_v51 = vld [vmem:[%s20964_s27 + $0x40] sm:$0xff]  ;;  %3255 = vmatprep.subr.bf16.mxu0 %v12902_v49  ;;  %v13029_v57 = vcombine.low %v275_v45, %v279_v46 }
  0x29   :  { %v143_v52 = vld [vmem:[%s20964_s27 + $0x60] sm:$0xff]  ;;  %3256 = vmatpush1.bf16.msra.mxu0 %v12901_v56 }
  0x2a   :  { %v267_v54 = vld [vmem:[%s20964_s27 + $0x440] sm:$0xff]  ;;  %v12894_v58 = vcombine.high %v139_v51, %v143_v52  ;;  %3296 = vmatprep.subr.bf16.mxu1 %v13030_v50  ;;  %v12893_v3 = vcombine.low %v139_v51, %v143_v52 }
  0x2b   :  { %v271_v55 = vld [vmem:[%s20964_s27 + $0x460] sm:$0xff]  ;;  %3297 = vmatpush1.bf16.msra.mxu1 %v13029_v57 }
  0x2c   :  { %v77_v59 = vld [vmem:[%s20965_s28] sm:$0xff]  ;;  %v13022_v60 = vcombine.high %v267_v54, %v271_v55  ;;  %3257 = vmatprep.subr.bf16.mxu0 %v12894_v58  ;;  %v13021_v6 = vcombine.low %v267_v54, %v271_v55 }
  0x2d   :  { %v131_v61 = vld [vmem:[%s20964_s27] sm:$0xff]  ;;  %v15541_v63 = vrot.slane %v77_v59, %v15523_v53  ;;  %v81_v0 = vcombine.high %v77_v59, %v77_v59  ;;  %3258 = vmatpush1.bf16.msra.mxu0 %v12893_v3 }
  0x2e   :  { %v135_v62 = vld [vmem:[%s20964_s27 + $0x20] sm:$0xff]  ;;  %3298 = vmatprep.subr.bf16.mxu1 %v13022_v60 }
  0x2f   :  { %v259_v1 = vld [vmem:[%s20964_s27 + $0x400] sm:$0xff]  ;;  %v96_v4 = vcombine.high %v15541_v63, %v15541_v63  ;;  %v15552_v5 = vrot.slane %v81_v0, %v15523_v53  ;;  %v12886_v7 = vcombine.high %v131_v61, %v135_v62  ;;  %v12885_v15 = vcombine.low %v131_v61, %v135_v62  ;;  %3299 = vmatpush1.bf16.msra.mxu1 %v13021_v6 }
  0x30   :  { %v263_v2 = vld [vmem:[%s20964_s27 + $0x420] sm:$0xff] }
  0x31   :  { %v13014_v8 = vcombine.high %v259_v1, %v263_v2  ;;  %v251_v9 = vld [vmem:[%s20964_s27 + $0x3c0] sm:$0xff]  ;;  %v15560_v11 = vpack.c.bf16 %v96_v4, %v96_v4  ;;  %v97_v12 = vcombine.high %v15552_v5, %v15552_v5  ;;  %3259 = vmatprep.subr.bf16.mxu0 %v12886_v7  ;;  %v13013_v17 = vcombine.low %v259_v1, %v263_v2  ;;  %v78_v4 = vld [vmem:[%s20965_s28 + $0x8] sm:$0xff] }
  0x32   :  { %v255_v10 = vld [vmem:[%s20964_s27 + $0x3e0] sm:$0xff]  ;;  %3260 = vmatpush1.bf16.msra.mxu0 %v12885_v15 }
  0x33   :  { %v379_v13 = vld [vmem:[%s20964_s27 + $0x7c0] sm:$0xff]  ;;  %3277 = vmatprep.mubr.bf16.mxu0 %v15560_v11  ;;  %v15571_v16 = vpack.c.bf16 %v97_v12, %v97_v12  ;;  %v13006_v18 = vcombine.high %v251_v9, %v255_v10  ;;  %3300 = vmatprep.subr.bf16.mxu1 %v13014_v8  ;;  %v13005_v24 = vcombine.low %v251_v9, %v255_v10 }
  0x34   :  { %v383_v14 = vld [vmem:[%s20964_s27 + $0x7e0] sm:$0xff]  ;;  %3301 = vmatpush1.bf16.msra.mxu1 %v13013_v17 }
  0x35   :  { %v13134_v19 = vcombine.high %v379_v13, %v383_v14  ;;  %v243_v20 = vld [vmem:[%s20964_s27 + $0x380] sm:$0xff]  ;;  %3318 = vmatprep.mubr.bf16.mxu1 %v15571_v16  ;;  %3261 = vmatprep.subr.bf16.mxu0 %v13006_v18  ;;  %v13133_v25 = vcombine.low %v379_v13, %v383_v14  ;;  %v98_v14 = vcombine.high %v78_v4, %v78_v4 }
  0x36   :  { %v247_v21 = vld [vmem:[%s20964_s27 + $0x3a0] sm:$0xff]  ;;  %3262 = vmatpush2.bf16.msra.mxu0 %v13005_v24 }
  0x37   :  { %v371_v22 = vld [vmem:[%s20964_s27 + $0x780] sm:$0xff]  ;;  %v12998_v26 = vcombine.high %v243_v20, %v247_v21  ;;  %3302 = vmatprep.subr.bf16.mxu1 %v13134_v19  ;;  %v12997_v32 = vcombine.low %v243_v20, %v247_v21 }
  0x38   :  { %v375_v23 = vld [vmem:[%s20964_s27 + $0x7a0] sm:$0xff]  ;;  %3303 = vmatpush2.bf16.msra.mxu1 %v13133_v25  ;;  %v15677_v25 = vrot.slane %v98_v14, %v15523_v53 }
  0x39   :  { %v13126_v27 = vcombine.high %v371_v22, %v375_v23  ;;  %v235_v28 = vld [vmem:[%s20964_s27 + $0x340] sm:$0xff]  ;;  %3263 = vmatprep.subr.bf16.mxu0 %v12998_v26  ;;  %v13125_v33 = vcombine.low %v371_v22, %v375_v23  ;;  %v15668_v22 = vrot.slane %v78_v4, %v15523_v53 }
  0x3a   :  { %v239_v29 = vld [vmem:[%s20964_s27 + $0x360] sm:$0xff]  ;;  %3264 = vmatpush2.bf16.msra.mxu0 %v12997_v32 }
  0x3b   :  { %v363_v30 = vld [vmem:[%s20964_s27 + $0x740] sm:$0xff]  ;;  %v12990_v34 = vcombine.high %v235_v28, %v239_v29  ;;  %3304 = vmatprep.subr.bf16.mxu1 %v13126_v27  ;;  %v12989_v40 = vcombine.low %v235_v28, %v239_v29  ;;  %v113_v32 = vcombine.high %v15668_v22, %v15668_v22 }
  0x3c   :  { %v367_v31 = vld [vmem:[%s20964_s27 + $0x760] sm:$0xff]  ;;  %3305 = vmatpush2.bf16.msra.mxu1 %v13125_v33  ;;  %v15689_v33 = vpack.c.bf16 %v15541_v63, %v15541_v63 }
  0x3d   :  { %v13118_v35 = vcombine.high %v363_v30, %v367_v31  ;;  %v227_v36 = vld [vmem:[%s20964_s27 + $0x300] sm:$0xff]  ;;  %3265 = vmatprep.subr.bf16.mxu0 %v12990_v34  ;;  %v13117_v41 = vcombine.low %v363_v30, %v367_v31 }
  0x3e   :  { %v231_v37 = vld [vmem:[%s20964_s27 + $0x320] sm:$0xff]  ;;  %3266 = vmatpush2.bf16.msra.mxu0 %v12989_v40 }
  0x3f   :  { %v355_v38 = vld [vmem:[%s20964_s27 + $0x700] sm:$0xff]  ;;  %v12982_v42 = vcombine.high %v227_v36, %v231_v37  ;;  %3306 = vmatprep.subr.bf16.mxu1 %v13118_v35  ;;  %v12981_v49 = vcombine.low %v227_v36, %v231_v37  ;;  %v114_v36 = vcombine.high %v15677_v25, %v15677_v25  ;;  %v15701_v37 = vpack.c.bf16 %v15552_v5, %v15552_v5 }
  0x40   :  { %v359_v39 = vld [vmem:[%s20964_s27 + $0x720] sm:$0xff]  ;;  %3307 = vmatpush2.bf16.msra.mxu1 %v13117_v41 }
  0x41   :  { %v13110_v43 = vcombine.high %v355_v38, %v359_v39  ;;  %v219_v45 = vld [vmem:[%s20964_s27 + $0x2c0] sm:$0xff]  ;;  %3267 = vmatprep.subr.bf16.mxu0 %v12982_v42  ;;  %v13109_v50 = vcombine.low %v355_v38, %v359_v39 }
  0x42   :  { %v223_v46 = vld [vmem:[%s20964_s27 + $0x2e0] sm:$0xff]  ;;  %3268 = vmatpush2.bf16.msra.mxu0 %v12981_v49 }
  0x43   :  { %v347_v47 = vld [vmem:[%s20964_s27 + $0x6c0] sm:$0xff]  ;;  %v12974_v51 = vcombine.high %v219_v45, %v223_v46  ;;  %3308 = vmatprep.subr.bf16.mxu1 %v13110_v43  ;;  %v12973_v58 = vcombine.low %v219_v45, %v223_v46  ;;  %v15715_v45 = vpack.c.bf16 %v113_v32, %v113_v32  ;;  %v15718_v46 = vpack.c.bf16 %v114_v36, %v114_v36 }
  0x44   :  { %v351_v48 = vld [vmem:[%s20964_s27 + $0x6e0] sm:$0xff]  ;;  %3309 = vmatpush2.bf16.msra.mxu1 %v13109_v50 }
  0x45   :  { %v13102_v52 = vcombine.high %v347_v47, %v351_v48  ;;  %v211_v54 = vld [vmem:[%s20964_s27 + $0x280] sm:$0xff]  ;;  %3269 = vmatprep.subr.bf16.mxu0 %v12974_v51  ;;  %v13101_v59 = vcombine.low %v347_v47, %v351_v48 }
  0x46   :  { %v215_v55 = vld [vmem:[%s20964_s27 + $0x2a0] sm:$0xff]  ;;  %3270 = vmatpush2.bf16.msra.mxu0 %v12973_v58 }
  0x47   :  { %v339_v56 = vld [vmem:[%s20964_s27 + $0x680] sm:$0xff]  ;;  %v12966_v60 = vcombine.high %v211_v54, %v215_v55  ;;  %3310 = vmatprep.subr.bf16.mxu1 %v13102_v52  ;;  %v12965_v3 = vcombine.low %v211_v54, %v215_v55 }
  0x48   :  { %v343_v57 = vld [vmem:[%s20964_s27 + $0x6a0] sm:$0xff]  ;;  %3311 = vmatpush2.bf16.msra.mxu1 %v13101_v59 }
  0x49   :  { %v13094_v61 = vcombine.high %v339_v56, %v343_v57  ;;  %v203_v62 = vld [vmem:[%s20964_s27 + $0x240] sm:$0xff]  ;;  %3271 = vmatprep.subr.bf16.mxu0 %v12966_v60  ;;  %v13093_v6 = vcombine.low %v339_v56, %v343_v57 }
  0x4a   :  { %v207_v0 = vld [vmem:[%s20964_s27 + $0x260] sm:$0xff]  ;;  %3272 = vmatpush2.bf16.msra.mxu0 %v12965_v3 }
  0x4b   :  { %v331_v1 = vld [vmem:[%s20964_s27 + $0x640] sm:$0xff]  ;;  %v12958_v7 = vcombine.high %v203_v62, %v207_v0  ;;  %3312 = vmatprep.subr.bf16.mxu1 %v13094_v61  ;;  %v12957_v15 = vcombine.low %v203_v62, %v207_v0 }
  0x4c   :  { %v335_v2 = vld [vmem:[%s20964_s27 + $0x660] sm:$0xff]  ;;  %3313 = vmatpush2.bf16.msra.mxu1 %v13093_v6 }
  0x4d   :  { %v13086_v8 = vcombine.high %v331_v1, %v335_v2  ;;  %v195_v9 = vld [vmem:[%s20964_s27 + $0x200] sm:$0xff]  ;;  %3273 = vmatprep.subr.bf16.mxu0 %v12958_v7  ;;  %v13085_v17 = vcombine.low %v331_v1, %v335_v2 }
  0x4e   :  { %v199_v10 = vld [vmem:[%s20964_s27 + $0x220] sm:$0xff]  ;;  %3274 = vmatpush2.bf16.msra.mxu0 %v12957_v15 }
  0x4f   :  { %v323_v12 = vld [vmem:[%s20964_s27 + $0x600] sm:$0xff]  ;;  %v12950_v18 = vcombine.high %v195_v9, %v199_v10  ;;  %3314 = vmatprep.subr.bf16.mxu1 %v13086_v8  ;;  %v12949_v26 = vcombine.low %v195_v9, %v199_v10 }
  0x50   :  { %v327_v13 = vld [vmem:[%s20964_s27 + $0x620] sm:$0xff]  ;;  %3315 = vmatpush2.bf16.msra.mxu1 %v13085_v17 }
  0x51   :  { %v13078_v19 = vcombine.high %v323_v12, %v327_v13  ;;  %v443_v20 = vld [vmem:[%s20964_s27 + $0x9c0] sm:$0xff]  ;;  %3275 = vmatprep.subr.bf16.mxu0 %v12950_v18  ;;  %v13077_v27 = vcombine.low %v323_v12, %v327_v13 }
  0x52   :  { %v447_v21 = vld [vmem:[%s20964_s27 + $0x9e0] sm:$0xff]  ;;  %3276 = vmatpush2.bf16.msra.mxu0 %v12949_v26 }
  0x53   :  { %v571_v23 = vld [vmem:[%s20964_s27 + $0xdc0] sm:$0xff]  ;;  %v13198_v28 = vcombine.high %v443_v20, %v447_v21  ;;  %3316 = vmatprep.subr.bf16.mxu1 %v13078_v19  ;;  %v13197_v38 = vcombine.low %v443_v20, %v447_v21 }
  0x54   :  { %v575_v24 = vld [vmem:[%s20964_s27 + $0xde0] sm:$0xff]  ;;  %3317 = vmatpush2.bf16.msra.mxu1 %v13077_v27 }
  0x55   :  { %v13326_v29 = vcombine.high %v571_v23, %v575_v24  ;;  %v435_v30 = vld [vmem:[%s20964_s27 + $0x980] sm:$0xff]  ;;  %3327 = vmatprep.subr.bf16.mxu0 %v13198_v28  ;;  %v13325_v63 = vcombine.low %v571_v23, %v575_v24  ;;  %3278 = vmatmul.mubr.bf16.vlgmr.msra.gmra.mxu0 %v15689_v33 }
  0x56   :  { %v439_v31 = vld [vmem:[%s20964_s27 + $0x9a0] sm:$0xff]  ;;  %3328 = vmatpush1.bf16.msra.mxu0 %v13197_v38  ;;  %3359 = vmatprep.mubr.bf16.mxu0 %v15715_v45 }
  0x57   :  { %v563_v34 = vld [vmem:[%s20964_s27 + $0xd80] sm:$0xff]  ;;  %v13190_v39 = vcombine.high %v435_v30, %v439_v31  ;;  %3368 = vmatprep.subr.bf16.mxu1 %v13326_v29  ;;  %3319 = vmatmul.mubr.bf16.vlgmr.msra.gmra.mxu1 %v15701_v37  ;;  %v13189_v47 = vcombine.low %v435_v30, %v439_v31 }
  0x58   :  { %v567_v35 = vld [vmem:[%s20964_s27 + $0xda0] sm:$0xff]  ;;  %3369 = vmatpush1.bf16.msra.mxu1 %v13325_v63  ;;  %3400 = vmatprep.mubr.bf16.mxu1 %v15718_v46 }
  0x59   :  { %v427_v40 = vld [vmem:[%s20964_s27 + $0x940] sm:$0xff]  ;;  %v13318_v5 = vcombine.high %v563_v34, %v567_v35  ;;  %3329 = vmatprep.subr.bf16.mxu0 %v13190_v39  ;;  %v13317_v48 = vcombine.low %v563_v34, %v567_v35 }
  0x5a   :  { %v431_v41 = vld [vmem:[%s20964_s27 + $0x960] sm:$0xff]  ;;  %3330 = vmatpush1.bf16.msra.mxu0 %v13189_v47 }
  0x5b   :  { %v555_v42 = vld [vmem:[%s20964_s27 + $0xd40] sm:$0xff]  ;;  %v13182_v49 = vcombine.high %v427_v40, %v431_v41  ;;  %3370 = vmatprep.subr.bf16.mxu1 %v13318_v5  ;;  %v13181_v56 = vcombine.low %v427_v40, %v431_v41 }
  0x5c   :  { %v559_v43 = vld [vmem:[%s20964_s27 + $0xd60] sm:$0xff]  ;;  %3371 = vmatpush1.bf16.msra.mxu1 %v13317_v48 }
  0x5d   :  { %v419_v50 = vld [vmem:[%s20964_s27 + $0x900] sm:$0xff]  ;;  %v13310_v54 = vcombine.high %v555_v42, %v559_v43  ;;  %3331 = vmatprep.subr.bf16.mxu0 %v13182_v49  ;;  %v13309_v57 = vcombine.low %v555_v42, %v559_v43 }
  0x5e   :  { %v423_v51 = vld [vmem:[%s20964_s27 + $0x920] sm:$0xff]  ;;  %3332 = vmatpush1.bf16.msra.mxu0 %v13181_v56 }
  0x5f   :  { %v547_v52 = vld [vmem:[%s20964_s27 + $0xd00] sm:$0xff]  ;;  %v13174_v58 = vcombine.high %v419_v50, %v423_v51  ;;  %3372 = vmatprep.subr.bf16.mxu1 %v13310_v54  ;;  %v13173_v1 = vcombine.low %v419_v50, %v423_v51 }
  0x60   :  { %v551_v55 = vld [vmem:[%s20964_s27 + $0xd20] sm:$0xff]  ;;  %3373 = vmatpush1.bf16.msra.mxu1 %v13309_v57 }
  0x61   :  { %v411_v59 = vld [vmem:[%s20964_s27 + $0x8c0] sm:$0xff]  ;;  %v13302_v62 = vcombine.high %v547_v52, %v551_v55  ;;  %3333 = vmatprep.subr.bf16.mxu0 %v13174_v58  ;;  %v13301_v2 = vcombine.low %v547_v52, %v551_v55 }
  0x62   :  { %v415_v60 = vld [vmem:[%s20964_s27 + $0x8e0] sm:$0xff]  ;;  %3334 = vmatpush1.bf16.msra.mxu0 %v13173_v1 }
  0x63   :  { %v539_v61 = vld [vmem:[%s20964_s27 + $0xcc0] sm:$0xff]  ;;  %v13166_v3 = vcombine.high %v411_v59, %v415_v60  ;;  %3374 = vmatprep.subr.bf16.mxu1 %v13302_v62  ;;  %v13165_v10 = vcombine.low %v411_v59, %v415_v60 }
  0x64   :  { %v543_v0 = vld [vmem:[%s20964_s27 + $0xce0] sm:$0xff]  ;;  %3375 = vmatpush1.bf16.msra.mxu1 %v13301_v2 }
  0x65   :  { %v403_v4 = vld [vmem:[%s20964_s27 + $0x880] sm:$0xff]  ;;  %v13294_v8 = vcombine.high %v539_v61, %v543_v0  ;;  %3335 = vmatprep.subr.bf16.mxu0 %v13166_v3  ;;  %v13293_v12 = vcombine.low %v539_v61, %v543_v0 }
  0x66   :  { %v407_v6 = vld [vmem:[%s20964_s27 + $0x8a0] sm:$0xff]  ;;  %3336 = vmatpush1.bf16.msra.mxu0 %v13165_v10 }
  0x67   :  { %v531_v7 = vld [vmem:[%s20964_s27 + $0xc80] sm:$0xff]  ;;  %v13158_v13 = vcombine.high %v403_v4, %v407_v6  ;;  %3376 = vmatprep.subr.bf16.mxu1 %v13294_v8  ;;  %v13157_v20 = vcombine.low %v403_v4, %v407_v6 }
  0x68   :  { %v535_v9 = vld [vmem:[%s20964_s27 + $0xca0] sm:$0xff]  ;;  %3377 = vmatpush1.bf16.msra.mxu1 %v13293_v12 }
  0x69   :  { %v395_v14 = vld [vmem:[%s20964_s27 + $0x840] sm:$0xff]  ;;  %v13286_v18 = vcombine.high %v531_v7, %v535_v9  ;;  %3337 = vmatprep.subr.bf16.mxu0 %v13158_v13  ;;  %v13285_v21 = vcombine.low %v531_v7, %v535_v9 }
  0x6a   :  { %v399_v15 = vld [vmem:[%s20964_s27 + $0x860] sm:$0xff]  ;;  %3338 = vmatpush1.bf16.msra.mxu0 %v13157_v20 }
  0x6b   :  { %v523_v17 = vld [vmem:[%s20964_s27 + $0xc40] sm:$0xff]  ;;  %v13150_v23 = vcombine.high %v395_v14, %v399_v15  ;;  %3378 = vmatprep.subr.bf16.mxu1 %v13286_v18  ;;  %v13149_v30 = vcombine.low %v395_v14, %v399_v15 }
  0x6c   :  { %v527_v19 = vld [vmem:[%s20964_s27 + $0xc60] sm:$0xff]  ;;  %3379 = vmatpush1.bf16.msra.mxu1 %v13285_v21 }
  0x6d   :  { %v387_v24 = vld [vmem:[%s20964_s27 + $0x800] sm:$0xff]  ;;  %v13278_v28 = vcombine.high %v523_v17, %v527_v19  ;;  %3339 = vmatprep.subr.bf16.mxu0 %v13150_v23  ;;  %v13277_v31 = vcombine.low %v523_v17, %v527_v19 }
  0x6e   :  { %v391_v26 = vld [vmem:[%s20964_s27 + $0x820] sm:$0xff]  ;;  %3340 = vmatpush1.bf16.msra.mxu0 %v13149_v30 }
  0x6f   :  { %v515_v27 = vld [vmem:[%s20964_s27 + $0xc00] sm:$0xff]  ;;  %v13142_v32 = vcombine.high %v387_v24, %v391_v26  ;;  %3380 = vmatprep.subr.bf16.mxu1 %v13278_v28  ;;  %v13141_v39 = vcombine.low %v387_v24, %v391_v26 }
  0x70   :  { %v519_v29 = vld [vmem:[%s20964_s27 + $0xc20] sm:$0xff]  ;;  %3381 = vmatpush1.bf16.msra.mxu1 %v13277_v31 }
  0x71   :  { %v507_v34 = vld [vmem:[%s20964_s27 + $0xbc0] sm:$0xff]  ;;  %v13270_v38 = vcombine.high %v515_v27, %v519_v29  ;;  %3341 = vmatprep.subr.bf16.mxu0 %v13142_v32  ;;  %v13269_v40 = vcombine.low %v515_v27, %v519_v29 }
  0x72   :  { %v511_v35 = vld [vmem:[%s20964_s27 + $0xbe0] sm:$0xff]  ;;  %3342 = vmatpush1.bf16.msra.mxu0 %v13141_v39 }
  0x73   :  { %v635_v36 = vld [vmem:[%s20964_s27 + $0xfc0] sm:$0xff]  ;;  %v13262_v41 = vcombine.high %v507_v34, %v511_v35  ;;  %3382 = vmatprep.subr.bf16.mxu1 %v13270_v38  ;;  %v13261_v49 = vcombine.low %v507_v34, %v511_v35 }
  0x74   :  { %v639_v63 = vld [vmem:[%s20964_s27 + $0xfe0] sm:$0xff]  ;;  %3383 = vmatpush1.bf16.msra.mxu1 %v13269_v40 }
  0x75   :  { %v499_v42 = vld [vmem:[%s20964_s27 + $0xb80] sm:$0xff]  ;;  %v13390_v47 = vcombine.high %v635_v36, %v639_v63  ;;  %3343 = vmatprep.subr.bf16.mxu0 %v13262_v41  ;;  %v13389_v50 = vcombine.low %v635_v36, %v639_v63 }
  0x76   :  { %v503_v5 = vld [vmem:[%s20964_s27 + $0xba0] sm:$0xff]  ;;  %3344 = vmatpush2.bf16.msra.mxu0 %v13261_v49 }
  0x77   :  { %v627_v43 = vld [vmem:[%s20964_s27 + $0xf80] sm:$0xff]  ;;  %v13254_v51 = vcombine.high %v499_v42, %v503_v5  ;;  %3384 = vmatprep.subr.bf16.mxu1 %v13390_v47  ;;  %v13253_v58 = vcombine.low %v499_v42, %v503_v5  ;;  %v192_v47 = vld [vmem:[%s20964_s27 + $0x1e8] sm:$0xff] }
  0x78   :  { %v631_v48 = vld [vmem:[%s20964_s27 + $0xfa0] sm:$0xff]  ;;  %3385 = vmatpush2.bf16.msra.mxu1 %v13389_v50  ;;  %v320_v50 = vld [vmem:[%s20964_s27 + $0x5e8] sm:$0xff] }
  0x79   :  { %v491_v52 = vld [vmem:[%s20964_s27 + $0xb40] sm:$0xff]  ;;  %v13382_v56 = vcombine.high %v627_v43, %v631_v48  ;;  %3345 = vmatprep.subr.bf16.mxu0 %v13254_v51  ;;  %v13381_v59 = vcombine.low %v627_v43, %v631_v48  ;;  %v188_v43 = vld [vmem:[%s20964_s27 + $0x1c8] sm:$0xff] }
  0x7a   :  { %v495_v54 = vld [vmem:[%s20964_s27 + $0xb60] sm:$0xff]  ;;  %3346 = vmatpush2.bf16.msra.mxu0 %v13253_v58  ;;  %v316_v48 = vld [vmem:[%s20964_s27 + $0x5c8] sm:$0xff] }
  0x7b   :  { %v619_v55 = vld [vmem:[%s20964_s27 + $0xf40] sm:$0xff]  ;;  %v13246_v60 = vcombine.high %v491_v52, %v495_v54  ;;  %3386 = vmatprep.subr.bf16.mxu1 %v13382_v56  ;;  %v13245_v3 = vcombine.low %v491_v52, %v495_v54  ;;  %v12944_v54 = vcombine.high %v188_v43, %v192_v47  ;;  %v184_v56 = vld [vmem:[%s20964_s27 + $0x1a8] sm:$0xff]  ;;  %v13072_v58 = vcombine.high %v316_v48, %v320_v50 }
  0x7c   :  { %v623_v57 = vld [vmem:[%s20964_s27 + $0xf60] sm:$0xff]  ;;  %3387 = vmatpush2.bf16.msra.mxu1 %v13381_v59  ;;  %v312_v59 = vld [vmem:[%s20964_s27 + $0x5a8] sm:$0xff] }
  0x7d   :  { %v483_v61 = vld [vmem:[%s20964_s27 + $0xb00] sm:$0xff]  ;;  %v13374_v1 = vcombine.high %v619_v55, %v623_v57  ;;  %3347 = vmatprep.subr.bf16.mxu0 %v13246_v60  ;;  %v13373_v4 = vcombine.low %v619_v55, %v623_v57  ;;  %v180_v55 = vld [vmem:[%s20964_s27 + $0x188] sm:$0xff]  ;;  %v15905_v60 = vpack.c.bf16 %v15668_v22, %v15668_v22 }
  0x7e   :  { %v487_v62 = vld [vmem:[%s20964_s27 + $0xb20] sm:$0xff]  ;;  %3348 = vmatpush2.bf16.msra.mxu0 %v13245_v3  ;;  %v308_v57 = vld [vmem:[%s20964_s27 + $0x588] sm:$0xff] }
  0x7f   :  { %v611_v0 = vld [vmem:[%s20964_s27 + $0xf00] sm:$0xff]  ;;  %v13238_v6 = vcombine.high %v483_v61, %v487_v62  ;;  %3388 = vmatprep.subr.bf16.mxu1 %v13374_v1  ;;  %v13237_v13 = vcombine.low %v483_v61, %v487_v62  ;;  %v15909_v61 = vpack.c.bf16 %v15677_v25, %v15677_v25  ;;  %v12943_v62 = vcombine.low %v188_v43, %v192_v47  ;;  %v176_v3 = vld [vmem:[%s20964_s27 + $0x168] sm:$0xff] }
  0x80   :  { %v615_v2 = vld [vmem:[%s20964_s27 + $0xf20] sm:$0xff]  ;;  %3389 = vmatpush2.bf16.msra.mxu1 %v13373_v4  ;;  %v12936_v1 = vcombine.high %v180_v55, %v184_v56  ;;  %v13064_v22 = vcombine.high %v308_v57, %v312_v59  ;;  %v300_v25 = vld [vmem:[%s20964_s27 + $0x548] sm:$0xff] }
  0x81   :  { %v475_v7 = vld [vmem:[%s20964_s27 + $0xac0] sm:$0xff]  ;;  %v13366_v10 = vcombine.high %v611_v0, %v615_v2  ;;  %3349 = vmatprep.subr.bf16.mxu0 %v13238_v6  ;;  %v13365_v14 = vcombine.low %v611_v0, %v615_v2  ;;  %v13071_v0 = vcombine.low %v316_v48, %v320_v50  ;;  %v172_v2 = vld [vmem:[%s20964_s27 + $0x148] sm:$0xff]  ;;  %v12935_v6 = vcombine.low %v180_v55, %v184_v56 }
  0x82   :  { %v479_v8 = vld [vmem:[%s20964_s27 + $0xae0] sm:$0xff]  ;;  %3350 = vmatpush2.bf16.msra.mxu0 %v13237_v13  ;;  %v304_v4 = vld [vmem:[%s20964_s27 + $0x568] sm:$0xff] }
  0x83   :  { %v603_v9 = vld [vmem:[%s20964_s27 + $0xec0] sm:$0xff]  ;;  %v13230_v15 = vcombine.high %v475_v7, %v479_v8  ;;  %3390 = vmatprep.subr.bf16.mxu1 %v13366_v10  ;;  %v13229_v23 = vcombine.low %v475_v7, %v479_v8  ;;  %v13063_v7 = vcombine.low %v308_v57, %v312_v59  ;;  %v12928_v8 = vcombine.high %v172_v2, %v176_v3  ;;  %v168_v10 = vld [vmem:[%s20964_s27 + $0x128] sm:$0xff] }
  0x84   :  { %v607_v12 = vld [vmem:[%s20964_s27 + $0xee0] sm:$0xff]  ;;  %3391 = vmatpush2.bf16.msra.mxu1 %v13365_v14  ;;  %v13056_v13 = vcombine.high %v300_v25, %v304_v4  ;;  %v296_v14 = vld [vmem:[%s20964_s27 + $0x528] sm:$0xff] }
  0x85   :  { %v467_v17 = vld [vmem:[%s20964_s27 + $0xa80] sm:$0xff]  ;;  %v13358_v20 = vcombine.high %v603_v9, %v607_v12  ;;  %3351 = vmatprep.subr.bf16.mxu0 %v13230_v15  ;;  %v13357_v24 = vcombine.low %v603_v9, %v607_v12  ;;  %v164_v9 = vld [vmem:[%s20964_s27 + $0x108] sm:$0xff]  ;;  %v12927_v15 = vcombine.low %v172_v2, %v176_v3 }
  0x86   :  { %v471_v18 = vld [vmem:[%s20964_s27 + $0xaa0] sm:$0xff]  ;;  %3352 = vmatpush2.bf16.msra.mxu0 %v13229_v23  ;;  %v292_v12 = vld [vmem:[%s20964_s27 + $0x508] sm:$0xff] }
  0x87   :  { %v595_v19 = vld [vmem:[%s20964_s27 + $0xe80] sm:$0xff]  ;;  %v13222_v26 = vcombine.high %v467_v17, %v471_v18  ;;  %3392 = vmatprep.subr.bf16.mxu1 %v13358_v20  ;;  %v13221_v32 = vcombine.low %v467_v17, %v471_v18  ;;  %v13055_v17 = vcombine.low %v300_v25, %v304_v4  ;;  %v12920_v18 = vcombine.high %v164_v9, %v168_v10  ;;  %v160_v20 = vld [vmem:[%s20964_s27 + $0xe8] sm:$0xff] }
  0x88   :  { %v599_v21 = vld [vmem:[%s20964_s27 + $0xea0] sm:$0xff]  ;;  %3393 = vmatpush2.bf16.msra.mxu1 %v13357_v24  ;;  %v13048_v23 = vcombine.high %v292_v12, %v296_v14  ;;  %v288_v24 = vld [vmem:[%s20964_s27 + $0x4e8] sm:$0xff] }
  0x89   :  { %v459_v27 = vld [vmem:[%s20964_s27 + $0xa40] sm:$0xff]  ;;  %v13350_v30 = vcombine.high %v595_v19, %v599_v21  ;;  %3353 = vmatprep.subr.bf16.mxu0 %v13222_v26  ;;  %v13349_v34 = vcombine.low %v595_v19, %v599_v21  ;;  %v156_v19 = vld [vmem:[%s20964_s27 + $0xc8] sm:$0xff]  ;;  %v12919_v26 = vcombine.low %v164_v9, %v168_v10 }
  0x8a   :  { %v463_v28 = vld [vmem:[%s20964_s27 + $0xa60] sm:$0xff]  ;;  %3354 = vmatpush2.bf16.msra.mxu0 %v13221_v32  ;;  %v284_v21 = vld [vmem:[%s20964_s27 + $0x4c8] sm:$0xff] }
  0x8b   :  { %v587_v29 = vld [vmem:[%s20964_s27 + $0xe40] sm:$0xff]  ;;  %v13214_v35 = vcombine.high %v459_v27, %v463_v28  ;;  %3394 = vmatprep.subr.bf16.mxu1 %v13350_v30  ;;  %v13213_v41 = vcombine.low %v459_v27, %v463_v28  ;;  %v13047_v27 = vcombine.low %v292_v12, %v296_v14  ;;  %v12912_v28 = vcombine.high %v156_v19, %v160_v20  ;;  %v152_v30 = vld [vmem:[%s20964_s27 + $0xa8] sm:$0xff] }
  0x8c   :  { %v591_v31 = vld [vmem:[%s20964_s27 + $0xe60] sm:$0xff]  ;;  %3395 = vmatpush2.bf16.msra.mxu1 %v13349_v34  ;;  %v13040_v32 = vcombine.high %v284_v21, %v288_v24  ;;  %v280_v34 = vld [vmem:[%s20964_s27 + $0x4a8] sm:$0xff] }
  0x8d   :  { %v451_v36 = vld [vmem:[%s20964_s27 + $0xa00] sm:$0xff]  ;;  %v13342_v39 = vcombine.high %v587_v29, %v591_v31  ;;  %3355 = vmatprep.subr.bf16.mxu0 %v13214_v35  ;;  %v13341_v42 = vcombine.low %v587_v29, %v591_v31  ;;  %v148_v29 = vld [vmem:[%s20964_s27 + $0x88] sm:$0xff]  ;;  %v12911_v35 = vcombine.low %v156_v19, %v160_v20 }
  0x8e   :  { %v455_v38 = vld [vmem:[%s20964_s27 + $0xa20] sm:$0xff]  ;;  %3356 = vmatpush2.bf16.msra.mxu0 %v13213_v41  ;;  %v276_v31 = vld [vmem:[%s20964_s27 + $0x488] sm:$0xff] }
  0x8f   :  { %v579_v63 = vld [vmem:[%s20964_s27 + $0xe00] sm:$0xff]  ;;  %v13206_v5 = vcombine.high %v451_v36, %v455_v38  ;;  %3396 = vmatprep.subr.bf16.mxu1 %v13342_v39  ;;  %v13205_v51 = vcombine.low %v451_v36, %v455_v38  ;;  %v13039_v36 = vcombine.low %v284_v21, %v288_v24  ;;  %v12904_v38 = vcombine.high %v148_v29, %v152_v30  ;;  %v144_v39 = vld [vmem:[%s20964_s27 + $0x68] sm:$0xff] }
  0x90   :  { %v583_v40 = vld [vmem:[%s20964_s27 + $0xe20] sm:$0xff]  ;;  %3397 = vmatpush2.bf16.msra.mxu1 %v13341_v42  ;;  %v13032_v41 = vcombine.high %v276_v31, %v280_v34  ;;  %v272_v42 = vld [vmem:[%s20964_s27 + $0x468] sm:$0xff]  ;;  %v13031_v43 = vcombine.low %v276_v31, %v280_v34 }
  0x91   :  { %v13334_v49 = vcombine.high %v579_v63, %v583_v40  ;;  %3357 = vmatprep.subr.bf16.mxu0 %v13206_v5  ;;  %v13333_v52 = vcombine.low %v579_v63, %v583_v40  ;;  %v140_v63 = vld [vmem:[%s20964_s27 + $0x48] sm:$0xff]  ;;  %v12903_v5 = vcombine.low %v148_v29, %v152_v30 }
  0x92   :  { %3358 = vmatpush2.bf16.msra.mxu0 %v13205_v51  ;;  %v268_v40 = vld [vmem:[%s20964_s27 + $0x448] sm:$0xff]  ;;  %v12896_v47 = vcombine.high %v140_v63, %v144_v39 }
  0x93   :  { %3398 = vmatprep.subr.bf16.mxu1 %v13334_v49  ;;  %3409 = vmatprep.subr.bf16.mxu0 %v12944_v54  ;;  %v132_v48 = vld [vmem:[%s20964_s27 + $0x8] sm:$0xff]  ;;  %v13024_v51 = vcombine.high %v268_v40, %v272_v42  ;;  %v12895_v54 = vcombine.low %v140_v63, %v144_v39  ;;  %v13023_v55 = vcombine.low %v268_v40, %v272_v42 }
  0x94   :  { %3399 = vmatpush2.bf16.msra.mxu1 %v13333_v52  ;;  %v136_v49 = vld [vmem:[%s20964_s27 + $0x28] sm:$0xff] }
  0x95   :  { %3450 = vmatprep.subr.bf16.mxu1 %v13072_v58  ;;  %3360 = vmatmul.mubr.bf16.vlgmr.msra.gmra.mxu0 %v15905_v60  ;;  %v260_v50 = vld [vmem:[%s20964_s27 + $0x408] sm:$0xff]  ;;  %v12888_v56 = vcombine.high %v132_v48, %v136_v49 }
  0x96   :  { %3410 = vmatpush1.bf16.msra.mxu0 %v12943_v62  ;;  %3441 = vmatprep.mubr.bf16.mxu0 %v15560_v11  ;;  %v264_v52 = vld [vmem:[%s20964_s27 + $0x428] sm:$0xff] }
  0x97   :  { %3401 = vmatmul.mubr.bf16.vlgmr.msra.gmra.mxu1 %v15909_v61  ;;  %3411 = vmatprep.subr.bf16.mxu0 %v12936_v1  ;;  %v252_v57 = vld [vmem:[%s20964_s27 + $0x3c8] sm:$0xff]  ;;  %v13016_v62 = vcombine.high %v260_v50, %v264_v52  ;;  %v12887_v1 = vcombine.low %v132_v48, %v136_v49  ;;  %v13015_v2 = vcombine.low %v260_v50, %v264_v52 }
  0x98   :  { %3451 = vmatpush1.bf16.msra.mxu1 %v13071_v0  ;;  %3482 = vmatprep.mubr.bf16.mxu1 %v15571_v16  ;;  %v256_v58 = vld [vmem:[%s20964_s27 + $0x3e8] sm:$0xff] }
  0x99   :  { %3452 = vmatprep.subr.bf16.mxu1 %v13064_v22  ;;  %v380_v59 = vld [vmem:[%s20964_s27 + $0x7c8] sm:$0xff]  ;;  %v13008_v3 = vcombine.high %v252_v57, %v256_v58 }
  0x9a   :  { %3412 = vmatpush1.bf16.msra.mxu0 %v12935_v6  ;;  %v384_v0 = vld [vmem:[%s20964_s27 + $0x7e8] sm:$0xff] }
  0x9b   :  { %3413 = vmatprep.subr.bf16.mxu0 %v12928_v8  ;;  %v244_v22 = vld [vmem:[%s20964_s27 + $0x388] sm:$0xff]  ;;  %v13136_v6 = vcombine.high %v380_v59, %v384_v0  ;;  %v13007_v8 = vcombine.low %v252_v57, %v256_v58  ;;  %v13135_v9 = vcombine.low %v380_v59, %v384_v0 }
  0x9c   :  { %3453 = vmatpush1.bf16.msra.mxu1 %v13063_v7  ;;  %v248_v25 = vld [vmem:[%s20964_s27 + $0x3a8] sm:$0xff] }
  0x9d   :  { %3454 = vmatprep.subr.bf16.mxu1 %v13056_v13  ;;  %v372_v4 = vld [vmem:[%s20964_s27 + $0x788] sm:$0xff]  ;;  %v13000_v10 = vcombine.high %v244_v22, %v248_v25 }
  0x9e   :  { %3414 = vmatpush1.bf16.msra.mxu0 %v12927_v15  ;;  %v376_v7 = vld [vmem:[%s20964_s27 + $0x7a8] sm:$0xff] }
  0x9f   :  { %3415 = vmatprep.subr.bf16.mxu0 %v12920_v18  ;;  %v236_v12 = vld [vmem:[%s20964_s27 + $0x348] sm:$0xff]  ;;  %v13128_v15 = vcombine.high %v372_v4, %v376_v7  ;;  %v12999_v18 = vcombine.low %v244_v22, %v248_v25  ;;  %v13127_v19 = vcombine.low %v372_v4, %v376_v7 }
  0xa0   :  { %3455 = vmatpush1.bf16.msra.mxu1 %v13055_v17  ;;  %v240_v13 = vld [vmem:[%s20964_s27 + $0x368] sm:$0xff] }
  0xa1   :  { %3456 = vmatprep.subr.bf16.mxu1 %v13048_v23  ;;  %v364_v14 = vld [vmem:[%s20964_s27 + $0x748] sm:$0xff]  ;;  %v12992_v20 = vcombine.high %v236_v12, %v240_v13 }
  0xa2   :  { %3416 = vmatpush1.bf16.msra.mxu0 %v12919_v26  ;;  %v368_v17 = vld [vmem:[%s20964_s27 + $0x768] sm:$0xff] }
  0xa3   :  { %3417 = vmatprep.subr.bf16.mxu0 %v12912_v28  ;;  %v228_v21 = vld [vmem:[%s20964_s27 + $0x308] sm:$0xff]  ;;  %v13120_v26 = vcombine.high %v364_v14, %v368_v17  ;;  %v12991_v28 = vcombine.low %v236_v12, %v240_v13  ;;  %v13119_v29 = vcombine.low %v364_v14, %v368_v17 }
  0xa4   :  { %3457 = vmatpush1.bf16.msra.mxu1 %v13047_v27  ;;  %v232_v23 = vld [vmem:[%s20964_s27 + $0x328] sm:$0xff] }
  0xa5   :  { %3458 = vmatprep.subr.bf16.mxu1 %v13040_v32  ;;  %v356_v24 = vld [vmem:[%s20964_s27 + $0x708] sm:$0xff]  ;;  %v12984_v30 = vcombine.high %v228_v21, %v232_v23 }
  0xa6   :  { %3418 = vmatpush1.bf16.msra.mxu0 %v12911_v35  ;;  %v360_v27 = vld [vmem:[%s20964_s27 + $0x728] sm:$0xff] }
  0xa7   :  { %3419 = vmatprep.subr.bf16.mxu0 %v12904_v38  ;;  %v220_v31 = vld [vmem:[%s20964_s27 + $0x2c8] sm:$0xff]  ;;  %v13112_v35 = vcombine.high %v356_v24, %v360_v27  ;;  %v12983_v38 = vcombine.low %v228_v21, %v232_v23  ;;  %v13111_v63 = vcombine.low %v356_v24, %v360_v27 }
  0xa8   :  { %3459 = vmatpush1.bf16.msra.mxu1 %v13039_v36  ;;  %v224_v32 = vld [vmem:[%s20964_s27 + $0x2e8] sm:$0xff] }
  0xa9   :  { %3460 = vmatprep.subr.bf16.mxu1 %v13032_v41  ;;  %v348_v34 = vld [vmem:[%s20964_s27 + $0x6c8] sm:$0xff]  ;;  %v12976_v39 = vcombine.high %v220_v31, %v224_v32 }
  0xaa   :  { %3420 = vmatpush1.bf16.msra.mxu0 %v12903_v5  ;;  %v352_v36 = vld [vmem:[%s20964_s27 + $0x6e8] sm:$0xff] }
  0xab   :  { %3421 = vmatprep.subr.bf16.mxu0 %v12896_v47  ;;  %v212_v40 = vld [vmem:[%s20964_s27 + $0x288] sm:$0xff]  ;;  %v13104_v5 = vcombine.high %v348_v34, %v352_v36  ;;  %v12975_v47 = vcombine.low %v220_v31, %v224_v32  ;;  %v13103_v48 = vcombine.low %v348_v34, %v352_v36 }
  0xac   :  { %3461 = vmatpush1.bf16.msra.mxu1 %v13031_v43  ;;  %v216_v41 = vld [vmem:[%s20964_s27 + $0x2a8] sm:$0xff] }
  0xad   :  { %3462 = vmatprep.subr.bf16.mxu1 %v13024_v51  ;;  %v340_v42 = vld [vmem:[%s20964_s27 + $0x688] sm:$0xff]  ;;  %v12968_v49 = vcombine.high %v212_v40, %v216_v41 }
  0xae   :  { %3422 = vmatpush1.bf16.msra.mxu0 %v12895_v54  ;;  %v344_v43 = vld [vmem:[%s20964_s27 + $0x6a8] sm:$0xff] }
  0xaf   :  { %3423 = vmatprep.subr.bf16.mxu0 %v12888_v56  ;;  %v204_v50 = vld [vmem:[%s20964_s27 + $0x248] sm:$0xff]  ;;  %v13096_v54 = vcombine.high %v340_v42, %v344_v43  ;;  %v12967_v56 = vcombine.low %v212_v40, %v216_v41  ;;  %v13095_v57 = vcombine.low %v340_v42, %v344_v43 }
  0xb0   :  { %3463 = vmatpush1.bf16.msra.mxu1 %v13023_v55  ;;  %v208_v51 = vld [vmem:[%s20964_s27 + $0x268] sm:$0xff] }
  0xb1   :  { %3464 = vmatprep.subr.bf16.mxu1 %v13016_v62  ;;  %v332_v52 = vld [vmem:[%s20964_s27 + $0x648] sm:$0xff]  ;;  %v12960_v58 = vcombine.high %v204_v50, %v208_v51 }
  0xb2   :  { %3424 = vmatpush1.bf16.msra.mxu0 %v12887_v1  ;;  %v336_v55 = vld [vmem:[%s20964_s27 + $0x668] sm:$0xff] }
  0xb3   :  { %3425 = vmatprep.subr.bf16.mxu0 %v13008_v3  ;;  %v196_v59 = vld [vmem:[%s20964_s27 + $0x208] sm:$0xff]  ;;  %v13088_v1 = vcombine.high %v332_v52, %v336_v55  ;;  %v12959_v3 = vcombine.low %v204_v50, %v208_v51  ;;  %v13087_v22 = vcombine.low %v332_v52, %v336_v55 }
  0xb4   :  { %3465 = vmatpush1.bf16.msra.mxu1 %v13015_v2  ;;  %v200_v62 = vld [vmem:[%s20964_s27 + $0x228] sm:$0xff] }
  0xb5   :  { %3466 = vmatprep.subr.bf16.mxu1 %v13136_v6  ;;  %v324_v0 = vld [vmem:[%s20964_s27 + $0x608] sm:$0xff]  ;;  %v12952_v25 = vcombine.high %v196_v59, %v200_v62 }
  0xb6   :  { %3426 = vmatpush2.bf16.msra.mxu0 %v13007_v8  ;;  %v328_v2 = vld [vmem:[%s20964_s27 + $0x628] sm:$0xff] }
  0xb7   :  { %3427 = vmatprep.subr.bf16.mxu0 %v13000_v10  ;;  %v444_v4 = vld [vmem:[%s20964_s27 + $0x9c8] sm:$0xff]  ;;  %v13080_v8 = vcombine.high %v324_v0, %v328_v2  ;;  %v12951_v10 = vcombine.low %v196_v59, %v200_v62  ;;  %v13079_v12 = vcombine.low %v324_v0, %v328_v2 }
  0xb8   :  { %3467 = vmatpush2.bf16.msra.mxu1 %v13135_v9  ;;  %v448_v6 = vld [vmem:[%s20964_s27 + $0x9e8] sm:$0xff] }
  0xb9   :  { %3468 = vmatprep.subr.bf16.mxu1 %v13128_v15  ;;  %v572_v7 = vld [vmem:[%s20964_s27 + $0xdc8] sm:$0xff]  ;;  %v13200_v13 = vcombine.high %v444_v4, %v448_v6 }
  0xba   :  { %3428 = vmatpush2.bf16.msra.mxu0 %v12999_v18  ;;  %v576_v9 = vld [vmem:[%s20964_s27 + $0xde8] sm:$0xff] }
  0xbb   :  { %3429 = vmatprep.subr.bf16.mxu0 %v12992_v20  ;;  %v436_v14 = vld [vmem:[%s20964_s27 + $0x988] sm:$0xff]  ;;  %v13328_v18 = vcombine.high %v572_v7, %v576_v9  ;;  %v13199_v20 = vcombine.low %v444_v4, %v448_v6  ;;  %v13327_v21 = vcombine.low %v572_v7, %v576_v9 }
  0xbc   :  { %3469 = vmatpush2.bf16.msra.mxu1 %v13127_v19  ;;  %v440_v15 = vld [vmem:[%s20964_s27 + $0x9a8] sm:$0xff] }
  0xbd   :  { %3470 = vmatprep.subr.bf16.mxu1 %v13120_v26  ;;  %v564_v17 = vld [vmem:[%s20964_s27 + $0xd88] sm:$0xff]  ;;  %v13192_v23 = vcombine.high %v436_v14, %v440_v15 }
  0xbe   :  { %3430 = vmatpush2.bf16.msra.mxu0 %v12991_v28  ;;  %v568_v19 = vld [vmem:[%s20964_s27 + $0xda8] sm:$0xff] }
  0xbf   :  { %3431 = vmatprep.subr.bf16.mxu0 %v12984_v30  ;;  %v428_v24 = vld [vmem:[%s20964_s27 + $0x948] sm:$0xff]  ;;  %v13320_v28 = vcombine.high %v564_v17, %v568_v19  ;;  %v13191_v30 = vcombine.low %v436_v14, %v440_v15  ;;  %v13319_v31 = vcombine.low %v564_v17, %v568_v19 }
  0xc0   :  { %3471 = vmatpush2.bf16.msra.mxu1 %v13119_v29  ;;  %v432_v26 = vld [vmem:[%s20964_s27 + $0x968] sm:$0xff] }
  0xc1   :  { %3472 = vmatprep.subr.bf16.mxu1 %v13112_v35  ;;  %v556_v27 = vld [vmem:[%s20964_s27 + $0xd48] sm:$0xff]  ;;  %v13184_v32 = vcombine.high %v428_v24, %v432_v26 }
  0xc2   :  { %3432 = vmatpush2.bf16.msra.mxu0 %v12983_v38  ;;  %v560_v29 = vld [vmem:[%s20964_s27 + $0xd68] sm:$0xff] }
  0xc3   :  { %3433 = vmatprep.subr.bf16.mxu0 %v12976_v39  ;;  %v420_v34 = vld [vmem:[%s20964_s27 + $0x908] sm:$0xff]  ;;  %v13312_v38 = vcombine.high %v556_v27, %v560_v29  ;;  %v13183_v39 = vcombine.low %v428_v24, %v432_v26  ;;  %v13311_v40 = vcombine.low %v556_v27, %v560_v29 }
  0xc4   :  { %3473 = vmatpush2.bf16.msra.mxu1 %v13111_v63  ;;  %v424_v35 = vld [vmem:[%s20964_s27 + $0x928] sm:$0xff] }
  0xc5   :  { %3474 = vmatprep.subr.bf16.mxu1 %v13104_v5  ;;  %v548_v36 = vld [vmem:[%s20964_s27 + $0xd08] sm:$0xff]  ;;  %v13176_v41 = vcombine.high %v420_v34, %v424_v35 }
  0xc6   :  { %3434 = vmatpush2.bf16.msra.mxu0 %v12975_v47  ;;  %v552_v63 = vld [vmem:[%s20964_s27 + $0xd28] sm:$0xff] }
  0xc7   :  { %3435 = vmatprep.subr.bf16.mxu0 %v12968_v49  ;;  %v412_v42 = vld [vmem:[%s20964_s27 + $0x8c8] sm:$0xff]  ;;  %v13304_v47 = vcombine.high %v548_v36, %v552_v63  ;;  %v13175_v49 = vcombine.low %v420_v34, %v424_v35  ;;  %v13303_v50 = vcombine.low %v548_v36, %v552_v63 }
  0xc8   :  { %3475 = vmatpush2.bf16.msra.mxu1 %v13103_v48  ;;  %v416_v5 = vld [vmem:[%s20964_s27 + $0x8e8] sm:$0xff] }
  0xc9   :  { %3476 = vmatprep.subr.bf16.mxu1 %v13096_v54  ;;  %v540_v43 = vld [vmem:[%s20964_s27 + $0xcc8] sm:$0xff]  ;;  %v13168_v51 = vcombine.high %v412_v42, %v416_v5 }
  0xca   :  { %3436 = vmatpush2.bf16.msra.mxu0 %v12967_v56  ;;  %v544_v48 = vld [vmem:[%s20964_s27 + $0xce8] sm:$0xff] }
  0xcb   :  { %3437 = vmatprep.subr.bf16.mxu0 %v12960_v58  ;;  %v404_v52 = vld [vmem:[%s20964_s27 + $0x888] sm:$0xff]  ;;  %v13296_v56 = vcombine.high %v540_v43, %v544_v48  ;;  %v13167_v58 = vcombine.low %v412_v42, %v416_v5  ;;  %v13295_v59 = vcombine.low %v540_v43, %v544_v48 }
  0xcc   :  { %3477 = vmatpush2.bf16.msra.mxu1 %v13095_v57  ;;  %v408_v54 = vld [vmem:[%s20964_s27 + $0x8a8] sm:$0xff] }
  0xcd   :  { %3478 = vmatprep.subr.bf16.mxu1 %v13088_v1  ;;  %v532_v55 = vld [vmem:[%s20964_s27 + $0xc88] sm:$0xff]  ;;  %v13160_v62 = vcombine.high %v404_v52, %v408_v54 }
  0xce   :  { %3438 = vmatpush2.bf16.msra.mxu0 %v12959_v3  ;;  %v536_v57 = vld [vmem:[%s20964_s27 + $0xca8] sm:$0xff] }
  0xcf   :  { %3439 = vmatprep.subr.bf16.mxu0 %v12952_v25  ;;  %v396_v0 = vld [vmem:[%s20964_s27 + $0x848] sm:$0xff]  ;;  %v13288_v3 = vcombine.high %v532_v55, %v536_v57  ;;  %v13159_v25 = vcombine.low %v404_v52, %v408_v54  ;;  %v13287_v4 = vcombine.low %v532_v55, %v536_v57 }
  0xd0   :  { %3479 = vmatpush2.bf16.msra.mxu1 %v13087_v22  ;;  %v400_v1 = vld [vmem:[%s20964_s27 + $0x868] sm:$0xff] }
  0xd1   :  { %3480 = vmatprep.subr.bf16.mxu1 %v13080_v8  ;;  %v524_v2 = vld [vmem:[%s20964_s27 + $0xc48] sm:$0xff]  ;;  %v13152_v6 = vcombine.high %v396_v0, %v400_v1 }
  0xd2   :  { %3440 = vmatpush2.bf16.msra.mxu0 %v12951_v10  ;;  %v528_v22 = vld [vmem:[%s20964_s27 + $0xc68] sm:$0xff] }
  0xd3   :  { %3491 = vmatprep.subr.bf16.mxu0 %v13200_v13  ;;  %v388_v7 = vld [vmem:[%s20964_s27 + $0x808] sm:$0xff]  ;;  %v13280_v10 = vcombine.high %v524_v2, %v528_v22  ;;  %v13151_v13 = vcombine.low %v396_v0, %v400_v1  ;;  %v13279_v14 = vcombine.low %v524_v2, %v528_v22 }
  0xd4   :  { %3481 = vmatpush2.bf16.msra.mxu1 %v13079_v12  ;;  %v392_v8 = vld [vmem:[%s20964_s27 + $0x828] sm:$0xff] }
  0xd5   :  { %3532 = vmatprep.subr.bf16.mxu1 %v13328_v18  ;;  %3442 = vmatmul.mubr.bf16.vlgmr.msra.gmra.mxu0 %v15689_v33  ;;  %v516_v9 = vld [vmem:[%s20964_s27 + $0xc08] sm:$0xff]  ;;  %v13144_v15 = vcombine.high %v388_v7, %v392_v8 }
  0xd6   :  { %3492 = vmatpush1.bf16.msra.mxu0 %v13199_v20  ;;  %3523 = vmatprep.mubr.bf16.mxu0 %v15715_v45  ;;  %v520_v12 = vld [vmem:[%s20964_s27 + $0xc28] sm:$0xff] }
  0xd7   :  { %3483 = vmatmul.mubr.bf16.vlgmr.msra.gmra.mxu1 %v15701_v37  ;;  %3493 = vmatprep.subr.bf16.mxu0 %v13192_v23  ;;  %v508_v17 = vld [vmem:[%s20964_s27 + $0xbc8] sm:$0xff]  ;;  %v13272_v20 = vcombine.high %v516_v9, %v520_v12  ;;  %v13143_v23 = vcombine.low %v388_v7, %v392_v8  ;;  %v13271_v24 = vcombine.low %v516_v9, %v520_v12 }
  0xd8   :  { %3533 = vmatpush1.bf16.msra.mxu1 %v13327_v21  ;;  %3564 = vmatprep.mubr.bf16.mxu1 %v15718_v46  ;;  %v512_v18 = vld [vmem:[%s20964_s27 + $0xbe8] sm:$0xff] }
  0xd9   :  { %3534 = vmatprep.subr.bf16.mxu1 %v13320_v28  ;;  %v636_v19 = vld [vmem:[%s20964_s27 + $0xfc8] sm:$0xff]  ;;  %v13264_v26 = vcombine.high %v508_v17, %v512_v18 }
  0xda   :  { %3494 = vmatpush1.bf16.msra.mxu0 %v13191_v30  ;;  %v640_v21 = vld [vmem:[%s20964_s27 + $0xfe8] sm:$0xff] }
  0xdb   :  { %3495 = vmatprep.subr.bf16.mxu0 %v13184_v32  ;;  %v500_v27 = vld [vmem:[%s20964_s27 + $0xb88] sm:$0xff]  ;;  %v13392_v30 = vcombine.high %v636_v19, %v640_v21  ;;  %v13263_v32 = vcombine.low %v508_v17, %v512_v18  ;;  %v13391_v34 = vcombine.low %v636_v19, %v640_v21 }
  0xdc   :  { %3535 = vmatpush1.bf16.msra.mxu1 %v13319_v31  ;;  %v504_v28 = vld [vmem:[%s20964_s27 + $0xba8] sm:$0xff] }
  0xdd   :  { %3536 = vmatprep.subr.bf16.mxu1 %v13312_v38  ;;  %v628_v29 = vld [vmem:[%s20964_s27 + $0xf88] sm:$0xff]  ;;  %v13256_v35 = vcombine.high %v500_v27, %v504_v28 }
  0xde   :  { %3496 = vmatpush1.bf16.msra.mxu0 %v13183_v39  ;;  %v632_v31 = vld [vmem:[%s20964_s27 + $0xfa8] sm:$0xff] }
  0xdf   :  { %3497 = vmatprep.subr.bf16.mxu0 %v13176_v41  ;;  %v492_v36 = vld [vmem:[%s20964_s27 + $0xb48] sm:$0xff]  ;;  %v13384_v39 = vcombine.high %v628_v29, %v632_v31  ;;  %v13255_v41 = vcombine.low %v500_v27, %v504_v28  ;;  %v13383_v42 = vcombine.low %v628_v29, %v632_v31  ;;  %v189_v29 = vld [vmem:[%s20964_s27 + $0x1d0] sm:$0xff] }
  0xe0   :  { %3537 = vmatpush1.bf16.msra.mxu1 %v13311_v40  ;;  %v496_v38 = vld [vmem:[%s20964_s27 + $0xb68] sm:$0xff]  ;;  %v317_v31 = vld [vmem:[%s20964_s27 + $0x5d0] sm:$0xff] }
  0xe1   :  { %3538 = vmatprep.subr.bf16.mxu1 %v13304_v47  ;;  %v620_v63 = vld [vmem:[%s20964_s27 + $0xf48] sm:$0xff]  ;;  %v13248_v5 = vcombine.high %v492_v36, %v496_v38 }
  0xe2   :  { %3498 = vmatpush1.bf16.msra.mxu0 %v13175_v49  ;;  %v624_v40 = vld [vmem:[%s20964_s27 + $0xf68] sm:$0xff] }
  0xe3   :  { %3499 = vmatprep.subr.bf16.mxu0 %v13168_v51  ;;  %v484_v43 = vld [vmem:[%s20964_s27 + $0xb08] sm:$0xff]  ;;  %v13376_v49 = vcombine.high %v620_v63, %v624_v40  ;;  %v13247_v51 = vcombine.low %v492_v36, %v496_v38  ;;  %v13375_v52 = vcombine.low %v620_v63, %v624_v40  ;;  %v16297_v38 = vsub.s32 0, %v15508_v44  ;;  %v181_v40 = vld [vmem:[%s20964_s27 + $0x190] sm:$0xff] }
  0xe4   :  { %3539 = vmatpush1.bf16.msra.mxu1 %v13303_v50  ;;  %v488_v47 = vld [vmem:[%s20964_s27 + $0xb28] sm:$0xff] }
  0xe5   :  { %3540 = vmatprep.subr.bf16.mxu1 %v13296_v56  ;;  %v612_v48 = vld [vmem:[%s20964_s27 + $0xf08] sm:$0xff]  ;;  %v13240_v54 = vcombine.high %v484_v43, %v488_v47 }
  0xe6   :  { %3500 = vmatpush1.bf16.msra.mxu0 %v13167_v58  ;;  %v616_v50 = vld [vmem:[%s20964_s27 + $0xf28] sm:$0xff] }
  0xe7   :  { %3501 = vmatprep.subr.bf16.mxu0 %v13160_v62  ;;  %v476_v55 = vld [vmem:[%s20964_s27 + $0xac8] sm:$0xff]  ;;  %v13368_v58 = vcombine.high %v612_v48, %v616_v50  ;;  %v13239_v62 = vcombine.low %v484_v43, %v488_v47  ;;  %v13367_v0 = vcombine.low %v612_v48, %v616_v50  ;;  %v16309_v43 = vsub.s32 1, %v15508_v44  ;;  %v313_v47 = vld [vmem:[%s20964_s27 + $0x5b0] sm:$0xff] }
  0xe8   :  { %3541 = vmatpush1.bf16.msra.mxu1 %v13295_v59  ;;  %v480_v56 = vld [vmem:[%s20964_s27 + $0xae8] sm:$0xff] }
  0xe9   :  { %3542 = vmatprep.subr.bf16.mxu1 %v13288_v3  ;;  %v604_v57 = vld [vmem:[%s20964_s27 + $0xec8] sm:$0xff]  ;;  %v13232_v1 = vcombine.high %v476_v55, %v480_v56 }
  0xea   :  { %3502 = vmatpush1.bf16.msra.mxu0 %v13159_v25  ;;  %v608_v59 = vld [vmem:[%s20964_s27 + $0xee8] sm:$0xff] }
  0xeb   :  { %3503 = vmatprep.subr.bf16.mxu0 %v13152_v6  ;;  %v468_v2 = vld [vmem:[%s20964_s27 + $0xa88] sm:$0xff]  ;;  %v13360_v25 = vcombine.high %v604_v57, %v608_v59  ;;  %v13231_v6 = vcombine.low %v476_v55, %v480_v56  ;;  %v13359_v7 = vcombine.low %v604_v57, %v608_v59  ;;  %v301_v55 = vld [vmem:[%s20964_s27 + $0x550] sm:$0xff] }
  0xec   :  { %3543 = vmatpush1.bf16.msra.mxu1 %v13287_v4  ;;  %v472_v3 = vld [vmem:[%s20964_s27 + $0xaa8] sm:$0xff] }
  0xed   :  { %3544 = vmatprep.subr.bf16.mxu1 %v13280_v10  ;;  %v596_v22 = vld [vmem:[%s20964_s27 + $0xe88] sm:$0xff]  ;;  %v13224_v8 = vcombine.high %v468_v2, %v472_v3 }
  0xee   :  { %3504 = vmatpush1.bf16.msra.mxu0 %v13151_v13  ;;  %v600_v4 = vld [vmem:[%s20964_s27 + $0xea8] sm:$0xff] }
  0xef   :  { %3505 = vmatprep.subr.bf16.mxu0 %v13144_v15  ;;  %v460_v9 = vld [vmem:[%s20964_s27 + $0xa48] sm:$0xff]  ;;  %v13352_v13 = vcombine.high %v596_v22, %v600_v4  ;;  %v13223_v15 = vcombine.low %v468_v2, %v472_v3  ;;  %v13351_v17 = vcombine.low %v596_v22, %v600_v4  ;;  %v169_v4 = vld [vmem:[%s20964_s27 + $0x130] sm:$0xff] }
  0xf0   :  { %3545 = vmatpush1.bf16.msra.mxu1 %v13279_v14  ;;  %v464_v10 = vld [vmem:[%s20964_s27 + $0xa68] sm:$0xff] }
  0xf1   :  { %3546 = vmatprep.subr.bf16.mxu1 %v13272_v20  ;;  %v588_v12 = vld [vmem:[%s20964_s27 + $0xe48] sm:$0xff]  ;;  %v13216_v18 = vcombine.high %v460_v9, %v464_v10 }
  0xf2   :  { %3506 = vmatpush1.bf16.msra.mxu0 %v13143_v23  ;;  %v592_v14 = vld [vmem:[%s20964_s27 + $0xe68] sm:$0xff] }
  0xf3   :  { %3507 = vmatprep.subr.bf16.mxu0 %v13264_v26  ;;  %v452_v19 = vld [vmem:[%s20964_s27 + $0xa08] sm:$0xff]  ;;  %v13344_v23 = vcombine.high %v588_v12, %v592_v14  ;;  %v13215_v26 = vcombine.low %v460_v9, %v464_v10  ;;  %v13343_v27 = vcombine.low %v588_v12, %v592_v14  ;;  %v297_v12 = vld [vmem:[%s20964_s27 + $0x530] sm:$0xff] }
  0xf4   :  { %3547 = vmatpush1.bf16.msra.mxu1 %v13271_v24  ;;  %v456_v20 = vld [vmem:[%s20964_s27 + $0xa28] sm:$0xff] }
  0xf5   :  { %3548 = vmatprep.subr.bf16.mxu1 %v13392_v30  ;;  %v580_v21 = vld [vmem:[%s20964_s27 + $0xe08] sm:$0xff]  ;;  %v13208_v28 = vcombine.high %v452_v19, %v456_v20  ;;  %v193_v30 = vld [vmem:[%s20964_s27 + $0x1f0] sm:$0xff]  ;;  %v13207_v36 = vcombine.low %v452_v19, %v456_v20 }
  0xf6   :  { %3508 = vmatpush2.bf16.msra.mxu0 %v13263_v32  ;;  %v584_v24 = vld [vmem:[%s20964_s27 + $0xe28] sm:$0xff] }
  0xf7   :  { %3509 = vmatprep.subr.bf16.mxu0 %v13256_v35  ;;  %v13336_v32 = vcombine.high %v580_v21, %v584_v24  ;;  %v16294_v35 = vld [vmem:[%s20966_s1] sm:$0xff]  ;;  %v13335_v63 = vcombine.low %v580_v21, %v584_v24  ;;  %v157_v21 = vld [vmem:[%s20964_s27 + $0xd0] sm:$0xff] }
  0xf8   :  { %3549 = vmatpush2.bf16.msra.mxu1 %v13391_v34  ;;  %v321_v34 = vld [vmem:[%s20964_s27 + $0x5f0] sm:$0xff]  ;;  %v648_v48 = vrot.slane %v16294_v35, %v16297_v38  ;;  %v652_v56 = vrot.slane %v16294_v35, %v16309_v43 }
  0xf9   :  { %3550 = vmatprep.subr.bf16.mxu1 %v13384_v39  ;;  %v12946_v39 = vcombine.high %v189_v29, %v193_v30  ;;  %v13073_v50 = vcombine.low %v317_v31, %v321_v34 }
  0xfa   :  { %3510 = vmatpush2.bf16.msra.mxu0 %v13255_v41  ;;  %v185_v41 = vld [vmem:[%s20964_s27 + $0x1b0] sm:$0xff] }
  0xfb   :  { %3511 = vmatprep.subr.bf16.mxu0 %v13248_v5  ;;  %v13074_v5 = vcombine.high %v317_v31, %v321_v34 }
  0xfc   :  { %3551 = vmatpush2.bf16.msra.mxu1 %v13383_v42  ;;  %v309_v42 = vld [vmem:[%s20964_s27 + $0x590] sm:$0xff] }
  0xfd   :  { %3552 = vmatprep.subr.bf16.mxu1 %v13376_v49  ;;  %v12945_v49 = vcombine.low %v189_v29, %v193_v30  ;;  %v13066_v57 = vcombine.high %v309_v42, %v313_v47  ;;  %v13065_v3 = vcombine.low %v309_v42, %v313_v47 }
  0xfe   :  { %3512 = vmatpush2.bf16.msra.mxu0 %v13247_v51  ;;  %v12938_v51 = vcombine.high %v181_v40, %v185_v41 }
  0xff   :  { %3513 = vmatprep.subr.bf16.mxu0 %v13240_v54  ;;  %v177_v54 = vld [vmem:[%s20964_s27 + $0x170] sm:$0xff] }
 0x100   :  { %3553 = vmatpush2.bf16.msra.mxu1 %v13375_v52  ;;  %v173_v52 = vld [vmem:[%s20964_s27 + $0x150] sm:$0xff] }
 0x101   :  { %3554 = vmatprep.subr.bf16.mxu1 %v13368_v58  ;;  %v305_v58 = vld [vmem:[%s20964_s27 + $0x570] sm:$0xff]  ;;  %v12930_v22 = vcombine.high %v173_v52, %v177_v54 }
 0x102   :  { %3514 = vmatpush2.bf16.msra.mxu0 %v13239_v62  ;;  %v13058_v10 = vcombine.high %v301_v55, %v305_v58  ;;  %v13057_v19 = vcombine.low %v301_v55, %v305_v58 }
 0x103   :  { %3515 = vmatprep.subr.bf16.mxu0 %v13232_v1  ;;  %v12937_v1 = vcombine.low %v181_v40, %v185_v41 }
 0x104   :  { %3555 = vmatpush2.bf16.msra.mxu1 %v13367_v0 }
 0x105   :  { %3556 = vmatprep.subr.bf16.mxu1 %v13360_v25  ;;  %v165_v25 = vld [vmem:[%s20964_s27 + $0x110] sm:$0xff] }
 0x106   :  { %3516 = vmatpush2.bf16.msra.mxu0 %v13231_v6  ;;  %v293_v6 = vld [vmem:[%s20964_s27 + $0x510] sm:$0xff]  ;;  %v12922_v20 = vcombine.high %v165_v25, %v169_v4 }
 0x107   :  { %3517 = vmatprep.subr.bf16.mxu0 %v13224_v8  ;;  %v13050_v24 = vcombine.high %v293_v6, %v297_v12 }
 0x108   :  { %3557 = vmatpush2.bf16.msra.mxu1 %v13359_v7 }
 0x109   :  { %3558 = vmatprep.subr.bf16.mxu1 %v13352_v13 }
 0x10a   :  { %3518 = vmatpush2.bf16.msra.mxu0 %v13223_v15 }
 0x10b   :  { %3519 = vmatprep.subr.bf16.mxu0 %v13216_v18 }
 0x10c   :  { %3559 = vmatpush2.bf16.msra.mxu1 %v13351_v17  ;;  %v12929_v17 = vcombine.low %v173_v52, %v177_v54 }
 0x10d   :  { %3560 = vmatprep.subr.bf16.mxu1 %v13344_v23 }
 0x10e   :  { %3520 = vmatpush2.bf16.msra.mxu0 %v13215_v26  ;;  %v161_v26 = vld [vmem:[%s20964_s27 + $0xf0] sm:$0xff] }
 0x10f   :  { %3521 = vmatprep.subr.bf16.mxu0 %v13208_v28  ;;  %v289_v28 = vld [vmem:[%s20964_s27 + $0x4f0] sm:$0xff] }
 0x110   :  { %3561 = vmatpush2.bf16.msra.mxu1 %v13343_v27  ;;  %v285_v27 = vld [vmem:[%s20964_s27 + $0x4d0] sm:$0xff] }
 0x111   :  { %3562 = vmatprep.subr.bf16.mxu1 %v13336_v32 }
 0x112   :  { %3522 = vmatpush2.bf16.msra.mxu0 %v13207_v36 }
 0x113   :  { %3573 = vmatprep.subr.bf16.mxu0 %v12946_v39 }
 0x114   :  { %3563 = vmatpush2.bf16.msra.mxu1 %v13335_v63 }
 0x115   :  { %3614 = vmatprep.subr.bf16.mxu1 %v13074_v5  ;;  %v3279_v59 = vpop.f32.mrf.mxu0  ;;  %3524 = vmatmul.mubr.bf16.vlgmr.msra.gmra.mxu0 %v15905_v60 }
 0x116   :  { %v3280_v62 = vadd.f32 %v3279_v59, %v648_v48  ;;  %3574 = vmatpush1.bf16.msra.mxu0 %v12945_v49  ;;  %3605 = vmatprep.mubr.bf16.mxu0 %v15560_v11 }
 0x117   :  { %v3320_v0 = vpop.f32.mrf.mxu1  ;;  %3565 = vmatmul.mubr.bf16.vlgmr.msra.gmra.mxu1 %v15909_v61  ;;  %v3281_v2 = vpop.f32.mrf.mxu0  ;;  %3575 = vmatprep.subr.bf16.mxu0 %v12938_v51 }
 0x118   :  { %3615 = vmatpush1.bf16.msra.mxu1 %v13073_v50  ;;  %v16341_v7 = vadd.f32 %v3320_v0, %v3280_v62  ;;  %v3282_v8 = vadd.f32 %v3281_v2, %v652_v56  ;;  %3646 = vmatprep.mubr.bf16.mxu1 %v15571_v16 }
 0x119   :  { %v3322_v9 = vpop.f32.mrf.mxu1  ;;  %3616 = vmatprep.subr.bf16.mxu1 %v13066_v57  ;;  %v3283_v13 = vpop.f32.mrf.mxu0 }
 0x11a   :  { %v16348_v14 = vadd.f32 %v3322_v9, %v3282_v8  ;;  %3576 = vmatpush1.bf16.msra.mxu0 %v12937_v1 }
 0x11b   :  { %v3324_v15 = vpop.f32.mrf.mxu1  ;;  %v3284_v18 = vpop.f32.mrf.mxu0  ;;  %3577 = vmatprep.subr.bf16.mxu0 %v12930_v22 }
 0x11c   :  { %3617 = vmatpush1.bf16.msra.mxu1 %v13065_v3 }
 0x11d   :  { %v3325_v23 = vpop.f32.mrf.mxu1  ;;  %3618 = vmatprep.subr.bf16.mxu1 %v13058_v10 }
 0x11e   :  { %31 = vsyncpa [#allocation5], 0  ;;  %3578 = vmatpush1.bf16.msra.mxu0 %v12929_v17  ;;  %v12921_v29 = vcombine.low %v165_v25, %v169_v4  ;;  %v13049_v30 = vcombine.low %v293_v6, %v297_v12  ;;  %v12914_v31 = vcombine.high %v157_v21, %v161_v26  ;;  %v13042_v32 = vcombine.high %v285_v27, %v289_v28  ;;  %v149_v34 = vld [vmem:[%s20964_s27 + $0x90] sm:$0xff]  ;;  %s20967_s8 = sld [smem:[#allocation13_spill]] }
 0x11f   :  { %3579 = vmatprep.subr.bf16.mxu0 %v12922_v20  ;;  %v153_v36 = vld [vmem:[%s20964_s27 + $0xb0] sm:$0xff]  ;;  %v12913_v40 = vcombine.low %v157_v21, %v161_v26  ;;  %v13041_v41 = vcombine.low %v285_v27, %v289_v28  ;;  %vm5467_vm0 = vcmask 1043456   ;;  %vm5463_vm1 = vcmask 982016   ;;  %s20968_s2 = sld [smem:[#allocation14_spill]] }
 0x120   :  { %3619 = vmatpush1.bf16.msra.mxu1 %v13057_v19  ;;  %v277_v63 = vld [vmem:[%s20964_s27 + $0x490] sm:$0xff]  ;;  %v12906_v42 = vcombine.high %v149_v34, %v153_v36  ;;  %v12905_v51 = vcombine.low %v149_v34, %v153_v36  ;;  %s20969_s7 = sld [smem:[#allocation15_spill]]  ;;  %vm6194_vm2 = vcmask 850944   ;;  %vm6401_vm3 = vcmask 654336  }
 0x121   :  { %3620 = vmatprep.subr.bf16.mxu1 %v13050_v24  ;;  %v281_v39 = vld [vmem:[%s20964_s27 + $0x4b0] sm:$0xff]  ;;  %s20970_s5 = sld [smem:[#allocation17_spill]]  ;;  %vm15313_vm4 = vmmov 0   ;;  %vm6470_vm5 = vcmask 261120   ;;  %vm6577_vm6 = vcmask 254976   ;;  %vm12069_vm7 = vcmask 1041408  }
 0x122   :  { %3580 = vmatpush1.bf16.msra.mxu0 %v12921_v29  ;;  %v13034_v5 = vcombine.high %v277_v63, %v281_v39  ;;  %v141_v47 = vld [vmem:[%s20964_s27 + $0x50] sm:$0xff]  ;;  %v13033_v52 = vcombine.low %v277_v63, %v281_v39  ;;  %s20971_s26 = sld [smem:[#allocation16_spill]]  ;;  %vm12065_vm8 = vcmask 949248  }
 0x123   :  { %3581 = vmatprep.subr.bf16.mxu0 %v12914_v31  ;;  %v145_v48 = vld [vmem:[%s20964_s27 + $0x70] sm:$0xff] }
 0x124   :  { %3621 = vmatpush1.bf16.msra.mxu1 %v13049_v30  ;;  %v269_v49 = vld [vmem:[%s20964_s27 + $0x450] sm:$0xff]  ;;  %v12898_v54 = vcombine.high %v141_v47, %v145_v48  ;;  %v12897_v62 = vcombine.low %v141_v47, %v145_v48 }
 0x125   :  { %3622 = vmatprep.subr.bf16.mxu1 %v13042_v32  ;;  %v273_v50 = vld [vmem:[%s20964_s27 + $0x470] sm:$0xff] }
 0x126   :  { %3582 = vmatpush1.bf16.msra.mxu0 %v12913_v40  ;;  %v13026_v55 = vcombine.high %v269_v49, %v273_v50  ;;  %v133_v56 = vld [vmem:[%s20964_s27 + $0x10] sm:$0xff]  ;;  %v13025_v0 = vcombine.low %v269_v49, %v273_v50 }
 0x127   :  { %3583 = vmatprep.subr.bf16.mxu0 %v12906_v42  ;;  %v137_v57 = vld [vmem:[%s20964_s27 + $0x30] sm:$0xff] }
 0x128   :  { %3623 = vmatpush1.bf16.msra.mxu1 %v13041_v41  ;;  %v261_v58 = vld [vmem:[%s20964_s27 + $0x410] sm:$0xff]  ;;  %v12890_v1 = vcombine.high %v133_v56, %v137_v57  ;;  %v12889_v6 = vcombine.low %v133_v56, %v137_v57 }
 0x129   :  { %3624 = vmatprep.subr.bf16.mxu1 %v13034_v5  ;;  %v265_v59 = vld [vmem:[%s20964_s27 + $0x430] sm:$0xff] }
 0x12a   :  { %3584 = vmatpush1.bf16.msra.mxu0 %v12905_v51  ;;  %v13018_v2 = vcombine.high %v261_v58, %v265_v59  ;;  %v253_v3 = vld [vmem:[%s20964_s27 + $0x3d0] sm:$0xff]  ;;  %v13017_v8 = vcombine.low %v261_v58, %v265_v59 }
 0x12b   :  { %3585 = vmatprep.subr.bf16.mxu0 %v12898_v54  ;;  %v257_v22 = vld [vmem:[%s20964_s27 + $0x3f0] sm:$0xff] }
 0x12c   :  { %3625 = vmatpush1.bf16.msra.mxu1 %v13033_v52  ;;  %v381_v25 = vld [vmem:[%s20964_s27 + $0x7d0] sm:$0xff]  ;;  %v13010_v9 = vcombine.high %v253_v3, %v257_v22  ;;  %v13009_v18 = vcombine.low %v253_v3, %v257_v22 }
 0x12d   :  { %3626 = vmatprep.subr.bf16.mxu1 %v13026_v55  ;;  %v385_v4 = vld [vmem:[%s20964_s27 + $0x7f0] sm:$0xff] }
 0x12e   :  { %3586 = vmatpush1.bf16.msra.mxu0 %v12897_v62  ;;  %v13138_v10 = vcombine.high %v381_v25, %v385_v4  ;;  %v245_v12 = vld [vmem:[%s20964_s27 + $0x390] sm:$0xff]  ;;  %v13137_v19 = vcombine.low %v381_v25, %v385_v4 }
 0x12f   :  { %3587 = vmatprep.subr.bf16.mxu0 %v12890_v1  ;;  %v249_v13 = vld [vmem:[%s20964_s27 + $0x3b0] sm:$0xff] }
 0x130   :  { %3627 = vmatpush1.bf16.msra.mxu1 %v13025_v0  ;;  %v373_v15 = vld [vmem:[%s20964_s27 + $0x790] sm:$0xff]  ;;  %v13002_v20 = vcombine.high %v245_v12, %v249_v13  ;;  %v13001_v28 = vcombine.low %v245_v12, %v249_v13 }
 0x131   :  { %3628 = vmatprep.subr.bf16.mxu1 %v13018_v2  ;;  %v377_v17 = vld [vmem:[%s20964_s27 + $0x7b0] sm:$0xff] }
 0x132   :  { %3588 = vmatpush1.bf16.msra.mxu0 %v12889_v6  ;;  %v13130_v21 = vcombine.high %v373_v15, %v377_v17  ;;  %v237_v23 = vld [vmem:[%s20964_s27 + $0x350] sm:$0xff]  ;;  %v13129_v29 = vcombine.low %v373_v15, %v377_v17 }
 0x133   :  { %3589 = vmatprep.subr.bf16.mxu0 %v13010_v9  ;;  %v241_v24 = vld [vmem:[%s20964_s27 + $0x370] sm:$0xff] }
 0x134   :  { %3629 = vmatpush1.bf16.msra.mxu1 %v13017_v8  ;;  %v365_v26 = vld [vmem:[%s20964_s27 + $0x750] sm:$0xff]  ;;  %v12994_v30 = vcombine.high %v237_v23, %v241_v24  ;;  %v12993_v39 = vcombine.low %v237_v23, %v241_v24 }
 0x135   :  { %3630 = vmatprep.subr.bf16.mxu1 %v13138_v10  ;;  %v369_v27 = vld [vmem:[%s20964_s27 + $0x770] sm:$0xff] }
 0x136   :  { %3590 = vmatpush2.bf16.msra.mxu0 %v13009_v18  ;;  %v13122_v31 = vcombine.high %v365_v26, %v369_v27  ;;  %v229_v32 = vld [vmem:[%s20964_s27 + $0x310] sm:$0xff]  ;;  %v13121_v40 = vcombine.low %v365_v26, %v369_v27 }
 0x137   :  { %3591 = vmatprep.subr.bf16.mxu0 %v13002_v20  ;;  %v233_v34 = vld [vmem:[%s20964_s27 + $0x330] sm:$0xff] }
 0x138   :  { %3631 = vmatpush2.bf16.msra.mxu1 %v13137_v19  ;;  %v357_v36 = vld [vmem:[%s20964_s27 + $0x710] sm:$0xff]  ;;  %v12986_v41 = vcombine.high %v229_v32, %v233_v34  ;;  %v12985_v50 = vcombine.low %v229_v32, %v233_v34 }
 0x139   :  { %3632 = vmatprep.subr.bf16.mxu1 %v13130_v21  ;;  %v361_v63 = vld [vmem:[%s20964_s27 + $0x730] sm:$0xff] }
 0x13a   :  { %3592 = vmatpush2.bf16.msra.mxu0 %v13001_v28  ;;  %v13114_v42 = vcombine.high %v357_v36, %v361_v63  ;;  %v221_v5 = vld [vmem:[%s20964_s27 + $0x2d0] sm:$0xff]  ;;  %v13113_v51 = vcombine.low %v357_v36, %v361_v63 }
 0x13b   :  { %3593 = vmatprep.subr.bf16.mxu0 %v12994_v30  ;;  %v225_v47 = vld [vmem:[%s20964_s27 + $0x2f0] sm:$0xff] }
 0x13c   :  { %3633 = vmatpush2.bf16.msra.mxu1 %v13129_v29  ;;  %v349_v48 = vld [vmem:[%s20964_s27 + $0x6d0] sm:$0xff]  ;;  %v12978_v52 = vcombine.high %v221_v5, %v225_v47  ;;  %v12977_v59 = vcombine.low %v221_v5, %v225_v47 }
 0x13d   :  { %3634 = vmatprep.subr.bf16.mxu1 %v13122_v31  ;;  %v353_v49 = vld [vmem:[%s20964_s27 + $0x6f0] sm:$0xff] }
 0x13e   :  { %3594 = vmatpush2.bf16.msra.mxu0 %v12993_v39  ;;  %v13106_v54 = vcombine.high %v349_v48, %v353_v49  ;;  %v213_v55 = vld [vmem:[%s20964_s27 + $0x290] sm:$0xff]  ;;  %v13105_v62 = vcombine.low %v349_v48, %v353_v49 }
 0x13f   :  { %3595 = vmatprep.subr.bf16.mxu0 %v12986_v41  ;;  %v217_v56 = vld [vmem:[%s20964_s27 + $0x2b0] sm:$0xff] }
 0x140   :  { %3635 = vmatpush2.bf16.msra.mxu1 %v13121_v40  ;;  %v341_v57 = vld [vmem:[%s20964_s27 + $0x690] sm:$0xff]  ;;  %v12970_v0 = vcombine.high %v213_v55, %v217_v56  ;;  %v12969_v4 = vcombine.low %v213_v55, %v217_v56 }
 0x141   :  { %3636 = vmatprep.subr.bf16.mxu1 %v13114_v42  ;;  %v345_v58 = vld [vmem:[%s20964_s27 + $0x6b0] sm:$0xff] }
 0x142   :  { %3596 = vmatpush2.bf16.msra.mxu0 %v12985_v50  ;;  %v13098_v1 = vcombine.high %v341_v57, %v345_v58  ;;  %v205_v2 = vld [vmem:[%s20964_s27 + $0x250] sm:$0xff]  ;;  %v13097_v6 = vcombine.low %v341_v57, %v345_v58 }
 0x143   :  { %3597 = vmatprep.subr.bf16.mxu0 %v12978_v52  ;;  %v209_v3 = vld [vmem:[%s20964_s27 + $0x270] sm:$0xff] }
 0x144   :  { %3637 = vmatpush2.bf16.msra.mxu1 %v13113_v51  ;;  %v333_v22 = vld [vmem:[%s20964_s27 + $0x650] sm:$0xff]  ;;  %v12962_v8 = vcombine.high %v205_v2, %v209_v3  ;;  %v12961_v17 = vcombine.low %v205_v2, %v209_v3 }
 0x145   :  { %3638 = vmatprep.subr.bf16.mxu1 %v13106_v54  ;;  %v337_v25 = vld [vmem:[%s20964_s27 + $0x670] sm:$0xff] }
 0x146   :  { %3598 = vmatpush2.bf16.msra.mxu0 %v12977_v59  ;;  %v13090_v9 = vcombine.high %v333_v22, %v337_v25  ;;  %v197_v10 = vld [vmem:[%s20964_s27 + $0x210] sm:$0xff]  ;;  %v13089_v18 = vcombine.low %v333_v22, %v337_v25 }
 0x147   :  { %3599 = vmatprep.subr.bf16.mxu0 %v12970_v0  ;;  %v201_v12 = vld [vmem:[%s20964_s27 + $0x230] sm:$0xff] }
 0x148   :  { %3639 = vmatpush2.bf16.msra.mxu1 %v13105_v62  ;;  %v325_v13 = vld [vmem:[%s20964_s27 + $0x610] sm:$0xff]  ;;  %v12954_v19 = vcombine.high %v197_v10, %v201_v12  ;;  %v12953_v27 = vcombine.low %v197_v10, %v201_v12 }
 0x149   :  { %3640 = vmatprep.subr.bf16.mxu1 %v13098_v1  ;;  %v329_v15 = vld [vmem:[%s20964_s27 + $0x630] sm:$0xff] }
 0x14a   :  { %3600 = vmatpush2.bf16.msra.mxu0 %v12969_v4  ;;  %v13082_v20 = vcombine.high %v325_v13, %v329_v15  ;;  %v445_v21 = vld [vmem:[%s20964_s27 + $0x9d0] sm:$0xff]  ;;  %v13081_v28 = vcombine.low %v325_v13, %v329_v15 }
 0x14b   :  { %3601 = vmatprep.subr.bf16.mxu0 %v12962_v8  ;;  %v449_v23 = vld [vmem:[%s20964_s27 + $0x9f0] sm:$0xff] }
 0x14c   :  { %3641 = vmatpush2.bf16.msra.mxu1 %v13097_v6  ;;  %v573_v24 = vld [vmem:[%s20964_s27 + $0xdd0] sm:$0xff]  ;;  %v13202_v29 = vcombine.high %v445_v21, %v449_v23  ;;  %v13201_v63 = vcombine.low %v445_v21, %v449_v23 }
 0x14d   :  { %3642 = vmatprep.subr.bf16.mxu1 %v13090_v9  ;;  %v577_v26 = vld [vmem:[%s20964_s27 + $0xdf0] sm:$0xff] }
 0x14e   :  { %3602 = vmatpush2.bf16.msra.mxu0 %v12961_v17  ;;  %v13330_v30 = vcombine.high %v573_v24, %v577_v26  ;;  %v437_v31 = vld [vmem:[%s20964_s27 + $0x990] sm:$0xff]  ;;  %v13329_v39 = vcombine.low %v573_v24, %v577_v26 }
 0x14f   :  { %3603 = vmatprep.subr.bf16.mxu0 %v12954_v19  ;;  %v441_v32 = vld [vmem:[%s20964_s27 + $0x9b0] sm:$0xff] }
 0x150   :  { %3643 = vmatpush2.bf16.msra.mxu1 %v13089_v18  ;;  %v565_v34 = vld [vmem:[%s20964_s27 + $0xd90] sm:$0xff]  ;;  %v13194_v40 = vcombine.high %v437_v31, %v441_v32  ;;  %v13193_v52 = vcombine.low %v437_v31, %v441_v32 }
 0x151   :  { %3644 = vmatprep.subr.bf16.mxu1 %v13082_v20  ;;  %v569_v36 = vld [vmem:[%s20964_s27 + $0xdb0] sm:$0xff] }
 0x152   :  { %3604 = vmatpush2.bf16.msra.mxu0 %v12953_v27  ;;  %v13322_v41 = vcombine.high %v565_v34, %v569_v36  ;;  %v429_v42 = vld [vmem:[%s20964_s27 + $0x950] sm:$0xff]  ;;  %v13321_v55 = vcombine.low %v565_v34, %v569_v36 }
 0x153   :  { %3655 = vmatprep.subr.bf16.mxu0 %v13202_v29  ;;  %v433_v5 = vld [vmem:[%s20964_s27 + $0x970] sm:$0xff] }
 0x154   :  { %3645 = vmatpush2.bf16.msra.mxu1 %v13081_v28  ;;  %v557_v48 = vld [vmem:[%s20964_s27 + $0xd50] sm:$0xff]  ;;  %v13186_v56 = vcombine.high %v429_v42, %v433_v5  ;;  %v13185_v25 = vcombine.low %v429_v42, %v433_v5 }
 0x155   :  { %3696 = vmatprep.subr.bf16.mxu1 %v13330_v30  ;;  %v3361_v47 = vpop.f32.mrf.mxu0  ;;  %3606 = vmatmul.mubr.bf16.vlgmr.msra.gmra.mxu0 %v15689_v33  ;;  %v561_v49 = vld [vmem:[%s20964_s27 + $0xd70] sm:$0xff] }
 0x156   :  { %v3362_v50 = vadd.f32 %v3361_v47, %v16341_v7  ;;  %3656 = vmatpush1.bf16.msra.mxu0 %v13201_v63  ;;  %v13314_v62 = vcombine.high %v557_v48, %v561_v49  ;;  %v421_v7 = vld [vmem:[%s20964_s27 + $0x910] sm:$0xff]  ;;  %3687 = vmatprep.mubr.bf16.mxu0 %v15715_v45  ;;  %v13313_v6 = vcombine.low %v557_v48, %v561_v49 }
 0x157   :  { %v3402_v51 = vpop.f32.mrf.mxu1  ;;  %3647 = vmatmul.mubr.bf16.vlgmr.msra.gmra.mxu1 %v15701_v37  ;;  %v3363_v54 = vpop.f32.mrf.mxu0  ;;  %3657 = vmatprep.subr.bf16.mxu0 %v13194_v40  ;;  %v425_v0 = vld [vmem:[%s20964_s27 + $0x930] sm:$0xff] }
 0x158   :  { %3697 = vmatpush1.bf16.msra.mxu1 %v13329_v39  ;;  %v16533_v57 = vadd.f32 %v3402_v51, %v3362_v50  ;;  %v3364_v58 = vadd.f32 %v3363_v54, %v16348_v14  ;;  %v549_v2 = vld [vmem:[%s20964_s27 + $0xd10] sm:$0xff]  ;;  %3728 = vmatprep.mubr.bf16.mxu1 %v15718_v46  ;;  %v13178_v8 = vcombine.high %v421_v7, %v425_v0 }
 0x159   :  { %v3404_v59 = vpop.f32.mrf.mxu1  ;;  %3698 = vmatprep.subr.bf16.mxu1 %v13322_v41  ;;  %v3365_v1 = vpop.f32.mrf.mxu0  ;;  %v553_v14 = vld [vmem:[%s20964_s27 + $0xd30] sm:$0xff]  ;;  %v13177_v18 = vcombine.low %v421_v7, %v425_v0 }
 0x15a   :  { %v16550_v3 = vadd.f32 %v3404_v59, %v3364_v58  ;;  %3658 = vmatpush1.bf16.msra.mxu0 %v13193_v52  ;;  %v13306_v10 = vcombine.high %v549_v2, %v553_v14  ;;  %v413_v12 = vld [vmem:[%s20964_s27 + $0x8d0] sm:$0xff]  ;;  %v13305_v19 = vcombine.low %v549_v2, %v553_v14 }
 0x15b   :  { %v3406_v22 = vpop.f32.mrf.mxu1  ;;  %v3366_v4 = vpop.f32.mrf.mxu0  ;;  %3659 = vmatprep.subr.bf16.mxu0 %v13186_v56  ;;  %v417_v13 = vld [vmem:[%s20964_s27 + $0x8f0] sm:$0xff] }
 0x15c   :  { %3699 = vmatpush1.bf16.msra.mxu1 %v13321_v55  ;;  %v541_v15 = vld [vmem:[%s20964_s27 + $0xcd0] sm:$0xff]  ;;  %v13170_v20 = vcombine.high %v413_v12, %v417_v13  ;;  %v13169_v28 = vcombine.low %v413_v12, %v417_v13 }
 0x15d   :  { %v3407_v9 = vpop.f32.mrf.mxu1  ;;  %3700 = vmatprep.subr.bf16.mxu1 %v13314_v62  ;;  %v545_v17 = vld [vmem:[%s20964_s27 + $0xcf0] sm:$0xff] }
 0x15e   :  { %3660 = vmatpush1.bf16.msra.mxu0 %v13185_v25  ;;  %v13298_v21 = vcombine.high %v541_v15, %v545_v17  ;;  %v405_v23 = vld [vmem:[%s20964_s27 + $0x890] sm:$0xff]  ;;  %v13297_v29 = vcombine.low %v541_v15, %v545_v17 }
 0x15f   :  { %3661 = vmatprep.subr.bf16.mxu0 %v13178_v8  ;;  %v409_v24 = vld [vmem:[%s20964_s27 + $0x8b0] sm:$0xff] }
 0x160   :  { %3701 = vmatpush1.bf16.msra.mxu1 %v13313_v6  ;;  %v533_v26 = vld [vmem:[%s20964_s27 + $0xc90] sm:$0xff]  ;;  %v13162_v30 = vcombine.high %v405_v23, %v409_v24  ;;  %v13161_v39 = vcombine.low %v405_v23, %v409_v24 }
 0x161   :  { %3702 = vmatprep.subr.bf16.mxu1 %v13306_v10  ;;  %v537_v27 = vld [vmem:[%s20964_s27 + $0xcb0] sm:$0xff] }
 0x162   :  { %3662 = vmatpush1.bf16.msra.mxu0 %v13177_v18  ;;  %v13290_v31 = vcombine.high %v533_v26, %v537_v27  ;;  %v397_v32 = vld [vmem:[%s20964_s27 + $0x850] sm:$0xff]  ;;  %v13289_v40 = vcombine.low %v533_v26, %v537_v27 }
 0x163   :  { %3663 = vmatprep.subr.bf16.mxu0 %v13170_v20  ;;  %v401_v34 = vld [vmem:[%s20964_s27 + $0x870] sm:$0xff] }
 0x164   :  { %3703 = vmatpush1.bf16.msra.mxu1 %v13305_v19  ;;  %v525_v36 = vld [vmem:[%s20964_s27 + $0xc50] sm:$0xff]  ;;  %v13154_v41 = vcombine.high %v397_v32, %v401_v34  ;;  %v13153_v50 = vcombine.low %v397_v32, %v401_v34 }
 0x165   :  { %3704 = vmatprep.subr.bf16.mxu1 %v13298_v21  ;;  %v529_v63 = vld [vmem:[%s20964_s27 + $0xc70] sm:$0xff] }
 0x166   :  { %3664 = vmatpush1.bf16.msra.mxu0 %v13169_v28  ;;  %v13282_v42 = vcombine.high %v525_v36, %v529_v63  ;;  %v389_v5 = vld [vmem:[%s20964_s27 + $0x810] sm:$0xff]  ;;  %v13281_v51 = vcombine.low %v525_v36, %v529_v63 }
 0x167   :  { %3665 = vmatprep.subr.bf16.mxu0 %v13162_v30  ;;  %v393_v47 = vld [vmem:[%s20964_s27 + $0x830] sm:$0xff] }
 0x168   :  { %3705 = vmatpush1.bf16.msra.mxu1 %v13297_v29  ;;  %v517_v48 = vld [vmem:[%s20964_s27 + $0xc10] sm:$0xff]  ;;  %v13146_v52 = vcombine.high %v389_v5, %v393_v47  ;;  %v13145_v62 = vcombine.low %v389_v5, %v393_v47 }
 0x169   :  { %3706 = vmatprep.subr.bf16.mxu1 %v13290_v31  ;;  %v521_v49 = vld [vmem:[%s20964_s27 + $0xc30] sm:$0xff] }
 0x16a   :  { %3666 = vmatpush1.bf16.msra.mxu0 %v13161_v39  ;;  %v13274_v54 = vcombine.high %v517_v48, %v521_v49  ;;  %v509_v55 = vld [vmem:[%s20964_s27 + $0xbd0] sm:$0xff]  ;;  %v13273_v7 = vcombine.low %v517_v48, %v521_v49 }
 0x16b   :  { %3667 = vmatprep.subr.bf16.mxu0 %v13154_v41  ;;  %v513_v56 = vld [vmem:[%s20964_s27 + $0xbf0] sm:$0xff] }
 0x16c   :  { %3707 = vmatpush1.bf16.msra.mxu1 %v13289_v40  ;;  %v637_v58 = vld [vmem:[%s20964_s27 + $0xfd0] sm:$0xff]  ;;  %v13266_v0 = vcombine.high %v509_v55, %v513_v56  ;;  %v13265_v4 = vcombine.low %v509_v55, %v513_v56 }
 0x16d   :  { %3708 = vmatprep.subr.bf16.mxu1 %v13282_v42  ;;  %v641_v59 = vld [vmem:[%s20964_s27 + $0xff0] sm:$0xff] }
 0x16e   :  { %3668 = vmatpush1.bf16.msra.mxu0 %v13153_v50  ;;  %v13394_v1 = vcombine.high %v637_v58, %v641_v59  ;;  %v501_v2 = vld [vmem:[%s20964_s27 + $0xb90] sm:$0xff]  ;;  %v13393_v6 = vcombine.low %v637_v58, %v641_v59 }
 0x16f   :  { %3669 = vmatprep.subr.bf16.mxu0 %v13146_v52  ;;  %v505_v14 = vld [vmem:[%s20964_s27 + $0xbb0] sm:$0xff] }
 0x170   :  { %3709 = vmatpush1.bf16.msra.mxu1 %v13281_v51  ;;  %v629_v22 = vld [vmem:[%s20964_s27 + $0xf90] sm:$0xff]  ;;  %v13258_v8 = vcombine.high %v501_v2, %v505_v14  ;;  %v13257_v17 = vcombine.low %v501_v2, %v505_v14 }
 0x171   :  { %3710 = vmatprep.subr.bf16.mxu1 %v13274_v54  ;;  %v633_v25 = vld [vmem:[%s20964_s27 + $0xfb0] sm:$0xff] }
 0x172   :  { %3670 = vmatpush1.bf16.msra.mxu0 %v13145_v62  ;;  %v13386_v9 = vcombine.high %v629_v22, %v633_v25  ;;  %v493_v10 = vld [vmem:[%s20964_s27 + $0xb50] sm:$0xff]  ;;  %v13385_v18 = vcombine.low %v629_v22, %v633_v25 }
 0x173   :  { %3671 = vmatprep.subr.bf16.mxu0 %v13266_v0  ;;  %v497_v12 = vld [vmem:[%s20964_s27 + $0xb70] sm:$0xff] }
 0x174   :  { %3711 = vmatpush1.bf16.msra.mxu1 %v13273_v7  ;;  %v621_v13 = vld [vmem:[%s20964_s27 + $0xf50] sm:$0xff]  ;;  %v13250_v19 = vcombine.high %v493_v10, %v497_v12  ;;  %v13249_v27 = vcombine.low %v493_v10, %v497_v12  ;;  %v194_v10 = vld [vmem:[%s20964_s27 + $0x1f8] sm:$0xff] }
 0x175   :  { %3712 = vmatprep.subr.bf16.mxu1 %v13394_v1  ;;  %v625_v15 = vld [vmem:[%s20964_s27 + $0xf70] sm:$0xff]  ;;  %v318_v12 = vld [vmem:[%s20964_s27 + $0x5d8] sm:$0xff] }
 0x176   :  { %3672 = vmatpush2.bf16.msra.mxu0 %v13265_v4  ;;  %v13378_v20 = vcombine.high %v621_v13, %v625_v15  ;;  %v485_v21 = vld [vmem:[%s20964_s27 + $0xb10] sm:$0xff]  ;;  %v13377_v28 = vcombine.low %v621_v13, %v625_v15  ;;  %v322_v13 = vld [vmem:[%s20964_s27 + $0x5f8] sm:$0xff] }
 0x177   :  { %3673 = vmatprep.subr.bf16.mxu0 %v13258_v8  ;;  %v489_v23 = vld [vmem:[%s20964_s27 + $0xb30] sm:$0xff] }
 0x178   :  { %3713 = vmatpush2.bf16.msra.mxu1 %v13393_v6  ;;  %v613_v24 = vld [vmem:[%s20964_s27 + $0xf10] sm:$0xff]  ;;  %v13242_v29 = vcombine.high %v485_v21, %v489_v23  ;;  %v13241_v63 = vcombine.low %v485_v21, %v489_v23  ;;  %v16712_v21 = vsub.s32 3, %v15508_v44  ;;  %v182_v23 = vld [vmem:[%s20964_s27 + $0x198] sm:$0xff] }
 0x179   :  { %3714 = vmatprep.subr.bf16.mxu1 %v13386_v9  ;;  %v617_v26 = vld [vmem:[%s20964_s27 + $0xf30] sm:$0xff]  ;;  %v190_v9 = vld [vmem:[%s20964_s27 + $0x1d8] sm:$0xff] }
 0x17a   :  { %3674 = vmatpush2.bf16.msra.mxu0 %v13257_v17  ;;  %v13370_v30 = vcombine.high %v613_v24, %v617_v26  ;;  %v477_v31 = vld [vmem:[%s20964_s27 + $0xad0] sm:$0xff]  ;;  %v13369_v39 = vcombine.low %v613_v24, %v617_v26  ;;  %v16709_v17 = vsub.s32 2, %v15508_v44  ;;  %v186_v24 = vld [vmem:[%s20964_s27 + $0x1b8] sm:$0xff] }
 0x17b   :  { %3675 = vmatprep.subr.bf16.mxu0 %v13250_v19  ;;  %v481_v32 = vld [vmem:[%s20964_s27 + $0xaf0] sm:$0xff]  ;;  %v12948_v19 = vcombine.high %v190_v9, %v194_v10  ;;  %v310_v26 = vld [vmem:[%s20964_s27 + $0x598] sm:$0xff] }
 0x17c   :  { %3715 = vmatpush2.bf16.msra.mxu1 %v13385_v18  ;;  %v605_v34 = vld [vmem:[%s20964_s27 + $0xed0] sm:$0xff]  ;;  %v13234_v40 = vcombine.high %v477_v31, %v481_v32  ;;  %v13233_v49 = vcombine.low %v477_v31, %v481_v32  ;;  %v12940_v31 = vcombine.high %v182_v23, %v186_v24  ;;  %v660_v32 = vrot.slane %v16294_v35, %v16712_v21 }
 0x17d   :  { %3716 = vmatprep.subr.bf16.mxu1 %v13378_v20  ;;  %v609_v36 = vld [vmem:[%s20964_s27 + $0xef0] sm:$0xff]  ;;  %v13076_v20 = vcombine.high %v318_v12, %v322_v13 }
 0x17e   :  { %3676 = vmatpush2.bf16.msra.mxu0 %v13249_v27  ;;  %v13362_v41 = vcombine.high %v605_v34, %v609_v36  ;;  %v469_v42 = vld [vmem:[%s20964_s27 + $0xa90] sm:$0xff]  ;;  %v13361_v50 = vcombine.low %v605_v34, %v609_v36  ;;  %v314_v27 = vld [vmem:[%s20964_s27 + $0x5b8] sm:$0xff] }
 0x17f   :  { %3677 = vmatprep.subr.bf16.mxu0 %v13242_v29  ;;  %v473_v5 = vld [vmem:[%s20964_s27 + $0xab0] sm:$0xff]  ;;  %v12947_v29 = vcombine.low %v190_v9, %v194_v10  ;;  %v13068_v34 = vcombine.high %v310_v26, %v314_v27  ;;  %v174_v36 = vld [vmem:[%s20964_s27 + $0x158] sm:$0xff] }
 0x180   :  { %3717 = vmatpush2.bf16.msra.mxu1 %v13377_v28  ;;  %v597_v47 = vld [vmem:[%s20964_s27 + $0xe90] sm:$0xff]  ;;  %v13226_v51 = vcombine.high %v469_v42, %v473_v5  ;;  %v13225_v59 = vcombine.low %v469_v42, %v473_v5  ;;  %v656_v28 = vrot.slane %v16294_v35, %v16709_v17  ;;  %v306_v35 = vld [vmem:[%s20964_s27 + $0x578] sm:$0xff]  ;;  %v12939_v5 = vcombine.low %v182_v23, %v186_v24 }
 0x181   :  { %3718 = vmatprep.subr.bf16.mxu1 %v13370_v30  ;;  %v601_v48 = vld [vmem:[%s20964_s27 + $0xeb0] sm:$0xff]  ;;  %v13075_v30 = vcombine.low %v318_v12, %v322_v13 }
 0x182   :  { %3678 = vmatpush2.bf16.msra.mxu0 %v13241_v63  ;;  %v13354_v52 = vcombine.high %v597_v47, %v601_v48  ;;  %v461_v54 = vld [vmem:[%s20964_s27 + $0xa50] sm:$0xff]  ;;  %v13353_v62 = vcombine.low %v597_v47, %v601_v48  ;;  %v178_v63 = vld [vmem:[%s20964_s27 + $0x178] sm:$0xff]  ;;  %v13067_v48 = vcombine.low %v310_v26, %v314_v27 }
 0x183   :  { %3679 = vmatprep.subr.bf16.mxu0 %v13234_v40  ;;  %v465_v55 = vld [vmem:[%s20964_s27 + $0xa70] sm:$0xff]  ;;  %v302_v40 = vld [vmem:[%s20964_s27 + $0x558] sm:$0xff] }
 0x184   :  { %3719 = vmatpush2.bf16.msra.mxu1 %v13369_v39  ;;  %v589_v56 = vld [vmem:[%s20964_s27 + $0xe50] sm:$0xff]  ;;  %v13218_v7 = vcombine.high %v461_v54, %v465_v55  ;;  %v13217_v25 = vcombine.low %v461_v54, %v465_v55  ;;  %v13060_v54 = vcombine.high %v302_v40, %v306_v35  ;;  %v166_v55 = vld [vmem:[%s20964_s27 + $0x118] sm:$0xff] }
 0x185   :  { %3720 = vmatprep.subr.bf16.mxu1 %v13362_v41  ;;  %v593_v58 = vld [vmem:[%s20964_s27 + $0xe70] sm:$0xff] }
 0x186   :  { %3680 = vmatpush2.bf16.msra.mxu0 %v13233_v49  ;;  %v13346_v0 = vcombine.high %v589_v56, %v593_v58  ;;  %v453_v1 = vld [vmem:[%s20964_s27 + $0xa10] sm:$0xff]  ;;  %v13345_v4 = vcombine.low %v589_v56, %v593_v58  ;;  %v12932_v49 = vcombine.high %v174_v36, %v178_v63  ;;  %v170_v56 = vld [vmem:[%s20964_s27 + $0x138] sm:$0xff] }
 0x187   :  { %3681 = vmatprep.subr.bf16.mxu0 %v13226_v51  ;;  %v457_v2 = vld [vmem:[%s20964_s27 + $0xa30] sm:$0xff]  ;;  %v12923_v9 = vcombine.low %v166_v55, %v170_v56 }
 0x188   :  { %3721 = vmatpush2.bf16.msra.mxu1 %v13361_v50  ;;  %v581_v14 = vld [vmem:[%s20964_s27 + $0xe10] sm:$0xff]  ;;  %v13210_v6 = vcombine.high %v453_v1, %v457_v2  ;;  %v13209_v15 = vcombine.low %v453_v1, %v457_v2  ;;  %v12931_v1 = vcombine.low %v174_v36, %v178_v63 }
 0x189   :  { %3722 = vmatprep.subr.bf16.mxu1 %v13354_v52  ;;  %v585_v22 = vld [vmem:[%s20964_s27 + $0xe30] sm:$0xff] }
 0x18a   :  { %3682 = vmatpush2.bf16.msra.mxu0 %v13225_v59  ;;  %v13338_v8 = vcombine.high %v581_v14, %v585_v22  ;;  %v13337_v18 = vcombine.low %v581_v14, %v585_v22  ;;  %v294_v59 = vld [vmem:[%s20964_s27 + $0x518] sm:$0xff]  ;;  %v12924_v14 = vcombine.high %v166_v55, %v170_v56 }
 0x18b   :  { %3683 = vmatprep.subr.bf16.mxu0 %v13218_v7 }
 0x18c   :  { %3723 = vmatpush2.bf16.msra.mxu1 %v13353_v62  ;;  %v298_v62 = vld [vmem:[%s20964_s27 + $0x538] sm:$0xff] }
 0x18d   :  { %3724 = vmatprep.subr.bf16.mxu1 %v13346_v0  ;;  %v13051_v10 = vcombine.low %v294_v59, %v298_v62 }
 0x18e   :  { %3684 = vmatpush2.bf16.msra.mxu0 %v13217_v25  ;;  %v13052_v25 = vcombine.high %v294_v59, %v298_v62  ;;  %v246_v62 = vld [vmem:[%s20964_s27 + $0x398] sm:$0xff] }
 0x18f   :  { %3685 = vmatprep.subr.bf16.mxu0 %v13210_v6  ;;  %v286_v6 = vld [vmem:[%s20964_s27 + $0x4d8] sm:$0xff] }
 0x190   :  { %3725 = vmatpush2.bf16.msra.mxu1 %v13345_v4  ;;  %v158_v4 = vld [vmem:[%s20964_s27 + $0xd8] sm:$0xff] }
 0x191   :  { %3726 = vmatprep.subr.bf16.mxu1 %v13338_v8  ;;  %v290_v8 = vld [vmem:[%s20964_s27 + $0x4f8] sm:$0xff] }
 0x192   :  { %3686 = vmatpush2.bf16.msra.mxu0 %v13209_v15  ;;  %v13044_v13 = vcombine.high %v286_v6, %v290_v8  ;;  %v150_v15 = vld [vmem:[%s20964_s27 + $0x98] sm:$0xff]  ;;  %v13043_v24 = vcombine.low %v286_v6, %v290_v8 }
 0x193   :  { %3737 = vmatprep.subr.bf16.mxu0 %v12948_v19  ;;  %v278_v19 = vld [vmem:[%s20964_s27 + $0x498] sm:$0xff] }
 0x194   :  { %3727 = vmatpush2.bf16.msra.mxu1 %v13337_v18  ;;  %v154_v18 = vld [vmem:[%s20964_s27 + $0xb8] sm:$0xff] }
 0x195   :  { %3778 = vmatprep.subr.bf16.mxu1 %v13076_v20  ;;  %v3443_v39 = vpop.f32.mrf.mxu0  ;;  %3688 = vmatmul.mubr.bf16.vlgmr.msra.gmra.mxu0 %v15905_v60  ;;  %v282_v20 = vld [vmem:[%s20964_s27 + $0x4b8] sm:$0xff]  ;;  %v12908_v26 = vcombine.high %v150_v15, %v154_v18 }
 0x196   :  { %v3444_v41 = vadd.f32 %v3443_v39, %v656_v28  ;;  %3738 = vmatpush1.bf16.msra.mxu0 %v12947_v29  ;;  %3769 = vmatprep.mubr.bf16.mxu0 %v15560_v11  ;;  %v13059_v11 = vcombine.low %v302_v40, %v306_v35  ;;  %v13036_v27 = vcombine.high %v278_v19, %v282_v20  ;;  %v142_v28 = vld [vmem:[%s20964_s27 + $0x58] sm:$0xff] }
 0x197   :  { %v3484_v42 = vpop.f32.mrf.mxu1  ;;  %3729 = vmatmul.mubr.bf16.vlgmr.msra.gmra.mxu1 %v15909_v61  ;;  %v3445_v47 = vpop.f32.mrf.mxu0  ;;  %3739 = vmatprep.subr.bf16.mxu0 %v12940_v31  ;;  %v146_v29 = vld [vmem:[%s20964_s27 + $0x78] sm:$0xff] }
 0x198   :  { %3779 = vmatpush1.bf16.msra.mxu1 %v13075_v30  ;;  %v16744_v50 = vadd.f32 %v3484_v42, %v3444_v41  ;;  %v3446_v51 = vadd.f32 %v3445_v47, %v660_v32  ;;  %3810 = vmatprep.mubr.bf16.mxu1 %v15571_v16  ;;  %v162_v16 = vld [vmem:[%s20964_s27 + $0xf8] sm:$0xff]  ;;  %v12907_v32 = vcombine.low %v150_v15, %v154_v18 }
 0x199   :  { %v3486_v52 = vpop.f32.mrf.mxu1  ;;  %3780 = vmatprep.subr.bf16.mxu1 %v13068_v34  ;;  %v3447_v58 = vpop.f32.mrf.mxu0  ;;  %v12916_v12 = vcombine.high %v158_v4, %v162_v16  ;;  %v12915_v23 = vcombine.low %v158_v4, %v162_v16  ;;  %v270_v30 = vld [vmem:[%s20964_s27 + $0x458] sm:$0xff]  ;;  %v13035_v34 = vcombine.low %v278_v19, %v282_v20  ;;  %v12900_v36 = vcombine.high %v142_v28, %v146_v29 }
 0x19a   :  { %v16760_v7 = vadd.f32 %v3486_v52, %v3446_v51  ;;  %3740 = vmatpush1.bf16.msra.mxu0 %v12939_v5  ;;  %v274_v31 = vld [vmem:[%s20964_s27 + $0x478] sm:$0xff]  ;;  %v12899_v42 = vcombine.low %v142_v28, %v146_v29 }
 0x19b   :  { %v3488_v0 = vpop.f32.mrf.mxu1  ;;  %v3448_v2 = vpop.f32.mrf.mxu0  ;;  %3741 = vmatprep.subr.bf16.mxu0 %v12932_v49  ;;  %v13028_v63 = vcombine.high %v270_v30, %v274_v31  ;;  %v134_v39 = vld [vmem:[%s20964_s27 + $0x18] sm:$0xff]  ;;  %v13027_v5 = vcombine.low %v270_v30, %v274_v31 }
 0x19c   :  { %3781 = vmatpush1.bf16.msra.mxu1 %v13067_v48  ;;  %v138_v40 = vld [vmem:[%s20964_s27 + $0x38] sm:$0xff] }
 0x19d   :  { %v3489_v22 = vpop.f32.mrf.mxu1  ;;  %3782 = vmatprep.subr.bf16.mxu1 %v13060_v54  ;;  %v262_v35 = vld [vmem:[%s20964_s27 + $0x418] sm:$0xff]  ;;  %v12892_v47 = vcombine.high %v134_v39, %v138_v40  ;;  %v12891_v55 = vcombine.low %v134_v39, %v138_v40 }
 0x19e   :  { %3742 = vmatpush1.bf16.msra.mxu0 %v12931_v1  ;;  %v266_v41 = vld [vmem:[%s20964_s27 + $0x438] sm:$0xff] }
 0x19f   :  { %3743 = vmatprep.subr.bf16.mxu0 %v12924_v14  ;;  %v13020_v48 = vcombine.high %v262_v35, %v266_v41  ;;  %v254_v49 = vld [vmem:[%s20964_s27 + $0x3d8] sm:$0xff]  ;;  %v13019_v56 = vcombine.low %v262_v35, %v266_v41 }
 0x1a0   :  { %3783 = vmatpush1.bf16.msra.mxu1 %v13059_v11  ;;  %v258_v51 = vld [vmem:[%s20964_s27 + $0x3f8] sm:$0xff] }
 0x1a1   :  { %3784 = vmatprep.subr.bf16.mxu1 %v13052_v25  ;;  %v382_v52 = vld [vmem:[%s20964_s27 + $0x7d8] sm:$0xff]  ;;  %v13012_v58 = vcombine.high %v254_v49, %v258_v51  ;;  %v13011_v11 = vcombine.low %v254_v49, %v258_v51 }
 0x1a2   :  { %3744 = vmatpush1.bf16.msra.mxu0 %v12923_v9  ;;  %v386_v54 = vld [vmem:[%s20964_s27 + $0x7f8] sm:$0xff] }
 0x1a3   :  { %3745 = vmatprep.subr.bf16.mxu0 %v12916_v12  ;;  %v13140_v59 = vcombine.high %v382_v52, %v386_v54  ;;  %v250_v0 = vld [vmem:[%s20964_s27 + $0x3b8] sm:$0xff]  ;;  %v13139_v14 = vcombine.low %v382_v52, %v386_v54 }
 0x1a4   :  { %3785 = vmatpush1.bf16.msra.mxu1 %v13051_v10  ;;  %v374_v1 = vld [vmem:[%s20964_s27 + $0x798] sm:$0xff]  ;;  %v13004_v22 = vcombine.high %v246_v62, %v250_v0  ;;  %v13003_v9 = vcombine.low %v246_v62, %v250_v0 }
 0x1a5   :  { %3786 = vmatprep.subr.bf16.mxu1 %v13044_v13  ;;  %v378_v2 = vld [vmem:[%s20964_s27 + $0x7b8] sm:$0xff] }
 0x1a6   :  { %3746 = vmatpush1.bf16.msra.mxu0 %v12915_v23  ;;  %v13132_v25 = vcombine.high %v374_v1, %v378_v2  ;;  %v238_v4 = vld [vmem:[%s20964_s27 + $0x358] sm:$0xff]  ;;  %v13131_v10 = vcombine.low %v374_v1, %v378_v2 }
 0x1a7   :  { %3747 = vmatprep.subr.bf16.mxu0 %v12908_v26  ;;  %v242_v16 = vld [vmem:[%s20964_s27 + $0x378] sm:$0xff] }
 0x1a8   :  { %3787 = vmatpush1.bf16.msra.mxu1 %v13043_v24  ;;  %v366_v6 = vld [vmem:[%s20964_s27 + $0x758] sm:$0xff]  ;;  %v12996_v12 = vcombine.high %v238_v4, %v242_v16  ;;  %v12995_v23 = vcombine.low %v238_v4, %v242_v16 }
 0x1a9   :  { %3788 = vmatprep.subr.bf16.mxu1 %v13036_v27  ;;  %v370_v8 = vld [vmem:[%s20964_s27 + $0x778] sm:$0xff] }
 0x1aa   :  { %3748 = vmatpush1.bf16.msra.mxu0 %v12907_v32  ;;  %v13124_v13 = vcombine.high %v366_v6, %v370_v8  ;;  %v230_v15 = vld [vmem:[%s20964_s27 + $0x318] sm:$0xff]  ;;  %v13123_v24 = vcombine.low %v366_v6, %v370_v8 }
 0x1ab   :  { %3749 = vmatprep.subr.bf16.mxu0 %v12900_v36  ;;  %v234_v18 = vld [vmem:[%s20964_s27 + $0x338] sm:$0xff] }
 0x1ac   :  { %3789 = vmatpush1.bf16.msra.mxu1 %v13035_v34  ;;  %v358_v19 = vld [vmem:[%s20964_s27 + $0x718] sm:$0xff]  ;;  %v12988_v26 = vcombine.high %v230_v15, %v234_v18  ;;  %v12987_v32 = vcombine.low %v230_v15, %v234_v18 }
 0x1ad   :  { %3790 = vmatprep.subr.bf16.mxu1 %v13028_v63  ;;  %v362_v20 = vld [vmem:[%s20964_s27 + $0x738] sm:$0xff] }
 0x1ae   :  { %3750 = vmatpush1.bf16.msra.mxu0 %v12899_v42  ;;  %v13116_v27 = vcombine.high %v358_v19, %v362_v20  ;;  %v222_v28 = vld [vmem:[%s20964_s27 + $0x2d8] sm:$0xff]  ;;  %v13115_v34 = vcombine.low %v358_v19, %v362_v20 }
 0x1af   :  { %3751 = vmatprep.subr.bf16.mxu0 %v12892_v47  ;;  %v226_v29 = vld [vmem:[%s20964_s27 + $0x2f8] sm:$0xff] }
 0x1b0   :  { %3791 = vmatpush1.bf16.msra.mxu1 %v13027_v5  ;;  %v350_v30 = vld [vmem:[%s20964_s27 + $0x6d8] sm:$0xff]  ;;  %v12980_v36 = vcombine.high %v222_v28, %v226_v29  ;;  %v12979_v42 = vcombine.low %v222_v28, %v226_v29 }
 0x1b1   :  { %3792 = vmatprep.subr.bf16.mxu1 %v13020_v48  ;;  %v354_v31 = vld [vmem:[%s20964_s27 + $0x6f8] sm:$0xff] }
 0x1b2   :  { %3752 = vmatpush1.bf16.msra.mxu0 %v12891_v55  ;;  %v13108_v63 = vcombine.high %v350_v30, %v354_v31  ;;  %v214_v39 = vld [vmem:[%s20964_s27 + $0x298] sm:$0xff]  ;;  %v13107_v5 = vcombine.low %v350_v30, %v354_v31 }
 0x1b3   :  { %3753 = vmatprep.subr.bf16.mxu0 %v13012_v58  ;;  %v218_v40 = vld [vmem:[%s20964_s27 + $0x2b8] sm:$0xff] }
 0x1b4   :  { %3793 = vmatpush1.bf16.msra.mxu1 %v13019_v56  ;;  %v342_v35 = vld [vmem:[%s20964_s27 + $0x698] sm:$0xff]  ;;  %v12972_v47 = vcombine.high %v214_v39, %v218_v40  ;;  %v12971_v55 = vcombine.low %v214_v39, %v218_v40 }
 0x1b5   :  { %3794 = vmatprep.subr.bf16.mxu1 %v13140_v59  ;;  %v346_v41 = vld [vmem:[%s20964_s27 + $0x6b8] sm:$0xff] }
 0x1b6   :  { %3754 = vmatpush2.bf16.msra.mxu0 %v13011_v11  ;;  %v13100_v48 = vcombine.high %v342_v35, %v346_v41  ;;  %v206_v49 = vld [vmem:[%s20964_s27 + $0x258] sm:$0xff]  ;;  %v13099_v56 = vcombine.low %v342_v35, %v346_v41 }
 0x1b7   :  { %3755 = vmatprep.subr.bf16.mxu0 %v13004_v22  ;;  %v210_v51 = vld [vmem:[%s20964_s27 + $0x278] sm:$0xff] }
 0x1b8   :  { %3795 = vmatpush2.bf16.msra.mxu1 %v13139_v14  ;;  %v334_v52 = vld [vmem:[%s20964_s27 + $0x658] sm:$0xff]  ;;  %v12964_v58 = vcombine.high %v206_v49, %v210_v51  ;;  %v12963_v11 = vcombine.low %v206_v49, %v210_v51 }
 0x1b9   :  { %3796 = vmatprep.subr.bf16.mxu1 %v13132_v25  ;;  %v338_v54 = vld [vmem:[%s20964_s27 + $0x678] sm:$0xff] }
 0x1ba   :  { %3756 = vmatpush2.bf16.msra.mxu0 %v13003_v9  ;;  %v13092_v59 = vcombine.high %v334_v52, %v338_v54  ;;  %v198_v62 = vld [vmem:[%s20964_s27 + $0x218] sm:$0xff]  ;;  %v13091_v14 = vcombine.low %v334_v52, %v338_v54 }
 0x1bb   :  { %3757 = vmatprep.subr.bf16.mxu0 %v12996_v12  ;;  %v202_v0 = vld [vmem:[%s20964_s27 + $0x238] sm:$0xff] }
 0x1bc   :  { %3797 = vmatpush2.bf16.msra.mxu1 %v13131_v10  ;;  %v326_v1 = vld [vmem:[%s20964_s27 + $0x618] sm:$0xff]  ;;  %v12956_v22 = vcombine.high %v198_v62, %v202_v0  ;;  %v12955_v9 = vcombine.low %v198_v62, %v202_v0 }
 0x1bd   :  { %3798 = vmatprep.subr.bf16.mxu1 %v13124_v13  ;;  %v330_v2 = vld [vmem:[%s20964_s27 + $0x638] sm:$0xff] }
 0x1be   :  { %3758 = vmatpush2.bf16.msra.mxu0 %v12995_v23  ;;  %v13084_v25 = vcombine.high %v326_v1, %v330_v2  ;;  %v446_v4 = vld [vmem:[%s20964_s27 + $0x9d8] sm:$0xff]  ;;  %v13083_v10 = vcombine.low %v326_v1, %v330_v2 }
 0x1bf   :  { %3759 = vmatprep.subr.bf16.mxu0 %v12988_v26  ;;  %v450_v16 = vld [vmem:[%s20964_s27 + $0x9f8] sm:$0xff] }
 0x1c0   :  { %3799 = vmatpush2.bf16.msra.mxu1 %v13123_v24  ;;  %v574_v6 = vld [vmem:[%s20964_s27 + $0xdd8] sm:$0xff]  ;;  %v13204_v12 = vcombine.high %v446_v4, %v450_v16  ;;  %v13203_v23 = vcombine.low %v446_v4, %v450_v16 }
 0x1c1   :  { %3800 = vmatprep.subr.bf16.mxu1 %v13116_v27  ;;  %v578_v8 = vld [vmem:[%s20964_s27 + $0xdf8] sm:$0xff] }
 0x1c2   :  { %3760 = vmatpush2.bf16.msra.mxu0 %v12987_v32  ;;  %v13332_v13 = vcombine.high %v574_v6, %v578_v8  ;;  %v438_v15 = vld [vmem:[%s20964_s27 + $0x998] sm:$0xff]  ;;  %v13331_v24 = vcombine.low %v574_v6, %v578_v8 }
 0x1c3   :  { %3761 = vmatprep.subr.bf16.mxu0 %v12980_v36  ;;  %v442_v18 = vld [vmem:[%s20964_s27 + $0x9b8] sm:$0xff] }
 0x1c4   :  { %3801 = vmatpush2.bf16.msra.mxu1 %v13115_v34  ;;  %v566_v19 = vld [vmem:[%s20964_s27 + $0xd98] sm:$0xff]  ;;  %v13196_v26 = vcombine.high %v438_v15, %v442_v18 }
 0x1c5   :  { %3802 = vmatprep.subr.bf16.mxu1 %v13108_v63  ;;  %v570_v20 = vld [vmem:[%s20964_s27 + $0xdb8] sm:$0xff]  ;;  %v13195_v63 = vcombine.low %v438_v15, %v442_v18 }
 0x1c6   :  { %3762 = vmatpush2.bf16.msra.mxu0 %v12979_v42  ;;  %v13324_v27 = vcombine.high %v566_v19, %v570_v20  ;;  %v430_v28 = vld [vmem:[%s20964_s27 + $0x958] sm:$0xff] }
 0x1c7   :  { %3763 = vmatprep.subr.bf16.mxu0 %v12972_v47  ;;  %v434_v29 = vld [vmem:[%s20964_s27 + $0x978] sm:$0xff] }
 0x1c8   :  { %3803 = vmatpush2.bf16.msra.mxu1 %v13107_v5  ;;  %v558_v31 = vld [vmem:[%s20964_s27 + $0xd58] sm:$0xff]  ;;  %v13188_v40 = vcombine.high %v430_v28, %v434_v29  ;;  %v13187_v51 = vcombine.low %v430_v28, %v434_v29 }
 0x1c9   :  { %3804 = vmatprep.subr.bf16.mxu1 %v13100_v48  ;;  %v562_v32 = vld [vmem:[%s20964_s27 + $0xd78] sm:$0xff] }
 0x1ca   :  { %3764 = vmatpush2.bf16.msra.mxu0 %v12971_v55  ;;  %v13316_v42 = vcombine.high %v558_v31, %v562_v32  ;;  %v550_v47 = vld [vmem:[%s20964_s27 + $0xd18] sm:$0xff]  ;;  %v13315_v54 = vcombine.low %v558_v31, %v562_v32 }
 0x1cb   :  { %3765 = vmatprep.subr.bf16.mxu0 %v12964_v58  ;;  %v554_v48 = vld [vmem:[%s20964_s27 + $0xd38] sm:$0xff] }
 0x1cc   :  { %3805 = vmatpush2.bf16.msra.mxu1 %v13099_v56  ;;  %v13308_v56 = vcombine.high %v550_v47, %v554_v48  ;;  %v414_v58 = vld [vmem:[%s20964_s27 + $0x8d8] sm:$0xff]  ;;  %v13307_v1 = vcombine.low %v550_v47, %v554_v48 }
 0x1cd   :  { %3806 = vmatprep.subr.bf16.mxu1 %v13092_v59  ;;  %v418_v59 = vld [vmem:[%s20964_s27 + $0x8f8] sm:$0xff] }
 0x1ce   :  { %3766 = vmatpush2.bf16.msra.mxu0 %v12963_v11  ;;  %v546_v62 = vld [vmem:[%s20964_s27 + $0xcf8] sm:$0xff]  ;;  %v13172_v2 = vcombine.high %v414_v58, %v418_v59  ;;  %v13171_v16 = vcombine.low %v414_v58, %v418_v59 }
 0x1cf   :  { %3767 = vmatprep.subr.bf16.mxu0 %v12956_v22  ;;  %v410_v22 = vld [vmem:[%s20964_s27 + $0x8b8] sm:$0xff] }
 0x1d0   :  { %3807 = vmatpush2.bf16.msra.mxu1 %v13091_v14  ;;  %v406_v14 = vld [vmem:[%s20964_s27 + $0x898] sm:$0xff] }
 0x1d1   :  { %3808 = vmatprep.subr.bf16.mxu1 %v13084_v25  ;;  %v534_v25 = vld [vmem:[%s20964_s27 + $0xc98] sm:$0xff]  ;;  %v13164_v8 = vcombine.high %v406_v14, %v410_v22  ;;  %v13163_v18 = vcombine.low %v406_v14, %v410_v22 }
 0x1d2   :  { %3768 = vmatpush2.bf16.msra.mxu0 %v12955_v9  ;;  %v538_v4 = vld [vmem:[%s20964_s27 + $0xcb8] sm:$0xff] }
 0x1d3   :  { %3819 = vmatprep.subr.bf16.mxu0 %v13204_v12  ;;  %v13292_v9 = vcombine.high %v534_v25, %v538_v4  ;;  %v402_v12 = vld [vmem:[%s20964_s27 + $0x878] sm:$0xff] }
 0x1d4   :  { %3809 = vmatpush2.bf16.msra.mxu1 %v13083_v10  ;;  %v398_v10 = vld [vmem:[%s20964_s27 + $0x858] sm:$0xff] }
 0x1d5   :  { %3860 = vmatprep.subr.bf16.mxu1 %v13332_v13  ;;  %v3525_v30 = vpop.f32.mrf.mxu0  ;;  %3770 = vmatmul.mubr.bf16.vlgmr.msra.gmra.mxu0 %v15689_v33  ;;  %v13323_v33 = vcombine.low %v566_v19, %v570_v20  ;;  %v526_v13 = vld [vmem:[%s20964_s27 + $0xc58] sm:$0xff]  ;;  %v13291_v19 = vcombine.low %v534_v25, %v538_v4  ;;  %v13156_v20 = vcombine.high %v398_v10, %v402_v12 }
 0x1d6   :  { %v3526_v34 = vadd.f32 %v3525_v30, %v16744_v50  ;;  %3820 = vmatpush1.bf16.msra.mxu0 %v13203_v23  ;;  %v422_v50 = vld [vmem:[%s20964_s27 + $0x918] sm:$0xff]  ;;  %3851 = vmatprep.mubr.bf16.mxu0 %v15715_v45  ;;  %v13155_v29 = vcombine.low %v398_v10, %v402_v12 }
 0x1d7   :  { %v3566_v36 = vpop.f32.mrf.mxu1  ;;  %3811 = vmatmul.mubr.bf16.vlgmr.msra.gmra.mxu1 %v15701_v37  ;;  %v16945_v39 = vpop.f32.mrf.mxu0  ;;  %3821 = vmatprep.subr.bf16.mxu0 %v13196_v26  ;;  %v426_v37 = vld [vmem:[%s20964_s27 + $0x938] sm:$0xff] }
 0x1d8   :  { %3861 = vmatpush1.bf16.msra.mxu1 %v13331_v24  ;;  %v16947_v35 = vadd.f32 %v3566_v36, %v3526_v34  ;;  %3892 = vmatprep.mubr.bf16.mxu1 %v15718_v46  ;;  %v13180_v55 = vcombine.high %v422_v50, %v426_v37  ;;  %v542_v46 = vld [vmem:[%s20964_s27 + $0xcd8] sm:$0xff]  ;;  %v13179_v0 = vcombine.low %v422_v50, %v426_v37 }
 0x1d9   :  { %v16949_v41 = vpop.f32.mrf.mxu1  ;;  %3862 = vmatprep.subr.bf16.mxu1 %v13324_v27  ;;  %v3529_v5 = vpop.f32.mrf.mxu0  ;;  %v13300_v11 = vcombine.high %v542_v46, %v546_v62  ;;  %v13299_v6 = vcombine.low %v542_v46, %v546_v62  ;;  %v530_v15 = vld [vmem:[%s20964_s27 + $0xc78] sm:$0xff] }
 0x1da   :  { %3822 = vmatpush1.bf16.msra.mxu0 %v13195_v63  ;;  %v13284_v23 = vcombine.high %v526_v13, %v530_v15  ;;  %v390_v24 = vld [vmem:[%s20964_s27 + $0x818] sm:$0xff]  ;;  %v13283_v30 = vcombine.low %v526_v13, %v530_v15 }
 0x1db   :  { %v3570_v49 = vpop.f32.mrf.mxu1  ;;  %v3530_v52 = vpop.f32.mrf.mxu0  ;;  %3823 = vmatprep.subr.bf16.mxu0 %v13188_v40  ;;  %v394_v26 = vld [vmem:[%s20964_s27 + $0x838] sm:$0xff] }
 0x1dc   :  { %3863 = vmatpush1.bf16.msra.mxu1 %v13323_v33  ;;  %v518_v27 = vld [vmem:[%s20964_s27 + $0xc18] sm:$0xff]  ;;  %v13148_v31 = vcombine.high %v390_v24, %v394_v26  ;;  %v13147_v40 = vcombine.low %v390_v24, %v394_v26 }
 0x1dd   :  { %v3571_v45 = vpop.f32.mrf.mxu1  ;;  %3864 = vmatprep.subr.bf16.mxu1 %v13316_v42  ;;  %v522_v28 = vld [vmem:[%s20964_s27 + $0xc38] sm:$0xff] }
 0x1de   :  { %3824 = vmatpush1.bf16.msra.mxu0 %v13187_v51  ;;  %v13276_v32 = vcombine.high %v518_v27, %v522_v28  ;;  %v510_v34 = vld [vmem:[%s20964_s27 + $0xbd8] sm:$0xff]  ;;  %v13275_v42 = vcombine.low %v518_v27, %v522_v28 }
 0x1df   :  { %3825 = vmatprep.subr.bf16.mxu0 %v13180_v55  ;;  %v514_v36 = vld [vmem:[%s20964_s27 + $0xbf8] sm:$0xff] }
 0x1e0   :  { %3865 = vmatpush1.bf16.msra.mxu1 %v13315_v54  ;;  %v638_v63 = vld [vmem:[%s20964_s27 + $0xfd8] sm:$0xff]  ;;  %v13268_v50 = vcombine.high %v510_v34, %v514_v36  ;;  %v13267_v51 = vcombine.low %v510_v34, %v514_v36 }
 0x1e1   :  { %3866 = vmatprep.subr.bf16.mxu1 %v13308_v56  ;;  %v642_v33 = vld [vmem:[%s20964_s27 + $0xff8] sm:$0xff] }
 0x1e2   :  { %3826 = vmatpush1.bf16.msra.mxu0 %v13179_v0  ;;  %v13396_v37 = vcombine.high %v638_v63, %v642_v33  ;;  %v502_v5 = vld [vmem:[%s20964_s27 + $0xb98] sm:$0xff]  ;;  %v13395_v52 = vcombine.low %v638_v63, %v642_v33 }
 0x1e3   :  { %3827 = vmatprep.subr.bf16.mxu0 %v13172_v2  ;;  %v506_v47 = vld [vmem:[%s20964_s27 + $0xbb8] sm:$0xff] }
 0x1e4   :  { %3867 = vmatpush1.bf16.msra.mxu1 %v13307_v1  ;;  %v630_v48 = vld [vmem:[%s20964_s27 + $0xf98] sm:$0xff]  ;;  %v13260_v54 = vcombine.high %v502_v5, %v506_v47  ;;  %v13259_v46 = vcombine.low %v502_v5, %v506_v47 }
 0x1e5   :  { %3868 = vmatprep.subr.bf16.mxu1 %v13300_v11  ;;  %v634_v49 = vld [vmem:[%s20964_s27 + $0xfb8] sm:$0xff] }
 0x1e6   :  { %3828 = vmatpush1.bf16.msra.mxu0 %v13171_v16  ;;  %v13388_v55 = vcombine.high %v630_v48, %v634_v49  ;;  %v494_v45 = vld [vmem:[%s20964_s27 + $0xb58] sm:$0xff]  ;;  %v13387_v62 = vcombine.low %v630_v48, %v634_v49  ;;  %v3528_v48 = vadd.f32 %v16945_v39, %v16760_v7  ;;  %v14620_v7 = vld [vmem:[%s20967_s8 + $0xe4] ss:$16 sps:$4 sm:$0xff]  }
 0x1e7   :  { %3829 = vmatprep.subr.bf16.mxu0 %v13164_v8  ;;  %v498_v56 = vld [vmem:[%s20964_s27 + $0xb78] sm:$0xff]  ;;  %v14623_v39 = vld [vmem:[%s20967_s8 + $0x2e4] ss:$16 sps:$4 sm:$0xff]  }
 0x1e8   :  { %3869 = vmatpush1.bf16.msra.mxu1 %v13299_v6  ;;  %v622_v58 = vld [vmem:[%s20964_s27 + $0xf58] sm:$0xff]  ;;  %v13252_v0 = vcombine.high %v494_v45, %v498_v56  ;;  %v13251_v25 = vcombine.low %v494_v45, %v498_v56  ;;  %v17113_v56 = vsub.s32 4, %v15508_v44 }
 0x1e9   :  { %3870 = vmatprep.subr.bf16.mxu1 %v13292_v9  ;;  %v626_v59 = vld [vmem:[%s20964_s27 + $0xf78] sm:$0xff] }
 0x1ea   :  { %3830 = vmatpush1.bf16.msra.mxu0 %v13163_v18  ;;  %v13380_v1 = vcombine.high %v622_v58, %v626_v59  ;;  %v486_v2 = vld [vmem:[%s20964_s27 + $0xb18] sm:$0xff]  ;;  %v13379_v4 = vcombine.low %v622_v58, %v626_v59  ;;  %v3902_v59 = vmax.f32 %v16550_v3, 0.0  ;;  %v14621_v3 = vld [vmem:[%s20967_s8 + $0x2e0] ss:$16 sps:$4 sm:$0xff]  }
 0x1eb   :  { %3831 = vmatprep.subr.bf16.mxu0 %v13156_v20  ;;  %v490_v11 = vld [vmem:[%s20964_s27 + $0xb38] sm:$0xff] }
 0x1ec   :  { %3871 = vmatpush1.bf16.msra.mxu1 %v13291_v19  ;;  %v614_v14 = vld [vmem:[%s20964_s27 + $0xf18] sm:$0xff]  ;;  %v13244_v16 = vcombine.high %v486_v2, %v490_v11  ;;  %v13243_v13 = vcombine.low %v486_v2, %v490_v11  ;;  %v17138_v2 = vpack.c.bf16 %v3902_v59, %v3902_v59  ;;  %v14683_v59 = vld [vmem:[%s20967_s8 + $0x3a4] ss:$16 sps:$4 sm:$0xff]  }
 0x1ed   :  { %3872 = vmatprep.subr.bf16.mxu1 %v13284_v23  ;;  %v618_v22 = vld [vmem:[%s20964_s27 + $0xf38] sm:$0xff] }
 0x1ee   :  { %3832 = vmatpush1.bf16.msra.mxu0 %v13155_v29  ;;  %v13372_v6 = vcombine.high %v614_v14, %v618_v22  ;;  %v478_v8 = vld [vmem:[%s20964_s27 + $0xad8] sm:$0xff]  ;;  %v13371_v15 = vcombine.low %v614_v14, %v618_v22  ;;  %v14629_v14 = vld [vmem:[%s20967_s8 + $0x2c4] ss:$16 sps:$4 sm:$0xff]  }
 0x1ef   :  { %3833 = vmatprep.subr.bf16.mxu0 %v13148_v31  ;;  %v482_v9 = vld [vmem:[%s20964_s27 + $0xaf8] sm:$0xff] }
 0x1f0   :  { %3873 = vmatpush1.bf16.msra.mxu1 %v13283_v30  ;;  %v606_v10 = vld [vmem:[%s20964_s27 + $0xed8] sm:$0xff]  ;;  %v13236_v18 = vcombine.high %v478_v8, %v482_v9  ;;  %v13235_v27 = vcombine.low %v478_v8, %v482_v9  ;;  %v14632_v8 = vld [vmem:[%s20967_s8 + $0xa4] ss:$16 sps:$4 sm:$0xff]  }
 0x1f1   :  { %3874 = vmatprep.subr.bf16.mxu1 %v13276_v32  ;;  %v610_v12 = vld [vmem:[%s20964_s27 + $0xef8] sm:$0xff] }
 0x1f2   :  { %3834 = vmatpush1.bf16.msra.mxu0 %v13147_v40  ;;  %v13364_v19 = vcombine.high %v606_v10, %v610_v12  ;;  %v470_v20 = vld [vmem:[%s20964_s27 + $0xa98] sm:$0xff]  ;;  %v13363_v28 = vcombine.low %v606_v10, %v610_v12  ;;  %v14635_v10 = vld [vmem:[%s20967_s8 + $0x2a4] ss:$16 sps:$4 sm:$0xff]  }
 0x1f3   :  { %3835 = vmatprep.subr.bf16.mxu0 %v13268_v50  ;;  %v474_v23 = vld [vmem:[%s20964_s27 + $0xab8] sm:$0xff] }
 0x1f4   :  { %3875 = vmatpush1.bf16.msra.mxu1 %v13275_v42  ;;  %v598_v24 = vld [vmem:[%s20964_s27 + $0xe98] sm:$0xff]  ;;  %v13228_v29 = vcombine.high %v470_v20, %v474_v23  ;;  %v13227_v63 = vcombine.low %v470_v20, %v474_v23  ;;  %v14638_v20 = vld [vmem:[%s20967_s8 + $0x84] ss:$16 sps:$4 sm:$0xff]  }
 0x1f5   :  { %3876 = vmatprep.subr.bf16.mxu1 %v13396_v37  ;;  %v602_v26 = vld [vmem:[%s20964_s27 + $0xeb8] sm:$0xff] }
 0x1f6   :  { %3836 = vmatpush2.bf16.msra.mxu0 %v13267_v51  ;;  %v13356_v30 = vcombine.high %v598_v24, %v602_v26  ;;  %v462_v31 = vld [vmem:[%s20964_s27 + $0xa58] sm:$0xff]  ;;  %v13355_v33 = vcombine.low %v598_v24, %v602_v26  ;;  %v14641_v24 = vld [vmem:[%s20967_s8 + $0x284] ss:$16 sps:$4 sm:$0xff]   ;;  %v14636_v26 = vld [vmem:[%s20967_s8 + $0x80] ss:$16 sps:$4 sm:$0xff]  }
 0x1f7   :  { %3837 = vmatprep.subr.bf16.mxu0 %v13260_v54  ;;  %v466_v32 = vld [vmem:[%s20964_s27 + $0xa78] sm:$0xff] }
 0x1f8   :  { %3877 = vmatpush2.bf16.msra.mxu1 %v13395_v52  ;;  %v590_v34 = vld [vmem:[%s20964_s27 + $0xe58] sm:$0xff]  ;;  %v13220_v40 = vcombine.high %v462_v31, %v466_v32  ;;  %v13219_v49 = vcombine.low %v462_v31, %v466_v32  ;;  %v14645_v31 = vld [vmem:[%s20967_s8 + $0x260] ss:$16 sps:$4 sm:$0xff]   ;;  %v14650_v32 = vld [vmem:[%s20967_s8 + $0x44] ss:$16 sps:$4 sm:$0xff]  }
 0x1f9   :  { %3878 = vmatprep.subr.bf16.mxu1 %v13388_v55  ;;  %v594_v36 = vld [vmem:[%s20964_s27 + $0xe78] sm:$0xff]  ;;  %v3569_v55 = vadd.f32 %v16949_v41, %v3528_v48  ;;  %v14663_v48 = vld [vmem:[%s20967_s8 + $0x200] ss:$16 sps:$4 sm:$0xff]  }
 0x1fa   :  { %3838 = vmatpush2.bf16.msra.mxu0 %v13259_v46  ;;  %v13348_v42 = vcombine.high %v590_v34, %v594_v36  ;;  %v454_v50 = vld [vmem:[%s20964_s27 + $0xa18] sm:$0xff]  ;;  %v13347_v51 = vcombine.low %v590_v34, %v594_v36  ;;  %v17125_v46 = vld [vmem:[%s20966_s1] sm:$0xff]  ;;  %s20972_s1 = sld [smem:[#allocation10_spill]] }
 0x1fb   :  { %3839 = vmatprep.subr.bf16.mxu0 %v13252_v0  ;;  %v458_v37 = vld [vmem:[%s20964_s27 + $0xa38] sm:$0xff]  ;;  %v3904_v41 = vmax.f32 %v3569_v55, 0.0  ;;  %v14618_v0 = vld [vmem:[%s20967_s8 + $0xe0] ss:$16 sps:$4 sm:$0xff]   ;;  %v14653_v34 = vld [vmem:[%s20967_s8 + $0x244] ss:$16 sps:$4 sm:$0xff]  }
 0x1fc   :  { %3879 = vmatpush2.bf16.msra.mxu1 %v13387_v62  ;;  %v582_v5 = vld [vmem:[%s20964_s27 + $0xe18] sm:$0xff]  ;;  %v13212_v52 = vcombine.high %v454_v50, %v458_v37  ;;  %v13211_v45 = vcombine.low %v454_v50, %v458_v37  ;;  %v664_v62 = vrot.slane %v17125_v46, %v17113_v56  ;;  %v14648_v36 = vld [vmem:[%s20967_s8 + $0x40] ss:$16 sps:$4 sm:$0xff]   ;;  %v14662_v37 = vld [vmem:[%s20967_s8 + $0x4] ss:$16 sps:$4 sm:$0xff]  }
 0x1fd   :  { %3880 = vmatprep.subr.bf16.mxu1 %v13380_v1  ;;  %v586_v47 = vld [vmem:[%s20964_s27 + $0xe38] sm:$0xff]  ;;  %v14626_v1 = vld [vmem:[%s20967_s8 + $0xc4] ss:$16 sps:$4 sm:$0xff]   ;;  %v17144_v22 = vpack.c.bf16 %v3904_v41, %v3904_v41  ;;  %v14657_v50 = vld [vmem:[%s20967_s8 + $0x220] ss:$16 sps:$4 sm:$0xff]  }
 0x1fe   :  { %3840 = vmatpush2.bf16.msra.mxu0 %v13251_v25  ;;  %v13340_v54 = vcombine.high %v582_v5, %v586_v47  ;;  %v13339_v58 = vcombine.low %v582_v5, %v586_v47  ;;  %v14665_v5 = vld [vmem:[%s20967_s8 + $0x204] ss:$16 sps:$4 sm:$0xff]   ;;  %v14660_v47 = vld [vmem:[%s20967_s8] ss:$16 sps:$4 sm:$0xff]  }
 0x1ff   :  { %3841 = vmatprep.subr.bf16.mxu0 %v13244_v16  ;;  %v14624_v16 = vld [vmem:[%s20967_s8 + $0xc0] ss:$16 sps:$4 sm:$0xff]   ;;  %v14674_v55 = vld [vmem:[%s20967_s8 + $0x1c4] ss:$16 sps:$4 sm:$0xff]  }
 0x200   :  { %3881 = vmatpush2.bf16.msra.mxu1 %v13379_v4  ;;  %v14678_v41 = vld [vmem:[%s20967_s8 + $0x1a0] ss:$16 sps:$4 sm:$0xff]  }
 0x201   :  { %3882 = vmatprep.subr.bf16.mxu1 %v13372_v6 }
 0x202   :  { %3842 = vmatpush2.bf16.msra.mxu0 %v13243_v13 }
 0x203   :  { %3843 = vmatprep.subr.bf16.mxu0 %v13236_v18 }
 0x204   :  { %3883 = vmatpush2.bf16.msra.mxu1 %v13371_v15  ;;  %v14630_v15 = vld [vmem:[%s20967_s8 + $0xa0] ss:$16 sps:$4 sm:$0xff]  }
 0x205   :  { %3884 = vmatprep.subr.bf16.mxu1 %v13364_v19  ;;  %v14633_v19 = vld [vmem:[%s20967_s8 + $0x2a0] ss:$16 sps:$4 sm:$0xff]  }
 0x206   :  { %3844 = vmatpush2.bf16.msra.mxu0 %v13235_v27  ;;  %v14639_v27 = vld [vmem:[%s20967_s8 + $0x280] ss:$16 sps:$4 sm:$0xff]  }
 0x207   :  { %3845 = vmatprep.subr.bf16.mxu0 %v13228_v29  ;;  %v14647_v29 = vld [vmem:[%s20967_s8 + $0x264] ss:$16 sps:$4 sm:$0xff]  }
 0x208   :  { %3885 = vmatpush2.bf16.msra.mxu1 %v13363_v28  ;;  %v14644_v28 = vld [vmem:[%s20967_s8 + $0x64] ss:$16 sps:$4 sm:$0xff]  }
 0x209   :  { %3886 = vmatprep.subr.bf16.mxu1 %v13356_v30  ;;  %v14642_v30 = vld [vmem:[%s20967_s8 + $0x60] ss:$16 sps:$4 sm:$0xff]  }
 0x20a   :  { %3846 = vmatpush2.bf16.msra.mxu0 %v13227_v63  ;;  %v14651_v63 = vld [vmem:[%s20967_s8 + $0x240] ss:$16 sps:$4 sm:$0xff]  }
 0x20b   :  { %3847 = vmatprep.subr.bf16.mxu0 %v13220_v40  ;;  %v14659_v40 = vld [vmem:[%s20967_s8 + $0x224] ss:$16 sps:$4 sm:$0xff]  }
 0x20c   :  { %3887 = vmatpush2.bf16.msra.mxu1 %v13355_v33  ;;  %v14656_v33 = vld [vmem:[%s20967_s8 + $0x24] ss:$16 sps:$4 sm:$0xff]  }
 0x20d   :  { %3888 = vmatprep.subr.bf16.mxu1 %v13348_v42  ;;  %v14654_v42 = vld [vmem:[%s20967_s8 + $0x20] ss:$16 sps:$4 sm:$0xff]  }
 0x20e   :  { %3848 = vmatpush2.bf16.msra.mxu0 %v13219_v49  ;;  %v14668_v49 = vld [vmem:[%s20967_s8 + $0x1e4] ss:$16 sps:$4 sm:$0xff]  }
 0x20f   :  { %3849 = vmatprep.subr.bf16.mxu0 %v13212_v52  ;;  %v14666_v52 = vld [vmem:[%s20967_s8 + $0x1e0] ss:$16 sps:$4 sm:$0xff]  }
 0x210   :  { %3889 = vmatpush2.bf16.msra.mxu1 %v13347_v51  ;;  %v14671_v51 = vld [vmem:[%s20967_s8 + $0x3e4] ss:$16 sps:$4 sm:$0xff]  }
 0x211   :  { %3890 = vmatprep.subr.bf16.mxu1 %v13340_v54  ;;  %v14669_v54 = vld [vmem:[%s20967_s8 + $0x3e0] ss:$16 sps:$4 sm:$0xff]  }
 0x212   :  { %3850 = vmatpush2.bf16.msra.mxu0 %v13211_v45  ;;  %v14677_v45 = vld [vmem:[%s20967_s8 + $0x3c4] ss:$16 sps:$4 sm:$0xff]  }
 0x213   :  { %5480 = vmatprep.subr.bf16.mxu0 %v14620_v7  ;;  %v14675_v7 = vld [vmem:[%s20967_s8 + $0x3c0] ss:$16 sps:$4 sm:$0xff]  }
 0x214   :  { %3891 = vmatpush2.bf16.msra.mxu1 %v13339_v58  ;;  %v14672_v58 = vld [vmem:[%s20967_s8 + $0x1c0] ss:$16 sps:$4 sm:$0xff]  }
 0x215   :  { %5521 = vmatprep.subr.bf16.mxu1 %v14623_v39  ;;  %v3607_v11 = vpop.f32.mrf.mxu0  ;;  %3852 = vmatmul.mubr.bf16.vlgmr.msra.gmra.mxu0 %v15905_v60  ;;  %v14627_v60 = vld [vmem:[%s20967_s8 + $0x2c0] ss:$16 sps:$4 sm:$0xff]   ;;  %v14680_v39 = vld [vmem:[%s20967_s8 + $0x1a4] ss:$16 sps:$4 sm:$0xff]  }
 0x216   :  { %v3608_v25 = vadd.f32 %v3607_v11, %v664_v62  ;;  %5481 = vmatpush1.bf16.msra.mxu0 %v14618_v0  ;;  %5512 = vmatprep.mubr.bf16.mxu0 %v17138_v2  ;;  %v14681_v62 = vld [vmem:[%s20967_s8 + $0x3a0] ss:$16 sps:$4 sm:$0xff]   ;;  %v14686_v0 = vld [vmem:[%s20967_s8 + $0x184] ss:$16 sps:$4 sm:$0xff]  }
 0x217   :  { %v3648_v4 = vpop.f32.mrf.mxu1  ;;  %3893 = vmatmul.mubr.bf16.vlgmr.msra.gmra.mxu1 %v15909_v61  ;;  %v17151_v6 = vpop.f32.mrf.mxu0  ;;  %5482 = vmatprep.subr.bf16.mxu0 %v14626_v1  ;;  %v14684_v1 = vld [vmem:[%s20967_s8 + $0x180] ss:$16 sps:$4 sm:$0xff]  }
 0x218   :  { %5522 = vmatpush1.bf16.msra.mxu1 %v14621_v3  ;;  %v17159_v9 = vadd.f32 %v3648_v4, %v3608_v25  ;;  %5553 = vmatprep.mubr.bf16.mxu1 %v17144_v22  ;;  %v14689_v3 = vld [vmem:[%s20967_s8 + $0x384] ss:$16 sps:$4 sm:$0xff]   ;;  %v14687_v11 = vld [vmem:[%s20967_s8 + $0x380] ss:$16 sps:$4 sm:$0xff]  }
 0x219   :  { %v17162_v61 = vpop.f32.mrf.mxu1  ;;  %v3611_v12 = vpop.f32.mrf.mxu0  ;;  %5523 = vmatprep.subr.bf16.mxu1 %v14629_v14  ;;  %v14692_v14 = vld [vmem:[%s20967_s8 + $0x164] ss:$16 sps:$4 sm:$0xff]   ;;  %v14690_v4 = vld [vmem:[%s20967_s8 + $0x160] ss:$16 sps:$4 sm:$0xff]  }
 0x21a   :  { %5483 = vmatpush1.bf16.msra.mxu0 %v14624_v16  ;;  %v14695_v25 = vld [vmem:[%s20967_s8 + $0x364] ss:$16 sps:$4 sm:$0xff]   ;;  %v14693_v16 = vld [vmem:[%s20967_s8 + $0x360] ss:$16 sps:$4 sm:$0xff]  }
 0x21b   :  { %v3652_v13 = vpop.f32.mrf.mxu1  ;;  %v3612_v18 = vpop.f32.mrf.mxu0  ;;  %5484 = vmatprep.subr.bf16.mxu0 %v14632_v8  ;;  %v14701_v8 = vld [vmem:[%s20967_s8 + $0x344] ss:$16 sps:$4 sm:$0xff]   ;;  %v14699_v12 = vld [vmem:[%s20967_s8 + $0x340] ss:$16 sps:$4 sm:$0xff]  }
 0x21c   :  { %5524 = vmatpush1.bf16.msra.mxu1 %v14627_v60  ;;  %v14698_v60 = vld [vmem:[%s20967_s8 + $0x144] ss:$16 sps:$4 sm:$0xff]   ;;  %v17312_v18 = vsub.s32 5, %v15508_v44 }
 0x21d   :  { %v3653_v23 = vpop.f32.mrf.mxu1  ;;  %5525 = vmatprep.subr.bf16.mxu1 %v14635_v10  ;;  %v14696_v10 = vld [vmem:[%s20967_s8 + $0x140] ss:$16 sps:$4 sm:$0xff]   ;;  %v14704_v13 = vld [vmem:[%s20967_s8 + $0x124] ss:$16 sps:$4 sm:$0xff]  }
 0x21e   :  { %5485 = vmatpush1.bf16.msra.mxu0 %v14630_v15  ;;  %v14707_v15 = vld [vmem:[%s20967_s8 + $0x324] ss:$16 sps:$4 sm:$0xff]  }
 0x21f   :  { %5486 = vmatprep.subr.bf16.mxu0 %v14638_v20  ;;  %v14705_v20 = vld [vmem:[%s20967_s8 + $0x320] ss:$16 sps:$4 sm:$0xff]   ;;  %v14710_v23 = vld [vmem:[%s20967_s8 + $0x104] ss:$16 sps:$4 sm:$0xff]  }
 0x220   :  { %5526 = vmatpush1.bf16.msra.mxu1 %v14633_v19  ;;  %v14702_v19 = vld [vmem:[%s20967_s8 + $0x120] ss:$16 sps:$4 sm:$0xff]  }
 0x221   :  { %5527 = vmatprep.subr.bf16.mxu1 %v14641_v24  ;;  %v14713_v24 = vld [vmem:[%s20967_s8 + $0x304] ss:$16 sps:$4 sm:$0xff]  }
 0x222   :  { %5487 = vmatpush1.bf16.msra.mxu0 %v14636_v26  ;;  %v668_v26 = vrot.slane %v17125_v46, %v17312_v18 }
 0x223   :  { %5488 = vmatprep.subr.bf16.mxu0 %v14644_v28  ;;  %v3901_v28 = vmax.f32 %v16533_v57, 0.0  ;;  %v14714_v57 = vld [vmem:[%s20967_s8 + $0x4e0] ss:$16 sps:$4 sm:$0xff]  }
 0x224   :  { %5528 = vmatpush1.bf16.msra.mxu1 %v14639_v27  ;;  %v14708_v27 = vld [vmem:[%s20967_s8 + $0x100] ss:$16 sps:$4 sm:$0xff]  }
 0x225   :  { %5529 = vmatprep.subr.bf16.mxu1 %v14647_v29  ;;  %v14711_v29 = vld [vmem:[%s20967_s8 + $0x300] ss:$16 sps:$4 sm:$0xff]  }
 0x226   :  { %5489 = vmatpush1.bf16.msra.mxu0 %v14642_v30  ;;  %v14716_v30 = vld [vmem:[%s20967_s8 + $0x4e4] ss:$16 sps:$4 sm:$0xff]  }
 0x227   :  { %5490 = vmatprep.subr.bf16.mxu0 %v14650_v32  ;;  %v14773_v32 = vld [vmem:[%s20967_s8 + $0x6e4] ss:$16 sps:$4 sm:$0xff]  }
 0x228   :  { %5530 = vmatpush1.bf16.msra.mxu1 %v14645_v31  ;;  %v3903_v31 = vmax.f32 %v16947_v35, 0.0  ;;  %v14719_v35 = vld [vmem:[%s20967_s8 + $0x4c4] ss:$16 sps:$4 sm:$0xff]  }
 0x229   :  { %5531 = vmatprep.subr.bf16.mxu1 %v14653_v34  ;;  %v3610_v34 = vadd.f32 %v17151_v6, %v668_v26  ;;  %v14779_v6 = vld [vmem:[%s20967_s8 + $0x6c4] ss:$16 sps:$4 sm:$0xff]   ;;  %v14735_v26 = vld [vmem:[%s20967_s8 + $0x400] ss:$16 sps:$4 sm:$0xff]  }
 0x22a   :  { %5491 = vmatpush1.bf16.msra.mxu0 %v14648_v36  ;;  %v17346_v36 = vpack.c.bf16 %v3901_v28, %v3901_v28  ;;  %v14813_v28 = vld [vmem:[%s20967_s8 + $0x600] ss:$16 sps:$4 sm:$0xff]  }
 0x22b   :  { %5492 = vmatprep.subr.bf16.mxu0 %v14656_v33  ;;  %v17354_v33 = vpack.c.bf16 %v3903_v31, %v3903_v31  ;;  %v14738_v31 = vld [vmem:[%s20967_s8 + $0x5e0] ss:$16 sps:$4 sm:$0xff]  }
 0x22c   :  { %5532 = vmatpush1.bf16.msra.mxu1 %v14651_v63  ;;  %v14771_v63 = vld [vmem:[%s20967_s8 + $0x6e0] ss:$16 sps:$4 sm:$0xff]  }
 0x22d   :  { %5533 = vmatprep.subr.bf16.mxu1 %v14659_v40 }
 0x22e   :  { %5493 = vmatpush1.bf16.msra.mxu0 %v14654_v42  ;;  %v3651_v42 = vadd.f32 %v17162_v61, %v3610_v34  ;;  %v14777_v61 = vld [vmem:[%s20967_s8 + $0x6c0] ss:$16 sps:$4 sm:$0xff]  }
 0x22f   :  { %5494 = vmatprep.subr.bf16.mxu0 %v14662_v37  ;;  %v14717_v37 = vld [vmem:[%s20967_s8 + $0x4c0] ss:$16 sps:$4 sm:$0xff]  }
 0x230   :  { %5534 = vmatpush1.bf16.msra.mxu1 %v14657_v50 }
 0x231   :  { %5535 = vmatprep.subr.bf16.mxu1 %v14665_v5 }
 0x232   :  { %5495 = vmatpush1.bf16.msra.mxu0 %v14660_v47  ;;  %v14722_v47 = vld [vmem:[%s20967_s8 + $0x4a4] ss:$16 sps:$4 sm:$0xff]  }
 0x233   :  { %5496 = vmatprep.subr.bf16.mxu0 %v14668_v49 }
 0x234   :  { %5536 = vmatpush1.bf16.msra.mxu1 %v14663_v48 }
 0x235   :  { %5537 = vmatprep.subr.bf16.mxu1 %v14671_v51  ;;  %v14785_v51 = vld [vmem:[%s20967_s8 + $0x6a4] ss:$16 sps:$4 sm:$0xff]  }
 0x236   :  { %5497 = vmatpush2.bf16.msra.mxu0 %v14666_v52 }
 0x237   :  { %5498 = vmatprep.subr.bf16.mxu0 %v14674_v55 }
 0x238   :  { %5538 = vmatpush2.bf16.msra.mxu1 %v14669_v54 }
 0x239   :  { %5539 = vmatprep.subr.bf16.mxu1 %v14677_v45  ;;  %v14720_v45 = vld [vmem:[%s20967_s8 + $0x4a0] ss:$16 sps:$4 sm:$0xff]  }
 0x23a   :  { %5499 = vmatpush2.bf16.msra.mxu0 %v14672_v58 }
 0x23b   :  { %5500 = vmatprep.subr.bf16.mxu0 %v14680_v39  ;;  %v14783_v39 = vld [vmem:[%s20967_s8 + $0x6a0] ss:$16 sps:$4 sm:$0xff]  }
 0x23c   :  { %5540 = vmatpush2.bf16.msra.mxu1 %v14675_v7  ;;  %v14725_v7 = vld [vmem:[%s20967_s8 + $0x484] ss:$16 sps:$4 sm:$0xff]  }
 0x23d   :  { %5541 = vmatprep.subr.bf16.mxu1 %v14683_v59 }
 0x23e   :  { %5501 = vmatpush2.bf16.msra.mxu0 %v14678_v41 }
 0x23f   :  { %5502 = vmatprep.subr.bf16.mxu0 %v14686_v0 }
 0x240   :  { %5542 = vmatpush2.bf16.msra.mxu1 %v14681_v62  ;;  %v14791_v62 = vld [vmem:[%s20967_s8 + $0x684] ss:$16 sps:$4 sm:$0xff]  }
 0x241   :  { %5543 = vmatprep.subr.bf16.mxu1 %v14689_v3  ;;  %v14723_v3 = vld [vmem:[%s20967_s8 + $0x480] ss:$16 sps:$4 sm:$0xff]  }
 0x242   :  { %5503 = vmatpush2.bf16.msra.mxu0 %v14684_v1  ;;  %v14728_v1 = vld [vmem:[%s20967_s8 + $0x464] ss:$16 sps:$4 sm:$0xff]  }
 0x243   :  { %5504 = vmatprep.subr.bf16.mxu0 %v14692_v14  ;;  %v14797_v14 = vld [vmem:[%s20967_s8 + $0x664] ss:$16 sps:$4 sm:$0xff]  }
 0x244   :  { %5544 = vmatpush2.bf16.msra.mxu1 %v14687_v11  ;;  %v14789_v11 = vld [vmem:[%s20967_s8 + $0x680] ss:$16 sps:$4 sm:$0xff]  }
 0x245   :  { %5545 = vmatprep.subr.bf16.mxu1 %v14695_v25  ;;  %v14726_v25 = vld [vmem:[%s20967_s8 + $0x460] ss:$16 sps:$4 sm:$0xff]  }
 0x246   :  { %5505 = vmatpush2.bf16.msra.mxu0 %v14690_v4  ;;  %v14731_v4 = vld [vmem:[%s20967_s8 + $0x444] ss:$16 sps:$4 sm:$0xff]  }
 0x247   :  { %5506 = vmatprep.subr.bf16.mxu0 %v14698_v60  ;;  %v14803_v60 = vld [vmem:[%s20967_s8 + $0x644] ss:$16 sps:$4 sm:$0xff]  }
 0x248   :  { %5546 = vmatpush2.bf16.msra.mxu1 %v14693_v16  ;;  %v14795_v16 = vld [vmem:[%s20967_s8 + $0x660] ss:$16 sps:$4 sm:$0xff]  }
 0x249   :  { %5547 = vmatprep.subr.bf16.mxu1 %v14701_v8  ;;  %v14729_v8 = vld [vmem:[%s20967_s8 + $0x440] ss:$16 sps:$4 sm:$0xff]  }
 0x24a   :  { %5507 = vmatpush2.bf16.msra.mxu0 %v14696_v10  ;;  %v14734_v10 = vld [vmem:[%s20967_s8 + $0x424] ss:$16 sps:$4 sm:$0xff]  }
 0x24b   :  { %5508 = vmatprep.subr.bf16.mxu0 %v14704_v13  ;;  %v14809_v13 = vld [vmem:[%s20967_s8 + $0x624] ss:$16 sps:$4 sm:$0xff]  }
 0x24c   :  { %5548 = vmatpush2.bf16.msra.mxu1 %v14699_v12  ;;  %v14801_v12 = vld [vmem:[%s20967_s8 + $0x640] ss:$16 sps:$4 sm:$0xff]  }
 0x24d   :  { %5549 = vmatprep.subr.bf16.mxu1 %v14707_v15  ;;  %v14732_v15 = vld [vmem:[%s20967_s8 + $0x420] ss:$16 sps:$4 sm:$0xff]  }
 0x24e   :  { %5509 = vmatpush2.bf16.msra.mxu0 %v14702_v19  ;;  %v14737_v19 = vld [vmem:[%s20967_s8 + $0x404] ss:$16 sps:$4 sm:$0xff]  }
 0x24f   :  { %5510 = vmatprep.subr.bf16.mxu0 %v14710_v23  ;;  %v14815_v23 = vld [vmem:[%s20967_s8 + $0x604] ss:$16 sps:$4 sm:$0xff]  }
 0x250   :  { %5550 = vmatpush2.bf16.msra.mxu1 %v14705_v20  ;;  %v14807_v20 = vld [vmem:[%s20967_s8 + $0x620] ss:$16 sps:$4 sm:$0xff]  }
 0x251   :  { %5551 = vmatprep.subr.bf16.mxu1 %v14713_v24  ;;  %v4169_v24 = vld [vmem:[%s20967_s8 + $0x7e0] sm:$0xff] }
 0x252   :  { %5511 = vmatpush2.bf16.msra.mxu0 %v14708_v27  ;;  %v14740_v27 = vld [vmem:[%s20967_s8 + $0x5e4] ss:$16 sps:$4 sm:$0xff]  }
 0x253   :  { %5562 = vmatprep.subr.bf16.mxu0 %v14716_v30  ;;  %v13649_v30 = vcombine.low %v4169_v24, %v4169_v24 }
 0x254   :  { %5552 = vmatpush2.bf16.msra.mxu1 %v14711_v29  ;;  %v13650_v29 = vcombine.high %v4169_v24, %v4169_v24 }
 0x255   :  { %5603 = vmatprep.subr.bf16.mxu1 %v14773_v32  ;;  %v17359_v40 = vpop.f32.mrf.mxu0  ;;  %5513 = vmatmul.mubr.bf16.vlgmr.msra.gmra.mxu0 %v17346_v36  ;;  %v14743_v32 = vld [vmem:[%s20967_s8 + $0x5c4] ss:$16 sps:$4 sm:$0xff]   ;;  %v5469_v34 = vsel %vm5467_vm0, %v13649_v30, 0  ;;  %v14774_v30 = vld [vmem:[%s20967_s8 + $0x88] ss:$16 sps:$4 sm:$0xff]  }
 0x256   :  { %5563 = vmatpush1.bf16.msra.mxu0 %v14714_v57  ;;  %v14826_v57 = vld [vmem:[%s20967_s8 + $0x7c4] ss:$16 sps:$4 sm:$0xff]  }
 0x257   :  { %v17363_v50 = vpop.f32.mrf.mxu1  ;;  %5554 = vmatmul.mubr.bf16.vlgmr.msra.gmra.mxu1 %v17354_v33  ;;  %v3691_v5 = vpop.f32.mrf.mxu0  ;;  %5564 = vmatprep.subr.bf16.mxu0 %v14719_v35  ;;  %v14741_v35 = vld [vmem:[%s20967_s8 + $0x5c0] ss:$16 sps:$4 sm:$0xff]  }
 0x258   :  { %5604 = vmatpush1.bf16.msra.mxu1 %v14771_v63  ;;  %v3692_v48 = vadd.f32 %v3691_v5, %v3651_v42  ;;  %v14746_v63 = vld [vmem:[%s20967_s8 + $0x5a4] ss:$16 sps:$4 sm:$0xff]  }
 0x259   :  { %v3732_v49 = vpop.f32.mrf.mxu1  ;;  %5605 = vmatprep.subr.bf16.mxu1 %v14779_v6  ;;  %v3693_v52 = vpop.f32.mrf.mxu0  ;;  %v14824_v6 = vld [vmem:[%s20967_s8 + $0x7c0] ss:$16 sps:$4 sm:$0xff]   ;;  %v14832_v42 = vld [vmem:[%s20967_s8 + $0x7a4] ss:$16 sps:$4 sm:$0xff]  }
 0x25a   :  { %v3733_v54 = vadd.f32 %v3732_v49, %v3692_v48  ;;  %5565 = vmatpush1.bf16.msra.mxu0 %v14717_v37  ;;  %v14744_v37 = vld [vmem:[%s20967_s8 + $0x5a0] ss:$16 sps:$4 sm:$0xff]   ;;  %v14749_v5 = vld [vmem:[%s20967_s8 + $0x584] ss:$16 sps:$4 sm:$0xff]  }
 0x25b   :  { %v3734_v55 = vpop.f32.mrf.mxu1  ;;  %v3694_v58 = vpop.f32.mrf.mxu0  ;;  %5566 = vmatprep.subr.bf16.mxu0 %v14722_v47  ;;  %v14830_v47 = vld [vmem:[%s20967_s8 + $0x7a0] ss:$16 sps:$4 sm:$0xff]   ;;  %v14752_v49 = vld [vmem:[%s20967_s8 + $0x564] ss:$16 sps:$4 sm:$0xff]  }
 0x25c   :  { %5606 = vmatpush1.bf16.msra.mxu1 %v14777_v61  ;;  %v3906_v59 = vmax.f32 %v3733_v54, 0.0  ;;  %v14838_v61 = vld [vmem:[%s20967_s8 + $0x784] ss:$16 sps:$4 sm:$0xff]   ;;  %v14747_v48 = vld [vmem:[%s20967_s8 + $0x580] ss:$16 sps:$4 sm:$0xff]  }
 0x25d   :  { %v3735_v41 = vpop.f32.mrf.mxu1  ;;  %5607 = vmatprep.subr.bf16.mxu1 %v14785_v51  ;;  %v14836_v51 = vld [vmem:[%s20967_s8 + $0x780] ss:$16 sps:$4 sm:$0xff]   ;;  %v14844_v52 = vld [vmem:[%s20967_s8 + $0x764] ss:$16 sps:$4 sm:$0xff]  }
 0x25e   :  { %v17390_v0 = vpack.c.bf16 %v3906_v59, %v3906_v59  ;;  %5567 = vmatpush1.bf16.msra.mxu0 %v14720_v45  ;;  %v14750_v54 = vld [vmem:[%s20967_s8 + $0x560] ss:$16 sps:$4 sm:$0xff]   ;;  %v14755_v55 = vld [vmem:[%s20967_s8 + $0x544] ss:$16 sps:$4 sm:$0xff]  }
 0x25f   :  { %5568 = vmatprep.subr.bf16.mxu0 %v14725_v7  ;;  %v14842_v45 = vld [vmem:[%s20967_s8 + $0x760] ss:$16 sps:$4 sm:$0xff]   ;;  %v14850_v58 = vld [vmem:[%s20967_s8 + $0x744] ss:$16 sps:$4 sm:$0xff]  }
 0x260   :  { %5608 = vmatpush1.bf16.msra.mxu1 %v14783_v39  ;;  %5594 = vmatprep.mubr.bf16.mxu0 %v17390_v0  ;;  %v14753_v7 = vld [vmem:[%s20967_s8 + $0x540] ss:$16 sps:$4 sm:$0xff]   ;;  %v3690_v39 = vadd.f32 %v17359_v40, %v17159_v9  ;;  %v14758_v59 = vld [vmem:[%s20967_s8 + $0x524] ss:$16 sps:$4 sm:$0xff]  }
 0x261   :  { %5609 = vmatprep.subr.bf16.mxu1 %v14791_v62  ;;  %v14848_v41 = vld [vmem:[%s20967_s8 + $0x740] ss:$16 sps:$4 sm:$0xff]   ;;  %v14856_v62 = vld [vmem:[%s20967_s8 + $0x724] ss:$16 sps:$4 sm:$0xff]  }
 0x262   :  { %5569 = vmatpush1.bf16.msra.mxu0 %v14723_v3  ;;  %v14756_v9 = vld [vmem:[%s20967_s8 + $0x520] ss:$16 sps:$4 sm:$0xff]   ;;  %v3731_v40 = vadd.f32 %v17363_v50, %v3690_v39  ;;  %v14761_v3 = vld [vmem:[%s20967_s8 + $0x504] ss:$16 sps:$4 sm:$0xff]   ;;  %v17648_v39 = vsub.s32 6, %v15508_v44 }
 0x263   :  { %5570 = vmatprep.subr.bf16.mxu0 %v14728_v1  ;;  %v14854_v1 = vld [vmem:[%s20967_s8 + $0x720] ss:$16 sps:$4 sm:$0xff]  }
 0x264   :  { %5610 = vmatpush1.bf16.msra.mxu1 %v14789_v11  ;;  %v14862_v11 = vld [vmem:[%s20967_s8 + $0x704] ss:$16 sps:$4 sm:$0xff]   ;;  %v14759_v50 = vld [vmem:[%s20967_s8 + $0x500] ss:$16 sps:$4 sm:$0xff]  }
 0x265   :  { %5611 = vmatprep.subr.bf16.mxu1 %v14797_v14  ;;  %v3905_v14 = vmax.f32 %v3731_v40, 0.0 }
 0x266   :  { %5571 = vmatpush1.bf16.msra.mxu0 %v14726_v25  ;;  %v14764_v25 = vld [vmem:[%s20967_s8 + $0xec] ss:$16 sps:$4 sm:$0xff]  }
 0x267   :  { %5572 = vmatprep.subr.bf16.mxu0 %v14731_v4  ;;  %v14860_v4 = vld [vmem:[%s20967_s8 + $0x700] ss:$16 sps:$4 sm:$0xff]  }
 0x268   :  { %5612 = vmatpush1.bf16.msra.mxu1 %v14795_v16  ;;  %v14868_v16 = vld [vmem:[%s20967_s8 + $0x2ec] ss:$16 sps:$4 sm:$0xff]  }
 0x269   :  { %5613 = vmatprep.subr.bf16.mxu1 %v14803_v60  ;;  %v14762_v60 = vld [vmem:[%s20967_s8 + $0xe8] ss:$16 sps:$4 sm:$0xff]  }
 0x26a   :  { %5573 = vmatpush1.bf16.msra.mxu0 %v14729_v8  ;;  %v17554_v8 = vpack.c.bf16 %v3905_v14, %v3905_v14 }
 0x26b   :  { %5574 = vmatprep.subr.bf16.mxu0 %v14734_v10  ;;  %v14767_v10 = vld [vmem:[%s20967_s8 + $0xcc] ss:$16 sps:$4 sm:$0xff]  }
 0x26c   :  { %5614 = vmatpush1.bf16.msra.mxu1 %v14801_v12 }
 0x26d   :  { %5615 = vmatprep.subr.bf16.mxu1 %v14809_v13 }
 0x26e   :  { %5575 = vmatpush1.bf16.msra.mxu0 %v14732_v15  ;;  %v14765_v15 = vld [vmem:[%s20967_s8 + $0xc8] ss:$16 sps:$4 sm:$0xff]  }
 0x26f   :  { %5576 = vmatprep.subr.bf16.mxu0 %v14737_v19 }
 0x270   :  { %5616 = vmatpush1.bf16.msra.mxu1 %v14807_v20  ;;  %v14770_v20 = vld [vmem:[%s20967_s8 + $0xac] ss:$16 sps:$4 sm:$0xff]  }
 0x271   :  { %5617 = vmatprep.subr.bf16.mxu1 %v14815_v23 }
 0x272   :  { %5577 = vmatpush1.bf16.msra.mxu0 %v14735_v26 }
 0x273   :  { %5578 = vmatprep.subr.bf16.mxu0 %v14740_v27 }
 0x274   :  { %5618 = vmatpush1.bf16.msra.mxu1 %v14813_v28  ;;  %v14776_v28 = vld [vmem:[%s20967_s8 + $0x8c] ss:$16 sps:$4 sm:$0xff]  }
 0x275   :  { %13653 = vmatprep.subr.msk.bf16.mxu1 %vm5467_vm0, %v13650_v29 }
 0x276   :  { %5579 = vmatpush2.bf16.msra.mxu0 %v14738_v31  ;;  %v14782_v31 = vld [vmem:[%s20967_s8 + $0x6c] ss:$16 sps:$4 sm:$0xff]  }
 0x277   :  { %5580 = vmatprep.subr.bf16.mxu0 %v14743_v32  ;;  %v14780_v32 = vld [vmem:[%s20967_s8 + $0x68] ss:$16 sps:$4 sm:$0xff]  }
 0x278   :  { %5620 = vmatpush2.bf16.msra.mxu1 %v5469_v34  ;;  %v14788_v34 = vld [vmem:[%s20967_s8 + $0x4c] ss:$16 sps:$4 sm:$0xff]  }
 0x279   :  { %5621 = vmatprep.subr.bf16.mxu1 %v14826_v57  ;;  %v14786_v57 = vld [vmem:[%s20967_s8 + $0x48] ss:$16 sps:$4 sm:$0xff]  }
 0x27a   :  { %5581 = vmatpush2.bf16.msra.mxu0 %v14741_v35  ;;  %v14794_v35 = vld [vmem:[%s20967_s8 + $0x2c] ss:$16 sps:$4 sm:$0xff]  }
 0x27b   :  { %5582 = vmatprep.subr.bf16.mxu0 %v14746_v63  ;;  %v14792_v63 = vld [vmem:[%s20967_s8 + $0x28] ss:$16 sps:$4 sm:$0xff]  }
 0x27c   :  { %5622 = vmatpush2.bf16.msra.mxu1 %v14824_v6  ;;  %v14800_v6 = vld [vmem:[%s20967_s8 + $0xc] ss:$16 sps:$4 sm:$0xff]  }
 0x27d   :  { %5623 = vmatprep.subr.bf16.mxu1 %v14832_v42  ;;  %v14798_v42 = vld [vmem:[%s20967_s8 + $0x8] ss:$16 sps:$4 sm:$0xff]  }
 0x27e   :  { %5583 = vmatpush2.bf16.msra.mxu0 %v14744_v37  ;;  %v14806_v37 = vld [vmem:[%s20967_s8 + $0x1ec] ss:$16 sps:$4 sm:$0xff]  }
 0x27f   :  { %5584 = vmatprep.subr.bf16.mxu0 %v14749_v5  ;;  %v14804_v5 = vld [vmem:[%s20967_s8 + $0x1e8] ss:$16 sps:$4 sm:$0xff]  }
 0x280   :  { %5624 = vmatpush2.bf16.msra.mxu1 %v14830_v47  ;;  %v14812_v47 = vld [vmem:[%s20967_s8 + $0x1cc] ss:$16 sps:$4 sm:$0xff]  }
 0x281   :  { %5625 = vmatprep.subr.bf16.mxu1 %v14838_v61  ;;  %v14810_v61 = vld [vmem:[%s20967_s8 + $0x1c8] ss:$16 sps:$4 sm:$0xff]  }
 0x282   :  { %5585 = vmatpush2.bf16.msra.mxu0 %v14747_v48  ;;  %v14818_v48 = vld [vmem:[%s20967_s8 + $0x1ac] ss:$16 sps:$4 sm:$0xff]  }
 0x283   :  { %5586 = vmatprep.subr.bf16.mxu0 %v14752_v49  ;;  %v14816_v49 = vld [vmem:[%s20967_s8 + $0x1a8] ss:$16 sps:$4 sm:$0xff]  }
 0x284   :  { %5626 = vmatpush2.bf16.msra.mxu1 %v14836_v51  ;;  %v14823_v51 = vld [vmem:[%s20967_s8 + $0x18c] ss:$16 sps:$4 sm:$0xff]  }
 0x285   :  { %5627 = vmatprep.subr.bf16.mxu1 %v14844_v52  ;;  %v14821_v52 = vld [vmem:[%s20967_s8 + $0x188] ss:$16 sps:$4 sm:$0xff]  }
 0x286   :  { %5587 = vmatpush2.bf16.msra.mxu0 %v14750_v54  ;;  %v14829_v54 = vld [vmem:[%s20967_s8 + $0x16c] ss:$16 sps:$4 sm:$0xff]  }
 0x287   :  { %5588 = vmatprep.subr.bf16.mxu0 %v14755_v55  ;;  %v14827_v55 = vld [vmem:[%s20967_s8 + $0x168] ss:$16 sps:$4 sm:$0xff]  }
 0x288   :  { %5628 = vmatpush2.bf16.msra.mxu1 %v14842_v45  ;;  %v14835_v45 = vld [vmem:[%s20967_s8 + $0x14c] ss:$16 sps:$4 sm:$0xff]  }
 0x289   :  { %5629 = vmatprep.subr.bf16.mxu1 %v14850_v58  ;;  %v14833_v58 = vld [vmem:[%s20967_s8 + $0x148] ss:$16 sps:$4 sm:$0xff]  }
 0x28a   :  { %5589 = vmatpush2.bf16.msra.mxu0 %v14753_v7  ;;  %v14841_v7 = vld [vmem:[%s20967_s8 + $0x12c] ss:$16 sps:$4 sm:$0xff]  }
 0x28b   :  { %5590 = vmatprep.subr.bf16.mxu0 %v14758_v59  ;;  %v17651_v59 = vsub.s32 7, %v15508_v44  ;;  %v14845_v44 = vld [vmem:[%s20967_s8 + $0x108] ss:$16 sps:$4 sm:$0xff]  }
 0x28c   :  { %5630 = vmatpush2.bf16.msra.mxu1 %v14848_v41  ;;  %v14839_v41 = vld [vmem:[%s20967_s8 + $0x128] ss:$16 sps:$4 sm:$0xff]  }
 0x28d   :  { %5631 = vmatprep.subr.bf16.mxu1 %v14856_v62  ;;  %v14847_v62 = vld [vmem:[%s20967_s8 + $0x10c] ss:$16 sps:$4 sm:$0xff]   ;;  %v676_v40 = vrot.slane %v17125_v46, %v17651_v59 }
 0x28e   :  { %5591 = vmatpush2.bf16.msra.mxu0 %v14756_v9  ;;  %v672_v9 = vrot.slane %v17125_v46, %v17648_v39  ;;  %v14859_v46 = vld [vmem:[%s20967_s8 + $0x4cc] ss:$16 sps:$4 sm:$0xff]  }
 0x28f   :  { %5592 = vmatprep.subr.bf16.mxu0 %v14761_v3  ;;  %v14853_v3 = vld [vmem:[%s20967_s8 + $0x4ec] ss:$16 sps:$4 sm:$0xff]  }
 0x290   :  { %5632 = vmatpush2.bf16.msra.mxu1 %v14854_v1 }
 0x291   :  { %5633 = vmatprep.subr.bf16.mxu1 %v14862_v11 }
 0x292   :  { %5593 = vmatpush2.bf16.msra.mxu0 %v14759_v50  ;;  %v14851_v50 = vld [vmem:[%s20967_s8 + $0x4e8] ss:$16 sps:$4 sm:$0xff]  }
 0x293   :  { %5644 = vmatprep.subr.bf16.mxu0 %v14764_v25 }
 0x294   :  { %5634 = vmatpush2.bf16.msra.mxu1 %v14860_v4 }
 0x295   :  { %5685 = vmatprep.subr.bf16.mxu1 %v14868_v16  ;;  %v17559_v12 = vpop.f32.mrf.mxu0  ;;  %5595 = vmatmul.mubr.bf16.vlgmr.msra.gmra.mxu0 %v17554_v8 }
 0x296   :  { %5645 = vmatpush1.bf16.msra.mxu0 %v14762_v60  ;;  %5676 = vmatprep.mubr.bf16.mxu0 %v17138_v2  ;;  %v14768_v2 = vld [vmem:[%s20967_s8 + $0xa8] ss:$16 sps:$4 sm:$0xff]   ;;  %v3772_v1 = vadd.f32 %v17559_v12, %v672_v9  ;;  %v14907_v9 = vld [vmem:[%s20967_s8 + $0x5cc] ss:$16 sps:$4 sm:$0xff]  }
 0x297   :  { %v17562_v13 = vpop.f32.mrf.mxu1  ;;  %v17568_v19 = vpop.f32.mrf.mxu0  ;;  %5646 = vmatprep.subr.bf16.mxu0 %v14767_v10  ;;  %v14857_v10 = vld [vmem:[%s20967_s8 + $0x4c8] ss:$16 sps:$4 sm:$0xff]  }
 0x298   :  { %v3774_v11 = vadd.f32 %v17568_v19, %v676_v40  ;;  %v3813_v14 = vadd.f32 %v17562_v13, %v3772_v1  ;;  %v14865_v13 = vld [vmem:[%s20967_s8 + $0x4ac] ss:$16 sps:$4 sm:$0xff]   ;;  %v14902_v40 = vld [vmem:[%s20967_s8 + $0x228] ss:$16 sps:$4 sm:$0xff]  }
 0x299   :  { %v17573_v23 = vpop.f32.mrf.mxu1  ;;  %v3775_v24 = vpop.f32.mrf.mxu0  ;;  %v14913_v1 = vld [vmem:[%s20967_s8 + $0x5ac] ss:$16 sps:$4 sm:$0xff]  }
 0x29a   :  { %5647 = vmatpush1.bf16.msra.mxu0 %v14765_v15  ;;  %v3815_v4 = vadd.f32 %v17573_v23, %v3774_v11  ;;  %v14908_v11 = vld [vmem:[%s20967_s8 + $0x208] ss:$16 sps:$4 sm:$0xff]  }
 0x29b   :  { %v3816_v26 = vpop.f32.mrf.mxu1  ;;  %v3776_v27 = vpop.f32.mrf.mxu0  ;;  %5648 = vmatprep.subr.bf16.mxu0 %v14770_v20 }
 0x29c   :  { %v14871_v27 = vld [vmem:[%s20967_s8 + $0x48c] ss:$16 sps:$4 sm:$0xff]  }
 0x29d   :  { %v3817_v29 = vpop.f32.mrf.mxu1 }
 0x29e   :  { %5649 = vmatpush1.bf16.msra.mxu0 %v14768_v2 }
 0x29f   :  { %5650 = vmatprep.subr.bf16.mxu0 %v14776_v28 }
 0x2a2   :  { %5651 = vmatpush1.bf16.msra.mxu0 %v14774_v30 }
 0x2a3   :  { %5652 = vmatprep.subr.bf16.mxu0 %v14782_v31  ;;  %v14866_v31 = vld [vmem:[%s20967_s8 + $0x2e8] ss:$16 sps:$4 sm:$0xff]  }
 0x2a6   :  { %5653 = vmatpush1.bf16.msra.mxu0 %v14780_v32 }
 0x2a7   :  { %5654 = vmatprep.subr.bf16.mxu0 %v14788_v34  ;;  %v14869_v34 = vld [vmem:[%s20967_s8 + $0x488] ss:$16 sps:$4 sm:$0xff]  }
 0x2aa   :  { %5655 = vmatpush1.bf16.msra.mxu0 %v14786_v57  ;;  %v14874_v57 = vld [vmem:[%s20967_s8 + $0x2cc] ss:$16 sps:$4 sm:$0xff]  }
 0x2ab   :  { %5656 = vmatprep.subr.bf16.mxu0 %v14794_v35  ;;  %v14877_v35 = vld [vmem:[%s20967_s8 + $0x46c] ss:$16 sps:$4 sm:$0xff]  }
 0x2ae   :  { %5657 = vmatpush1.bf16.msra.mxu0 %v14792_v63  ;;  %v14872_v63 = vld [vmem:[%s20967_s8 + $0x2c8] ss:$16 sps:$4 sm:$0xff]  }
 0x2af   :  { %5658 = vmatprep.subr.bf16.mxu0 %v14800_v6  ;;  %v14875_v6 = vld [vmem:[%s20967_s8 + $0x468] ss:$16 sps:$4 sm:$0xff]  }
 0x2b2   :  { %5659 = vmatpush1.bf16.msra.mxu0 %v14798_v42  ;;  %v14880_v42 = vld [vmem:[%s20967_s8 + $0x2ac] ss:$16 sps:$4 sm:$0xff]  }
 0x2b3   :  { %5660 = vmatprep.subr.bf16.mxu0 %v14806_v37  ;;  %v14883_v37 = vld [vmem:[%s20967_s8 + $0x44c] ss:$16 sps:$4 sm:$0xff]  }
 0x2b6   :  { %5661 = vmatpush2.bf16.msra.mxu0 %v14804_v5  ;;  %v14881_v5 = vld [vmem:[%s20967_s8 + $0x448] ss:$16 sps:$4 sm:$0xff]  }
 0x2b7   :  { %5662 = vmatprep.subr.bf16.mxu0 %v14812_v47  ;;  %v14886_v47 = vld [vmem:[%s20967_s8 + $0x28c] ss:$16 sps:$4 sm:$0xff]  }
 0x2ba   :  { %5663 = vmatpush2.bf16.msra.mxu0 %v14810_v61  ;;  %v14889_v61 = vld [vmem:[%s20967_s8 + $0x42c] ss:$16 sps:$4 sm:$0xff]  }
 0x2bb   :  { %5664 = vmatprep.subr.bf16.mxu0 %v14818_v48  ;;  %v14884_v48 = vld [vmem:[%s20967_s8 + $0x288] ss:$16 sps:$4 sm:$0xff]  }
 0x2be   :  { %5665 = vmatpush2.bf16.msra.mxu0 %v14816_v49  ;;  %v14887_v49 = vld [vmem:[%s20967_s8 + $0x428] ss:$16 sps:$4 sm:$0xff]  }
 0x2bf   :  { %5666 = vmatprep.subr.bf16.mxu0 %v14823_v51  ;;  %v14892_v51 = vld [vmem:[%s20967_s8 + $0x26c] ss:$16 sps:$4 sm:$0xff]  }
 0x2c2   :  { %5667 = vmatpush2.bf16.msra.mxu0 %v14821_v52  ;;  %v14895_v52 = vld [vmem:[%s20967_s8 + $0x40c] ss:$16 sps:$4 sm:$0xff]  }
 0x2c3   :  { %5668 = vmatprep.subr.bf16.mxu0 %v14829_v54  ;;  %v14890_v54 = vld [vmem:[%s20967_s8 + $0x268] ss:$16 sps:$4 sm:$0xff]  }
 0x2c6   :  { %5669 = vmatpush2.bf16.msra.mxu0 %v14827_v55  ;;  %v14893_v55 = vld [vmem:[%s20967_s8 + $0x408] ss:$16 sps:$4 sm:$0xff]  }
 0x2c7   :  { %5670 = vmatprep.subr.bf16.mxu0 %v14835_v45  ;;  %v14898_v45 = vld [vmem:[%s20967_s8 + $0x24c] ss:$16 sps:$4 sm:$0xff]  }
 0x2ca   :  { %5671 = vmatpush2.bf16.msra.mxu0 %v14833_v58  ;;  %v14901_v58 = vld [vmem:[%s20967_s8 + $0x5ec] ss:$16 sps:$4 sm:$0xff]  }
 0x2cb   :  { %5672 = vmatprep.subr.bf16.mxu0 %v14841_v7  ;;  %v14896_v7 = vld [vmem:[%s20967_s8 + $0x248] ss:$16 sps:$4 sm:$0xff]  }
 0x2ce   :  { %5673 = vmatpush2.bf16.msra.mxu0 %v14839_v41  ;;  %v14899_v41 = vld [vmem:[%s20967_s8 + $0x5e8] ss:$16 sps:$4 sm:$0xff]  }
 0x2cf   :  { %5674 = vmatprep.subr.bf16.mxu0 %v14847_v62  ;;  %v14904_v62 = vld [vmem:[%s20967_s8 + $0x22c] ss:$16 sps:$4 sm:$0xff]  }
 0x2d2   :  { %5675 = vmatpush2.bf16.msra.mxu0 %v14845_v44  ;;  %v14905_v44 = vld [vmem:[%s20967_s8 + $0x5c8] ss:$16 sps:$4 sm:$0xff]  }
 0x2d3   :  { %5726 = vmatprep.subr.bf16.mxu0 %v14853_v3  ;;  %v14910_v3 = vld [vmem:[%s20967_s8 + $0x20c] ss:$16 sps:$4 sm:$0xff]  }
 0x2d5   :  { %v3853_v25 = vpop.f32.mrf.mxu0  ;;  %5677 = vmatmul.mubr.bf16.vlgmr.msra.gmra.mxu0 %v17346_v36 }
 0x2d6   :  { %v3854_v16 = vadd.f32 %v3853_v25, %v3813_v14  ;;  %5727 = vmatpush1.bf16.msra.mxu0 %v14851_v50  ;;  %5758 = vmatprep.mubr.bf16.mxu0 %v17390_v0  ;;  %v14863_v0 = vld [vmem:[%s20967_s8 + $0x4a8] ss:$16 sps:$4 sm:$0xff]   ;;  %v14919_v14 = vld [vmem:[%s20967_s8 + $0x58c] ss:$16 sps:$4 sm:$0xff]  }
 0x2d7   :  { %v3894_v60 = vpop.f32.mrf.mxu1  ;;  %v3855_v12 = vpop.f32.mrf.mxu0  ;;  %5728 = vmatprep.subr.bf16.mxu0 %v14859_v46  ;;  %v14911_v50 = vld [vmem:[%s20967_s8 + $0x5a8] ss:$16 sps:$4 sm:$0xff]   ;;  %v14916_v46 = vld [vmem:[%s20967_s8 + $0x3ec] ss:$16 sps:$4 sm:$0xff]  }
 0x2d8   :  { %v3895_v15 = vadd.f32 %v3894_v60, %v3854_v16  ;;  %v3856_v19 = vadd.f32 %v3855_v12, %v3815_v4  ;;  %v14914_v25 = vld [vmem:[%s20967_s8 + $0x3e8] ss:$16 sps:$4 sm:$0xff]   ;;  %v14922_v16 = vld [vmem:[%s20967_s8 + $0x3cc] ss:$16 sps:$4 sm:$0xff]  }
 0x2d9   :  { %v3896_v36 = vpop.f32.mrf.mxu1  ;;  %v3857_v20 = vpop.f32.mrf.mxu0  ;;  %v14917_v4 = vld [vmem:[%s20967_s8 + $0x588] ss:$16 sps:$4 sm:$0xff]   ;;  %v14925_v60 = vld [vmem:[%s20967_s8 + $0x56c] ss:$16 sps:$4 sm:$0xff]  }
 0x2da   :  { %v3897_v23 = vadd.f32 %v3896_v36, %v3856_v19  ;;  %5729 = vmatpush1.bf16.msra.mxu0 %v14857_v10  ;;  %v3907_v26 = vmax.f32 %v3895_v15, 0.0  ;;  %v14920_v10 = vld [vmem:[%s20967_s8 + $0x3c8] ss:$16 sps:$4 sm:$0xff]   ;;  %v14931_v15 = vld [vmem:[%s20967_s8 + $0x54c] ss:$16 sps:$4 sm:$0xff]  }
 0x2db   :  { %v3898_v24 = vpop.f32.mrf.mxu1  ;;  %v3858_v2 = vpop.f32.mrf.mxu0  ;;  %5730 = vmatprep.subr.bf16.mxu0 %v14865_v13  ;;  %v14923_v12 = vld [vmem:[%s20967_s8 + $0x568] ss:$16 sps:$4 sm:$0xff]   ;;  %v14928_v13 = vld [vmem:[%s20967_s8 + $0x3ac] ss:$16 sps:$4 sm:$0xff]  }
 0x2dc   :  { %v3908_v28 = vmax.f32 %v3897_v23, 0.0  ;;  %v17698_v32 = vpack.c.bf16 %v3907_v26, %v3907_v26  ;;  %v14926_v19 = vld [vmem:[%s20967_s8 + $0x3a8] ss:$16 sps:$4 sm:$0xff]   ;;  %v14934_v20 = vld [vmem:[%s20967_s8 + $0x38c] ss:$16 sps:$4 sm:$0xff]  }
 0x2dd   :  { %v3899_v29 = vpop.f32.mrf.mxu1  ;;  %v14929_v36 = vld [vmem:[%s20967_s8 + $0x548] ss:$16 sps:$4 sm:$0xff]   ;;  %v14937_v23 = vld [vmem:[%s20967_s8 + $0x52c] ss:$16 sps:$4 sm:$0xff]  }
 0x2de   :  { %v17693_v30 = vpack.c.bf16 %v3908_v28, %v3908_v28  ;;  %5731 = vmatpush1.bf16.msra.mxu0 %v14863_v0  ;;  %v14932_v24 = vld [vmem:[%s20967_s8 + $0x388] ss:$16 sps:$4 sm:$0xff]   ;;  %v14940_v26 = vld [vmem:[%s20967_s8 + $0x36c] ss:$16 sps:$4 sm:$0xff]  }
 0x2df   :  { %5732 = vmatprep.subr.bf16.mxu0 %v14871_v27  ;;  %v14935_v0 = vld [vmem:[%s20967_s8 + $0x528] ss:$16 sps:$4 sm:$0xff]   ;;  %v14943_v2 = vld [vmem:[%s20967_s8 + $0x50c] ss:$16 sps:$4 sm:$0xff]  }
 0x2e0   :  { %13654 = vmatprep.mubr.msk.bf16.mxu1 %vm5463_vm1, %v17693_v30  ;;  %v14938_v27 = vld [vmem:[%s20967_s8 + $0x368] ss:$16 sps:$4 sm:$0xff]   ;;  %v14946_v29 = vld [vmem:[%s20967_s8 + $0x34c] ss:$16 sps:$4 sm:$0xff]  }
 0x2e1   :  { %5636 = vmatmul.mubr.bf16.vlgmr.msra.gmra.mxu1 %v17698_v32  ;;  %v14941_v28 = vld [vmem:[%s20967_s8 + $0x508] ss:$16 sps:$4 sm:$0xff]  }
 0x2e2   :  { %5686 = vmatpush1.bf16.msra.mxu1 %v14866_v31  ;;  %5717 = vmatprep.mubr.bf16.mxu1 %v17144_v22  ;;  %v14878_v22 = vld [vmem:[%s20967_s8 + $0x2a8] ss:$16 sps:$4 sm:$0xff]   ;;  %v17857_v31 = vld [vmem:[%s20968_s2] sm:$0xf] }
 0x2e3   :  { %5733 = vmatpush1.bf16.msra.mxu0 %v14869_v34  ;;  %5687 = vmatprep.subr.bf16.mxu1 %v14874_v57  ;;  %v15002_v34 = vld [vmem:[%s20969_s7 + $0x74] ss:$8 sps:$4 sm:$0xff]   ;;  %v14944_v57 = vld [vmem:[%s20967_s8 + $0x348] ss:$16 sps:$4 sm:$0xff]  }
 0x2e4   :  { %5734 = vmatprep.subr.bf16.mxu0 %v14877_v35  ;;  %v4176_v35 = vrot.slane %v17857_v31, %v16297_v38 }
 0x2e6   :  { %5688 = vmatpush1.bf16.msra.mxu1 %v14872_v63  ;;  %v14949_v63 = vld [vmem:[%s20967_s8 + $0x32c] ss:$16 sps:$4 sm:$0xff]  }
 0x2e7   :  { %5735 = vmatpush1.bf16.msra.mxu0 %v14875_v6  ;;  %5689 = vmatprep.subr.bf16.mxu1 %v14880_v42  ;;  %v15000_v6 = vld [vmem:[%s20969_s7 + $0x70] ss:$8 sps:$4 sm:$0xff]   ;;  %v4180_v42 = vrot.slane %v17857_v31, %v16309_v43 }
 0x2e8   :  { %5736 = vmatprep.subr.bf16.mxu0 %v14883_v37  ;;  %v15005_v37 = vld [vmem:[%s20969_s7 + $0x64] ss:$8 sps:$4 sm:$0xff]  }
 0x2ea   :  { %5690 = vmatpush1.bf16.msra.mxu1 %v14878_v22 }
 0x2eb   :  { %5737 = vmatpush1.bf16.msra.mxu0 %v14881_v5  ;;  %5691 = vmatprep.subr.bf16.mxu1 %v14886_v47 }
 0x2ec   :  { %5738 = vmatprep.subr.bf16.mxu0 %v14889_v61  ;;  %v14947_v61 = vld [vmem:[%s20967_s8 + $0x328] ss:$16 sps:$4 sm:$0xff]  }
 0x2ee   :  { %5692 = vmatpush1.bf16.msra.mxu1 %v14884_v48 }
 0x2ef   :  { %5739 = vmatpush1.bf16.msra.mxu0 %v14887_v49  ;;  %5693 = vmatprep.subr.bf16.mxu1 %v14892_v51  ;;  %v14952_v49 = vld [vmem:[%s20967_s8 + $0x30c] ss:$16 sps:$4 sm:$0xff]   ;;  %v15003_v51 = vld [vmem:[%s20969_s7 + $0x60] ss:$8 sps:$4 sm:$0xff]  }
 0x2f0   :  { %5740 = vmatprep.subr.bf16.mxu0 %v14895_v52 }
 0x2f2   :  { %5694 = vmatpush1.bf16.msra.mxu1 %v14890_v54 }
 0x2f3   :  { %5741 = vmatpush1.bf16.msra.mxu0 %v14893_v55  ;;  %5695 = vmatprep.subr.bf16.mxu1 %v14898_v45 }
 0x2f4   :  { %5742 = vmatprep.subr.bf16.mxu0 %v14901_v58 }
 0x2f6   :  { %5696 = vmatpush1.bf16.msra.mxu1 %v14896_v7 }
 0x2f7   :  { %5743 = vmatpush2.bf16.msra.mxu0 %v14899_v41  ;;  %5697 = vmatprep.subr.bf16.mxu1 %v14904_v62  ;;  %v14950_v41 = vld [vmem:[%s20967_s8 + $0x308] ss:$16 sps:$4 sm:$0xff]  }
 0x2f8   :  { %5744 = vmatprep.subr.bf16.mxu0 %v14907_v9  ;;  %v14955_v9 = vld [vmem:[%s20967_s8 + $0x6ec] ss:$16 sps:$4 sm:$0xff]  }
 0x2fa   :  { %5698 = vmatpush1.bf16.msra.mxu1 %v14902_v40  ;;  %v15006_v40 = vld [vmem:[%s20969_s7 + $0x50] ss:$8 sps:$4 sm:$0xff]  }
 0x2fb   :  { %5745 = vmatpush2.bf16.msra.mxu0 %v14905_v44  ;;  %5699 = vmatprep.subr.bf16.mxu1 %v14910_v3  ;;  %v15011_v3 = vld [vmem:[%s20969_s7 + $0x44] ss:$8 sps:$4 sm:$0xff]  }
 0x2fc   :  { %5746 = vmatprep.subr.bf16.mxu0 %v14913_v1  ;;  %v14953_v1 = vld [vmem:[%s20967_s8 + $0x6e8] ss:$16 sps:$4 sm:$0xff]  }
 0x2fe   :  { %5700 = vmatpush1.bf16.msra.mxu1 %v14908_v11  ;;  %v14958_v11 = vld [vmem:[%s20967_s8 + $0x6cc] ss:$16 sps:$4 sm:$0xff]  }
 0x2ff   :  { %5747 = vmatpush2.bf16.msra.mxu0 %v14911_v50  ;;  %5701 = vmatprep.subr.bf16.mxu1 %v14916_v46  ;;  %v15009_v50 = vld [vmem:[%s20969_s7 + $0x40] ss:$8 sps:$4 sm:$0xff]   ;;  %v15014_v46 = vld [vmem:[%s20969_s7 + $0x34] ss:$8 sps:$4 sm:$0xff]  }
 0x300   :  { %5748 = vmatprep.subr.bf16.mxu0 %v14919_v14  ;;  %v14956_v14 = vld [vmem:[%s20967_s8 + $0x6c8] ss:$16 sps:$4 sm:$0xff]  }
 0x302   :  { %5702 = vmatpush2.bf16.msra.mxu1 %v14914_v25  ;;  %v14961_v25 = vld [vmem:[%s20967_s8 + $0x6ac] ss:$16 sps:$4 sm:$0xff]  }
 0x303   :  { %5749 = vmatpush2.bf16.msra.mxu0 %v14917_v4  ;;  %5703 = vmatprep.subr.bf16.mxu1 %v14922_v16  ;;  %v15012_v4 = vld [vmem:[%s20969_s7 + $0x30] ss:$8 sps:$4 sm:$0xff]   ;;  %v14964_v16 = vld [vmem:[%s20967_s8 + $0x68c] ss:$16 sps:$4 sm:$0xff]  }
 0x304   :  { %5750 = vmatprep.subr.bf16.mxu0 %v14925_v60  ;;  %v15015_v60 = vld [vmem:[%s20969_s7 + $0x20] ss:$8 sps:$4 sm:$0xff]  }
 0x306   :  { %5704 = vmatpush2.bf16.msra.mxu1 %v14920_v10  ;;  %v15020_v10 = vld [vmem:[%s20969_s7 + $0x14] ss:$8 sps:$4 sm:$0xff]  }
 0x307   :  { %5751 = vmatpush2.bf16.msra.mxu0 %v14923_v12  ;;  %5705 = vmatprep.subr.bf16.mxu1 %v14928_v13  ;;  %v14962_v12 = vld [vmem:[%s20967_s8 + $0x688] ss:$16 sps:$4 sm:$0xff]   ;;  %v14967_v13 = vld [vmem:[%s20967_s8 + $0x66c] ss:$16 sps:$4 sm:$0xff]  }
 0x308   :  { %5752 = vmatprep.subr.bf16.mxu0 %v14931_v15  ;;  %v15018_v15 = vld [vmem:[%s20969_s7 + $0x10] ss:$8 sps:$4 sm:$0xff]  }
 0x30a   :  { %5706 = vmatpush2.bf16.msra.mxu1 %v14926_v19  ;;  %v15023_v19 = vld [vmem:[%s20969_s7 + $0x4] ss:$8 sps:$4 sm:$0xff]  }
 0x30b   :  { %5753 = vmatpush2.bf16.msra.mxu0 %v14929_v36  ;;  %5707 = vmatprep.subr.bf16.mxu1 %v14934_v20  ;;  %v14965_v36 = vld [vmem:[%s20967_s8 + $0x668] ss:$16 sps:$4 sm:$0xff]   ;;  %v14970_v20 = vld [vmem:[%s20967_s8 + $0x64c] ss:$16 sps:$4 sm:$0xff]  }
 0x30c   :  { %5754 = vmatprep.subr.bf16.mxu0 %v14937_v23  ;;  %v15021_v23 = vld [vmem:[%s20969_s7] ss:$8 sps:$4 sm:$0xff]  }
 0x30e   :  { %5708 = vmatpush2.bf16.msra.mxu1 %v14932_v24  ;;  %v15026_v24 = vld [vmem:[%s20969_s7 + $0xf4] ss:$8 sps:$4 sm:$0xff]  }
 0x30f   :  { %5755 = vmatpush2.bf16.msra.mxu0 %v14935_v0  ;;  %5709 = vmatprep.subr.bf16.mxu1 %v14940_v26  ;;  %v14968_v0 = vld [vmem:[%s20967_s8 + $0x648] ss:$16 sps:$4 sm:$0xff]   ;;  %v14973_v26 = vld [vmem:[%s20967_s8 + $0x62c] ss:$16 sps:$4 sm:$0xff]  }
 0x310   :  { %5756 = vmatprep.subr.bf16.mxu0 %v14943_v2  ;;  %v15024_v2 = vld [vmem:[%s20969_s7 + $0xf0] ss:$8 sps:$4 sm:$0xff]  }
 0x312   :  { %5710 = vmatpush2.bf16.msra.mxu1 %v14938_v27  ;;  %v15029_v27 = vld [vmem:[%s20969_s7 + $0xe4] ss:$8 sps:$4 sm:$0xff]  }
 0x313   :  { %5757 = vmatpush2.bf16.msra.mxu0 %v14941_v28  ;;  %5711 = vmatprep.subr.bf16.mxu1 %v14946_v29  ;;  %v14971_v28 = vld [vmem:[%s20967_s8 + $0x628] ss:$16 sps:$4 sm:$0xff]   ;;  %v14976_v29 = vld [vmem:[%s20967_s8 + $0x60c] ss:$16 sps:$4 sm:$0xff]  }
 0x314   :  { %6204 = vmatprep.subr.bf16.mxu0 %v15002_v34  ;;  %v15027_v34 = vld [vmem:[%s20969_s7 + $0xe0] ss:$8 sps:$4 sm:$0xff]  }
 0x315   :  { %v5514_v22 = vpop.f32.mrf.mxu0 }
 0x316   :  { %v5515_v5 = vadd.f32 %v5514_v22, %v4176_v35  ;;  %5712 = vmatpush2.bf16.msra.mxu1 %v14944_v57  ;;  %5759 = vmatmul.mubr.bf16.vlgmr.msra.gmra.mxu0 %v17554_v8  ;;  %v15008_v8 = vld [vmem:[%s20969_s7 + $0x54] ss:$8 sps:$4 sm:$0xff]   ;;  %v4170_v57 = vld [vmem:[%s20967_s8 + $0x7e8] sm:$0xff] }
 0x317   :  { %v5555_v47 = vpop.f32.mrf.mxu1  ;;  %v5516_v48 = vpop.f32.mrf.mxu0  ;;  %5713 = vmatprep.subr.bf16.mxu1 %v14949_v63  ;;  %6205 = vmatpush1.bf16.msra.mxu0 %v15000_v6  ;;  %v15032_v35 = vld [vmem:[%s20969_s7 + $0xd4] ss:$8 sps:$4 sm:$0xff]   ;;  %v14974_v63 = vld [vmem:[%s20967_s8 + $0x608] ss:$16 sps:$4 sm:$0xff]   ;;  %v13652_v6 = vcombine.high %v4170_v57, %v4170_v57  ;;  %v15035_v22 = vld [vmem:[%s20969_s7 + $0xc4] ss:$8 sps:$4 sm:$0xff]  }
 0x318   :  { %v17888_v52 = vadd.f32 %v5555_v47, %v5515_v5  ;;  %v5517_v54 = vadd.f32 %v5516_v48, %v4180_v42  ;;  %6206 = vmatprep.subr.bf16.mxu0 %v15005_v37  ;;  %v13651_v42 = vcombine.low %v4170_v57, %v4170_v57  ;;  %v15030_v37 = vld [vmem:[%s20969_s7 + $0xd0] ss:$8 sps:$4 sm:$0xff]   ;;  %v14981_v47 = vld [vmem:[%s20967_s8 + $0x7cc] ss:$16 sps:$4 sm:$0xff]  }
 0x319   :  { %v5557_v55 = vpop.f32.mrf.mxu1  ;;  %v5518_v45 = vpop.f32.mrf.mxu0  ;;  %v15038_v48 = vld [vmem:[%s20969_s7 + $0xb4] ss:$8 sps:$4 sm:$0xff]  }
 0x31a   :  { %v17893_v58 = vadd.f32 %v5557_v55, %v5517_v54  ;;  %5714 = vmatpush2.bf16.msra.mxu1 %v14947_v61  ;;  %v5475_v5 = vsel %vm5467_vm0, %v13651_v42, 0  ;;  %v15033_v61 = vld [vmem:[%s20969_s7 + $0xc0] ss:$8 sps:$4 sm:$0xff]   ;;  %v15036_v54 = vld [vmem:[%s20969_s7 + $0xb0] ss:$8 sps:$4 sm:$0xff]  }
 0x31b   :  { %v5559_v7 = vpop.f32.mrf.mxu1  ;;  %v5519_v62 = vpop.f32.mrf.mxu0  ;;  %5715 = vmatprep.subr.bf16.mxu1 %v14952_v49  ;;  %6207 = vmatpush1.bf16.msra.mxu0 %v15003_v51  ;;  %v14979_v49 = vld [vmem:[%s20967_s8 + $0x7c8] ss:$16 sps:$4 sm:$0xff]   ;;  %v14984_v51 = vld [vmem:[%s20967_s8 + $0x7ac] ss:$16 sps:$4 sm:$0xff]  }
 0x31c   :  { %6208 = vmatprep.subr.bf16.mxu0 %v15008_v8  ;;  %v15041_v55 = vld [vmem:[%s20969_s7 + $0xa4] ss:$8 sps:$4 sm:$0xff]   ;;  %v14982_v8 = vld [vmem:[%s20967_s8 + $0x7a8] ss:$16 sps:$4 sm:$0xff]  }
 0x31d   :  { %v5560_v44 = vpop.f32.mrf.mxu1  ;;  %v14987_v45 = vld [vmem:[%s20967_s8 + $0x78c] ss:$16 sps:$4 sm:$0xff]   ;;  %v15039_v7 = vld [vmem:[%s20969_s7 + $0xa0] ss:$8 sps:$4 sm:$0xff]   ;;  %v15074_v42 = vld [vmem:[%s20969_s7 + $0x1d0] ss:$8 sps:$4 sm:$0xff]  }
 0x31e   :  { %5716 = vmatpush2.bf16.msra.mxu1 %v14950_v41  ;;  %v15044_v41 = vld [vmem:[%s20969_s7 + $0x94] ss:$8 sps:$4 sm:$0xff]   ;;  %v14985_v62 = vld [vmem:[%s20967_s8 + $0x788] ss:$16 sps:$4 sm:$0xff]   ;;  %v15047_v44 = vld [vmem:[%s20969_s7 + $0x84] ss:$8 sps:$4 sm:$0xff]  }
 0x31f   :  { %5767 = vmatprep.subr.bf16.mxu1 %v14955_v9  ;;  %6209 = vmatpush1.bf16.msra.mxu0 %v15006_v40  ;;  %v14990_v9 = vld [vmem:[%s20967_s8 + $0x76c] ss:$16 sps:$4 sm:$0xff]   ;;  %v15042_v40 = vld [vmem:[%s20969_s7 + $0x90] ss:$8 sps:$4 sm:$0xff]  }
 0x320   :  { %6210 = vmatprep.subr.bf16.mxu0 %v15011_v3  ;;  %v14988_v3 = vld [vmem:[%s20967_s8 + $0x768] ss:$16 sps:$4 sm:$0xff]  }
 0x321   :  { %5718 = vmatmul.mubr.bf16.vlgmr.msra.gmra.mxu1 %v17354_v33  ;;  %v15017_v33 = vld [vmem:[%s20969_s7 + $0x24] ss:$8 sps:$4 sm:$0xff]  }
 0x322   :  { %5768 = vmatpush1.bf16.msra.mxu1 %v14953_v1  ;;  %13656 = vmatprep.mubr.msk.bf16.mxu1 %vm5463_vm1, %v17693_v30  ;;  %v14959_v30 = vld [vmem:[%s20967_s8 + $0x6a8] ss:$16 sps:$4 sm:$0xff]   ;;  %v14993_v1 = vld [vmem:[%s20967_s8 + $0x74c] ss:$16 sps:$4 sm:$0xff]  }
 0x323   :  { %5769 = vmatprep.subr.bf16.mxu1 %v14958_v11  ;;  %6211 = vmatpush1.bf16.msra.mxu0 %v15009_v50  ;;  %v15045_v11 = vld [vmem:[%s20969_s7 + $0x80] ss:$8 sps:$4 sm:$0xff]  }
 0x324   :  { %6212 = vmatprep.subr.bf16.mxu0 %v15014_v46  ;;  %v14991_v50 = vld [vmem:[%s20967_s8 + $0x748] ss:$16 sps:$4 sm:$0xff]   ;;  %v14996_v46 = vld [vmem:[%s20967_s8 + $0x72c] ss:$16 sps:$4 sm:$0xff]  }
 0x326   :  { %5770 = vmatpush1.bf16.msra.mxu1 %v14956_v14 }
 0x327   :  { %5771 = vmatprep.subr.bf16.mxu1 %v14961_v25  ;;  %6213 = vmatpush1.bf16.msra.mxu0 %v15012_v4  ;;  %v14994_v4 = vld [vmem:[%s20967_s8 + $0x728] ss:$16 sps:$4 sm:$0xff]  }
 0x328   :  { %6214 = vmatprep.subr.bf16.mxu0 %v15017_v33 }
 0x32a   :  { %5772 = vmatpush1.bf16.msra.mxu1 %v14959_v30  ;;  %v14999_v30 = vld [vmem:[%s20967_s8 + $0x70c] ss:$16 sps:$4 sm:$0xff]  }
 0x32b   :  { %5773 = vmatprep.subr.bf16.mxu1 %v14964_v16  ;;  %6215 = vmatpush1.bf16.msra.mxu0 %v15015_v60 }
 0x32c   :  { %6216 = vmatprep.subr.bf16.mxu0 %v15020_v10 }
 0x32e   :  { %5774 = vmatpush1.bf16.msra.mxu1 %v14962_v12  ;;  %v15048_v12 = vld [vmem:[%s20969_s7 + $0x170] ss:$8 sps:$4 sm:$0xff]  }
 0x32f   :  { %5775 = vmatprep.subr.bf16.mxu1 %v14967_v13  ;;  %6217 = vmatpush1.bf16.msra.mxu0 %v15018_v15  ;;  %v15053_v13 = vld [vmem:[%s20969_s7 + $0x164] ss:$8 sps:$4 sm:$0xff]   ;;  %v15051_v15 = vld [vmem:[%s20969_s7 + $0x160] ss:$8 sps:$4 sm:$0xff]  }
 0x330   :  { %6218 = vmatprep.subr.bf16.mxu0 %v15023_v19  ;;  %v15054_v19 = vld [vmem:[%s20969_s7 + $0x150] ss:$8 sps:$4 sm:$0xff]  }
 0x332   :  { %5776 = vmatpush1.bf16.msra.mxu1 %v14965_v36  ;;  %v15059_v36 = vld [vmem:[%s20969_s7 + $0x144] ss:$8 sps:$4 sm:$0xff]  }
 0x333   :  { %5777 = vmatprep.subr.bf16.mxu1 %v14970_v20  ;;  %6219 = vmatpush1.bf16.msra.mxu0 %v15021_v23  ;;  %v15057_v20 = vld [vmem:[%s20969_s7 + $0x140] ss:$8 sps:$4 sm:$0xff]   ;;  %v15062_v23 = vld [vmem:[%s20969_s7 + $0x134] ss:$8 sps:$4 sm:$0xff]  }
 0x334   :  { %6220 = vmatprep.subr.bf16.mxu0 %v15026_v24  ;;  %v15060_v24 = vld [vmem:[%s20969_s7 + $0x130] ss:$8 sps:$4 sm:$0xff]  }
 0x336   :  { %5778 = vmatpush1.bf16.msra.mxu1 %v14968_v0  ;;  %v15065_v0 = vld [vmem:[%s20969_s7 + $0x124] ss:$8 sps:$4 sm:$0xff]  }
 0x337   :  { %5779 = vmatprep.subr.bf16.mxu1 %v14973_v26  ;;  %6221 = vmatpush2.bf16.msra.mxu0 %v15024_v2  ;;  %v15063_v26 = vld [vmem:[%s20969_s7 + $0x120] ss:$8 sps:$4 sm:$0xff]   ;;  %v15068_v2 = vld [vmem:[%s20969_s7 + $0x114] ss:$8 sps:$4 sm:$0xff]  }
 0x338   :  { %6222 = vmatprep.subr.bf16.mxu0 %v15029_v27  ;;  %v15066_v27 = vld [vmem:[%s20969_s7 + $0x110] ss:$8 sps:$4 sm:$0xff]  }
 0x33a   :  { %5780 = vmatpush1.bf16.msra.mxu1 %v14971_v28  ;;  %v15071_v28 = vld [vmem:[%s20969_s7 + $0x104] ss:$8 sps:$4 sm:$0xff]  }
 0x33b   :  { %5781 = vmatprep.subr.bf16.mxu1 %v14976_v29  ;;  %6223 = vmatpush2.bf16.msra.mxu0 %v15027_v34  ;;  %v5876_v29 = vld [vmem:[%s20969_s7 + $0x1e0] sm:$0xff] }
 0x33c   :  { %6224 = vmatprep.subr.bf16.mxu0 %v15032_v35  ;;  %v15069_v34 = vld [vmem:[%s20969_s7 + $0x100] ss:$8 sps:$4 sm:$0xff]   ;;  %v13718_v57 = vcombine.high %v5876_v29, %v5876_v29  ;;  %v13717_v35 = vcombine.low %v5876_v29, %v5876_v29 }
 0x33e   :  { %5782 = vmatpush1.bf16.msra.mxu1 %v14974_v63  ;;  %v6199_v63 = vsel %vm5467_vm0, %v13717_v35, 0 }
 0x33f   :  { %13655 = vmatprep.subr.msk.bf16.mxu1 %vm5467_vm0, %v13652_v6  ;;  %6225 = vmatpush2.bf16.msra.mxu0 %v15030_v37  ;;  %v15076_v6 = vld [vmem:[%s20969_s7 + $0x1d4] ss:$8 sps:$4 sm:$0xff]   ;;  %v15079_v37 = vld [vmem:[%s20969_s7 + $0x1c4] ss:$8 sps:$4 sm:$0xff]  }
 0x340   :  { %6226 = vmatprep.subr.bf16.mxu0 %v15035_v22  ;;  %v15077_v22 = vld [vmem:[%s20969_s7 + $0x1c0] ss:$8 sps:$4 sm:$0xff]  }
 0x342   :  { %5784 = vmatpush2.bf16.msra.mxu1 %v5475_v5  ;;  %v15082_v5 = vld [vmem:[%s20969_s7 + $0x1b4] ss:$8 sps:$4 sm:$0xff]  }
 0x343   :  { %5785 = vmatprep.subr.bf16.mxu1 %v14981_v47  ;;  %6227 = vmatpush2.bf16.msra.mxu0 %v15033_v61  ;;  %v15080_v47 = vld [vmem:[%s20969_s7 + $0x1b0] ss:$8 sps:$4 sm:$0xff]   ;;  %v15085_v61 = vld [vmem:[%s20969_s7 + $0x1a4] ss:$8 sps:$4 sm:$0xff]  }
 0x344   :  { %6228 = vmatprep.subr.bf16.mxu0 %v15038_v48 }
 0x346   :  { %5786 = vmatpush2.bf16.msra.mxu1 %v14979_v49  ;;  %v15083_v49 = vld [vmem:[%s20969_s7 + $0x1a0] ss:$8 sps:$4 sm:$0xff]  }
 0x347   :  { %5787 = vmatprep.subr.bf16.mxu1 %v14984_v51  ;;  %6229 = vmatpush2.bf16.msra.mxu0 %v15036_v54 }
 0x348   :  { %6230 = vmatprep.subr.bf16.mxu0 %v15041_v55 }
 0x34a   :  { %5788 = vmatpush2.bf16.msra.mxu1 %v14982_v8 }
 0x34b   :  { %5789 = vmatprep.subr.bf16.mxu1 %v14987_v45  ;;  %6231 = vmatpush2.bf16.msra.mxu0 %v15039_v7  ;;  %v15088_v7 = vld [vmem:[%s20969_s7 + $0x194] ss:$8 sps:$4 sm:$0xff]  }
 0x34c   :  { %6232 = vmatprep.subr.bf16.mxu0 %v15044_v41 }
 0x34e   :  { %5790 = vmatpush2.bf16.msra.mxu1 %v14985_v62  ;;  %v15086_v62 = vld [vmem:[%s20969_s7 + $0x190] ss:$8 sps:$4 sm:$0xff]  }
 0x34f   :  { %5791 = vmatprep.subr.bf16.mxu1 %v14990_v9  ;;  %6233 = vmatpush2.bf16.msra.mxu0 %v15042_v40 }
 0x350   :  { %6234 = vmatprep.subr.bf16.mxu0 %v15047_v44 }
 0x352   :  { %5792 = vmatpush2.bf16.msra.mxu1 %v14988_v3 }
 0x353   :  { %5793 = vmatprep.subr.bf16.mxu1 %v14993_v1  ;;  %6235 = vmatpush2.bf16.msra.mxu0 %v15045_v11  ;;  %v15091_v1 = vld [vmem:[%s20969_s7 + $0x184] ss:$8 sps:$4 sm:$0xff]  }
 0x355   :  { %v5596_v14 = vpop.f32.mrf.mxu0 }
 0x356   :  { %v18069_v25 = vadd.f32 %v5596_v14, %v17888_v52  ;;  %5794 = vmatpush2.bf16.msra.mxu1 %v14991_v50  ;;  %v14997_v52 = vld [vmem:[%s20967_s8 + $0x708] ss:$16 sps:$4 sm:$0xff]  }
 0x357   :  { %v5598_v33 = vpop.f32.mrf.mxu0  ;;  %5795 = vmatprep.subr.bf16.mxu1 %v14996_v46  ;;  %v15089_v50 = vld [vmem:[%s20969_s7 + $0x180] ss:$8 sps:$4 sm:$0xff]  }
 0x358   :  { %v18078_v16 = vadd.f32 %v5598_v33, %v17893_v58  ;;  %v15050_v58 = vld [vmem:[%s20969_s7 + $0x174] ss:$8 sps:$4 sm:$0xff]  }
 0x359   :  { %v5600_v60 = vpop.f32.mrf.mxu0 }
 0x35a   :  { %5796 = vmatpush2.bf16.msra.mxu1 %v14994_v4  ;;  %v4188_v60 = vrot.slane %v17857_v31, %v16712_v21 }
 0x35b   :  { %v5601_v10 = vpop.f32.mrf.mxu0  ;;  %5797 = vmatprep.subr.bf16.mxu1 %v14999_v30  ;;  %v4184_v30 = vrot.slane %v17857_v31, %v16709_v17 }
 0x35e   :  { %5798 = vmatpush2.bf16.msra.mxu1 %v14997_v52 }
 0x35f   :  { %6245 = vmatprep.subr.bf16.mxu1 %v15050_v58 }
 0x361   :  { %5800 = vmatmul.mubr.bf16.vlgmr.msra.gmra.mxu1 %v17698_v32  ;;  %v15056_v32 = vld [vmem:[%s20969_s7 + $0x154] ss:$8 sps:$4 sm:$0xff]  }
 0x362   :  { %6246 = vmatpush1.bf16.msra.mxu1 %v15048_v12 }
 0x363   :  { %6247 = vmatprep.subr.bf16.mxu1 %v15053_v13 }
 0x366   :  { %6248 = vmatpush1.bf16.msra.mxu1 %v15051_v15 }
 0x367   :  { %6249 = vmatprep.subr.bf16.mxu1 %v15056_v32 }
 0x36a   :  { %6250 = vmatpush1.bf16.msra.mxu1 %v15054_v19 }
 0x36b   :  { %6251 = vmatprep.subr.bf16.mxu1 %v15059_v36 }
 0x36e   :  { %6252 = vmatpush1.bf16.msra.mxu1 %v15057_v20 }
 0x36f   :  { %6253 = vmatprep.subr.bf16.mxu1 %v15062_v23  ;;  %v15311_v23 = vmov 0  }
 0x372   :  { %6254 = vmatpush1.bf16.msra.mxu1 %v15060_v24 }
 0x373   :  { %6255 = vmatprep.subr.bf16.mxu1 %v15065_v0 }
 0x376   :  { %6256 = vmatpush1.bf16.msra.mxu1 %v15063_v26 }
 0x377   :  { %6257 = vmatprep.subr.bf16.mxu1 %v15068_v2 }
 0x37a   :  { %6258 = vmatpush1.bf16.msra.mxu1 %v15066_v27 }
 0x37b   :  { %6259 = vmatprep.subr.bf16.mxu1 %v15071_v28 }
 0x37e   :  { %6260 = vmatpush1.bf16.msra.mxu1 %v15069_v34 }
 0x37f   :  { %13719 = vmatprep.subr.msk.bf16.mxu1 %vm5467_vm0, %v13718_v57  ;;  %v15092_v57 = vld [vmem:[%s20970_s5 + $0x38] sm:$0xff]  }
 0x382   :  { %6264 = vmatpush2.bf16.msra.mxu1 %v6199_v63  ;;  %v15093_v63 = vld [vmem:[%s20970_s5 + $0x30] sm:$0xff]  }
 0x383   :  { %6265 = vmatprep.subr.bf16.mxu1 %v15076_v6  ;;  %v15094_v6 = vld [vmem:[%s20970_s5 + $0x28] sm:$0xff]  }
 0x386   :  { %6266 = vmatpush2.bf16.msra.mxu1 %v15074_v42  ;;  %v15095_v42 = vld [vmem:[%s20970_s5 + $0x20] sm:$0xff]  }
 0x387   :  { %6267 = vmatprep.subr.bf16.mxu1 %v15079_v37  ;;  %v15096_v37 = vld [vmem:[%s20970_s5 + $0x18] sm:$0xff]  }
 0x38a   :  { %6268 = vmatpush2.bf16.msra.mxu1 %v15077_v22  ;;  %v15097_v22 = vld [vmem:[%s20970_s5 + $0x10] sm:$0xff]  }
 0x38b   :  { %6269 = vmatprep.subr.bf16.mxu1 %v15082_v5  ;;  %v15098_v5 = vld [vmem:[%s20970_s5 + $0x8] sm:$0xff]  }
 0x38e   :  { %6270 = vmatpush2.bf16.msra.mxu1 %v15080_v47  ;;  %v15099_v47 = vld [vmem:[%s20970_s5] sm:$0xff]  }
 0x38f   :  { %6271 = vmatprep.subr.bf16.mxu1 %v15085_v61  ;;  %v15100_v61 = vld [vmem:[%s20970_s5 + $0x60] sm:$0xff]  }
 0x392   :  { %6272 = vmatpush2.bf16.msra.mxu1 %v15083_v49  ;;  %v15102_v49 = vld [vmem:[%s20970_s5 + $0x50] sm:$0xff]  }
 0x393   :  { %6273 = vmatprep.subr.bf16.mxu1 %v15088_v7  ;;  %v15104_v7 = vld [vmem:[%s20970_s5 + $0x40] sm:$0xff]  }
 0x395   :  { %v5678_v48 = vpop.f32.mrf.mxu0 }
 0x396   :  { %6274 = vmatpush2.bf16.msra.mxu1 %v15086_v62  ;;  %v5679_v52 = vadd.f32 %v5678_v48, %v4184_v30  ;;  %v15101_v48 = vld [vmem:[%s20970_s5 + $0x58] sm:$0xff]   ;;  %v15312_v62 = vmov 0.0  }
 0x397   :  { %v5680_v51 = vpop.f32.mrf.mxu0  ;;  %6275 = vmatprep.subr.bf16.mxu1 %v15091_v1  ;;  %14593 = vmatprep.subr.bf16.mxu0 %v15312_v62 }
 0x398   :  { %v5681_v12 = vadd.f32 %v5680_v51, %v4188_v60 }
 0x399   :  { %v5682_v54 = vpop.f32.mrf.mxu0 }
 0x39a   :  { %6276 = vmatpush2.bf16.msra.mxu1 %v15089_v50 }
 0x39b   :  { %v5683_v55 = vpop.f32.mrf.mxu0  ;;  %6405 = vmatprep.subr.bf16.mxu1 %v15311_v23 }
 0x39c   :  { %v15103_v55 = vld [vmem:[%s20970_s5 + $0x48] sm:$0xff]  }
 0x3a1   :  { %v5637_v8 = vpop.f32.mrf.mxu1 }
 0x3a2   :  { %v5638_v45 = vadd.f32 %v5637_v8, %v18069_v25 }
 0x3a3   :  { %v5639_v41 = vpop.f32.mrf.mxu1 }
 0x3a4   :  { %v5640_v9 = vadd.f32 %v5639_v41, %v18078_v16  ;;  %v5808_v40 = vmax.f32 %v5638_v45, 0.0  ;;  %v15105_v41 = vld [vmem:[%s20934_s10 + $0x8] sm:$0xff]  }
 0x3a5   :  { %v5641_v44 = vpop.f32.mrf.mxu1 }
 0x3a6   :  { %v5809_v3 = vmax.f32 %v5640_v9, 0.0  ;;  %v5812_v14 = vpack.c.bf16 %v5808_v40, %v5808_v40  ;;  %v5877_v9 = vld [vmem:[%s20971_s26] sm:$0x3] }
 0x3a7   :  { %v5642_v11 = vpop.f32.mrf.mxu1  ;;  %v5882_v40 = vrot.slane %v5877_v9, %v16297_v38  ;;  %v5886_v44 = vrot.slane %v5877_v9, %v16309_v43 }
 0x3a8   :  { %v5813_v46 = vpack.c.bf16 %v5809_v3, %v5809_v3 }
 0x3aa   :  { %6236 = vmatprep.mubr.bf16.mxu0 %v5813_v46 }
 0x3ab   :  { %6237 = vmatmul.mubr.bf16.vlgmr.msra.gmra.mxu0 %v5812_v14 }
 0x3ac   :  { %14594 = vmatpush3.bf16.msra.mxu0 %v15105_v41  ;;  %14597 = vmatprep.mubr.msk.bf16.mxu0 %vm15313_vm4, %v15312_v62  ;;  %v13736_v41 = vld [vmem:[%s20935_s11] ss:$0 sm:$0xff] }
 0x3ad   :  { %14595 = vmatprep.subr.bf16.mxu0 %v15312_v62 }
 0x3d6   :  { %v5760_v25 = vpop.f32.mrf.mxu0 }
 0x3d8   :  { %v5762_v4 = vpop.f32.mrf.mxu0 }
 0x3da   :  { %v5764_v33 = vpop.f32.mrf.mxu0 }
 0x3dc   :  { %v5765_v16 = vpop.f32.mrf.mxu0 }
 0x3e1   :  { %v5719_v10 = vpop.f32.mrf.mxu1 }
 0x3e2   :  { %v5720_v58 = vadd.f32 %v5719_v10, %v5679_v52  ;;  %v15106_v52 = vld [vmem:[%s20934_s10] sm:$0xff]  }
 0x3e3   :  { %v5721_v13 = vpop.f32.mrf.mxu1  ;;  %14596 = vmatpush3.bf16.msra.mxu0 %v15106_v52  ;;  %v13721_v10 = vld [vmem:[%s20933_s9] ss:$0 sm:$0xff] }
 0x3e4   :  { %v5722_v15 = vadd.f32 %v5721_v13, %v5681_v12  ;;  %v5761_v32 = vadd.f32 %v5760_v25, %v5720_v58  ;;  %14601 = vmatprep.subr.bf16.mxu0 %v15312_v62 }
 0x3e5   :  { %v5723_v19 = vpop.f32.mrf.mxu1 }
 0x3e6   :  { %v5763_v36 = vadd.f32 %v5762_v4, %v5722_v15  ;;  %v15107_v19 = vld [vmem:[%s20936_s12 + $0x8] sm:$0xff]  }
 0x3e7   :  { %v5724_v20 = vpop.f32.mrf.mxu1 }
 0x421   :  { %v5801_v24 = vpop.f32.mrf.mxu1 }
 0x422   :  { %v5802_v0 = vadd.f32 %v5801_v24, %v5761_v32  ;;  %v15108_v24 = vld [vmem:[%s20936_s12] sm:$0xff]  }
 0x423   :  { %v5803_v26 = vpop.f32.mrf.mxu1 }
 0x424   :  { %v5804_v2 = vadd.f32 %v5803_v26, %v5763_v36  ;;  %v5810_v27 = vmax.f32 %v5802_v0, 0.0  ;;  %v15109_v0 = vld [vmem:[%s20938_s14 + $0x10] ss:$8 sps:$4 sm:$0xff]   ;;  %v15111_v26 = vld [vmem:[%s20938_s14 + $0x14] ss:$8 sps:$4 sm:$0xff]  }
 0x425   :  { %v5805_v28 = vpop.f32.mrf.mxu1 }
 0x426   :  { %v5811_v31 = vmax.f32 %v5804_v2, 0.0  ;;  %v5814_v35 = vpack.c.bf16 %v5810_v27, %v5810_v27  ;;  %v15114_v2 = vld [vmem:[%s20938_s14 + $0x4] ss:$8 sps:$4 sm:$0xff]   ;;  %v15112_v27 = vld [vmem:[%s20938_s14] ss:$8 sps:$4 sm:$0xff]  }
 0x427   :  { %v5806_v29 = vpop.f32.mrf.mxu1  ;;  %v15118_v28 = vld [vmem:[%s20940_s16 + $0xe8] ss:$16 sps:$4 sm:$0xff]  }
 0x428   :  { %v5815_v34 = vpack.c.bf16 %v5811_v31, %v5811_v31  ;;  %v15120_v31 = vld [vmem:[%s20940_s16 + $0xec] ss:$16 sps:$4 sm:$0xff]  }
 0x429   :  { %v15126_v29 = vld [vmem:[%s20940_s16 + $0xcc] ss:$16 sps:$4 sm:$0xff]  }
 0x42a   :  { %13720 = vmatprep.mubr.msk.bf16.mxu1 %vm6194_vm2, %v5815_v34  ;;  %v15124_v34 = vld [vmem:[%s20940_s16 + $0xc8] ss:$16 sps:$4 sm:$0xff]  }
 0x42b   :  { %6278 = vmatmul.mubr.bf16.vlgmr.msra.gmra.mxu1 %v5814_v35  ;;  %v15130_v35 = vld [vmem:[%s20940_s16 + $0xa8] ss:$16 sps:$4 sm:$0xff]  }
 0x42c   :  { %6406 = vmatpush1.bf16.msra.mxu1 %v15092_v57  ;;  %v15132_v57 = vld [vmem:[%s20940_s16 + $0xac] ss:$16 sps:$4 sm:$0xff]  }
 0x42d   :  { %6407 = vmatprep.subr.bf16.mxu1 %v15311_v23 }
 0x430   :  { %6408 = vmatpush1.bf16.msra.mxu1 %v15093_v63  ;;  %v15138_v63 = vld [vmem:[%s20940_s16 + $0x8c] ss:$16 sps:$4 sm:$0xff]  }
 0x431   :  { %6409 = vmatprep.subr.bf16.mxu1 %v15311_v23 }
 0x434   :  { %6410 = vmatpush1.bf16.msra.mxu1 %v15094_v6  ;;  %v15136_v6 = vld [vmem:[%s20940_s16 + $0x88] ss:$16 sps:$4 sm:$0xff]  }
 0x435   :  { %6411 = vmatprep.subr.bf16.mxu1 %v15311_v23 }
 0x438   :  { %6412 = vmatpush1.bf16.msra.mxu1 %v15095_v42  ;;  %v15144_v42 = vld [vmem:[%s20940_s16 + $0x6c] ss:$16 sps:$4 sm:$0xff]  }
 0x439   :  { %6413 = vmatprep.subr.bf16.mxu1 %v15311_v23 }
 0x43c   :  { %6414 = vmatpush1.bf16.msra.mxu1 %v15096_v37  ;;  %v15142_v37 = vld [vmem:[%s20940_s16 + $0x68] ss:$16 sps:$4 sm:$0xff]  }
 0x43d   :  { %6415 = vmatprep.subr.bf16.mxu1 %v15311_v23 }
 0x440   :  { %6416 = vmatpush1.bf16.msra.mxu1 %v15097_v22  ;;  %v15150_v22 = vld [vmem:[%s20940_s16 + $0x4c] ss:$16 sps:$4 sm:$0xff]  }
 0x441   :  { %6417 = vmatprep.subr.bf16.mxu1 %v15311_v23 }
 0x444   :  { %6418 = vmatpush1.bf16.msra.mxu1 %v15098_v5  ;;  %v15148_v5 = vld [vmem:[%s20940_s16 + $0x48] ss:$16 sps:$4 sm:$0xff]  }
 0x445   :  { %6419 = vmatprep.subr.bf16.mxu1 %v15311_v23 }
 0x448   :  { %6420 = vmatpush1.bf16.msra.mxu1 %v15099_v47  ;;  %v15156_v47 = vld [vmem:[%s20940_s16 + $0x2c] ss:$16 sps:$4 sm:$0xff]  }
 0x449   :  { %6427 = vmatprep.subr.bf16.mxu1 %v15311_v23 }
 0x44c   :  { %6428 = vmatpush2.bf16.msra.mxu1 %v15100_v61  ;;  %v15154_v61 = vld [vmem:[%s20940_s16 + $0x28] ss:$16 sps:$4 sm:$0xff]  }
 0x44d   :  { %6429 = vmatprep.subr.bf16.mxu1 %v15311_v23 }
 0x450   :  { %6430 = vmatpush2.bf16.msra.mxu1 %v15101_v48  ;;  %v15162_v48 = vld [vmem:[%s20940_s16 + $0xc] ss:$16 sps:$4 sm:$0xff]  }
 0x451   :  { %6431 = vmatprep.subr.bf16.mxu1 %v15311_v23 }
 0x454   :  { %6432 = vmatpush2.bf16.msra.mxu1 %v15102_v49  ;;  %v15160_v49 = vld [vmem:[%s20940_s16 + $0x8] ss:$16 sps:$4 sm:$0xff]  }
 0x455   :  { %6433 = vmatprep.subr.bf16.mxu1 %v15311_v23 }
 0x458   :  { %6434 = vmatpush2.bf16.msra.mxu1 %v15103_v55  ;;  %v15174_v55 = vld [vmem:[%s20940_s16 + $0x16c] ss:$16 sps:$4 sm:$0xff]  }
 0x459   :  { %6435 = vmatprep.subr.bf16.mxu1 %v15311_v23 }
 0x45c   :  { %6436 = vmatpush2.bf16.msra.mxu1 %v15104_v7  ;;  %v15178_v7 = vld [vmem:[%s20940_s16 + $0x148] ss:$16 sps:$4 sm:$0xff]  }
 0x45d   :  { %7049 = vmatprep.subr.bf16.mxu1 %v15120_v31  ;;  %v15165_v31 = vld [vmem:[%s20940_s16 + $0x184] ss:$16 sps:$4 sm:$0xff]  }
 0x46b   :  { %v6238_v51 = vpop.f32.mrf.mxu0 }
 0x46c   :  { %v6239_v3 = vadd.f32 %v6238_v51, %v5882_v40  ;;  %v15168_v51 = vld [vmem:[%s20940_s16 + $0x18c] ss:$16 sps:$4 sm:$0xff]  }
 0x46d   :  { %v6240_v54 = vpop.f32.mrf.mxu0 }
 0x46e   :  { %v6241_v11 = vadd.f32 %v6240_v54, %v5886_v44  ;;  %v15166_v54 = vld [vmem:[%s20940_s16 + $0x188] ss:$16 sps:$4 sm:$0xff]  }
 0x46f   :  { %v6242_v8 = vpop.f32.mrf.mxu0 }
 0x470   :  { %v15172_v8 = vld [vmem:[%s20940_s16 + $0x168] ss:$16 sps:$4 sm:$0xff]  }
 0x471   :  { %v6243_v45 = vpop.f32.mrf.mxu0 }
 0x472   :  { %v15180_v45 = vld [vmem:[%s20940_s16 + $0x14c] ss:$16 sps:$4 sm:$0xff]  }
 0x4eb   :  { %v6279_v1 = vpop.f32.mrf.mxu1 }
 0x4ec   :  { %v6280_v50 = vadd.f32 %v6279_v1, %v6239_v3  ;;  %v13740_v1 = vld [vmem:[%s20937_s13] ss:$0 sm:$0xff] }
 0x4ed   :  { %v6281_v46 = vpop.f32.mrf.mxu1 }
 0x4ee   :  { %v6282_v14 = vadd.f32 %v6281_v46, %v6241_v11  ;;  %v6286_v25 = vmax.f32 %v6280_v50, 0.0 }
 0x4ef   :  { %v6283_v4 = vpop.f32.mrf.mxu1 }
 0x4f0   :  { %v6287_v33 = vmax.f32 %v6282_v14, 0.0  ;;  %v6288_v60 = vpack.c.bf16 %v6286_v25, %v6286_v25 }
 0x4f1   :  { %v6284_v30 = vpop.f32.mrf.mxu1 }
 0x4f2   :  { %v6289_v16 = vpack.c.bf16 %v6287_v33, %v6287_v33  ;;  %v6580_v30 = vld [vmem:[%s20972_s1] sm:$0x3] }
 0x4f4   :  { %13735 = vmatprep.mubr.msk.bf16.mxu1 %vm6401_vm3, %v6289_v16 }
 0x4f5   :  { %6438 = vmatmul.mubr.bf16.vlgmr.msra.gmra.mxu1 %v6288_v60 }
 0x4f6   :  { %7050 = vmatpush1.bf16.msra.mxu1 %v15118_v28  ;;  %v15157_v28 = vld [vmem:[%s20940_s16] ss:$16 sps:$4 sm:$0xff]  }
 0x4f7   :  { %7051 = vmatprep.subr.bf16.mxu1 %v15126_v29  ;;  %v15163_v29 = vld [vmem:[%s20940_s16 + $0x180] ss:$16 sps:$4 sm:$0xff]  }
 0x4fa   :  { %7052 = vmatpush1.bf16.msra.mxu1 %v15124_v34  ;;  %v15171_v34 = vld [vmem:[%s20940_s16 + $0x164] ss:$16 sps:$4 sm:$0xff]  }
 0x4fb   :  { %7053 = vmatprep.subr.bf16.mxu1 %v15132_v57  ;;  %v15169_v57 = vld [vmem:[%s20940_s16 + $0x160] ss:$16 sps:$4 sm:$0xff]  }
 0x4fe   :  { %7054 = vmatpush1.bf16.msra.mxu1 %v15130_v35  ;;  %v15177_v35 = vld [vmem:[%s20940_s16 + $0x144] ss:$16 sps:$4 sm:$0xff]  }
 0x4ff   :  { %7055 = vmatprep.subr.bf16.mxu1 %v15138_v63  ;;  %v15175_v63 = vld [vmem:[%s20940_s16 + $0x140] ss:$16 sps:$4 sm:$0xff]  }
 0x502   :  { %7056 = vmatpush1.bf16.msra.mxu1 %v15136_v6  ;;  %v15183_v6 = vld [vmem:[%s20940_s16 + $0x124] ss:$16 sps:$4 sm:$0xff]  }
 0x503   :  { %7057 = vmatprep.subr.bf16.mxu1 %v15144_v42  ;;  %v15186_v42 = vld [vmem:[%s20940_s16 + $0x12c] ss:$16 sps:$4 sm:$0xff]  }
 0x506   :  { %7058 = vmatpush1.bf16.msra.mxu1 %v15142_v37  ;;  %v15181_v37 = vld [vmem:[%s20940_s16 + $0x120] ss:$16 sps:$4 sm:$0xff]  }
 0x507   :  { %7059 = vmatprep.subr.bf16.mxu1 %v15150_v22  ;;  %v15184_v22 = vld [vmem:[%s20940_s16 + $0x128] ss:$16 sps:$4 sm:$0xff]  }
 0x50a   :  { %7060 = vmatpush1.bf16.msra.mxu1 %v15148_v5  ;;  %v15189_v5 = vld [vmem:[%s20940_s16 + $0x104] ss:$16 sps:$4 sm:$0xff]  }
 0x50b   :  { %7061 = vmatprep.subr.bf16.mxu1 %v15156_v47  ;;  %v15192_v47 = vld [vmem:[%s20940_s16 + $0x10c] ss:$16 sps:$4 sm:$0xff]  }
 0x50e   :  { %7062 = vmatpush1.bf16.msra.mxu1 %v15154_v61  ;;  %v15187_v61 = vld [vmem:[%s20940_s16 + $0x100] ss:$16 sps:$4 sm:$0xff]  }
 0x50f   :  { %7063 = vmatprep.subr.bf16.mxu1 %v15162_v48  ;;  %v15190_v48 = vld [vmem:[%s20940_s16 + $0x108] ss:$16 sps:$4 sm:$0xff]  }
 0x512   :  { %7064 = vmatpush1.bf16.msra.mxu1 %v15160_v49  ;;  %v7154_v49 = vld [vmem:[%s20942_s18 + $0x1c0] sm:$0xff] }
 0x513   :  { %7071 = vmatprep.subr.bf16.mxu1 %v15168_v51  ;;  %v7158_v51 = vld [vmem:[%s20942_s18 + $0x1e0] sm:$0xff] }
 0x516   :  { %7072 = vmatpush2.bf16.msra.mxu1 %v15166_v54  ;;  %v13859_v54 = vcombine.low %v7154_v49, %v7158_v51 }
 0x517   :  { %7073 = vmatprep.subr.bf16.mxu1 %v15174_v55  ;;  %v13860_v55 = vcombine.high %v7154_v49, %v7158_v51 }
 0x51a   :  { %7074 = vmatpush2.bf16.msra.mxu1 %v15172_v8  ;;  %v7282_v8 = vld [vmem:[%s20942_s18 + $0x5c0] sm:$0xff] }
 0x51b   :  { %7075 = vmatprep.subr.bf16.mxu1 %v15180_v45  ;;  %v7286_v45 = vld [vmem:[%s20942_s18 + $0x5e0] sm:$0xff] }
 0x51e   :  { %7076 = vmatpush2.bf16.msra.mxu1 %v15178_v7  ;;  %v13987_v7 = vcombine.low %v7282_v8, %v7286_v45 }
 0x51f   :  { %7077 = vmatprep.subr.bf16.mxu1 %v15186_v42 }
 0x522   :  { %7078 = vmatpush2.bf16.msra.mxu1 %v15184_v22  ;;  %v7114_v22 = vld [vmem:[%s20942_s18 + $0x80] sm:$0xff] }
 0x523   :  { %7079 = vmatprep.subr.bf16.mxu1 %v15192_v47  ;;  %v7118_v47 = vld [vmem:[%s20942_s18 + $0xa0] sm:$0xff] }
 0x526   :  { %7080 = vmatpush2.bf16.msra.mxu1 %v15190_v48  ;;  %v7246_v48 = vld [vmem:[%s20942_s18 + $0x4a0] sm:$0xff] }
 0x5b5   :  { %v6439_v12 = vpop.f32.mrf.mxu1 }
 0x5b6   :  { %v6440_v58 = vadd.f32 %v13721_v10, %v6439_v12  ;;  %v15115_v10 = vld [vmem:[%s20940_s16 + $0xe0] ss:$16 sps:$4 sm:$0xff]  }
 0x5b7   :  { %v6441_v13 = vpop.f32.mrf.mxu1 }
 0x5b8   :  { %v6445_v15 = vmax.f32 %v6440_v58, 0.0  ;;  %v15123_v58 = vld [vmem:[%s20940_s16 + $0xc4] ss:$16 sps:$4 sm:$0xff]   ;;  %v15121_v13 = vld [vmem:[%s20940_s16 + $0xc0] ss:$16 sps:$4 sm:$0xff]  }
 0x5b9   :  { %v6442_v32 = vpop.f32.mrf.mxu1 }
 0x5ba   :  { %v6446_v36 = vpack.c.bf16 %v6445_v15, %v6445_v15  ;;  %v15129_v15 = vld [vmem:[%s20940_s16 + $0xa4] ss:$16 sps:$4 sm:$0xff]   ;;  %v15127_v32 = vld [vmem:[%s20940_s16 + $0xa0] ss:$16 sps:$4 sm:$0xff]  }
 0x5bb   :  { %v6443_v20 = vpop.f32.mrf.mxu1 }
 0x5bc   :  { %14598 = vmatmul.mubr.msk.bf16.vlgmr.msra.gmra.mxu0 %vm6470_vm5, %v6446_v36  ;;  %v15141_v20 = vld [vmem:[%s20940_s16 + $0x64] ss:$16 sps:$4 sm:$0xff]  }
 0x5bd   :  { %14602 = vmatpush3.bf16.msra.mxu0 %v15107_v19  ;;  %14605 = vmatprep.mubr.msk.bf16.mxu0 %vm15313_vm4, %v15312_v62  ;;  %v15135_v19 = vld [vmem:[%s20940_s16 + $0x84] ss:$16 sps:$4 sm:$0xff]  }
 0x5be   :  { %14603 = vmatprep.subr.bf16.mxu0 %v15312_v62 }
 0x5c1   :  { %14604 = vmatpush3.bf16.msra.mxu0 %v15108_v24  ;;  %v15139_v24 = vld [vmem:[%s20940_s16 + $0x60] ss:$16 sps:$4 sm:$0xff]  }
 0x5c2   :  { %6638 = vmatprep.subr.bf16.mxu0 %v15111_v26  ;;  %v15145_v26 = vld [vmem:[%s20940_s16 + $0x40] ss:$16 sps:$4 sm:$0xff]  }
 0x5c4   :  { %14606 = vmatmul.mubr.msk.bf16.vlgmr.msra.gmra.mxu0 %vm6470_vm5, %v6446_v36  ;;  %v15133_v36 = vld [vmem:[%s20940_s16 + $0x80] ss:$16 sps:$4 sm:$0xff]  }
 0x5c5   :  { %6658 = vmatprep.mubr.bf16.mxu0 %v15311_v23  ;;  %6639 = vmatpush1.bf16.msra.mxu0 %v15109_v0  ;;  %v15117_v23 = vld [vmem:[%s20940_s16 + $0xe4] ss:$16 sps:$4 sm:$0xff]  }
 0x5c6   :  { %6640 = vmatprep.subr.bf16.mxu0 %v15114_v2  ;;  %v15147_v0 = vld [vmem:[%s20940_s16 + $0x44] ss:$16 sps:$4 sm:$0xff]  }
 0x5c7   :  { %v15153_v2 = vld [vmem:[%s20940_s16 + $0x24] ss:$16 sps:$4 sm:$0xff]  }
 0x5c9   :  { %6641 = vmatpush1.bf16.msra.mxu0 %v15112_v27  ;;  %v15151_v27 = vld [vmem:[%s20940_s16 + $0x20] ss:$16 sps:$4 sm:$0xff]  }
 0x5ca   :  { %7008 = vmatprep.subr.bf16.mxu0 %v15117_v23  ;;  %v15159_v23 = vld [vmem:[%s20940_s16 + $0x4] ss:$16 sps:$4 sm:$0xff]  }
 0x67c   :  { %v6508_v62 = vpop.f32.mrf.mxu0 }
 0x67d   :  { %v6509_v9 = vadd.f32 %v13736_v41, %v6508_v62  ;;  %v13988_v41 = vcombine.high %v7282_v8, %v7286_v45  ;;  %v6591_v62 = vld [vmem:[%s20939_s15] sm:$0x3] }
 0x67e   :  { %v14599_v40 = vpop.f32.mrf.mxu0  ;;  %v7110_v45 = vld [vmem:[%s20942_s18 + $0x60] sm:$0xff] }
 0x67f   :  { %6578 = vst.msk [vmem:[#allocation4] sm:$0x3] %vm6577_vm6, %v6509_v9  ;;  %8672 = vmatprep.subr.bf16.mxu1 %v13988_v41  ;;  %v6600_v40 = vrot.slane %v6591_v62, %v16309_v43  ;;  %v7238_v41 = vld [vmem:[%s20942_s18 + $0x460] sm:$0xff] }
 0x680   :  { %v6511_v44 = vpop.f32.mrf.mxu0 }
 0x682   :  { %v14600_v3 = vpop.f32.mrf.mxu0 }
 0x684   :  { %v6571_v11 = vpop.f32.mrf.mxu0 }
 0x685   :  { %v6572_v50 = vadd.f32 %v13740_v1, %v6571_v11 }
 0x686   :  { %v14607_v46 = vpop.f32.mrf.mxu0 }
 0x687   :  { %v6581_v14 = vmul.f32 0.5, %v6572_v50  ;;  %6579 = vst.msk [vmem:[#allocation6] sm:$0x3] %vm6577_vm6, %v6572_v50 }
 0x688   :  { %v6574_v25 = vpop.f32.mrf.mxu0 }
 0x689   :  { %v6582_v4 = vmul.f32 1.442695, %v6581_v14  ;;  %v7146_v14 = vld [vmem:[%s20942_s18 + $0x180] sm:$0xff] }
 0x68a   :  { %v14608_v33 = vpop.f32.mrf.mxu0 }
 0x68b   :  { %15209 = vpow2.f32 %v6582_v4  ;;  %v7150_v4 = vld [vmem:[%s20942_s18 + $0x1a0] sm:$0xff] }
 0x68c   :  { %v7274_v33 = vld [vmem:[%s20942_s18 + $0x580] sm:$0xff] }
 0x698   :  { %v15210_v16 = vpop.eup %15209 }
 0x699   :  { %v6584_v60 = vmul.f32 %v15210_v16, %v6580_v30  ;;  %v7278_v30 = vld [vmem:[%s20942_s18 + $0x5a0] sm:$0xff] }
 0x69b   :  { %v6585_v52 = vadd.f32 %v6584_v60, %v6509_v9  ;;  %v6596_v9 = vrot.slane %v6591_v62, %v16297_v38  ;;  %v13819_v62 = vcombine.low %v7114_v22, %v7118_v47 }
 0x69d   :  { %v6586_v12 = vpack.c.bf16 %v6585_v52, %v6585_v52 }
 0x69f   :  { %13748 = vmatmul.mubr.msk.bf16.vlgmr.msra.gmra.mxu0 %vm6470_vm5, %v6586_v12  ;;  %v7138_v12 = vld [vmem:[%s20942_s18 + $0x140] sm:$0xff] }
 0x6a0   :  { %7009 = vmatpush1.bf16.msra.mxu0 %v15115_v10  ;;  %v13852_v10 = vcombine.high %v7146_v14, %v7150_v4 }
 0x6a1   :  { %7010 = vmatprep.subr.bf16.mxu0 %v15123_v58  ;;  %v13980_v58 = vcombine.high %v7274_v33, %v7278_v30 }
 0x6a4   :  { %7011 = vmatpush1.bf16.msra.mxu0 %v15121_v13  ;;  %v7142_v13 = vld [vmem:[%s20942_s18 + $0x160] sm:$0xff] }
 0x6a5   :  { %7012 = vmatprep.subr.bf16.mxu0 %v15129_v15  ;;  %v7266_v15 = vld [vmem:[%s20942_s18 + $0x540] sm:$0xff] }
 0x6a8   :  { %7013 = vmatpush1.bf16.msra.mxu0 %v15127_v32  ;;  %v7270_v32 = vld [vmem:[%s20942_s18 + $0x560] sm:$0xff] }
 0x6a9   :  { %7014 = vmatprep.subr.bf16.mxu0 %v15135_v19  ;;  %v13851_v19 = vcombine.low %v7146_v14, %v7150_v4 }
 0x6ac   :  { %7015 = vmatpush1.bf16.msra.mxu0 %v15133_v36  ;;  %v13979_v36 = vcombine.low %v7274_v33, %v7278_v30  ;;  %v7218_v33 = vld [vmem:[%s20942_s18 + $0x3c0] sm:$0xff] }
 0x6ad   :  { %7016 = vmatprep.subr.bf16.mxu0 %v15141_v20  ;;  %v13844_v20 = vcombine.high %v7138_v12, %v7142_v13  ;;  %v7222_v30 = vld [vmem:[%s20942_s18 + $0x3e0] sm:$0xff] }
 0x6b0   :  { %7017 = vmatpush1.bf16.msra.mxu0 %v15139_v24  ;;  %v7130_v24 = vld [vmem:[%s20942_s18 + $0x100] sm:$0xff] }
 0x6b1   :  { %7018 = vmatprep.subr.bf16.mxu0 %v15147_v0  ;;  %v13972_v0 = vcombine.high %v7266_v15, %v7270_v32 }
 0x6b4   :  { %7019 = vmatpush1.bf16.msra.mxu0 %v15145_v26  ;;  %v7134_v26 = vld [vmem:[%s20942_s18 + $0x120] sm:$0xff] }
 0x6b5   :  { %7020 = vmatprep.subr.bf16.mxu0 %v15153_v2  ;;  %v7258_v2 = vld [vmem:[%s20942_s18 + $0x500] sm:$0xff] }
 0x6b8   :  { %7021 = vmatpush1.bf16.msra.mxu0 %v15151_v27  ;;  %v7262_v27 = vld [vmem:[%s20942_s18 + $0x520] sm:$0xff] }
 0x6b9   :  { %7022 = vmatprep.subr.bf16.mxu0 %v15159_v23  ;;  %v13843_v23 = vcombine.low %v7138_v12, %v7142_v13  ;;  %v13963_v42 = vcombine.low %v7258_v2, %v7262_v27  ;;  %v7210_v12 = vld [vmem:[%s20942_s18 + $0x380] sm:$0xff] }
 0x6bc   :  { %7023 = vmatpush1.bf16.msra.mxu0 %v15157_v28  ;;  %v13971_v28 = vcombine.low %v7266_v15, %v7270_v32  ;;  %v7214_v15 = vld [vmem:[%s20942_s18 + $0x3a0] sm:$0xff] }
 0x6bd   :  { %7030 = vmatprep.subr.bf16.mxu0 %v15165_v31  ;;  %v13836_v31 = vcombine.high %v7130_v24, %v7134_v26  ;;  %v7330_v32 = vld [vmem:[%s20942_s18 + $0x740] sm:$0xff] }
 0x6c0   :  { %7031 = vmatpush2.bf16.msra.mxu0 %v15163_v29  ;;  %v7122_v29 = vld [vmem:[%s20942_s18 + $0xc0] sm:$0xff] }
 0x6c1   :  { %7032 = vmatprep.subr.bf16.mxu0 %v15171_v34  ;;  %v13964_v34 = vcombine.high %v7258_v2, %v7262_v27  ;;  %v7206_v2 = vld [vmem:[%s20942_s18 + $0x360] sm:$0xff] }
 0x6c2   :  { %v7322_v27 = vld [vmem:[%s20942_s18 + $0x700] sm:$0xff] }
 0x6c4   :  { %7033 = vmatpush2.bf16.msra.mxu0 %v15169_v57  ;;  %v7126_v57 = vld [vmem:[%s20942_s18 + $0xe0] sm:$0xff] }
 0x6c5   :  { %7034 = vmatprep.subr.bf16.mxu0 %v15177_v35  ;;  %v7250_v35 = vld [vmem:[%s20942_s18 + $0x4c0] sm:$0xff]  ;;  %v13827_v49 = vcombine.low %v7122_v29, %v7126_v57 }
 0x6c8   :  { %7035 = vmatpush2.bf16.msra.mxu0 %v15175_v63  ;;  %v7254_v63 = vld [vmem:[%s20942_s18 + $0x4e0] sm:$0xff] }
 0x6c9   :  { %7036 = vmatprep.subr.bf16.mxu0 %v15183_v6  ;;  %v13835_v6 = vcombine.low %v7130_v24, %v7134_v26  ;;  %v13955_v51 = vcombine.low %v7250_v35, %v7254_v63 }
 0x6cc   :  { %7037 = vmatpush2.bf16.msra.mxu0 %v15181_v37  ;;  %v13828_v37 = vcombine.high %v7122_v29, %v7126_v57 }
 0x6cd   :  { %7038 = vmatprep.subr.bf16.mxu0 %v15189_v5  ;;  %v13956_v5 = vcombine.high %v7250_v35, %v7254_v63  ;;  %v7198_v35 = vld [vmem:[%s20942_s18 + $0x320] sm:$0xff] }
 0x6ce   :  { %v7314_v63 = vld [vmem:[%s20942_s18 + $0x6c0] sm:$0xff] }
 0x6d0   :  { %7039 = vmatpush2.bf16.msra.mxu0 %v15187_v61  ;;  %v7242_v61 = vld [vmem:[%s20942_s18 + $0x480] sm:$0xff] }
 0x6d1   :  { %8631 = vmatprep.subr.bf16.mxu0 %v13860_v55  ;;  %v7106_v55 = vld [vmem:[%s20942_s18 + $0x40] sm:$0xff]  ;;  %v13948_v8 = vcombine.high %v7242_v61, %v7246_v48 }
 0x75f   :  { %v6660_v44 = vpop.f32.mrf.mxu0 }
 0x760   :  { %v6661_v3 = vadd.f32 %v6660_v44, %v6596_v9  ;;  %v13947_v9 = vcombine.low %v7242_v61, %v7246_v48  ;;  %v7098_v44 = vld [vmem:[%s20942_s18] sm:$0xff] }
 0x761   :  { %v6662_v1 = vpop.f32.mrf.mxu0  ;;  %v7190_v61 = vld [vmem:[%s20942_s18 + $0x2e0] sm:$0xff] }
 0x762   :  { %v6663_v11 = vadd.f32 %v6662_v1, %v6600_v40  ;;  %v6667_v50 = vmax.f32 %v6661_v3, 0.0  ;;  %v13812_v40 = vcombine.high %v7106_v55, %v7110_v45  ;;  %v7102_v1 = vld [vmem:[%s20942_s18 + $0x20] sm:$0xff] }
 0x763   :  { %v6664_v46 = vpop.f32.mrf.mxu0  ;;  %v7306_v48 = vld [vmem:[%s20942_s18 + $0x680] sm:$0xff] }
 0x764   :  { %v6668_v25 = vmax.f32 %v6663_v11, 0.0  ;;  %v6669_v52 = vpack.c.bf16 %v6667_v50, %v6667_v50  ;;  %v7226_v11 = vld [vmem:[%s20942_s18 + $0x400] sm:$0xff]  ;;  %v13811_v46 = vcombine.low %v7106_v55, %v7110_v45 }
 0x765   :  { %v6665_v16 = vpop.f32.mrf.mxu0  ;;  %v7230_v50 = vld [vmem:[%s20942_s18 + $0x420] sm:$0xff] }
 0x766   :  { %v6670_v60 = vpack.c.bf16 %v6668_v25, %v6668_v25  ;;  %v13804_v25 = vcombine.high %v7098_v44, %v7102_v1  ;;  %v13932_v4 = vcombine.high %v7226_v11, %v7230_v50  ;;  %v7338_v16 = vld [vmem:[%s20942_s18 + $0x780] sm:$0xff] }
 0x767   :  { %v14043_v13 = vcombine.low %v7338_v16, %v7338_v16  ;;  %v7178_v45 = vld [vmem:[%s20942_s18 + $0x280] sm:$0xff] }
 0x768   :  { %13801 = vmatprep.mubr.msk.bf16.mxu0 %vm6401_vm3, %v6670_v60  ;;  %13802 = vmatprep.mubr.msk.bf16.mxu1 %vm6401_vm3, %v6670_v60  ;;  %v13803_v60 = vcombine.low %v7098_v44, %v7102_v1  ;;  %v7170_v44 = vld [vmem:[%s20942_s18 + $0x240] sm:$0xff] }
 0x769   :  { %7041 = vmatmul.mubr.bf16.vlgmr.msra.gmra.mxu0 %v6669_v52  ;;  %7082 = vmatmul.mubr.bf16.vlgmr.msra.gmra.mxu1 %v6669_v52  ;;  %v13931_v52 = vcombine.low %v7226_v11, %v7230_v50  ;;  %v8608_v24 = vsel %vm5467_vm0, %v14043_v13, 0  ;;  %v7298_v1 = vld [vmem:[%s20942_s18 + $0x640] sm:$0xff]  ;;  %v7159_v13 = vld [vmem:[%s20942_s18 + $0x1e8] sm:$0xff] }
 0x76a   :  { %8632 = vmatpush1.bf16.msra.mxu0 %v13859_v54  ;;  %8673 = vmatpush1.bf16.msra.mxu1 %v13987_v7  ;;  %v13820_v54 = vcombine.high %v7114_v22, %v7118_v47  ;;  %v7234_v7 = vld [vmem:[%s20942_s18 + $0x440] sm:$0xff] }
 0x76b   :  { %8633 = vmatprep.subr.bf16.mxu0 %v13852_v10  ;;  %8674 = vmatprep.subr.bf16.mxu1 %v13980_v58  ;;  %v13940_v3 = vcombine.high %v7234_v7, %v7238_v41  ;;  %v13939_v14 = vcombine.low %v7234_v7, %v7238_v41  ;;  %v13924_v10 = vcombine.high %v7218_v33, %v7222_v30  ;;  %v7182_v7 = vld [vmem:[%s20942_s18 + $0x2a0] sm:$0xff] }
 0x76c   :  { %v14044_v58 = vcombine.high %v7338_v16, %v7338_v16  ;;  %v7302_v50 = vld [vmem:[%s20942_s18 + $0x660] sm:$0xff] }
 0x76e   :  { %8634 = vmatpush1.bf16.msra.mxu0 %v13851_v19  ;;  %8675 = vmatpush1.bf16.msra.mxu1 %v13979_v36  ;;  %v7334_v19 = vld [vmem:[%s20942_s18 + $0x760] sm:$0xff]  ;;  %v13923_v36 = vcombine.low %v7218_v33, %v7222_v30 }
 0x76f   :  { %8635 = vmatprep.subr.bf16.mxu0 %v13844_v20  ;;  %8676 = vmatprep.subr.bf16.mxu1 %v13972_v0  ;;  %v13916_v20 = vcombine.high %v7210_v12, %v7214_v15  ;;  %v7202_v0 = vld [vmem:[%s20942_s18 + $0x340] sm:$0xff]  ;;  %v14036_v26 = vcombine.high %v7330_v32, %v7334_v19 }
 0x770   :  { %v13908_v29 = vcombine.high %v7202_v0, %v7206_v2  ;;  %v7166_v33 = vld [vmem:[%s20942_s18 + $0x220] sm:$0xff] }
 0x771   :  { %v7290_v30 = vld [vmem:[%s20942_s18 + $0x600] sm:$0xff] }
 0x772   :  { %8636 = vmatpush1.bf16.msra.mxu0 %v13843_v23  ;;  %8677 = vmatpush1.bf16.msra.mxu1 %v13971_v28  ;;  %v7326_v23 = vld [vmem:[%s20942_s18 + $0x720] sm:$0xff]  ;;  %v13915_v28 = vcombine.low %v7210_v12, %v7214_v15  ;;  %v7283_v15 = vld [vmem:[%s20942_s18 + $0x5c8] sm:$0xff] }
 0x773   :  { %8637 = vmatprep.subr.bf16.mxu0 %v13836_v31  ;;  %8678 = vmatprep.subr.bf16.mxu1 %v13964_v34  ;;  %v14035_v31 = vcombine.low %v7330_v32, %v7334_v19  ;;  %v7194_v34 = vld [vmem:[%s20942_s18 + $0x300] sm:$0xff]  ;;  %v14028_v57 = vcombine.high %v7322_v27, %v7326_v23  ;;  %v7287_v19 = vld [vmem:[%s20942_s18 + $0x5e8] sm:$0xff] }
 0x774   :  { %v13900_v22 = vcombine.high %v7194_v34, %v7198_v35 }
 0x776   :  { %8638 = vmatpush1.bf16.msra.mxu0 %v13835_v6  ;;  %8679 = vmatpush1.bf16.msra.mxu1 %v13963_v42  ;;  %v7318_v6 = vld [vmem:[%s20942_s18 + $0x6e0] sm:$0xff]  ;;  %v13907_v42 = vcombine.low %v7202_v0, %v7206_v2 }
 0x777   :  { %8639 = vmatprep.subr.bf16.mxu0 %v13828_v37  ;;  %8680 = vmatprep.subr.bf16.mxu1 %v13956_v5  ;;  %v14027_v37 = vcombine.low %v7322_v27, %v7326_v23  ;;  %v7186_v5 = vld [vmem:[%s20942_s18 + $0x2c0] sm:$0xff]  ;;  %v14020_v47 = vcombine.high %v7314_v63, %v7318_v6 }
 0x778   :  { %v13892_v55 = vcombine.high %v7186_v5, %v7190_v61  ;;  %v13891_v41 = vcombine.low %v7186_v5, %v7190_v61  ;;  %v6723_v0 = vld [vmem:[%s20941_s17] sm:$0xf] }
 0x779   :  { %v6736_v2 = vrot.slane %v6723_v0, %v16709_v17  ;;  %v6732_v27 = vrot.slane %v6723_v0, %v16309_v43  ;;  %v6740_v23 = vrot.slane %v6723_v0, %v16712_v21 }
 0x77a   :  { %8640 = vmatpush1.bf16.msra.mxu0 %v13827_v49  ;;  %8681 = vmatpush1.bf16.msra.mxu1 %v13955_v51  ;;  %v7310_v49 = vld [vmem:[%s20942_s18 + $0x6a0] sm:$0xff]  ;;  %v13899_v51 = vcombine.low %v7194_v34, %v7198_v35 }
 0x77b   :  { %8641 = vmatprep.subr.bf16.mxu0 %v13820_v54  ;;  %8682 = vmatprep.subr.bf16.mxu1 %v13948_v8  ;;  %v14019_v54 = vcombine.low %v7314_v63, %v7318_v6  ;;  %v14012_v8 = vcombine.high %v7306_v48, %v7310_v49 }
 0x77e   :  { %8642 = vmatpush1.bf16.msra.mxu0 %v13819_v62  ;;  %8683 = vmatpush1.bf16.msra.mxu1 %v13947_v9  ;;  %v14011_v62 = vcombine.low %v7306_v48, %v7310_v49  ;;  %v13884_v9 = vcombine.high %v7178_v45, %v7182_v7  ;;  %v7147_v48 = vld [vmem:[%s20942_s18 + $0x188] sm:$0xff] }
 0x77f   :  { %8643 = vmatprep.subr.bf16.mxu0 %v13812_v40  ;;  %8684 = vmatprep.subr.bf16.mxu1 %v13940_v3  ;;  %v13883_v40 = vcombine.low %v7178_v45, %v7182_v7  ;;  %v7174_v3 = vld [vmem:[%s20942_s18 + $0x260] sm:$0xff] }
 0x780   :  { %v13876_v11 = vcombine.high %v7170_v44, %v7174_v3 }
 0x782   :  { %8644 = vmatpush1.bf16.msra.mxu0 %v13811_v46  ;;  %8685 = vmatpush1.bf16.msra.mxu1 %v13939_v14  ;;  %v13875_v46 = vcombine.low %v7170_v44, %v7174_v3  ;;  %v14003_v14 = vcombine.low %v7298_v1, %v7302_v50  ;;  %v7143_v3 = vld [vmem:[%s20942_s18 + $0x168] sm:$0xff] }
 0x783   :  { %8645 = vmatprep.subr.bf16.mxu0 %v13804_v25  ;;  %8686 = vmatprep.subr.bf16.mxu1 %v13932_v4  ;;  %v14004_v25 = vcombine.high %v7298_v1, %v7302_v50  ;;  %v7162_v4 = vld [vmem:[%s20942_s18 + $0x200] sm:$0xff]  ;;  %v7267_v1 = vld [vmem:[%s20942_s18 + $0x548] sm:$0xff] }
 0x784   :  { %v13868_v16 = vcombine.high %v7162_v4, %v7166_v33 }
 0x786   :  { %8646 = vmatpush1.bf16.msra.mxu0 %v13803_v60  ;;  %8687 = vmatpush1.bf16.msra.mxu1 %v13931_v52  ;;  %v7294_v60 = vld [vmem:[%s20942_s18 + $0x620] sm:$0xff]  ;;  %v13867_v52 = vcombine.low %v7162_v4, %v7166_v33  ;;  %v7131_v4 = vld [vmem:[%s20942_s18 + $0x108] sm:$0xff] }
 0x787   :  { %8647 = vmatprep.subr.bf16.mxu0 %v13924_v10  ;;  %14051 = vmatprep.subr.msk.bf16.mxu1 %vm5467_vm0, %v14044_v58  ;;  %v13995_v10 = vcombine.low %v7290_v30, %v7294_v60  ;;  %v13996_v12 = vcombine.high %v7290_v30, %v7294_v60  ;;  %v7155_v58 = vld [vmem:[%s20942_s18 + $0x1c8] sm:$0xff] }
 0x788   :  { %v13862_v32 = vcombine.high %v7155_v58, %v7159_v13  ;;  %v7135_v33 = vld [vmem:[%s20942_s18 + $0x128] sm:$0xff] }
 0x789   :  { %v7259_v30 = vld [vmem:[%s20942_s18 + $0x508] sm:$0xff] }
 0x78a   :  { %8648 = vmatpush2.bf16.msra.mxu0 %v13923_v36  ;;  %8691 = vmatpush2.bf16.msra.mxu1 %v8608_v24  ;;  %v13861_v36 = vcombine.low %v7155_v58, %v7159_v13  ;;  %v13990_v24 = vcombine.high %v7283_v15, %v7287_v19  ;;  %v7123_v58 = vld [vmem:[%s20942_s18 + $0xc8] sm:$0xff] }
 0x78b   :  { %8649 = vmatprep.subr.bf16.mxu0 %v13916_v20  ;;  %8692 = vmatprep.subr.bf16.mxu1 %v14036_v26  ;;  %v13989_v20 = vcombine.low %v7283_v15, %v7287_v19  ;;  %v6728_v26 = vrot.slane %v6723_v0, %v16297_v38  ;;  %v7127_v13 = vld [vmem:[%s20942_s18 + $0xe8] sm:$0xff]  ;;  %v13837_v19 = vcombine.low %v7131_v4, %v7135_v33 }
 0x78c   :  { %v7251_v15 = vld [vmem:[%s20942_s18 + $0x4c8] sm:$0xff] }
 0x78d   :  { %v7115_v0 = vld [vmem:[%s20942_s18 + $0x88] sm:$0xff] }
 0x78e   :  { %8650 = vmatpush2.bf16.msra.mxu0 %v13915_v28  ;;  %8693 = vmatpush2.bf16.msra.mxu1 %v14035_v31 }
 0x78f   :  { %8651 = vmatprep.subr.bf16.mxu0 %v13908_v29  ;;  %8694 = vmatprep.subr.bf16.mxu1 %v14028_v57 }
 0x792   :  { %8652 = vmatpush2.bf16.msra.mxu0 %v13907_v42  ;;  %8695 = vmatpush2.bf16.msra.mxu1 %v14027_v37 }
 0x793   :  { %8653 = vmatprep.subr.bf16.mxu0 %v13900_v22  ;;  %8696 = vmatprep.subr.bf16.mxu1 %v14020_v47 }
 0x796   :  { %8654 = vmatpush2.bf16.msra.mxu0 %v13899_v51  ;;  %8697 = vmatpush2.bf16.msra.mxu1 %v14019_v54  ;;  %v7151_v54 = vld [vmem:[%s20942_s18 + $0x1a8] sm:$0xff] }
 0x797   :  { %8655 = vmatprep.subr.bf16.mxu0 %v13892_v55  ;;  %8698 = vmatprep.subr.bf16.mxu1 %v14012_v8  ;;  %v7275_v55 = vld [vmem:[%s20942_s18 + $0x588] sm:$0xff]  ;;  %v13853_v50 = vcombine.low %v7147_v48, %v7151_v54 }
 0x798   :  { %v7279_v8 = vld [vmem:[%s20942_s18 + $0x5a8] sm:$0xff] }
 0x799   :  { %v13982_v44 = vcombine.high %v7275_v55, %v7279_v8 }
 0x79a   :  { %8656 = vmatpush2.bf16.msra.mxu0 %v13891_v41  ;;  %8699 = vmatpush2.bf16.msra.mxu1 %v14011_v62 }
 0x79b   :  { %8657 = vmatprep.subr.bf16.mxu0 %v13884_v9  ;;  %8700 = vmatprep.subr.bf16.mxu1 %v14004_v25  ;;  %v7139_v9 = vld [vmem:[%s20942_s18 + $0x148] sm:$0xff] }
 0x79c   :  { %v13845_v60 = vcombine.low %v7139_v9, %v7143_v3 }
 0x79e   :  { %8658 = vmatpush2.bf16.msra.mxu0 %v13883_v40  ;;  %8701 = vmatpush2.bf16.msra.mxu1 %v14003_v14  ;;  %v13854_v40 = vcombine.high %v7147_v48, %v7151_v54  ;;  %v13846_v14 = vcombine.high %v7139_v9, %v7143_v3  ;;  %v7231_v48 = vld [vmem:[%s20942_s18 + $0x428] sm:$0xff] }
 0x79f   :  { %8659 = vmatprep.subr.bf16.mxu0 %v13876_v11  ;;  %8702 = vmatprep.subr.bf16.mxu1 %v13996_v12  ;;  %v7271_v11 = vld [vmem:[%s20942_s18 + $0x568] sm:$0xff] }
 0x7a0   :  { %v13974_v25 = vcombine.high %v7267_v1, %v7271_v11  ;;  %v7223_v9 = vld [vmem:[%s20942_s18 + $0x3e8] sm:$0xff] }
 0x7a2   :  { %8660 = vmatpush2.bf16.msra.mxu0 %v13875_v46  ;;  %8703 = vmatpush2.bf16.msra.mxu1 %v13995_v10  ;;  %v13981_v46 = vcombine.low %v7275_v55, %v7279_v8  ;;  %v13838_v10 = vcombine.high %v7131_v4, %v7135_v33  ;;  %v7219_v8 = vld [vmem:[%s20942_s18 + $0x3c8] sm:$0xff] }
 0x7a3   :  { %8661 = vmatprep.subr.bf16.mxu0 %v13868_v16  ;;  %8754 = vmatprep.subr.bf16.mxu1 %v13990_v24  ;;  %v7263_v16 = vld [vmem:[%s20942_s18 + $0x528] sm:$0xff]  ;;  %v13925_v33 = vcombine.low %v7219_v8, %v7223_v9 }
 0x7a4   :  { %v13966_v12 = vcombine.high %v7259_v30, %v7263_v16  ;;  %v7335_v4 = vld [vmem:[%s20942_s18 + $0x768] sm:$0xff] }
 0x7a6   :  { %8662 = vmatpush2.bf16.msra.mxu0 %v13867_v52  ;;  %v13973_v52 = vcombine.low %v7267_v1, %v7271_v11  ;;  %v13926_v1 = vcombine.high %v7219_v8, %v7223_v9  ;;  %v7295_v8 = vld [vmem:[%s20942_s18 + $0x628] sm:$0xff] }
 0x7a7   :  { %8713 = vmatprep.subr.bf16.mxu0 %v13862_v32  ;;  %v7255_v32 = vld [vmem:[%s20942_s18 + $0x4e8] sm:$0xff] }
 0x7a8   :  { %v13958_v24 = vcombine.high %v7251_v15, %v7255_v32 }
 0x829   :  { %v7042_v28 = vpop.f32.mrf.mxu0  ;;  %v7083_v31 = vpop.f32.mrf.mxu1 }
 0x82a   :  { %v7043_v29 = vadd.f32 %v7042_v28, %v6728_v26  ;;  %v7084_v34 = vadd.f32 %v7083_v31, %v6736_v2  ;;  %v7119_v26 = vld [vmem:[%s20942_s18 + $0xa8] sm:$0xff]  ;;  %v13957_v28 = vcombine.low %v7251_v15, %v7255_v32 }
 0x82b   :  { %v7044_v57 = vpop.f32.mrf.mxu0  ;;  %v7085_v35 = vpop.f32.mrf.mxu1  ;;  %v7243_v2 = vld [vmem:[%s20942_s18 + $0x488] sm:$0xff]  ;;  %v13822_v31 = vcombine.high %v7115_v0, %v7119_v26 }
 0x82c   :  { %v7045_v63 = vadd.f32 %v7044_v57, %v6732_v27  ;;  %v7086_v6 = vadd.f32 %v7085_v35, %v6740_v23  ;;  %v7090_v42 = vmax.f32 %v7043_v29, 0.0  ;;  %v7092_v37 = vmax.f32 %v7084_v34, 0.0  ;;  %v7247_v27 = vld [vmem:[%s20942_s18 + $0x4a8] sm:$0xff] }
 0x82d   :  { %v7046_v22 = vpop.f32.mrf.mxu0  ;;  %v7087_v5 = vpop.f32.mrf.mxu1  ;;  %v13829_v23 = vcombine.low %v7123_v58, %v7127_v13  ;;  %v13950_v29 = vcombine.high %v7243_v2, %v7247_v27  ;;  %v7107_v34 = vld [vmem:[%s20942_s18 + $0x48] sm:$0xff] }
 0x82e   :  { %v7091_v47 = vmax.f32 %v7045_v63, 0.0  ;;  %v7093_v61 = vmax.f32 %v7086_v6, 0.0  ;;  %v18661_v41 = vpack.c.bf16 %v7090_v42, %v7090_v42  ;;  %v18663_v62 = vpack.c.bf16 %v7092_v37, %v7092_v37  ;;  %v7111_v57 = vld [vmem:[%s20942_s18 + $0x68] sm:$0xff] }
 0x82f   :  { %v7047_v49 = vpop.f32.mrf.mxu0  ;;  %v7088_v51 = vpop.f32.mrf.mxu1  ;;  %v7235_v35 = vld [vmem:[%s20942_s18 + $0x448] sm:$0xff]  ;;  %v13821_v6 = vcombine.low %v7115_v0, %v7119_v26  ;;  %v13949_v42 = vcombine.low %v7243_v2, %v7247_v27  ;;  %v13814_v37 = vcombine.high %v7107_v34, %v7111_v57 }
 0x830   :  { %v18657_v45 = vpack.c.bf16 %v7091_v47, %v7091_v47  ;;  %v18659_v7 = vpack.c.bf16 %v7093_v61, %v7093_v61  ;;  %v7239_v63 = vld [vmem:[%s20942_s18 + $0x468] sm:$0xff]  ;;  %v13813_v49 = vcombine.low %v7107_v34, %v7111_v57 }
 0x831   :  { %v13942_v22 = vcombine.high %v7235_v35, %v7239_v63  ;;  %v7099_v5 = vld [vmem:[%s20942_s18 + $0x8] sm:$0xff]  ;;  %v13941_v51 = vcombine.low %v7235_v35, %v7239_v63 }
 0x832   :  { %8663 = vmatprep.mubr.bf16.mxu0 %v18657_v45  ;;  %14052 = vmatprep.mubr.msk.bf16.mxu1 %vm6194_vm2, %v18659_v7  ;;  %v7103_v47 = vld [vmem:[%s20942_s18 + $0x28] sm:$0xff] }
 0x833   :  { %8664 = vmatmul.mubr.bf16.vlgmr.msra.gmra.mxu0 %v18661_v41  ;;  %8705 = vmatmul.mubr.bf16.vlgmr.msra.gmra.mxu1 %v18663_v62  ;;  %v7227_v61 = vld [vmem:[%s20942_s18 + $0x408] sm:$0xff]  ;;  %v13806_v54 = vcombine.high %v7099_v5, %v7103_v47 }
 0x834   :  { %8714 = vmatpush1.bf16.msra.mxu0 %v13861_v36  ;;  %8755 = vmatpush1.bf16.msra.mxu1 %v13989_v20  ;;  %v13965_v36 = vcombine.low %v7259_v30, %v7263_v16  ;;  %v13830_v20 = vcombine.high %v7123_v58, %v7127_v13  ;;  %v13934_v55 = vcombine.high %v7227_v61, %v7231_v48  ;;  %v7327_v58 = vld [vmem:[%s20942_s18 + $0x728] sm:$0xff] }
 0x835   :  { %8745 = vmatprep.mubr.bf16.mxu0 %v18657_v45  ;;  %14054 = vmatprep.mubr.msk.bf16.mxu1 %vm6194_vm2, %v18659_v7  ;;  %v13933_v3 = vcombine.low %v7227_v61, %v7231_v48  ;;  %v7319_v0 = vld [vmem:[%s20942_s18 + $0x6e8] sm:$0xff] }
 0x836   :  { %8715 = vmatprep.subr.bf16.mxu0 %v13854_v40  ;;  %8756 = vmatprep.subr.bf16.mxu1 %v13982_v44  ;;  %v7339_v40 = vld [vmem:[%s20942_s18 + $0x788] sm:$0xff]  ;;  %v13805_v44 = vcombine.low %v7099_v5, %v7103_v47 }
 0x837   :  { %v14046_v11 = vcombine.high %v7339_v40, %v7339_v40  ;;  %v7311_v34 = vld [vmem:[%s20942_s18 + $0x6a8] sm:$0xff] }
 0x838   :  { %8716 = vmatpush1.bf16.msra.mxu0 %v13853_v50  ;;  %8757 = vmatpush1.bf16.msra.mxu1 %v13981_v46  ;;  %v14045_v50 = vcombine.low %v7339_v40, %v7339_v40  ;;  %v7211_v46 = vld [vmem:[%s20942_s18 + $0x388] sm:$0xff] }
 0x839   :  { %8717 = vmatprep.subr.bf16.mxu0 %v13846_v14  ;;  %8758 = vmatprep.subr.bf16.mxu1 %v13974_v25  ;;  %v7215_v14 = vld [vmem:[%s20942_s18 + $0x3a8] sm:$0xff] }
 0x83a   :  { %v7331_v25 = vld [vmem:[%s20942_s18 + $0x748] sm:$0xff]  ;;  %v8614_v30 = vsel %vm5467_vm0, %v14045_v50, 0  ;;  %v13918_v16 = vcombine.high %v7211_v46, %v7215_v14  ;;  %v13917_v13 = vcombine.low %v7211_v46, %v7215_v14  ;;  %v7284_v50 = vld [vmem:[%s20942_s18 + $0x5d0] sm:$0xff] }
 0x83b   :  { %v14037_v15 = vcombine.low %v7331_v25, %v7335_v4  ;;  %v7303_v5 = vld [vmem:[%s20942_s18 + $0x668] sm:$0xff]  ;;  %v7288_v46 = vld [vmem:[%s20942_s18 + $0x5f0] sm:$0xff] }
 0x83c   :  { %8718 = vmatpush1.bf16.msra.mxu0 %v13845_v60  ;;  %8759 = vmatpush1.bf16.msra.mxu1 %v13973_v52  ;;  %v14038_v60 = vcombine.high %v7331_v25, %v7335_v4  ;;  %v7203_v52 = vld [vmem:[%s20942_s18 + $0x348] sm:$0xff] }
 0x83d   :  { %8719 = vmatprep.subr.bf16.mxu0 %v13838_v10  ;;  %8760 = vmatprep.subr.bf16.mxu1 %v13966_v12  ;;  %v7207_v10 = vld [vmem:[%s20942_s18 + $0x368] sm:$0xff] }
 0x83e   :  { %v7323_v12 = vld [vmem:[%s20942_s18 + $0x708] sm:$0xff]  ;;  %v13910_v32 = vcombine.high %v7203_v52, %v7207_v10  ;;  %v13909_v26 = vcombine.low %v7203_v52, %v7207_v10  ;;  %v7280_v52 = vld [vmem:[%s20942_s18 + $0x5b0] sm:$0xff] }
 0x83f   :  { %v14029_v2 = vcombine.low %v7323_v12, %v7327_v58 }
 0x840   :  { %8720 = vmatpush1.bf16.msra.mxu0 %v13837_v19  ;;  %8761 = vmatpush1.bf16.msra.mxu1 %v13965_v36  ;;  %v14030_v19 = vcombine.high %v7323_v12, %v7327_v58  ;;  %v7195_v36 = vld [vmem:[%s20942_s18 + $0x308] sm:$0xff]  ;;  %v13991_v12 = vcombine.low %v7284_v50, %v7288_v46 }
 0x841   :  { %8721 = vmatprep.subr.bf16.mxu0 %v13830_v20  ;;  %8762 = vmatprep.subr.bf16.mxu1 %v13958_v24  ;;  %v7199_v20 = vld [vmem:[%s20942_s18 + $0x328] sm:$0xff] }
 0x842   :  { %v7315_v24 = vld [vmem:[%s20942_s18 + $0x6c8] sm:$0xff]  ;;  %v13902_v27 = vcombine.high %v7195_v36, %v7199_v20  ;;  %v13901_v57 = vcombine.low %v7195_v36, %v7199_v20  ;;  %v7272_v36 = vld [vmem:[%s20942_s18 + $0x570] sm:$0xff] }
 0x843   :  { %v14021_v35 = vcombine.low %v7315_v24, %v7319_v0 }
 0x844   :  { %8722 = vmatpush1.bf16.msra.mxu0 %v13829_v23  ;;  %8763 = vmatpush1.bf16.msra.mxu1 %v13957_v28  ;;  %v14022_v23 = vcombine.high %v7315_v24, %v7319_v0  ;;  %v7187_v28 = vld [vmem:[%s20942_s18 + $0x2c8] sm:$0xff] }
 0x845   :  { %8723 = vmatprep.subr.bf16.mxu0 %v13822_v31  ;;  %8764 = vmatprep.subr.bf16.mxu1 %v13950_v29  ;;  %v7191_v31 = vld [vmem:[%s20942_s18 + $0x2e8] sm:$0xff] }
 0x846   :  { %v7307_v29 = vld [vmem:[%s20942_s18 + $0x688] sm:$0xff]  ;;  %v13894_v63 = vcombine.high %v7187_v28, %v7191_v31  ;;  %v13893_v47 = vcombine.low %v7187_v28, %v7191_v31  ;;  %v7264_v28 = vld [vmem:[%s20942_s18 + $0x530] sm:$0xff] }
 0x847   :  { %v14013_v61 = vcombine.low %v7307_v29, %v7311_v34 }
 0x848   :  { %8724 = vmatpush1.bf16.msra.mxu0 %v13821_v6  ;;  %8765 = vmatpush1.bf16.msra.mxu1 %v13949_v42  ;;  %v14014_v6 = vcombine.high %v7307_v29, %v7311_v34  ;;  %v7179_v42 = vld [vmem:[%s20942_s18 + $0x288] sm:$0xff] }
 0x849   :  { %8725 = vmatprep.subr.bf16.mxu0 %v13814_v37  ;;  %8766 = vmatprep.subr.bf16.mxu1 %v13942_v22  ;;  %v7183_v37 = vld [vmem:[%s20942_s18 + $0x2a8] sm:$0xff] }
 0x84a   :  { %v7299_v22 = vld [vmem:[%s20942_s18 + $0x648] sm:$0xff]  ;;  %v13886_v48 = vcombine.high %v7179_v42, %v7183_v37  ;;  %v13885_v9 = vcombine.low %v7179_v42, %v7183_v37  ;;  %v7256_v42 = vld [vmem:[%s20942_s18 + $0x4f0] sm:$0xff] }
 0x84b   :  { %v14005_v40 = vcombine.low %v7299_v22, %v7303_v5 }
 0x84c   :  { %8726 = vmatpush1.bf16.msra.mxu0 %v13813_v49  ;;  %8767 = vmatpush1.bf16.msra.mxu1 %v13941_v51  ;;  %v14006_v49 = vcombine.high %v7299_v22, %v7303_v5  ;;  %v7171_v51 = vld [vmem:[%s20942_s18 + $0x248] sm:$0xff] }
 0x84d   :  { %8727 = vmatprep.subr.bf16.mxu0 %v13806_v54  ;;  %8768 = vmatprep.subr.bf16.mxu1 %v13934_v55  ;;  %v7175_v54 = vld [vmem:[%s20942_s18 + $0x268] sm:$0xff] }
 0x84e   :  { %v7291_v55 = vld [vmem:[%s20942_s18 + $0x608] sm:$0xff]  ;;  %v13877_v14 = vcombine.low %v7171_v51, %v7175_v54 }
 0x84f   :  { %v13997_v25 = vcombine.low %v7291_v55, %v7295_v8 }
 0x850   :  { %8728 = vmatpush1.bf16.msra.mxu0 %v13805_v44  ;;  %8769 = vmatpush1.bf16.msra.mxu1 %v13933_v3  ;;  %v13878_v44 = vcombine.high %v7171_v51, %v7175_v54  ;;  %v13998_v3 = vcombine.high %v7291_v55, %v7295_v8  ;;  %v7248_v51 = vld [vmem:[%s20942_s18 + $0x4b0] sm:$0xff] }
 0x851   :  { %8729 = vmatprep.subr.bf16.mxu0 %v13926_v1  ;;  %14053 = vmatprep.subr.msk.bf16.mxu1 %vm5467_vm0, %v14046_v11  ;;  %v7163_v1 = vld [vmem:[%s20942_s18 + $0x208] sm:$0xff] }
 0x852   :  { %v7167_v11 = vld [vmem:[%s20942_s18 + $0x228] sm:$0xff] }
 0x853   :  { %v13870_v4 = vcombine.high %v7163_v1, %v7167_v11  ;;  %v13869_v10 = vcombine.low %v7163_v1, %v7167_v11  ;;  %v7240_v1 = vld [vmem:[%s20942_s18 + $0x470] sm:$0xff] }
 0x854   :  { %8730 = vmatpush2.bf16.msra.mxu0 %v13925_v33  ;;  %8773 = vmatpush2.bf16.msra.mxu1 %v8614_v30  ;;  %v13992_v33 = vcombine.high %v7284_v50, %v7288_v46  ;;  %v7156_v30 = vld [vmem:[%s20942_s18 + $0x1d0] sm:$0xff] }
 0x855   :  { %8731 = vmatprep.subr.bf16.mxu0 %v13918_v16  ;;  %8774 = vmatprep.subr.bf16.mxu1 %v14038_v60  ;;  %v7160_v16 = vld [vmem:[%s20942_s18 + $0x1f0] sm:$0xff] }
 0x856   :  { %v7276_v60 = vld [vmem:[%s20942_s18 + $0x590] sm:$0xff]  ;;  %v13864_v58 = vcombine.high %v7156_v30, %v7160_v16  ;;  %v13863_v20 = vcombine.low %v7156_v30, %v7160_v16 }
 0x857   :  { %v13983_v24 = vcombine.low %v7276_v60, %v7280_v52  ;;  %v7232_v30 = vld [vmem:[%s20942_s18 + $0x430] sm:$0xff] }
 0x858   :  { %8732 = vmatpush2.bf16.msra.mxu0 %v13917_v13  ;;  %8775 = vmatpush2.bf16.msra.mxu1 %v14037_v15  ;;  %v13984_v13 = vcombine.high %v7276_v60, %v7280_v52  ;;  %v7148_v15 = vld [vmem:[%s20942_s18 + $0x190] sm:$0xff] }
 0x859   :  { %8733 = vmatprep.subr.bf16.mxu0 %v13910_v32  ;;  %8776 = vmatprep.subr.bf16.mxu1 %v14030_v19  ;;  %v7152_v32 = vld [vmem:[%s20942_s18 + $0x1b0] sm:$0xff] }
 0x85a   :  { %v7268_v19 = vld [vmem:[%s20942_s18 + $0x550] sm:$0xff]  ;;  %v13856_v0 = vcombine.high %v7148_v15, %v7152_v32  ;;  %v13855_v31 = vcombine.low %v7148_v15, %v7152_v32 }
 0x85b   :  { %v13975_v29 = vcombine.low %v7268_v19, %v7272_v36 }
 0x85c   :  { %8734 = vmatpush2.bf16.msra.mxu0 %v13909_v26  ;;  %8777 = vmatpush2.bf16.msra.mxu1 %v14029_v2  ;;  %v13976_v26 = vcombine.high %v7268_v19, %v7272_v36  ;;  %v7140_v2 = vld [vmem:[%s20942_s18 + $0x150] sm:$0xff] }
 0x85d   :  { %8735 = vmatprep.subr.bf16.mxu0 %v13902_v27  ;;  %8778 = vmatprep.subr.bf16.mxu1 %v14022_v23  ;;  %v7144_v27 = vld [vmem:[%s20942_s18 + $0x170] sm:$0xff] }
 0x85e   :  { %v7260_v23 = vld [vmem:[%s20942_s18 + $0x510] sm:$0xff]  ;;  %v13848_v34 = vcombine.high %v7140_v2, %v7144_v27  ;;  %v13847_v37 = vcombine.low %v7140_v2, %v7144_v27 }
 0x85f   :  { %v13967_v22 = vcombine.low %v7260_v23, %v7264_v28  ;;  %v7336_v2 = vld [vmem:[%s20942_s18 + $0x770] sm:$0xff] }
 0x860   :  { %8736 = vmatpush2.bf16.msra.mxu0 %v13901_v57  ;;  %8779 = vmatpush2.bf16.msra.mxu1 %v14021_v35  ;;  %v13968_v57 = vcombine.high %v7260_v23, %v7264_v28  ;;  %v7132_v35 = vld [vmem:[%s20942_s18 + $0x110] sm:$0xff] }
 0x861   :  { %8737 = vmatprep.subr.bf16.mxu0 %v13894_v63  ;;  %8780 = vmatprep.subr.bf16.mxu1 %v14014_v6  ;;  %v7136_v63 = vld [vmem:[%s20942_s18 + $0x130] sm:$0xff] }
 0x862   :  { %v7252_v6 = vld [vmem:[%s20942_s18 + $0x4d0] sm:$0xff]  ;;  %v13840_v5 = vcombine.high %v7132_v35, %v7136_v63  ;;  %v13839_v54 = vcombine.low %v7132_v35, %v7136_v63 }
 0x863   :  { %v13959_v55 = vcombine.low %v7252_v6, %v7256_v42  ;;  %v7328_v35 = vld [vmem:[%s20942_s18 + $0x730] sm:$0xff] }
 0x864   :  { %8738 = vmatpush2.bf16.msra.mxu0 %v13893_v47  ;;  %8781 = vmatpush2.bf16.msra.mxu1 %v14013_v61  ;;  %v13960_v47 = vcombine.high %v7252_v6, %v7256_v42  ;;  %v7124_v61 = vld [vmem:[%s20942_s18 + $0xd0] sm:$0xff] }
 0x865   :  { %8739 = vmatprep.subr.bf16.mxu0 %v13886_v48  ;;  %8782 = vmatprep.subr.bf16.mxu1 %v14006_v49  ;;  %v7128_v48 = vld [vmem:[%s20942_s18 + $0xf0] sm:$0xff] }
 0x866   :  { %v7244_v49 = vld [vmem:[%s20942_s18 + $0x490] sm:$0xff]  ;;  %v13832_v8 = vcombine.high %v7124_v61, %v7128_v48  ;;  %v13831_v11 = vcombine.low %v7124_v61, %v7128_v48 }
 0x867   :  { %v13951_v50 = vcombine.low %v7244_v49, %v7248_v51  ;;  %v7320_v61 = vld [vmem:[%s20942_s18 + $0x6f0] sm:$0xff] }
 0x868   :  { %8740 = vmatpush2.bf16.msra.mxu0 %v13885_v9  ;;  %8783 = vmatpush2.bf16.msra.mxu1 %v14005_v40  ;;  %v13952_v9 = vcombine.high %v7244_v49, %v7248_v51  ;;  %v7116_v40 = vld [vmem:[%s20942_s18 + $0x90] sm:$0xff] }
 0x869   :  { %8741 = vmatprep.subr.bf16.mxu0 %v13878_v44  ;;  %8784 = vmatprep.subr.bf16.mxu1 %v13998_v3  ;;  %v7120_v44 = vld [vmem:[%s20942_s18 + $0xb0] sm:$0xff] }
 0x86a   :  { %v7236_v3 = vld [vmem:[%s20942_s18 + $0x450] sm:$0xff]  ;;  %v13824_v46 = vcombine.high %v7116_v40, %v7120_v44  ;;  %v13823_v16 = vcombine.low %v7116_v40, %v7120_v44 }
 0x86b   :  { %v13943_v60 = vcombine.low %v7236_v3, %v7240_v1  ;;  %v7312_v40 = vld [vmem:[%s20942_s18 + $0x6b0] sm:$0xff] }
 0x86c   :  { %8742 = vmatpush2.bf16.msra.mxu0 %v13877_v14  ;;  %8785 = vmatpush2.bf16.msra.mxu1 %v13997_v25  ;;  %v13944_v14 = vcombine.high %v7236_v3, %v7240_v1  ;;  %v7108_v25 = vld [vmem:[%s20942_s18 + $0x50] sm:$0xff] }
 0x86d   :  { %8743 = vmatprep.subr.bf16.mxu0 %v13870_v4  ;;  %8836 = vmatprep.subr.bf16.mxu1 %v13992_v33  ;;  %v7112_v4 = vld [vmem:[%s20942_s18 + $0x70] sm:$0xff] }
 0x86e   :  { %v7228_v33 = vld [vmem:[%s20942_s18 + $0x410] sm:$0xff]  ;;  %v13816_v52 = vcombine.high %v7108_v25, %v7112_v4  ;;  %v13815_v15 = vcombine.low %v7108_v25, %v7112_v4 }
 0x86f   :  { %8787 = vmatmul.mubr.bf16.vlgmr.msra.gmra.mxu1 %v18663_v62  ;;  %v13935_v32 = vcombine.low %v7228_v33, %v7232_v30  ;;  %v7304_v25 = vld [vmem:[%s20942_s18 + $0x670] sm:$0xff] }
 0x870   :  { %8744 = vmatpush2.bf16.msra.mxu0 %v13869_v10  ;;  %8837 = vmatpush1.bf16.msra.mxu1 %v13991_v12  ;;  %v13936_v10 = vcombine.high %v7228_v33, %v7232_v30  ;;  %v7100_v12 = vld [vmem:[%s20942_s18 + $0x10] sm:$0xff] }
 0x871   :  { %14056 = vmatprep.mubr.msk.bf16.mxu1 %vm6194_vm2, %v18659_v7  ;;  %8795 = vmatprep.subr.bf16.mxu0 %v13864_v58  ;;  %v7104_v58 = vld [vmem:[%s20942_s18 + $0x30] sm:$0xff] }
 0x872   :  { %8838 = vmatprep.subr.bf16.mxu1 %v13984_v13  ;;  %v7340_v13 = vld [vmem:[%s20942_s18 + $0x790] sm:$0xff]  ;;  %v13808_v19 = vcombine.high %v7100_v12, %v7104_v58  ;;  %v13807_v27 = vcombine.low %v7100_v12, %v7104_v58 }
 0x873   :  { %8746 = vmatmul.mubr.bf16.vlgmr.msra.gmra.mxu0 %v18661_v41  ;;  %v14048_v36 = vcombine.high %v7340_v13, %v7340_v13  ;;  %v7296_v12 = vld [vmem:[%s20942_s18 + $0x630] sm:$0xff] }
 0x874   :  { %8796 = vmatpush1.bf16.msra.mxu0 %v13863_v20  ;;  %8827 = vmatprep.mubr.bf16.mxu0 %v18657_v45  ;;  %v14047_v20 = vcombine.low %v7340_v13, %v7340_v13 }
 0x875   :  { %8839 = vmatpush1.bf16.msra.mxu1 %v13983_v24  ;;  %8797 = vmatprep.subr.bf16.mxu0 %v13856_v0  ;;  %v7220_v24 = vld [vmem:[%s20942_s18 + $0x3d0] sm:$0xff] }
 0x876   :  { %8840 = vmatprep.subr.bf16.mxu1 %v13976_v26  ;;  %v7224_v0 = vld [vmem:[%s20942_s18 + $0x3f0] sm:$0xff]  ;;  %v8620_v28 = vsel %vm5467_vm0, %v14047_v20, 0  ;;  %v7285_v20 = vld [vmem:[%s20942_s18 + $0x5d8] sm:$0xff] }
 0x877   :  { %v7332_v26 = vld [vmem:[%s20942_s18 + $0x750] sm:$0xff]  ;;  %v13928_v23 = vcombine.high %v7220_v24, %v7224_v0  ;;  %v13927_v63 = vcombine.low %v7220_v24, %v7224_v0  ;;  %v7289_v24 = vld [vmem:[%s20942_s18 + $0x5f8] sm:$0xff] }
 0x878   :  { %8798 = vmatpush1.bf16.msra.mxu0 %v13855_v31  ;;  %v14040_v31 = vcombine.high %v7332_v26, %v7336_v2  ;;  %v14039_v6 = vcombine.low %v7332_v26, %v7336_v2 }
 0x879   :  { %8841 = vmatpush1.bf16.msra.mxu1 %v13975_v29  ;;  %8799 = vmatprep.subr.bf16.mxu0 %v13848_v34  ;;  %v7212_v29 = vld [vmem:[%s20942_s18 + $0x390] sm:$0xff] }
 0x87a   :  { %8842 = vmatprep.subr.bf16.mxu1 %v13968_v57  ;;  %v7216_v34 = vld [vmem:[%s20942_s18 + $0x3b0] sm:$0xff] }
 0x87b   :  { %v7324_v57 = vld [vmem:[%s20942_s18 + $0x710] sm:$0xff]  ;;  %v13920_v42 = vcombine.high %v7212_v29, %v7216_v34  ;;  %v13919_v48 = vcombine.low %v7212_v29, %v7216_v34  ;;  %v7281_v29 = vld [vmem:[%s20942_s18 + $0x5b8] sm:$0xff] }
 0x87c   :  { %8800 = vmatpush1.bf16.msra.mxu0 %v13847_v37  ;;  %v14032_v37 = vcombine.high %v7324_v57, %v7328_v35  ;;  %v14031_v49 = vcombine.low %v7324_v57, %v7328_v35  ;;  %v13993_v57 = vcombine.low %v7285_v20, %v7289_v24 }
 0x87d   :  { %8843 = vmatpush1.bf16.msra.mxu1 %v13967_v22  ;;  %8801 = vmatprep.subr.bf16.mxu0 %v13840_v5  ;;  %v7204_v22 = vld [vmem:[%s20942_s18 + $0x350] sm:$0xff] }
 0x87e   :  { %8844 = vmatprep.subr.bf16.mxu1 %v13960_v47  ;;  %v7208_v5 = vld [vmem:[%s20942_s18 + $0x370] sm:$0xff] }
 0x87f   :  { %v7316_v47 = vld [vmem:[%s20942_s18 + $0x6d0] sm:$0xff]  ;;  %v13912_v51 = vcombine.high %v7204_v22, %v7208_v5  ;;  %v13911_v44 = vcombine.low %v7204_v22, %v7208_v5  ;;  %v7273_v22 = vld [vmem:[%s20942_s18 + $0x578] sm:$0xff] }
 0x880   :  { %8802 = vmatpush1.bf16.msra.mxu0 %v13839_v54  ;;  %v14024_v54 = vcombine.high %v7316_v47, %v7320_v61  ;;  %v14023_v3 = vcombine.low %v7316_v47, %v7320_v61 }
 0x881   :  { %8845 = vmatpush1.bf16.msra.mxu1 %v13959_v55  ;;  %8803 = vmatprep.subr.bf16.mxu0 %v13832_v8  ;;  %v7196_v55 = vld [vmem:[%s20942_s18 + $0x310] sm:$0xff] }
 0x882   :  { %8846 = vmatprep.subr.bf16.mxu1 %v13952_v9  ;;  %v7200_v8 = vld [vmem:[%s20942_s18 + $0x330] sm:$0xff] }
 0x883   :  { %v7308_v9 = vld [vmem:[%s20942_s18 + $0x690] sm:$0xff]  ;;  %v13904_v1 = vcombine.high %v7196_v55, %v7200_v8  ;;  %v13903_v4 = vcombine.low %v7196_v55, %v7200_v8 }
 0x884   :  { %8804 = vmatpush1.bf16.msra.mxu0 %v13831_v11  ;;  %v14016_v11 = vcombine.high %v7308_v9, %v7312_v40  ;;  %v14015_v33 = vcombine.low %v7308_v9, %v7312_v40 }
 0x885   :  { %8847 = vmatpush1.bf16.msra.mxu1 %v13951_v50  ;;  %8805 = vmatprep.subr.bf16.mxu0 %v13824_v46  ;;  %v7188_v50 = vld [vmem:[%s20942_s18 + $0x2d0] sm:$0xff] }
 0x886   :  { %8848 = vmatprep.subr.bf16.mxu1 %v13944_v14  ;;  %v7192_v46 = vld [vmem:[%s20942_s18 + $0x2f0] sm:$0xff] }
 0x887   :  { %v7300_v14 = vld [vmem:[%s20942_s18 + $0x650] sm:$0xff]  ;;  %v13896_v30 = vcombine.high %v7188_v50, %v7192_v46  ;;  %v13895_v58 = vcombine.low %v7188_v50, %v7192_v46 }
 0x888   :  { %8806 = vmatpush1.bf16.msra.mxu0 %v13823_v16  ;;  %v14008_v16 = vcombine.high %v7300_v14, %v7304_v25  ;;  %v14007_v13 = vcombine.low %v7300_v14, %v7304_v25 }
 0x889   :  { %8849 = vmatpush1.bf16.msra.mxu1 %v13943_v60  ;;  %8807 = vmatprep.subr.bf16.mxu0 %v13816_v52  ;;  %v7180_v60 = vld [vmem:[%s20942_s18 + $0x290] sm:$0xff] }
 0x88a   :  { %8850 = vmatprep.subr.bf16.mxu1 %v13936_v10  ;;  %v7184_v52 = vld [vmem:[%s20942_s18 + $0x2b0] sm:$0xff] }
 0x88b   :  { %v7292_v10 = vld [vmem:[%s20942_s18 + $0x610] sm:$0xff]  ;;  %v13887_v0 = vcombine.low %v7180_v60, %v7184_v52 }
 0x88c   :  { %8808 = vmatpush1.bf16.msra.mxu0 %v13815_v15  ;;  %v13888_v15 = vcombine.high %v7180_v60, %v7184_v52  ;;  %v13999_v26 = vcombine.low %v7292_v10, %v7296_v12 }
 0x88d   :  { %8851 = vmatpush1.bf16.msra.mxu1 %v13935_v32  ;;  %8809 = vmatprep.subr.bf16.mxu0 %v13808_v19  ;;  %v14000_v32 = vcombine.high %v7292_v10, %v7296_v12  ;;  %v7172_v19 = vld [vmem:[%s20942_s18 + $0x250] sm:$0xff]  ;;  %v7125_v12 = vld [vmem:[%s20942_s18 + $0xd8] sm:$0xff] }
 0x88e   :  { %14055 = vmatprep.subr.msk.bf16.mxu1 %vm5467_vm0, %v14048_v36  ;;  %v7176_v36 = vld [vmem:[%s20942_s18 + $0x270] sm:$0xff] }
 0x88f   :  { %v13880_v2 = vcombine.high %v7172_v19, %v7176_v36  ;;  %v13879_v34 = vcombine.low %v7172_v19, %v7176_v36 }
 0x890   :  { %8810 = vmatpush1.bf16.msra.mxu0 %v13807_v27  ;;  %v13994_v27 = vcombine.high %v7285_v20, %v7289_v24  ;;  %v7117_v24 = vld [vmem:[%s20942_s18 + $0x98] sm:$0xff] }
 0x891   :  { %8855 = vmatpush2.bf16.msra.mxu1 %v8620_v28  ;;  %8811 = vmatprep.subr.bf16.mxu0 %v13928_v23  ;;  %v7164_v23 = vld [vmem:[%s20942_s18 + $0x210] sm:$0xff] }
 0x892   :  { %8856 = vmatprep.subr.bf16.mxu1 %v14040_v31  ;;  %v7168_v28 = vld [vmem:[%s20942_s18 + $0x230] sm:$0xff]  ;;  %v7277_v31 = vld [vmem:[%s20942_s18 + $0x598] sm:$0xff] }
 0x893   :  { %v13872_v35 = vcombine.high %v7164_v23, %v7168_v28  ;;  %v13871_v5 = vcombine.low %v7164_v23, %v7168_v28  ;;  %v13985_v47 = vcombine.low %v7277_v31, %v7281_v29 }
 0x894   :  { %8812 = vmatpush2.bf16.msra.mxu0 %v13927_v63  ;;  %v13986_v63 = vcombine.high %v7277_v31, %v7281_v29  ;;  %v7109_v29 = vld [vmem:[%s20942_s18 + $0x58] sm:$0xff] }
 0x895   :  { %8857 = vmatpush2.bf16.msra.mxu1 %v14039_v6  ;;  %8813 = vmatprep.subr.bf16.mxu0 %v13920_v42  ;;  %v7157_v6 = vld [vmem:[%s20942_s18 + $0x1d8] sm:$0xff] }
 0x896   :  { %8858 = vmatprep.subr.bf16.mxu1 %v14032_v37  ;;  %v7161_v42 = vld [vmem:[%s20942_s18 + $0x1f8] sm:$0xff] }
 0x897   :  { %v7269_v37 = vld [vmem:[%s20942_s18 + $0x558] sm:$0xff]  ;;  %v13866_v61 = vcombine.high %v7157_v6, %v7161_v42  ;;  %v13865_v55 = vcombine.low %v7157_v6, %v7161_v42 }
 0x898   :  { %8814 = vmatpush2.bf16.msra.mxu0 %v13919_v48  ;;  %v13978_v48 = vcombine.high %v7269_v37, %v7273_v22  ;;  %v13977_v8 = vcombine.low %v7269_v37, %v7273_v22  ;;  %v7101_v22 = vld [vmem:[%s20942_s18 + $0x18] sm:$0xff] }
 0x899   :  { %8859 = vmatpush2.bf16.msra.mxu1 %v14031_v49  ;;  %8815 = vmatprep.subr.bf16.mxu0 %v13912_v51  ;;  %v7149_v49 = vld [vmem:[%s20942_s18 + $0x198] sm:$0xff] }
 0x89a   :  { %8860 = vmatprep.subr.bf16.mxu1 %v14024_v54  ;;  %v7153_v51 = vld [vmem:[%s20942_s18 + $0x1b8] sm:$0xff] }
 0x89b   :  { %v7261_v54 = vld [vmem:[%s20942_s18 + $0x518] sm:$0xff]  ;;  %v13858_v9 = vcombine.high %v7149_v49, %v7153_v51  ;;  %v13857_v50 = vcombine.low %v7149_v49, %v7153_v51 }
 0x89c   :  { %8816 = vmatpush2.bf16.msra.mxu0 %v13911_v44  ;;  %v7141_v44 = vld [vmem:[%s20942_s18 + $0x158] sm:$0xff] }
 0x89d   :  { %8861 = vmatpush2.bf16.msra.mxu1 %v14023_v3  ;;  %8817 = vmatprep.subr.bf16.mxu0 %v13904_v1  ;;  %v7145_v3 = vld [vmem:[%s20942_s18 + $0x178] sm:$0xff] }
 0x89e   :  { %8862 = vmatprep.subr.bf16.mxu1 %v14016_v11  ;;  %v7253_v1 = vld [vmem:[%s20942_s18 + $0x4d8] sm:$0xff]  ;;  %v13850_v14 = vcombine.high %v7141_v44, %v7145_v3 }
 0x89f   :  { %v7257_v11 = vld [vmem:[%s20942_s18 + $0x4f8] sm:$0xff] }
 0x8a0   :  { %8818 = vmatpush2.bf16.msra.mxu0 %v13903_v4  ;;  %v13962_v25 = vcombine.high %v7253_v1, %v7257_v11  ;;  %v7133_v4 = vld [vmem:[%s20942_s18 + $0x118] sm:$0xff]  ;;  %v13961_v60 = vcombine.low %v7253_v1, %v7257_v11 }
 0x8a1   :  { %8863 = vmatpush2.bf16.msra.mxu1 %v14015_v33  ;;  %8819 = vmatprep.subr.bf16.mxu0 %v13896_v30  ;;  %v7137_v33 = vld [vmem:[%s20942_s18 + $0x138] sm:$0xff] }
 0x8a2   :  { %8864 = vmatprep.subr.bf16.mxu1 %v14008_v16  ;;  %v7245_v30 = vld [vmem:[%s20942_s18 + $0x498] sm:$0xff]  ;;  %v13849_v16 = vcombine.low %v7141_v44, %v7145_v3  ;;  %v13842_v52 = vcombine.high %v7133_v4, %v7137_v33 }
 0x8a3   :  { %v7213_v11 = vld [vmem:[%s20942_s18 + $0x398] sm:$0xff] }
 0x8a4   :  { %8820 = vmatpush2.bf16.msra.mxu0 %v13895_v58  ;;  %v7129_v58 = vld [vmem:[%s20942_s18 + $0xf8] sm:$0xff] }
 0x8a5   :  { %8865 = vmatpush2.bf16.msra.mxu1 %v14007_v13  ;;  %8821 = vmatprep.subr.bf16.mxu0 %v13888_v15  ;;  %v7237_v13 = vld [vmem:[%s20942_s18 + $0x458] sm:$0xff]  ;;  %v13834_v36 = vcombine.high %v7125_v12, %v7129_v58 }
 0x8a6   :  { %8866 = vmatprep.subr.bf16.mxu1 %v14000_v32  ;;  %v7241_v15 = vld [vmem:[%s20942_s18 + $0x478] sm:$0xff]  ;;  %v13841_v32 = vcombine.low %v7133_v4, %v7137_v33 }
 0x8a7   :  { %v13946_v20 = vcombine.high %v7237_v13, %v7241_v15  ;;  %v13945_v23 = vcombine.low %v7237_v13, %v7241_v15  ;;  %v7197_v15 = vld [vmem:[%s20942_s18 + $0x318] sm:$0xff] }
 0x8a8   :  { %8822 = vmatpush2.bf16.msra.mxu0 %v13887_v0  ;;  %v7121_v0 = vld [vmem:[%s20942_s18 + $0xb8] sm:$0xff] }
 0x8a9   :  { %8867 = vmatpush2.bf16.msra.mxu1 %v13999_v26  ;;  %8823 = vmatprep.subr.bf16.mxu0 %v13880_v2  ;;  %v7229_v26 = vld [vmem:[%s20942_s18 + $0x418] sm:$0xff]  ;;  %v13826_v28 = vcombine.high %v7117_v24, %v7121_v0 }
 0x8aa   :  { %8918 = vmatprep.subr.bf16.mxu1 %v13994_v27  ;;  %v7233_v2 = vld [vmem:[%s20942_s18 + $0x438] sm:$0xff]  ;;  %v13833_v27 = vcombine.low %v7125_v12, %v7129_v58 }
 0x8ab   :  { %v13938_v31 = vcombine.high %v7229_v26, %v7233_v2 }
 0x8ac   :  { %8869 = vmatmul.mubr.bf16.vlgmr.msra.gmra.mxu1 %v18663_v62  ;;  %8824 = vmatpush2.bf16.msra.mxu0 %v13879_v34  ;;  %v7113_v34 = vld [vmem:[%s20942_s18 + $0x78] sm:$0xff] }
 0x8ad   :  { %8919 = vmatpush1.bf16.msra.mxu1 %v13993_v57  ;;  %14058 = vmatprep.mubr.msk.bf16.mxu1 %vm6194_vm2, %v18659_v7  ;;  %v7265_v7 = vld [vmem:[%s20942_s18 + $0x538] sm:$0xff]  ;;  %v13818_v6 = vcombine.high %v7109_v29, %v7113_v34 }
 0x8ae   :  { %8825 = vmatprep.subr.bf16.mxu0 %v13872_v35  ;;  %8920 = vmatprep.subr.bf16.mxu1 %v13986_v63  ;;  %v13970_v40 = vcombine.high %v7261_v54, %v7265_v7  ;;  %v13969_v46 = vcombine.low %v7261_v54, %v7265_v7  ;;  %v7341_v57 = vld [vmem:[%s20942_s18 + $0x798] sm:$0xff]  ;;  %v13825_v35 = vcombine.low %v7117_v24, %v7121_v0 }
 0x8af   :  { %v13937_v63 = vcombine.low %v7229_v26, %v7233_v2  ;;  %v14050_v42 = vcombine.high %v7341_v57, %v7341_v57  ;;  %v14049_v37 = vcombine.low %v7341_v57, %v7341_v57  ;;  %v7221_v7 = vld [vmem:[%s20942_s18 + $0x3d8] sm:$0xff] }
 0x8b0   :  { %8826 = vmatpush2.bf16.msra.mxu0 %v13871_v5  ;;  %v7105_v5 = vld [vmem:[%s20942_s18 + $0x38] sm:$0xff] }
 0x8b1   :  { %8921 = vmatpush1.bf16.msra.mxu1 %v13985_v47  ;;  %8877 = vmatprep.subr.bf16.mxu0 %v13866_v61  ;;  %v7333_v47 = vld [vmem:[%s20942_s18 + $0x758] sm:$0xff]  ;;  %v13810_v49 = vcombine.high %v7101_v22, %v7105_v5  ;;  %v8626_v51 = vsel %vm5467_vm0, %v14049_v37, 0 }
 0x8b2   :  { %8922 = vmatprep.subr.bf16.mxu1 %v13978_v48  ;;  %v7337_v61 = vld [vmem:[%s20942_s18 + $0x778] sm:$0xff]  ;;  %v13817_v48 = vcombine.low %v7109_v29, %v7113_v34 }
 0x8b3   :  { %8828 = vmatmul.mubr.bf16.vlgmr.msra.gmra.mxu0 %v18661_v41  ;;  %v14042_v54 = vcombine.high %v7333_v47, %v7337_v61  ;;  %v14041_v44 = vcombine.low %v7333_v47, %v7337_v61  ;;  %v7189_v2 = vld [vmem:[%s20942_s18 + $0x2d8] sm:$0xff] }
 0x8b4   :  { %8878 = vmatpush1.bf16.msra.mxu0 %v13865_v55  ;;  %8909 = vmatprep.mubr.bf16.mxu0 %v18657_v45  ;;  %v7249_v45 = vld [vmem:[%s20942_s18 + $0x4b8] sm:$0xff] }
 0x8b5   :  { %8923 = vmatpush1.bf16.msra.mxu1 %v13977_v8  ;;  %8879 = vmatprep.subr.bf16.mxu0 %v13858_v9  ;;  %v13954_v10 = vcombine.high %v7245_v30, %v7249_v45  ;;  %v13953_v19 = vcombine.low %v7245_v30, %v7249_v45  ;;  %v7225_v55 = vld [vmem:[%s20942_s18 + $0x3f8] sm:$0xff] }
 0x8b6   :  { %8924 = vmatprep.subr.bf16.mxu1 %v13970_v40  ;;  %v7325_v8 = vld [vmem:[%s20942_s18 + $0x718] sm:$0xff]  ;;  %v13809_v40 = vcombine.low %v7101_v22, %v7105_v5  ;;  %v13930_v3 = vcombine.high %v7221_v7, %v7225_v55 }
 0x8b7   :  { %v7329_v9 = vld [vmem:[%s20942_s18 + $0x738] sm:$0xff] }
 0x8b8   :  { %8880 = vmatpush1.bf16.msra.mxu0 %v13857_v50  ;;  %v14034_v1 = vcombine.high %v7325_v8, %v7329_v9  ;;  %v7217_v50 = vld [vmem:[%s20942_s18 + $0x3b8] sm:$0xff]  ;;  %v14033_v4 = vcombine.low %v7325_v8, %v7329_v9 }
 0x8b9   :  { %8925 = vmatpush1.bf16.msra.mxu1 %v13969_v46  ;;  %8881 = vmatprep.subr.bf16.mxu0 %v13850_v14  ;;  %v7317_v46 = vld [vmem:[%s20942_s18 + $0x6d8] sm:$0xff]  ;;  %v13922_v33 = vcombine.high %v7213_v11, %v7217_v50 }
 0x8ba   :  { %8926 = vmatprep.subr.bf16.mxu1 %v13962_v25  ;;  %v7321_v14 = vld [vmem:[%s20942_s18 + $0x6f8] sm:$0xff]  ;;  %v13929_v25 = vcombine.low %v7221_v7, %v7225_v55 }
 0x8bb   :  { %v14026_v30 = vcombine.high %v7317_v46, %v7321_v14  ;;  %v7205_v45 = vld [vmem:[%s20942_s18 + $0x358] sm:$0xff]  ;;  %v14025_v12 = vcombine.low %v7317_v46, %v7321_v14  ;;  %v9031_v46 = vld [vmem:[%s20944_s20 + $0x1c0] sm:$0xff] }
 0x8bc   :  { %8882 = vmatpush1.bf16.msra.mxu0 %v13849_v16  ;;  %v7209_v16 = vld [vmem:[%s20942_s18 + $0x378] sm:$0xff]  ;;  %v9035_v14 = vld [vmem:[%s20944_s20 + $0x1e0] sm:$0xff] }
 0x8bd   :  { %8927 = vmatpush1.bf16.msra.mxu1 %v13961_v60  ;;  %8883 = vmatprep.subr.bf16.mxu0 %v13842_v52  ;;  %v7309_v60 = vld [vmem:[%s20942_s18 + $0x698] sm:$0xff]  ;;  %v13914_v58 = vcombine.high %v7205_v45, %v7209_v16 }
 0x8be   :  { %8928 = vmatprep.subr.bf16.mxu1 %v13954_v10  ;;  %v7313_v52 = vld [vmem:[%s20942_s18 + $0x6b8] sm:$0xff]  ;;  %v13921_v10 = vcombine.low %v7213_v11, %v7217_v50 }
 0x8bf   :  { %v14018_v13 = vcombine.high %v7309_v60, %v7313_v52  ;;  %v14017_v24 = vcombine.low %v7309_v60, %v7313_v52  ;;  %v7173_v47 = vld [vmem:[%s20942_s18 + $0x258] sm:$0xff]  ;;  %v9027_v60 = vld [vmem:[%s20944_s20 + $0x1a0] sm:$0xff] }
 0x8c0   :  { %8884 = vmatpush1.bf16.msra.mxu0 %v13841_v32  ;;  %v7201_v32 = vld [vmem:[%s20942_s18 + $0x338] sm:$0xff] }
 0x8c1   :  { %8929 = vmatpush1.bf16.msra.mxu1 %v13953_v19  ;;  %8885 = vmatprep.subr.bf16.mxu0 %v13834_v36  ;;  %v7301_v19 = vld [vmem:[%s20942_s18 + $0x658] sm:$0xff]  ;;  %v13906_v0 = vcombine.high %v7197_v15, %v7201_v32 }
 0x8c2   :  { %8930 = vmatprep.subr.bf16.mxu1 %v13946_v20  ;;  %v7305_v36 = vld [vmem:[%s20942_s18 + $0x678] sm:$0xff]  ;;  %v13913_v20 = vcombine.low %v7205_v45, %v7209_v16  ;;  %v9023_v16 = vld [vmem:[%s20944_s20 + $0x180] sm:$0xff] }
 0x8c3   :  { %v14010_v26 = vcombine.high %v7301_v19, %v7305_v36  ;;  %v14009_v29 = vcombine.low %v7301_v19, %v7305_v36  ;;  %v7177_v61 = vld [vmem:[%s20942_s18 + $0x278] sm:$0xff]  ;;  %v9015_v36 = vld [vmem:[%s20944_s20 + $0x140] sm:$0xff] }
 0x8c4   :  { %8886 = vmatpush1.bf16.msra.mxu0 %v13833_v27  ;;  %v7193_v27 = vld [vmem:[%s20942_s18 + $0x2f8] sm:$0xff]  ;;  %v13882_v7 = vcombine.high %v7173_v47, %v7177_v61 }
 0x8c5   :  { %8931 = vmatpush1.bf16.msra.mxu1 %v13945_v23  ;;  %8887 = vmatprep.subr.bf16.mxu0 %v13826_v28  ;;  %v7293_v23 = vld [vmem:[%s20942_s18 + $0x618] sm:$0xff]  ;;  %v13898_v34 = vcombine.high %v7189_v2, %v7193_v27  ;;  %v13897_v37 = vcombine.low %v7189_v2, %v7193_v27  ;;  %v9119_v2 = vld [vmem:[%s20944_s20 + $0x480] sm:$0xff] }
 0x8c6   :  { %8932 = vmatprep.subr.bf16.mxu1 %v13938_v31  ;;  %v7297_v28 = vld [vmem:[%s20942_s18 + $0x638] sm:$0xff]  ;;  %v13905_v31 = vcombine.low %v7197_v15, %v7201_v32  ;;  %v14108_v15 = vcombine.high %v9023_v16, %v9027_v60  ;;  %v9123_v27 = vld [vmem:[%s20944_s20 + $0x4a0] sm:$0xff] }
 0x8c7   :  { %v14002_v57 = vcombine.high %v7293_v23, %v7297_v28  ;;  %v14001_v22 = vcombine.low %v7293_v23, %v7297_v28  ;;  %v7165_v8 = vld [vmem:[%s20942_s18 + $0x218] sm:$0xff]  ;;  %v14107_v23 = vcombine.low %v9023_v16, %v9027_v60  ;;  %v8987_v16 = vld [vmem:[%s20944_s20 + $0x60] sm:$0xff] }
 0x8c8   :  { %8888 = vmatpush1.bf16.msra.mxu0 %v13825_v35  ;;  %v7181_v35 = vld [vmem:[%s20942_s18 + $0x298] sm:$0xff] }
 0x8c9   :  { %8933 = vmatpush1.bf16.msra.mxu1 %v13937_v63  ;;  %8889 = vmatprep.subr.bf16.mxu0 %v13818_v6  ;;  %v7185_v63 = vld [vmem:[%s20942_s18 + $0x2b8] sm:$0xff]  ;;  %v9159_v6 = vld [vmem:[%s20944_s20 + $0x5c0] sm:$0xff] }
 0x8ca   :  { %14057 = vmatprep.subr.msk.bf16.mxu1 %vm5467_vm0, %v14050_v42  ;;  %v9163_v42 = vld [vmem:[%s20944_s20 + $0x5e0] sm:$0xff]  ;;  %v13890_v5 = vcombine.high %v7181_v35, %v7185_v63  ;;  %v7169_v9 = vld [vmem:[%s20942_s18 + $0x238] sm:$0xff] }
 0x8cb   :  { %v14243_v55 = vcombine.low %v9159_v6, %v9163_v42  ;;  %v13874_v11 = vcombine.high %v7165_v8, %v7169_v9 }
 0x8cc   :  { %8890 = vmatpush1.bf16.msra.mxu0 %v13817_v48  ;;  %v14244_v48 = vcombine.high %v9159_v6, %v9163_v42 }
 0x8cd   :  { %8937 = vmatpush2.bf16.msra.mxu1 %v8626_v51  ;;  %8891 = vmatprep.subr.bf16.mxu0 %v13810_v49  ;;  %v9151_v49 = vld [vmem:[%s20944_s20 + $0x580] sm:$0xff] }
 0x8ce   :  { %8938 = vmatprep.subr.bf16.mxu1 %v14042_v54  ;;  %v9155_v51 = vld [vmem:[%s20944_s20 + $0x5a0] sm:$0xff]  ;;  %v13889_v54 = vcombine.low %v7181_v35, %v7185_v63  ;;  %v14204_v63 = vcombine.high %v9119_v2, %v9123_v27 }
 0x8cf   :  { %v14235_v50 = vcombine.low %v9151_v49, %v9155_v51  ;;  %v9011_v35 = vld [vmem:[%s20944_s20 + $0x120] sm:$0xff] }
 0x8d0   :  { %8892 = vmatpush1.bf16.msra.mxu0 %v13809_v40  ;;  %v14236_v40 = vcombine.high %v9151_v49, %v9155_v51  ;;  %v14203_v51 = vcombine.low %v9119_v2, %v9123_v27 }
 0x8d1   :  { %8939 = vmatpush2.bf16.msra.mxu1 %v14041_v44  ;;  %8893 = vmatprep.subr.bf16.mxu0 %v13930_v3  ;;  %v9143_v44 = vld [vmem:[%s20944_s20 + $0x540] sm:$0xff] }
 0x8d2   :  { %8940 = vmatprep.subr.bf16.mxu1 %v14034_v1  ;;  %v9147_v3 = vld [vmem:[%s20944_s20 + $0x560] sm:$0xff]  ;;  %v13881_v1 = vcombine.low %v7173_v47, %v7177_v61 }
 0x8d3   :  { %v14227_v45 = vcombine.low %v9143_v44, %v9147_v3 }
 0x8d4   :  { %8894 = vmatpush2.bf16.msra.mxu0 %v13929_v25  ;;  %v14228_v25 = vcombine.high %v9143_v44, %v9147_v3 }
 0x8d5   :  { %8941 = vmatpush2.bf16.msra.mxu1 %v14033_v4  ;;  %8895 = vmatprep.subr.bf16.mxu0 %v13922_v33  ;;  %v9139_v4 = vld [vmem:[%s20944_s20 + $0x520] sm:$0xff]  ;;  %v13873_v33 = vcombine.low %v7165_v8, %v7169_v9 }
 0x8d6   :  { %8942 = vmatprep.subr.bf16.mxu1 %v14026_v30  ;;  %v14116_v30 = vcombine.high %v9031_v46, %v9035_v14  ;;  %v9103_v9 = vld [vmem:[%s20944_s20 + $0x400] sm:$0xff] }
 0x8d8   :  { %8896 = vmatpush2.bf16.msra.mxu0 %v13921_v10  ;;  %v9127_v10 = vld [vmem:[%s20944_s20 + $0x4c0] sm:$0xff] }
 0x8d9   :  { %8943 = vmatpush2.bf16.msra.mxu1 %v14025_v12  ;;  %8897 = vmatprep.subr.bf16.mxu0 %v13914_v58  ;;  %v9131_v12 = vld [vmem:[%s20944_s20 + $0x4e0] sm:$0xff]  ;;  %v14115_v58 = vcombine.low %v9031_v46, %v9035_v14 }
 0x8da   :  { %8944 = vmatprep.subr.bf16.mxu1 %v14018_v13  ;;  %v19260_v13 = vld [vmem:[%s20943_s19] sm:$0xff] }
 0x8db   :  { %v7351_v19 = vrot.slane %v19260_v13, %v16309_v43  ;;  %v8995_v46 = vld [vmem:[%s20944_s20 + $0xa0] sm:$0xff] }
 0x8dc   :  { %8898 = vmatpush2.bf16.msra.mxu0 %v13913_v20  ;;  %v9019_v20 = vld [vmem:[%s20944_s20 + $0x160] sm:$0xff] }
 0x8dd   :  { %8945 = vmatpush2.bf16.msra.mxu1 %v14017_v24  ;;  %8899 = vmatprep.subr.bf16.mxu0 %v13906_v0  ;;  %v14212_v24 = vcombine.high %v9127_v10, %v9131_v12  ;;  %v14099_v47 = vcombine.low %v9015_v36, %v9019_v20 }
 0x8de   :  { %8946 = vmatprep.subr.bf16.mxu1 %v14010_v26 }
 0x8e0   :  { %8900 = vmatpush2.bf16.msra.mxu0 %v13905_v31 }
 0x8e1   :  { %8947 = vmatpush2.bf16.msra.mxu1 %v14009_v29  ;;  %8901 = vmatprep.subr.bf16.mxu0 %v13898_v34  ;;  %v14100_v29 = vcombine.high %v9015_v36, %v9019_v20  ;;  %v9207_v20 = vld [vmem:[%s20944_s20 + $0x740] sm:$0xff] }
 0x8e2   :  { %8948 = vmatprep.subr.bf16.mxu1 %v14002_v57  ;;  %v9007_v57 = vld [vmem:[%s20944_s20 + $0x100] sm:$0xff] }
 0x8e3   :  { %v14092_v49 = vcombine.high %v9007_v57, %v9011_v35  ;;  %v14091_v3 = vcombine.low %v9007_v57, %v9011_v35 }
 0x8e4   :  { %8902 = vmatpush2.bf16.msra.mxu0 %v13897_v37  ;;  %v9111_v37 = vld [vmem:[%s20944_s20 + $0x440] sm:$0xff] }
 0x8e5   :  { %8949 = vmatpush2.bf16.msra.mxu1 %v14001_v22  ;;  %8903 = vmatprep.subr.bf16.mxu0 %v13890_v5  ;;  %v9115_v22 = vld [vmem:[%s20944_s20 + $0x460] sm:$0xff] }
 0x8e6   :  { %12135 = vmatprep.subr.bf16.mxu1 %v14244_v48  ;;  %v14196_v8 = vcombine.high %v9111_v37, %v9115_v22 }
 0x8e8   :  { %8951 = vmatmul.mubr.bf16.vlgmr.msra.gmra.mxu1 %v18663_v62  ;;  %8904 = vmatpush2.bf16.msra.mxu0 %v13889_v54  ;;  %v9135_v62 = vld [vmem:[%s20944_s20 + $0x500] sm:$0xff] }
 0x8e9   :  { %8905 = vmatprep.subr.bf16.mxu0 %v13882_v7  ;;  %12136 = vmatpush1.bf16.msra.mxu1 %v14243_v55  ;;  %v14220_v52 = vcombine.high %v9135_v62, %v9139_v4  ;;  %v14219_v32 = vcombine.low %v9135_v62, %v9139_v4  ;;  %v8999_v7 = vld [vmem:[%s20944_s20 + $0xc0] sm:$0xff] }
 0x8ea   :  { %12137 = vmatprep.subr.bf16.mxu1 %v14236_v40  ;;  %v9003_v55 = vld [vmem:[%s20944_s20 + $0xe0] sm:$0xff] }
 0x8eb   :  { %v9107_v40 = vld [vmem:[%s20944_s20 + $0x420] sm:$0xff]  ;;  %v14083_v4 = vcombine.low %v8999_v7, %v9003_v55 }
 0x8ec   :  { %8906 = vmatpush2.bf16.msra.mxu0 %v13881_v1  ;;  %v14084_v1 = vcombine.high %v8999_v7, %v9003_v55  ;;  %v14188_v14 = vcombine.high %v9103_v9, %v9107_v40  ;;  %v9227_v62 = vld [vmem:[%s20944_s20 + $0x7e0] sm:$0xff] }
 0x8ed   :  { %8907 = vmatprep.subr.bf16.mxu0 %v13874_v11  ;;  %12138 = vmatpush1.bf16.msra.mxu1 %v14235_v50  ;;  %v14195_v11 = vcombine.low %v9111_v37, %v9115_v22  ;;  %v8991_v50 = vld [vmem:[%s20944_s20 + $0x80] sm:$0xff] }
 0x8ee   :  { %12139 = vmatprep.subr.bf16.mxu1 %v14228_v25  ;;  %v9223_v25 = vld [vmem:[%s20944_s20 + $0x7c0] sm:$0xff] }
 0x8ef   :  { %v14308_v60 = vcombine.high %v9223_v25, %v9227_v62  ;;  %v9191_v22 = vld [vmem:[%s20944_s20 + $0x6c0] sm:$0xff] }
 0x8f0   :  { %8908 = vmatpush2.bf16.msra.mxu0 %v13873_v33  ;;  %v14076_v33 = vcombine.high %v8991_v50, %v8995_v46  ;;  %v9183_v7 = vld [vmem:[%s20944_s20 + $0x680] sm:$0xff] }
 0x8f1   :  { %12094 = vmatprep.subr.bf16.mxu0 %v14116_v30  ;;  %12140 = vmatpush1.bf16.msra.mxu1 %v14227_v45  ;;  %v14187_v30 = vcombine.low %v9103_v9, %v9107_v40  ;;  %v8983_v45 = vld [vmem:[%s20944_s20 + $0x40] sm:$0xff] }
 0x8f2   :  { %12141 = vmatprep.subr.bf16.mxu1 %v14220_v52  ;;  %v9215_v52 = vld [vmem:[%s20944_s20 + $0x780] sm:$0xff]  ;;  %v14067_v2 = vcombine.low %v8983_v45, %v8987_v16 }
 0x8f3   :  { %8910 = vmatmul.mubr.bf16.vlgmr.msra.gmra.mxu0 %v18661_v41  ;;  %v19271_v0 = vpop.f32.mrf.mxu0  ;;  %v19273_v26 = vpop.f32.mrf.mxu1  ;;  %v14211_v41 = vcombine.low %v9127_v10, %v9131_v12  ;;  %v9219_v10 = vld [vmem:[%s20944_s20 + $0x7a0] sm:$0xff]  ;;  %v14075_v12 = vcombine.low %v8991_v50, %v8995_v46 }
 0x8f4   :  { %12095 = vmatpush1.bf16.msra.mxu0 %v14115_v58  ;;  %v14068_v58 = vcombine.high %v8983_v45, %v8987_v16  ;;  %v14300_v36 = vcombine.high %v9215_v52, %v9219_v10  ;;  %v9187_v55 = vld [vmem:[%s20944_s20 + $0x6a0] sm:$0xff] }
 0x8f5   :  { %v8667_v28 = vpop.f32.mrf.mxu0  ;;  %v8708_v31 = vpop.f32.mrf.mxu1  ;;  %12096 = vmatprep.subr.bf16.mxu0 %v14108_v15  ;;  %12142 = vmatpush1.bf16.msra.mxu1 %v14219_v32  ;;  %v14307_v15 = vcombine.low %v9223_v25, %v9227_v62  ;;  %v8975_v32 = vld [vmem:[%s20944_s20] sm:$0xff]  ;;  %v14267_v62 = vcombine.low %v9183_v7, %v9187_v55 }
 0x8f6   :  { %v8668_v34 = vadd.f32 %v8667_v28, %v7351_v19  ;;  %12143 = vmatprep.subr.bf16.mxu1 %v14212_v24  ;;  %v8979_v19 = vld [vmem:[%s20944_s20 + $0x20] sm:$0xff] }
 0x8f7   :  { %v8669_v6 = vpop.f32.mrf.mxu0  ;;  %v8710_v42 = vpop.f32.mrf.mxu1  ;;  %v9211_v24 = vld [vmem:[%s20944_s20 + $0x760] sm:$0xff]  ;;  %v14060_v27 = vcombine.high %v8975_v32, %v8979_v19  ;;  %v14059_v57 = vcombine.low %v8975_v32, %v8979_v19 }
 0x8f8   :  { %v8709_v5 = vadd.f32 %v8708_v31, %v8668_v34  ;;  %12097 = vmatpush1.bf16.msra.mxu0 %v14107_v23  ;;  %v14299_v23 = vcombine.low %v9215_v52, %v9219_v10  ;;  %v9095_v28 = vld [vmem:[%s20944_s20 + $0x3c0] sm:$0xff] }
 0x8f9   :  { %v8670_v61 = vpop.f32.mrf.mxu0  ;;  %v8711_v48 = vpop.f32.mrf.mxu1  ;;  %12098 = vmatprep.subr.bf16.mxu0 %v14100_v29  ;;  %12144 = vmatpush1.bf16.msra.mxu1 %v14211_v41  ;;  %v9099_v31 = vld [vmem:[%s20944_s20 + $0x3e0] sm:$0xff]  ;;  %v14292_v29 = vcombine.high %v9207_v20, %v9211_v24 }
 0x8fa   :  { %v8960_v54 = vmax.f32 %v8709_v5, 0.0  ;;  %12145 = vmatprep.subr.bf16.mxu1 %v14204_v63  ;;  %v9199_v41 = vld [vmem:[%s20944_s20 + $0x700] sm:$0xff]  ;;  %v14180_v35 = vcombine.high %v9095_v28, %v9099_v31  ;;  %v14291_v63 = vcombine.low %v9207_v20, %v9211_v24  ;;  %v7347_v20 = vrot.slane %v19260_v13, %v16297_v38 }
 0x8fb   :  { %v9203_v34 = vld [vmem:[%s20944_s20 + $0x720] sm:$0xff] }
 0x8fc   :  { %v19305_v44 = vpack.c.bf16 %v8960_v54, %v8960_v54  ;;  %12099 = vmatpush1.bf16.msra.mxu0 %v14099_v47  ;;  %v9087_v6 = vld [vmem:[%s20944_s20 + $0x380] sm:$0xff]  ;;  %v14284_v37 = vcombine.high %v9199_v41, %v9203_v34  ;;  %v14179_v47 = vcombine.low %v9095_v28, %v9099_v31  ;;  %v14283_v48 = vcombine.low %v9199_v41, %v9203_v34 }
 0x8fd   :  { %12100 = vmatprep.subr.bf16.mxu0 %v14092_v49  ;;  %12146 = vmatpush1.bf16.msra.mxu1 %v14203_v51  ;;  %v9091_v42 = vld [vmem:[%s20944_s20 + $0x3a0] sm:$0xff] }
 0x8fe   :  { %12126 = vmatprep.mubr.bf16.mxu0 %v19305_v44  ;;  %12147 = vmatprep.subr.bf16.mxu1 %v14196_v8  ;;  %v9195_v5 = vld [vmem:[%s20944_s20 + $0x6e0] sm:$0xff]  ;;  %v14172_v61 = vcombine.high %v9087_v6, %v9091_v42  ;;  %v14171_v8 = vcombine.low %v9087_v6, %v9091_v42 }
 0x8ff   :  { %v9079_v49 = vld [vmem:[%s20944_s20 + $0x340] sm:$0xff]  ;;  %v14276_v54 = vcombine.high %v9191_v22, %v9195_v5  ;;  %v14275_v40 = vcombine.low %v9191_v22, %v9195_v5 }
 0x900   :  { %12101 = vmatpush1.bf16.msra.mxu0 %v14091_v3  ;;  %v9083_v51 = vld [vmem:[%s20944_s20 + $0x360] sm:$0xff] }
 0x901   :  { %12102 = vmatprep.subr.bf16.mxu0 %v14084_v1  ;;  %12148 = vmatpush1.bf16.msra.mxu1 %v14195_v11  ;;  %v14164_v9 = vcombine.high %v9079_v49, %v9083_v51  ;;  %v9071_v3 = vld [vmem:[%s20944_s20 + $0x300] sm:$0xff]  ;;  %v14268_v11 = vcombine.high %v9183_v7, %v9187_v55  ;;  %v7359_v55 = vrot.slane %v19260_v13, %v16712_v21 }
 0x902   :  { %12149 = vmatprep.subr.bf16.mxu1 %v14188_v14  ;;  %v9075_v1 = vld [vmem:[%s20944_s20 + $0x320] sm:$0xff]  ;;  %v14163_v14 = vcombine.low %v9079_v49, %v9083_v51 }
 0x903   :  { %v9175_v50 = vld [vmem:[%s20944_s20 + $0x640] sm:$0xff]  ;;  %v14156_v25 = vcombine.high %v9071_v3, %v9075_v1 }
 0x904   :  { %12103 = vmatpush1.bf16.msra.mxu0 %v14083_v4  ;;  %v9179_v46 = vld [vmem:[%s20944_s20 + $0x660] sm:$0xff] }
 0x905   :  { %12104 = vmatprep.subr.bf16.mxu0 %v14076_v33  ;;  %12150 = vmatpush1.bf16.msra.mxu1 %v14187_v30  ;;  %v9063_v4 = vld [vmem:[%s20944_s20 + $0x2c0] sm:$0xff]  ;;  %v14260_v30 = vcombine.high %v9175_v50, %v9179_v46  ;;  %v14259_v10 = vcombine.low %v9175_v50, %v9179_v46 }
 0x906   :  { %12151 = vmatprep.subr.bf16.mxu1 %v14308_v60  ;;  %v9067_v33 = vld [vmem:[%s20944_s20 + $0x2e0] sm:$0xff]  ;;  %v14155_v60 = vcombine.low %v9071_v3, %v9075_v1 }
 0x907   :  { %v9167_v45 = vld [vmem:[%s20944_s20 + $0x600] sm:$0xff]  ;;  %v14148_v52 = vcombine.high %v9063_v4, %v9067_v33 }
 0x908   :  { %12105 = vmatpush1.bf16.msra.mxu0 %v14075_v12  ;;  %v9171_v16 = vld [vmem:[%s20944_s20 + $0x620] sm:$0xff] }
 0x909   :  { %12106 = vmatprep.subr.bf16.mxu0 %v14068_v58  ;;  %12152 = vmatpush2.bf16.msra.mxu1 %v14307_v15  ;;  %v9055_v12 = vld [vmem:[%s20944_s20 + $0x280] sm:$0xff]  ;;  %v14252_v15 = vcombine.high %v9167_v45, %v9171_v16 }
 0x90a   :  { %12153 = vmatprep.subr.bf16.mxu1 %v14300_v36  ;;  %v9059_v58 = vld [vmem:[%s20944_s20 + $0x2a0] sm:$0xff]  ;;  %v14147_v36 = vcombine.low %v9063_v4, %v9067_v33 }
 0x90b   :  { %v19413_v32 = vld [vmem:[%s20944_s20 + $0xdc0] sm:$0xff]  ;;  %v14140_v24 = vcombine.high %v9055_v12, %v9059_v58  ;;  %v14139_v31 = vcombine.low %v9055_v12, %v9059_v58 }
 0x90c   :  { %12107 = vmatpush1.bf16.msra.mxu0 %v14067_v2  ;;  %v19418_v19 = vld [vmem:[%s20944_s20 + $0xde0] sm:$0xff]  ;;  %v14251_v2 = vcombine.low %v9167_v45, %v9171_v16 }
 0x90d   :  { %12108 = vmatprep.subr.bf16.mxu0 %v14060_v27  ;;  %12154 = vmatpush2.bf16.msra.mxu1 %v14299_v23  ;;  %v9047_v27 = vld [vmem:[%s20944_s20 + $0x240] sm:$0xff]  ;;  %v14500_v28 = vcombine.high %v19413_v32, %v19418_v19 }
 0x90e   :  { %12155 = vmatprep.subr.bf16.mxu1 %v14292_v29  ;;  %v9051_v23 = vld [vmem:[%s20944_s20 + $0x260] sm:$0xff]  ;;  %v8666_v29 = vadd.f32 %v19271_v0, %v7347_v20 }
 0x90f   :  { %v14132_v41 = vcombine.high %v9047_v27, %v9051_v23  ;;  %v9039_v34 = vld [vmem:[%s20944_s20 + $0x200] sm:$0xff] }
 0x910   :  { %12109 = vmatpush1.bf16.msra.mxu0 %v14059_v57  ;;  %v9043_v57 = vld [vmem:[%s20944_s20 + $0x220] sm:$0xff] }
 0x911   :  { %12110 = vmatprep.subr.bf16.mxu0 %v14180_v35  ;;  %12156 = vmatpush2.bf16.msra.mxu1 %v14291_v63  ;;  %v14131_v35 = vcombine.low %v9047_v27, %v9051_v23  ;;  %v8707_v63 = vadd.f32 %v19273_v26, %v8666_v29  ;;  %v14124_v6 = vcombine.high %v9039_v34, %v9043_v57  ;;  %v9287_v0 = vld [vmem:[%s20944_s20 + $0x9c0] sm:$0xff]  ;;  %v19488_v23 = vld [vmem:[%s20944_s20 + $0x5c8] sm:$0xff] }
 0x912   :  { %12157 = vmatprep.subr.bf16.mxu1 %v14284_v37  ;;  %v9291_v42 = vld [vmem:[%s20944_s20 + $0x9e0] sm:$0xff]  ;;  %v14123_v37 = vcombine.low %v9039_v34, %v9043_v57  ;;  %v14499_v27 = vcombine.low %v19413_v32, %v19418_v19 }
 0x913   :  { %v8959_v22 = vmax.f32 %v8707_v63, 0.0  ;;  %v14372_v5 = vcombine.high %v9287_v0, %v9291_v42  ;;  %v9283_v26 = vld [vmem:[%s20944_s20 + $0x9a0] sm:$0xff]  ;;  %v14371_v49 = vcombine.low %v9287_v0, %v9291_v42 }
 0x914   :  { %12111 = vmatpush2.bf16.msra.mxu0 %v14179_v47  ;;  %v9279_v47 = vld [vmem:[%s20944_s20 + $0x980] sm:$0xff] }
 0x915   :  { %12112 = vmatprep.subr.bf16.mxu0 %v14172_v61  ;;  %12158 = vmatpush2.bf16.msra.mxu1 %v14283_v48  ;;  %v7355_v48 = vrot.slane %v19260_v13, %v16709_v17  ;;  %v19452_v51 = vpack.c.bf16 %v8959_v22, %v8959_v22  ;;  %v14364_v7 = vcombine.high %v9279_v47, %v9283_v26  ;;  %v9263_v4 = vld [vmem:[%s20944_s20 + $0x900] sm:$0xff] }
 0x916   :  { %12159 = vmatprep.subr.bf16.mxu1 %v14276_v54  ;;  %v9267_v33 = vld [vmem:[%s20944_s20 + $0x920] sm:$0xff] }
 0x917   :  { %v9255_v12 = vld [vmem:[%s20944_s20 + $0x8c0] sm:$0xff] }
 0x918   :  { %12113 = vmatpush2.bf16.msra.mxu0 %v14171_v8  ;;  %v9271_v8 = vld [vmem:[%s20944_s20 + $0x940] sm:$0xff] }
 0x919   :  { %12114 = vmatprep.subr.bf16.mxu0 %v14164_v9  ;;  %12160 = vmatpush2.bf16.msra.mxu1 %v14275_v40  ;;  %v9275_v9 = vld [vmem:[%s20944_s20 + $0x960] sm:$0xff] }
 0x91a   :  { %12161 = vmatprep.subr.bf16.mxu1 %v14268_v11  ;;  %v14363_v11 = vcombine.low %v9279_v47, %v9283_v26  ;;  %v14355_v16 = vcombine.low %v9271_v8, %v9275_v9  ;;  %v9411_v20 = vld [vmem:[%s20944_s20 + $0xda0] sm:$0xff] }
 0x91b   :  { %v9251_v32 = vld [vmem:[%s20944_s20 + $0x8a0] sm:$0xff] }
 0x91c   :  { %12115 = vmatpush2.bf16.msra.mxu0 %v14163_v14  ;;  %v14356_v14 = vcombine.high %v9271_v8, %v9275_v9  ;;  %v9399_v19 = vld [vmem:[%s20944_s20 + $0xd40] sm:$0xff] }
 0x91d   :  { %12116 = vmatprep.subr.bf16.mxu0 %v14156_v25  ;;  %12162 = vmatpush2.bf16.msra.mxu1 %v14267_v62  ;;  %v9403_v57 = vld [vmem:[%s20944_s20 + $0xd60] sm:$0xff] }
 0x91e   :  { %12163 = vmatprep.subr.bf16.mxu1 %v14260_v30  ;;  %v9239_v42 = vld [vmem:[%s20944_s20 + $0x840] sm:$0xff] }
 0x91f   :  { %v9243_v22 = vld [vmem:[%s20944_s20 + $0x860] sm:$0xff] }
 0x920   :  { %12117 = vmatpush2.bf16.msra.mxu0 %v14155_v60  ;;  %v9395_v47 = vld [vmem:[%s20944_s20 + $0xd20] sm:$0xff]  ;;  %v14323_v9 = vcombine.low %v9239_v42, %v9243_v22 }
 0x921   :  { %12118 = vmatprep.subr.bf16.mxu0 %v14148_v52  ;;  %12164 = vmatpush2.bf16.msra.mxu1 %v14259_v10  ;;  %v14348_v10 = vcombine.high %v9263_v4, %v9267_v33  ;;  %v9387_v8 = vld [vmem:[%s20944_s20 + $0xce0] sm:$0xff] }
 0x922   :  { %12165 = vmatprep.subr.bf16.mxu1 %v14252_v15  ;;  %v9259_v15 = vld [vmem:[%s20944_s20 + $0x8e0] sm:$0xff] }
 0x923   :  { %v14340_v29 = vcombine.high %v9255_v12, %v9259_v15  ;;  %v14339_v63 = vcombine.low %v9255_v12, %v9259_v15 }
 0x924   :  { %12119 = vmatpush2.bf16.msra.mxu0 %v14147_v36  ;;  %v9407_v36 = vld [vmem:[%s20944_s20 + $0xd80] sm:$0xff] }
 0x925   :  { %12120 = vmatprep.subr.bf16.mxu0 %v14140_v24  ;;  %12166 = vmatpush2.bf16.msra.mxu1 %v14251_v2  ;;  %v14347_v2 = vcombine.low %v9263_v4, %v9267_v33  ;;  %v14492_v34 = vcombine.high %v9407_v36, %v9411_v20  ;;  %v9343_v33 = vld [vmem:[%s20944_s20 + $0xb80] sm:$0xff] }
 0x926   :  { %12217 = vmatprep.subr.bf16.mxu1 %v14500_v28  ;;  %v19493_v28 = vld [vmem:[%s20944_s20 + $0x5e8] sm:$0xff] }
 0x928   :  { %12121 = vmatpush2.bf16.msra.mxu0 %v14139_v31 }
 0x929   :  { %12122 = vmatprep.subr.bf16.mxu0 %v14132_v41  ;;  %v9247_v41 = vld [vmem:[%s20944_s20 + $0x880] sm:$0xff] }
 0x92a   :  { %v14332_v0 = vcombine.high %v9247_v41, %v9251_v32  ;;  %v14331_v26 = vcombine.low %v9247_v41, %v9251_v32  ;;  %v9327_v32 = vld [vmem:[%s20944_s20 + $0xb00] sm:$0xff] }
 0x92c   :  { %12123 = vmatpush2.bf16.msra.mxu0 %v14131_v35  ;;  %v14245_v35 = vcombine.low %v19488_v23, %v19493_v28 }
 0x92d   :  { %12124 = vmatprep.subr.bf16.mxu0 %v14124_v6  ;;  %v14491_v6 = vcombine.low %v9407_v36, %v9411_v20  ;;  %v9339_v36 = vld [vmem:[%s20944_s20 + $0xb60] sm:$0xff] }
 0x92e   :  { %v9359_v20 = vld [vmem:[%s20944_s20 + $0xc00] sm:$0xff] }
 0x92f   :  { %v8788_v61 = vpop.f32.mrf.mxu1 }
 0x930   :  { %12125 = vmatpush2.bf16.msra.mxu0 %v14123_v37  ;;  %v14484_v37 = vcombine.high %v9399_v19, %v9403_v57 }
 0x931   :  { %v8790_v54 = vpop.f32.mrf.mxu1  ;;  %12176 = vmatprep.subr.bf16.mxu0 %v14372_v5  ;;  %v9391_v5 = vld [vmem:[%s20944_s20 + $0xd00] sm:$0xff] }
 0x933   :  { %v8747_v40 = vpop.f32.mrf.mxu0  ;;  %v8792_v3 = vpop.f32.mrf.mxu1  ;;  %12127 = vmatmul.mubr.bf16.vlgmr.msra.gmra.mxu0 %v19452_v51 }
 0x934   :  { %v8748_v1 = vadd.f32 %v8747_v40, %v7355_v48  ;;  %12177 = vmatpush1.bf16.msra.mxu0 %v14371_v49  ;;  %v14324_v48 = vcombine.high %v9239_v42, %v9243_v22  ;;  %v9231_v49 = vld [vmem:[%s20944_s20 + $0x800] sm:$0xff]  ;;  %v14475_v40 = vcombine.low %v9391_v5, %v9395_v47 }
 0x935   :  { %v8749_v50 = vpop.f32.mrf.mxu0  ;;  %v8793_v46 = vpop.f32.mrf.mxu1  ;;  %12178 = vmatprep.subr.bf16.mxu0 %v14364_v7  ;;  %v9235_v7 = vld [vmem:[%s20944_s20 + $0x820] sm:$0xff] }
 0x936   :  { %v8789_v25 = vadd.f32 %v8788_v61, %v8748_v1  ;;  %v8750_v62 = vadd.f32 %v8749_v50, %v7359_v55  ;;  %v14483_v61 = vcombine.low %v9399_v19, %v9403_v57  ;;  %v9383_v55 = vld [vmem:[%s20944_s20 + $0xcc0] sm:$0xff]  ;;  %v14316_v3 = vcombine.high %v9231_v49, %v9235_v7 }
 0x937   :  { %v8751_v30 = vpop.f32.mrf.mxu0  ;;  %v9351_v1 = vld [vmem:[%s20944_s20 + $0xbc0] sm:$0xff] }
 0x938   :  { %v8791_v45 = vadd.f32 %v8790_v54, %v8750_v62  ;;  %12179 = vmatpush1.bf16.msra.mxu0 %v14363_v11  ;;  %v8961_v60 = vmax.f32 %v8789_v25, 0.0  ;;  %v14476_v54 = vcombine.high %v9391_v5, %v9395_v47  ;;  %v14468_v11 = vcombine.high %v9383_v55, %v9387_v8  ;;  %v9355_v50 = vld [vmem:[%s20944_s20 + $0xbe0] sm:$0xff] }
 0x939   :  { %v8752_v52 = vpop.f32.mrf.mxu0  ;;  %12180 = vmatprep.subr.bf16.mxu0 %v14356_v14  ;;  %v9375_v46 = vld [vmem:[%s20944_s20 + $0xc80] sm:$0xff]  ;;  %v14315_v25 = vcombine.low %v9231_v49, %v9235_v7  ;;  %v14467_v62 = vcombine.low %v9383_v55, %v9387_v8  ;;  %v14436_v4 = vcombine.high %v9351_v1, %v9355_v50 }
 0x93a   :  { %v8962_v58 = vmax.f32 %v8791_v45, 0.0  ;;  %v19495_v31 = vpack.c.bf16 %v8961_v60, %v8961_v60  ;;  %v9379_v14 = vld [vmem:[%s20944_s20 + $0xca0] sm:$0xff]  ;;  %v14435_v52 = vcombine.low %v9351_v1, %v9355_v50 }
 0x93b   :  { %v14460_v30 = vcombine.high %v9375_v46, %v9379_v14  ;;  %v9347_v45 = vld [vmem:[%s20944_s20 + $0xba0] sm:$0xff] }
 0x93c   :  { %v19481_v24 = vpack.c.bf16 %v8962_v58, %v8962_v58  ;;  %12181 = vmatpush1.bf16.msra.mxu0 %v14355_v16  ;;  %v9367_v16 = vld [vmem:[%s20944_s20 + $0xc40] sm:$0xff]  ;;  %v14428_v12 = vcombine.high %v9343_v33, %v9347_v45 }
 0x93d   :  { %12182 = vmatprep.subr.bf16.mxu0 %v14348_v10  ;;  %v9371_v60 = vld [vmem:[%s20944_s20 + $0xc60] sm:$0xff]  ;;  %v14459_v10 = vcombine.low %v9375_v46, %v9379_v14 }
 0x93e   :  { %12167 = vmatprep.mubr.bf16.mxu1 %v19481_v24  ;;  %v9335_v58 = vld [vmem:[%s20944_s20 + $0xb40] sm:$0xff]  ;;  %v14452_v15 = vcombine.high %v9367_v16, %v9371_v60 }
 0x93f   :  { %12168 = vmatmul.mubr.bf16.vlgmr.msra.gmra.mxu1 %v19495_v31  ;;  %v14420_v41 = vcombine.high %v9335_v58, %v9339_v36  ;;  %v9331_v19 = vld [vmem:[%s20944_s20 + $0xb20] sm:$0xff] }
 0x940   :  { %12183 = vmatpush1.bf16.msra.mxu0 %v14347_v2  ;;  %12218 = vmatpush1.bf16.msra.mxu1 %v14499_v27  ;;  %v9363_v2 = vld [vmem:[%s20944_s20 + $0xc20] sm:$0xff]  ;;  %v14427_v27 = vcombine.low %v9343_v33, %v9347_v45 }
 0x941   :  { %12184 = vmatprep.subr.bf16.mxu0 %v14340_v29  ;;  %12219 = vmatprep.subr.bf16.mxu1 %v14492_v34  ;;  %v14451_v29 = vcombine.low %v9367_v16, %v9371_v60  ;;  %v14444_v34 = vcombine.high %v9359_v20, %v9363_v2  ;;  %v9479_v57 = vld [vmem:[%s20944_s20 + $0xfc0] sm:$0x33] }
 0x942   :  { %v9319_v42 = vld [vmem:[%s20944_s20 + $0xac0] sm:$0xff]  ;;  %v14563_v22 = vcombine.low %v9479_v57, %v9479_v57 }
 0x943   :  { %v9323_v5 = vld [vmem:[%s20944_s20 + $0xae0] sm:$0xff] }
 0x944   :  { %12185 = vmatpush1.bf16.msra.mxu0 %v14339_v63  ;;  %12220 = vmatpush1.bf16.msra.mxu1 %v14491_v6  ;;  %v14419_v63 = vcombine.low %v9335_v58, %v9339_v36  ;;  %v14443_v6 = vcombine.low %v9359_v20, %v9363_v2  ;;  %v9471_v47 = vld [vmem:[%s20944_s20 + $0xf80] sm:$0xff]  ;;  %v9036_v20 = vld [vmem:[%s20944_s20 + $0x1e8] sm:$0xff] }
 0x945   :  { %12186 = vmatprep.subr.bf16.mxu0 %v14332_v0  ;;  %12221 = vmatprep.subr.bf16.mxu1 %v14484_v37  ;;  %v14412_v0 = vcombine.high %v9327_v32, %v9331_v19  ;;  %v14564_v37 = vcombine.high %v9479_v57, %v9479_v57  ;;  %v9311_v49 = vld [vmem:[%s20944_s20 + $0xa80] sm:$0xff] }
 0x946   :  { %v9315_v55 = vld [vmem:[%s20944_s20 + $0xaa0] sm:$0xff] }
 0x947   :  { %v9463_v8 = vld [vmem:[%s20944_s20 + $0xf40] sm:$0xff]  ;;  %v14396_v1 = vcombine.high %v9311_v49, %v9315_v55 }
 0x948   :  { %12187 = vmatpush1.bf16.msra.mxu0 %v14331_v26  ;;  %12222 = vmatpush1.bf16.msra.mxu1 %v14483_v61  ;;  %v9475_v26 = vld [vmem:[%s20944_s20 + $0xfa0] sm:$0xff]  ;;  %v14411_v61 = vcombine.low %v9327_v32, %v9331_v19 }
 0x949   :  { %12188 = vmatprep.subr.bf16.mxu0 %v14324_v48  ;;  %12223 = vmatprep.subr.bf16.mxu1 %v14476_v54  ;;  %v14404_v48 = vcombine.high %v9319_v42, %v9323_v5  ;;  %v12071_v54 = vsel %vm12069_vm7, %v14563_v22, 0  ;;  %v14556_v7 = vcombine.high %v9471_v47, %v9475_v26  ;;  %v9307_v46 = vld [vmem:[%s20944_s20 + $0xa60] sm:$0xff] }
 0x94a   :  { %v9455_v14 = vld [vmem:[%s20944_s20 + $0xf00] sm:$0xff] }
 0x94b   :  { %v9299_v16 = vld [vmem:[%s20944_s20 + $0xa20] sm:$0xff] }
 0x94c   :  { %12189 = vmatpush1.bf16.msra.mxu0 %v14323_v9  ;;  %12224 = vmatpush1.bf16.msra.mxu1 %v14475_v40  ;;  %v9467_v9 = vld [vmem:[%s20944_s20 + $0xf60] sm:$0xff]  ;;  %v14403_v40 = vcombine.low %v9319_v42, %v9323_v5  ;;  %v7363_v42 = vrot.slane %v19260_v13, %v17113_v56 }
 0x94d   :  { %12190 = vmatprep.subr.bf16.mxu0 %v14316_v3  ;;  %12225 = vmatprep.subr.bf16.mxu1 %v14468_v11  ;;  %v14555_v3 = vcombine.low %v9471_v47, %v9475_v26  ;;  %v9303_v11 = vld [vmem:[%s20944_s20 + $0xa40] sm:$0xff]  ;;  %v14548_v50 = vcombine.high %v9463_v8, %v9467_v9  ;;  %v7367_v47 = vrot.slane %v19260_v13, %v17312_v18 }
 0x94e   :  { %v14388_v33 = vcombine.high %v9303_v11, %v9307_v46  ;;  %v9447_v60 = vld [vmem:[%s20944_s20 + $0xec0] sm:$0xff] }
 0x94f   :  { %v9439_v2 = vld [vmem:[%s20944_s20 + $0xe80] sm:$0xff] }
 0x950   :  { %12191 = vmatpush1.bf16.msra.mxu0 %v14315_v25  ;;  %12226 = vmatpush1.bf16.msra.mxu1 %v14467_v62  ;;  %v9459_v25 = vld [vmem:[%s20944_s20 + $0xf20] sm:$0xff]  ;;  %v14395_v62 = vcombine.low %v9311_v49, %v9315_v55 }
 0x951   :  { %12192 = vmatprep.subr.bf16.mxu0 %v14436_v4  ;;  %12227 = vmatprep.subr.bf16.mxu1 %v14460_v30  ;;  %v14547_v4 = vcombine.low %v9463_v8, %v9467_v9  ;;  %v9295_v30 = vld [vmem:[%s20944_s20 + $0xa00] sm:$0xff]  ;;  %v14540_v45 = vcombine.high %v9455_v14, %v9459_v25 }
 0x952   :  { %v14380_v58 = vcombine.high %v9295_v30, %v9299_v16  ;;  %v9423_v26 = vld [vmem:[%s20944_s20 + $0xe00] sm:$0xff] }
 0x954   :  { %12193 = vmatpush2.bf16.msra.mxu0 %v14435_v52  ;;  %12228 = vmatpush1.bf16.msra.mxu1 %v14459_v10  ;;  %v9451_v52 = vld [vmem:[%s20944_s20 + $0xee0] sm:$0xff]  ;;  %v14387_v10 = vcombine.low %v9303_v11, %v9307_v46 }
 0x955   :  { %12194 = vmatprep.subr.bf16.mxu0 %v14428_v12  ;;  %12229 = vmatprep.subr.bf16.mxu1 %v14452_v15  ;;  %v14539_v12 = vcombine.low %v9455_v14, %v9459_v25  ;;  %v9032_v15 = vld [vmem:[%s20944_s20 + $0x1c8] sm:$0xff]  ;;  %v14532_v36 = vcombine.high %v9447_v60, %v9451_v52 }
 0x956   :  { %v14118_v32 = vcombine.high %v9032_v15, %v9036_v20  ;;  %v9024_v14 = vld [vmem:[%s20944_s20 + $0x188] sm:$0xff] }
 0x957   :  { %v9028_v25 = vld [vmem:[%s20944_s20 + $0x1a8] sm:$0xff] }
 0x958   :  { %12195 = vmatpush2.bf16.msra.mxu0 %v14427_v27  ;;  %12230 = vmatpush1.bf16.msra.mxu1 %v14451_v29  ;;  %v9443_v27 = vld [vmem:[%s20944_s20 + $0xea0] sm:$0xff] }
 0x959   :  { %12196 = vmatprep.subr.bf16.mxu0 %v14420_v41  ;;  %12231 = vmatprep.subr.bf16.mxu1 %v14444_v34  ;;  %v14379_v41 = vcombine.low %v9295_v30, %v9299_v16  ;;  %v14531_v34 = vcombine.low %v9447_v60, %v9451_v52  ;;  %v14524_v19 = vcombine.high %v9439_v2, %v9443_v27  ;;  %v9020_v16 = vld [vmem:[%s20944_s20 + $0x168] sm:$0xff] }
 0x95a   :  { %v14110_v30 = vcombine.high %v9024_v14, %v9028_v25  ;;  %v14109_v60 = vcombine.low %v9024_v14, %v9028_v25 }
 0x95c   :  { %12197 = vmatpush2.bf16.msra.mxu0 %v14419_v63  ;;  %12232 = vmatpush1.bf16.msra.mxu1 %v14443_v6  ;;  %v9431_v63 = vld [vmem:[%s20944_s20 + $0xe40] sm:$0xff] }
 0x95d   :  { %12198 = vmatprep.subr.bf16.mxu0 %v14412_v0  ;;  %14571 = vmatprep.subr.msk.bf16.mxu1 %vm12069_vm7, %v14564_v37  ;;  %v9435_v6 = vld [vmem:[%s20944_s20 + $0xe60] sm:$0xff]  ;;  %v14523_v37 = vcombine.low %v9439_v2, %v9443_v27 }
 0x95e   :  { %v14516_v22 = vcombine.high %v9431_v63, %v9435_v6 }
 0x960   :  { %12199 = vmatpush2.bf16.msra.mxu0 %v14411_v61  ;;  %12234 = vmatpush2.bf16.msra.mxu1 %v12071_v54  ;;  %v9427_v61 = vld [vmem:[%s20944_s20 + $0xe20] sm:$0xff]  ;;  %v14515_v54 = vcombine.low %v9431_v63, %v9435_v6 }
 0x961   :  { %12200 = vmatprep.subr.bf16.mxu0 %v14404_v48  ;;  %12235 = vmatprep.subr.bf16.mxu1 %v14556_v7  ;;  %v14508_v55 = vcombine.high %v9423_v26, %v9427_v61  ;;  %v14507_v13 = vcombine.low %v9423_v26, %v9427_v61 }
 0x964   :  { %12201 = vmatpush2.bf16.msra.mxu0 %v14403_v40  ;;  %12236 = vmatpush2.bf16.msra.mxu1 %v14555_v3 }
 0x965   :  { %12202 = vmatprep.subr.bf16.mxu0 %v14396_v1  ;;  %12237 = vmatprep.subr.bf16.mxu1 %v14548_v50  ;;  %v14246_v50 = vcombine.high %v19488_v23, %v19493_v28  ;;  %v9140_v23 = vld [vmem:[%s20944_s20 + $0x528] sm:$0xff] }
 0x966   :  { %v9264_v28 = vld [vmem:[%s20944_s20 + $0x908] sm:$0xff] }
 0x968   :  { %12203 = vmatpush2.bf16.msra.mxu0 %v14395_v62  ;;  %12238 = vmatpush2.bf16.msra.mxu1 %v14547_v4  ;;  %v14117_v4 = vcombine.low %v9032_v15, %v9036_v20  ;;  %v9004_v20 = vld [vmem:[%s20944_s20 + $0xe8] sm:$0xff] }
 0x969   :  { %12204 = vmatprep.subr.bf16.mxu0 %v14388_v33  ;;  %12239 = vmatprep.subr.bf16.mxu1 %v14540_v45  ;;  %v9016_v45 = vld [vmem:[%s20944_s20 + $0x148] sm:$0xff] }
 0x96a   :  { %v14102_v52 = vcombine.high %v9016_v45, %v9020_v16 }
 0x96c   :  { %v8870_v29 = vpop.f32.mrf.mxu1  ;;  %12205 = vmatpush2.bf16.msra.mxu0 %v14387_v10  ;;  %12240 = vmatpush2.bf16.msra.mxu1 %v14539_v12  ;;  %v9008_v10 = vld [vmem:[%s20944_s20 + $0x108] sm:$0xff] }
 0x96d   :  { %12206 = vmatprep.subr.bf16.mxu0 %v14380_v58  ;;  %12241 = vmatprep.subr.bf16.mxu1 %v14532_v36  ;;  %v9012_v12 = vld [vmem:[%s20944_s20 + $0x128] sm:$0xff]  ;;  %v14101_v58 = vcombine.low %v9016_v45, %v9020_v16 }
 0x96e   :  { %v8872_v57 = vpop.f32.mrf.mxu1  ;;  %v14094_v15 = vcombine.high %v9008_v10, %v9012_v12  ;;  %v9000_v36 = vld [vmem:[%s20944_s20 + $0xc8] sm:$0xff]  ;;  %v14093_v2 = vcombine.low %v9008_v10, %v9012_v12 }
 0x96f   :  { %v14086_v27 = vcombine.high %v9000_v36, %v9004_v20  ;;  %v9056_v45 = vld [vmem:[%s20944_s20 + $0x288] sm:$0xff] }
 0x970   :  { %v8874_v0 = vpop.f32.mrf.mxu1  ;;  %12207 = vmatpush2.bf16.msra.mxu0 %v14379_v41  ;;  %12242 = vmatpush2.bf16.msra.mxu1 %v14531_v34  ;;  %v8996_v41 = vld [vmem:[%s20944_s20 + $0xa8] sm:$0xff]  ;;  %v14085_v34 = vcombine.low %v9000_v36, %v9004_v20  ;;  %v15244_v20 = vld [vmem:[%s20943_s19] sm:$0xff] }
 0x971   :  { %12258 = vmatprep.subr.bf16.mxu0 %v14118_v32  ;;  %12243 = vmatprep.subr.bf16.mxu1 %v14524_v19  ;;  %v8984_v19 = vld [vmem:[%s20944_s20 + $0x48] sm:$0xff] }
 0x972   :  { %v8875_v5 = vpop.f32.mrf.mxu1  ;;  %v8976_v0 = vld [vmem:[%s20944_s20 + $0x8] sm:$0xff] }
 0x973   :  { %v8829_v48 = vpop.f32.mrf.mxu0  ;;  %v9096_v5 = vld [vmem:[%s20944_s20 + $0x3c8] sm:$0xff] }
 0x974   :  { %v8830_v49 = vadd.f32 %v8829_v48, %v7363_v42  ;;  %12244 = vmatpush2.bf16.msra.mxu1 %v14523_v37  ;;  %v8980_v42 = vld [vmem:[%s20944_s20 + $0x28] sm:$0xff] }
 0x975   :  { %v8831_v7 = vpop.f32.mrf.mxu0  ;;  %12245 = vmatprep.subr.bf16.mxu1 %v14516_v22  ;;  %v14062_v22 = vcombine.high %v8976_v0, %v8980_v42  ;;  %v14061_v26 = vcombine.low %v8976_v0, %v8980_v42  ;;  %v9088_v48 = vld [vmem:[%s20944_s20 + $0x388] sm:$0xff] }
 0x976   :  { %v8871_v8 = vadd.f32 %v8870_v29, %v8830_v49  ;;  %v8832_v9 = vadd.f32 %v8831_v7, %v7367_v47  ;;  %v8992_v29 = vld [vmem:[%s20944_s20 + $0x88] sm:$0xff] }
 0x977   :  { %v8833_v40 = vpop.f32.mrf.mxu0  ;;  %v14078_v32 = vcombine.high %v8992_v29, %v8996_v41  ;;  %v14077_v63 = vcombine.low %v8992_v29, %v8996_v41  ;;  %v9100_v47 = vld [vmem:[%s20944_s20 + $0x3e8] sm:$0xff]  ;;  %v7375_v29 = vrot.slane %v15244_v20, %v17651_v59 }
 0x978   :  { %v8873_v3 = vadd.f32 %v8872_v57, %v8832_v9  ;;  %12246 = vmatpush2.bf16.msra.mxu1 %v14515_v54  ;;  %v8963_v1 = vmax.f32 %v8871_v8, 0.0  ;;  %v8988_v57 = vld [vmem:[%s20944_s20 + $0x68] sm:$0xff]  ;;  %v14182_v61 = vcombine.high %v9096_v5, %v9100_v47  ;;  %v14181_v54 = vcombine.low %v9096_v5, %v9100_v47 }
 0x979   :  { %v8834_v11 = vpop.f32.mrf.mxu0  ;;  %12247 = vmatprep.subr.bf16.mxu1 %v14508_v55  ;;  %v14070_v6 = vcombine.high %v8984_v19, %v8988_v57  ;;  %v14069_v37 = vcombine.low %v8984_v19, %v8988_v57  ;;  %v9092_v49 = vld [vmem:[%s20944_s20 + $0x3a8] sm:$0xff] }
 0x97a   :  { %v8964_v46 = vmax.f32 %v8873_v3, 0.0  ;;  %v19670_v33 = vpack.c.bf16 %v8963_v1, %v8963_v1  ;;  %v14174_v7 = vcombine.high %v9088_v48, %v9092_v49  ;;  %v9080_v55 = vld [vmem:[%s20944_s20 + $0x348] sm:$0xff]  ;;  %v14173_v9 = vcombine.low %v9088_v48, %v9092_v49 }
 0x97b   :  { %v9084_v8 = vld [vmem:[%s20944_s20 + $0x368] sm:$0xff] }
 0x97c   :  { %v19668_v62 = vpack.c.bf16 %v8964_v46, %v8964_v46  ;;  %12248 = vmatpush2.bf16.msra.mxu1 %v14507_v13  ;;  %v14166_v40 = vcombine.high %v9080_v55, %v9084_v8  ;;  %v9072_v3 = vld [vmem:[%s20944_s20 + $0x308] sm:$0xff]  ;;  %v14165_v1 = vcombine.low %v9080_v55, %v9084_v8 }
 0x97d   :  { %12299 = vmatprep.subr.bf16.mxu1 %v14246_v50  ;;  %v9076_v13 = vld [vmem:[%s20944_s20 + $0x328] sm:$0xff] }
 0x97e   :  { %12208 = vmatprep.mubr.bf16.mxu0 %v19668_v62  ;;  %v14158_v11 = vcombine.high %v9072_v3, %v9076_v13  ;;  %v9064_v50 = vld [vmem:[%s20944_s20 + $0x2c8] sm:$0xff]  ;;  %v14157_v25 = vcombine.low %v9072_v3, %v9076_v13 }
 0x97f   :  { %12209 = vmatmul.mubr.bf16.vlgmr.msra.gmra.mxu0 %v19670_v33  ;;  %v9068_v46 = vld [vmem:[%s20944_s20 + $0x2e8] sm:$0xff] }
 0x980   :  { %12259 = vmatpush1.bf16.msra.mxu0 %v14117_v4  ;;  %12290 = vmatprep.mubr.bf16.mxu0 %v19305_v44  ;;  %v14150_v4 = vcombine.high %v9064_v50, %v9068_v46  ;;  %v9060_v16 = vld [vmem:[%s20944_s20 + $0x2a8] sm:$0xff] }
 0x981   :  { %12260 = vmatprep.subr.bf16.mxu0 %v14110_v30  ;;  %v14142_v10 = vcombine.high %v9056_v45, %v9060_v16  ;;  %v14141_v36 = vcombine.low %v9056_v45, %v9060_v16  ;;  %v9040_v41 = vld [vmem:[%s20944_s20 + $0x208] sm:$0xff] }
 0x982   :  { %v9156_v55 = vld [vmem:[%s20944_s20 + $0x5a8] sm:$0xff] }
 0x983   :  { %v9280_v8 = vld [vmem:[%s20944_s20 + $0x988] sm:$0xff] }
 0x984   :  { %12261 = vmatpush1.bf16.msra.mxu0 %v14109_v60 }
 0x985   :  { %12262 = vmatprep.subr.bf16.mxu0 %v14102_v52  ;;  %v14149_v52 = vcombine.low %v9064_v50, %v9068_v46  ;;  %v9148_v46 = vld [vmem:[%s20944_s20 + $0x568] sm:$0xff] }
 0x988   :  { %12263 = vmatpush1.bf16.msra.mxu0 %v14101_v58  ;;  %v9048_v58 = vld [vmem:[%s20944_s20 + $0x248] sm:$0xff] }
 0x989   :  { %12264 = vmatprep.subr.bf16.mxu0 %v14094_v15  ;;  %v9052_v15 = vld [vmem:[%s20944_s20 + $0x268] sm:$0xff] }
 0x98a   :  { %v14133_v57 = vcombine.low %v9048_v58, %v9052_v15 }
 0x98c   :  { %12265 = vmatpush1.bf16.msra.mxu0 %v14093_v2  ;;  %v7371_v2 = vrot.slane %v15244_v20, %v17648_v39  ;;  %v9256_v20 = vld [vmem:[%s20944_s20 + $0x8c8] sm:$0xff] }
 0x98d   :  { %12266 = vmatprep.subr.bf16.mxu0 %v14086_v27  ;;  %v14134_v27 = vcombine.high %v9048_v58, %v9052_v15  ;;  %v9128_v15 = vld [vmem:[%s20944_s20 + $0x4c8] sm:$0xff] }
 0x990   :  { %12267 = vmatpush1.bf16.msra.mxu0 %v14085_v34  ;;  %v9044_v34 = vld [vmem:[%s20944_s20 + $0x228] sm:$0xff] }
 0x991   :  { %12268 = vmatprep.subr.bf16.mxu0 %v14078_v32 }
 0x994   :  { %12269 = vmatpush1.bf16.msra.mxu0 %v14077_v63 }
 0x995   :  { %12270 = vmatprep.subr.bf16.mxu0 %v14070_v6  ;;  %v14126_v6 = vcombine.high %v9040_v41, %v9044_v34 }
 0x998   :  { %12271 = vmatpush1.bf16.msra.mxu0 %v14069_v37  ;;  %v9288_v37 = vld [vmem:[%s20944_s20 + $0x9c8] sm:$0xff] }
 0x999   :  { %12272 = vmatprep.subr.bf16.mxu0 %v14062_v22  ;;  %v9292_v22 = vld [vmem:[%s20944_s20 + $0x9e8] sm:$0xff] }
 0x99a   :  { %v14374_v49 = vcombine.high %v9288_v37, %v9292_v22  ;;  %v14373_v3 = vcombine.low %v9288_v37, %v9292_v22  ;;  %v9112_v22 = vld [vmem:[%s20944_s20 + $0x448] sm:$0xff] }
 0x99c   :  { %12273 = vmatpush1.bf16.msra.mxu0 %v14061_v26  ;;  %v14125_v26 = vcombine.low %v9040_v41, %v9044_v34 }
 0x99d   :  { %12274 = vmatprep.subr.bf16.mxu0 %v14182_v61 }
 0x9a0   :  { %12275 = vmatpush2.bf16.msra.mxu0 %v14181_v54 }
 0x9a1   :  { %12276 = vmatprep.subr.bf16.mxu0 %v14174_v7  ;;  %v9152_v7 = vld [vmem:[%s20944_s20 + $0x588] sm:$0xff] }
 0x9a4   :  { %12277 = vmatpush2.bf16.msra.mxu0 %v14173_v9  ;;  %v9284_v9 = vld [vmem:[%s20944_s20 + $0x9a8] sm:$0xff] }
 0x9a5   :  { %12278 = vmatprep.subr.bf16.mxu0 %v14166_v40  ;;  %v14366_v50 = vcombine.high %v9280_v8, %v9284_v9 }
 0x9a8   :  { %v8952_v14 = vpop.f32.mrf.mxu1  ;;  %12279 = vmatpush2.bf16.msra.mxu0 %v14165_v1  ;;  %v9144_v1 = vld [vmem:[%s20944_s20 + $0x548] sm:$0xff] }
 0x9a9   :  { %12280 = vmatprep.subr.bf16.mxu0 %v14158_v11  ;;  %v14238_v11 = vcombine.high %v9152_v7, %v9156_v55  ;;  %v14230_v45 = vcombine.high %v9144_v1, %v9148_v46 }
 0x9aa   :  { %v8954_v30 = vpop.f32.mrf.mxu1 }
 0x9ac   :  { %v8956_v60 = vpop.f32.mrf.mxu1  ;;  %12281 = vmatpush2.bf16.msra.mxu0 %v14157_v25  ;;  %v9276_v25 = vld [vmem:[%s20944_s20 + $0x968] sm:$0xff] }
 0x9ad   :  { %12282 = vmatprep.subr.bf16.mxu0 %v14150_v4  ;;  %v14237_v4 = vcombine.low %v9152_v7, %v9156_v55  ;;  %v9136_v60 = vld [vmem:[%s20944_s20 + $0x508] sm:$0xff] }
 0x9ae   :  { %v8957_v12 = vpop.f32.mrf.mxu1  ;;  %v9104_v7 = vld [vmem:[%s20944_s20 + $0x408] sm:$0xff] }
 0x9af   :  { %v14222_v12 = vcombine.high %v9136_v60, %v9140_v23  ;;  %v9108_v55 = vld [vmem:[%s20944_s20 + $0x428] sm:$0xff] }
 0x9b0   :  { %12283 = vmatpush2.bf16.msra.mxu0 %v14149_v52  ;;  %v14229_v52 = vcombine.low %v9144_v1, %v9148_v46  ;;  %v9224_v46 = vld [vmem:[%s20944_s20 + $0x7c8] sm:$0xff] }
 0x9b1   :  { %12284 = vmatprep.subr.bf16.mxu0 %v14142_v10 }
 0x9b3   :  { %v8911_v32 = vpop.f32.mrf.mxu0 }
 0x9b4   :  { %v8912_v19 = vadd.f32 %v8911_v32, %v7371_v2  ;;  %12285 = vmatpush2.bf16.msra.mxu0 %v14141_v36  ;;  %v9132_v36 = vld [vmem:[%s20944_s20 + $0x4e8] sm:$0xff] }
 0x9b5   :  { %v8913_v63 = vpop.f32.mrf.mxu0  ;;  %12286 = vmatprep.subr.bf16.mxu0 %v14134_v27  ;;  %v9260_v2 = vld [vmem:[%s20944_s20 + $0x8e8] sm:$0xff]  ;;  %v14221_v27 = vcombine.low %v9136_v60, %v9140_v23  ;;  %v14214_v41 = vcombine.high %v9128_v15, %v9132_v36 }
 0x9b6   :  { %v8953_v0 = vadd.f32 %v8952_v14, %v8912_v19  ;;  %v8914_v42 = vadd.f32 %v8913_v63, %v7375_v29  ;;  %v9272_v14 = vld [vmem:[%s20944_s20 + $0x948] sm:$0xff]  ;;  %v14342_v34 = vcombine.high %v9256_v20, %v9260_v2 }
 0x9b7   :  { %v8915_v5 = vpop.f32.mrf.mxu0  ;;  %v14358_v16 = vcombine.high %v9272_v14, %v9276_v25  ;;  %v14357_v10 = vcombine.low %v9272_v14, %v9276_v25  ;;  %v9120_v32 = vld [vmem:[%s20944_s20 + $0x488] sm:$0xff] }
 0x9b8   :  { %v8955_v47 = vadd.f32 %v8954_v30, %v8914_v42  ;;  %12287 = vmatpush2.bf16.msra.mxu0 %v14133_v57  ;;  %v8965_v61 = vmax.f32 %v8953_v0, 0.0  ;;  %v14365_v30 = vcombine.low %v9280_v8, %v9284_v9  ;;  %v9124_v19 = vld [vmem:[%s20944_s20 + $0x4a8] sm:$0xff]  ;;  %v14341_v0 = vcombine.low %v9256_v20, %v9260_v2 }
 0x9b9   :  { %v8916_v48 = vpop.f32.mrf.mxu0  ;;  %12288 = vmatprep.subr.bf16.mxu0 %v14126_v6  ;;  %v9248_v57 = vld [vmem:[%s20944_s20 + $0x888] sm:$0xff]  ;;  %v14213_v6 = vcombine.low %v9128_v15, %v9132_v36  ;;  %v14206_v42 = vcombine.high %v9120_v32, %v9124_v19 }
 0x9ba   :  { %v8966_v54 = vmax.f32 %v8955_v47, 0.0  ;;  %v19784_v13 = vpack.c.bf16 %v8965_v61, %v8965_v61  ;;  %v9252_v63 = vld [vmem:[%s20944_s20 + $0x8a8] sm:$0xff]  ;;  %v14205_v61 = vcombine.low %v9120_v32, %v9124_v19 }
 0x9bb   :  { %v14334_v37 = vcombine.high %v9248_v57, %v9252_v63  ;;  %v9116_v5 = vld [vmem:[%s20944_s20 + $0x468] sm:$0xff]  ;;  %v14333_v48 = vcombine.low %v9248_v57, %v9252_v63 }
 0x9bc   :  { %v19782_v40 = vpack.c.bf16 %v8966_v54, %v8966_v54  ;;  %12289 = vmatpush2.bf16.msra.mxu0 %v14125_v26  ;;  %v9240_v47 = vld [vmem:[%s20944_s20 + $0x848] sm:$0xff] }
 0x9bd   :  { %12340 = vmatprep.subr.bf16.mxu0 %v14374_v49  ;;  %v9244_v26 = vld [vmem:[%s20944_s20 + $0x868] sm:$0xff]  ;;  %v14198_v49 = vcombine.high %v9112_v22, %v9116_v5 }
 0x9be   :  { %14572 = vmatprep.mubr.msk.bf16.mxu1 %vm12065_vm8, %v19782_v40  ;;  %v14326_v54 = vcombine.high %v9240_v47, %v9244_v26  ;;  %v9232_v8 = vld [vmem:[%s20944_s20 + $0x808] sm:$0xff]  ;;  %v14325_v1 = vcombine.low %v9240_v47, %v9244_v26 }
 0x9bf   :  { %12291 = vmatmul.mubr.bf16.vlgmr.msra.gmra.mxu0 %v19452_v51  ;;  %12250 = vmatmul.mubr.bf16.vlgmr.msra.gmra.mxu1 %v19784_v13  ;;  %v9236_v9 = vld [vmem:[%s20944_s20 + $0x828] sm:$0xff] }
 0x9c0   :  { %12300 = vmatpush1.bf16.msra.mxu1 %v14245_v35  ;;  %12341 = vmatpush1.bf16.msra.mxu0 %v14373_v3  ;;  %v9268_v35 = vld [vmem:[%s20944_s20 + $0x928] sm:$0xff]  ;;  %v14197_v3 = vcombine.low %v9112_v22, %v9116_v5 }
 0x9c1   :  { %12372 = vmatprep.mubr.bf16.mxu0 %v19668_v62  ;;  %12331 = vmatprep.mubr.bf16.mxu1 %v19481_v24  ;;  %v14350_v58 = vcombine.high %v9264_v28, %v9268_v35  ;;  %v14349_v29 = vcombine.low %v9264_v28, %v9268_v35  ;;  %v9228_v14 = vld [vmem:[%s20944_s20 + $0x7e8] sm:$0xff] }
 0x9c2   :  { %12301 = vmatprep.subr.bf16.mxu1 %v14238_v11  ;;  %12342 = vmatprep.subr.bf16.mxu0 %v14366_v50  ;;  %v14190_v11 = vcombine.high %v9104_v7, %v9108_v55  ;;  %v14318_v50 = vcombine.high %v9232_v8, %v9236_v9  ;;  %v9352_v25 = vld [vmem:[%s20944_s20 + $0xbc8] sm:$0xff] }
 0x9c3   :  { %v9216_v23 = vld [vmem:[%s20944_s20 + $0x788] sm:$0xff] }
 0x9c4   :  { %12302 = vmatpush1.bf16.msra.mxu1 %v14237_v4  ;;  %12343 = vmatpush1.bf16.msra.mxu0 %v14365_v30  ;;  %v9356_v4 = vld [vmem:[%s20944_s20 + $0xbe8] sm:$0xff]  ;;  %v14189_v30 = vcombine.low %v9104_v7, %v9108_v55 }
 0x9c5   :  { %12303 = vmatprep.subr.bf16.mxu1 %v14230_v45  ;;  %12344 = vmatprep.subr.bf16.mxu0 %v14358_v16  ;;  %v14317_v45 = vcombine.low %v9232_v8, %v9236_v9  ;;  %v14310_v16 = vcombine.high %v9224_v46, %v9228_v14  ;;  %v14438_v60 = vcombine.high %v9352_v25, %v9356_v4  ;;  %v9220_v28 = vld [vmem:[%s20944_s20 + $0x7a8] sm:$0xff] }
 0x9c6   :  { %v9344_v35 = vld [vmem:[%s20944_s20 + $0xb88] sm:$0xff] }
 0x9c7   :  { %v9208_v36 = vld [vmem:[%s20944_s20 + $0x748] sm:$0xff] }
 0x9c8   :  { %12304 = vmatpush1.bf16.msra.mxu1 %v14229_v52  ;;  %12345 = vmatpush1.bf16.msra.mxu0 %v14357_v10  ;;  %v9348_v52 = vld [vmem:[%s20944_s20 + $0xba8] sm:$0xff]  ;;  %v14309_v10 = vcombine.low %v9224_v46, %v9228_v14 }
 0x9c9   :  { %12305 = vmatprep.subr.bf16.mxu1 %v14222_v12  ;;  %12346 = vmatprep.subr.bf16.mxu0 %v14350_v58  ;;  %v14437_v12 = vcombine.low %v9352_v25, %v9356_v4  ;;  %v14302_v58 = vcombine.high %v9216_v23, %v9220_v28  ;;  %v14430_v15 = vcombine.high %v9344_v35, %v9348_v52  ;;  %v9212_v20 = vld [vmem:[%s20944_s20 + $0x768] sm:$0xff] }
 0x9ca   :  { %v9336_v2 = vld [vmem:[%s20944_s20 + $0xb48] sm:$0xff] }
 0x9cb   :  { %v9200_v19 = vld [vmem:[%s20944_s20 + $0x708] sm:$0xff] }
 0x9cc   :  { %12306 = vmatpush1.bf16.msra.mxu1 %v14221_v27  ;;  %12347 = vmatpush1.bf16.msra.mxu0 %v14349_v29  ;;  %v9340_v27 = vld [vmem:[%s20944_s20 + $0xb68] sm:$0xff]  ;;  %v14301_v29 = vcombine.low %v9216_v23, %v9220_v28 }
 0x9cd   :  { %12307 = vmatprep.subr.bf16.mxu1 %v14214_v41  ;;  %12348 = vmatprep.subr.bf16.mxu0 %v14342_v34  ;;  %v14429_v41 = vcombine.low %v9344_v35, %v9348_v52  ;;  %v14294_v34 = vcombine.high %v9208_v36, %v9212_v20  ;;  %v14422_v32 = vcombine.high %v9336_v2, %v9340_v27  ;;  %v9204_v57 = vld [vmem:[%s20944_s20 + $0x728] sm:$0xff] }
 0x9ce   :  { %v9328_v63 = vld [vmem:[%s20944_s20 + $0xb08] sm:$0xff] }
 0x9cf   :  { %v9192_v5 = vld [vmem:[%s20944_s20 + $0x6c8] sm:$0xff] }
 0x9d0   :  { %12308 = vmatpush1.bf16.msra.mxu1 %v14213_v6  ;;  %12349 = vmatpush1.bf16.msra.mxu0 %v14341_v0  ;;  %v9332_v6 = vld [vmem:[%s20944_s20 + $0xb28] sm:$0xff]  ;;  %v14293_v0 = vcombine.low %v9208_v36, %v9212_v20 }
 0x9d1   :  { %12309 = vmatprep.subr.bf16.mxu1 %v14206_v42  ;;  %12350 = vmatprep.subr.bf16.mxu0 %v14334_v37  ;;  %v14421_v42 = vcombine.low %v9336_v2, %v9340_v27  ;;  %v14286_v37 = vcombine.high %v9200_v19, %v9204_v57  ;;  %v14414_v22 = vcombine.high %v9328_v63, %v9332_v6  ;;  %v9196_v47 = vld [vmem:[%s20944_s20 + $0x6e8] sm:$0xff] }
 0x9d2   :  { %v9320_v26 = vld [vmem:[%s20944_s20 + $0xac8] sm:$0xff] }
 0x9d3   :  { %v9184_v55 = vld [vmem:[%s20944_s20 + $0x688] sm:$0xff] }
 0x9d4   :  { %12310 = vmatpush1.bf16.msra.mxu1 %v14205_v61  ;;  %12351 = vmatpush1.bf16.msra.mxu0 %v14333_v48  ;;  %v9324_v61 = vld [vmem:[%s20944_s20 + $0xae8] sm:$0xff]  ;;  %v14285_v48 = vcombine.low %v9200_v19, %v9204_v57 }
 0x9d5   :  { %12311 = vmatprep.subr.bf16.mxu1 %v14198_v49  ;;  %12352 = vmatprep.subr.bf16.mxu0 %v14326_v54  ;;  %v14413_v49 = vcombine.low %v9328_v63, %v9332_v6  ;;  %v14278_v54 = vcombine.high %v9192_v5, %v9196_v47  ;;  %v14406_v7 = vcombine.high %v9320_v26, %v9324_v61  ;;  %v9188_v8 = vld [vmem:[%s20944_s20 + $0x6a8] sm:$0xff] }
 0x9d6   :  { %v9312_v9 = vld [vmem:[%s20944_s20 + $0xa88] sm:$0xff] }
 0x9d7   :  { %v9176_v14 = vld [vmem:[%s20944_s20 + $0x648] sm:$0xff] }
 0x9d8   :  { %12312 = vmatpush1.bf16.msra.mxu1 %v14197_v3  ;;  %12353 = vmatpush1.bf16.msra.mxu0 %v14325_v1  ;;  %v9316_v3 = vld [vmem:[%s20944_s20 + $0xaa8] sm:$0xff]  ;;  %v14277_v1 = vcombine.low %v9192_v5, %v9196_v47  ;;  %v9025_v47 = vld [vmem:[%s20944_s20 + $0x190] sm:$0xff] }
 0x9d9   :  { %12313 = vmatprep.subr.bf16.mxu1 %v14190_v11  ;;  %12354 = vmatprep.subr.bf16.mxu0 %v14318_v50  ;;  %v14405_v11 = vcombine.low %v9320_v26, %v9324_v61  ;;  %v14270_v50 = vcombine.high %v9184_v55, %v9188_v8  ;;  %v14398_v46 = vcombine.high %v9312_v9, %v9316_v3  ;;  %v9180_v25 = vld [vmem:[%s20944_s20 + $0x668] sm:$0xff]  ;;  %v9029_v26 = vld [vmem:[%s20944_s20 + $0x1b0] sm:$0xff] }
 0x9da   :  { %v9304_v4 = vld [vmem:[%s20944_s20 + $0xa48] sm:$0xff] }
 0x9db   :  { %v9168_v28 = vld [vmem:[%s20944_s20 + $0x608] sm:$0xff] }
 0x9dc   :  { %12314 = vmatpush1.bf16.msra.mxu1 %v14189_v30  ;;  %12355 = vmatpush1.bf16.msra.mxu0 %v14317_v45  ;;  %v9308_v30 = vld [vmem:[%s20944_s20 + $0xa68] sm:$0xff]  ;;  %v14269_v45 = vcombine.low %v9184_v55, %v9188_v8 }
 0x9dd   :  { %12315 = vmatprep.subr.bf16.mxu1 %v14310_v16  ;;  %12356 = vmatprep.subr.bf16.mxu0 %v14438_v60  ;;  %v14397_v16 = vcombine.low %v9312_v9, %v9316_v3  ;;  %v14262_v60 = vcombine.high %v9176_v14, %v9180_v25  ;;  %v14390_v23 = vcombine.high %v9304_v4, %v9308_v30  ;;  %v9172_v35 = vld [vmem:[%s20944_s20 + $0x628] sm:$0xff]  ;;  %v9017_v9 = vld [vmem:[%s20944_s20 + $0x150] sm:$0xff] }
 0x9de   :  { %v9296_v52 = vld [vmem:[%s20944_s20 + $0xa08] sm:$0xff]  ;;  %v14254_v20 = vcombine.high %v9168_v28, %v9172_v35  ;;  %v14253_v57 = vcombine.low %v9168_v28, %v9172_v35  ;;  %v9021_v3 = vld [vmem:[%s20944_s20 + $0x170] sm:$0xff] }
 0x9df   :  { %v9416_v27 = vld [vmem:[%s20944_s20 + $0xdc8] sm:$0xff]  ;;  %v9013_v28 = vld [vmem:[%s20944_s20 + $0x130] sm:$0xff] }
 0x9e0   :  { %12316 = vmatpush2.bf16.msra.mxu1 %v14309_v10  ;;  %12357 = vmatpush2.bf16.msra.mxu0 %v14437_v12  ;;  %v9300_v10 = vld [vmem:[%s20944_s20 + $0xa28] sm:$0xff] }
 0x9e1   :  { %12317 = vmatprep.subr.bf16.mxu1 %v14302_v58  ;;  %12358 = vmatprep.subr.bf16.mxu0 %v14430_v15  ;;  %v14261_v58 = vcombine.low %v9176_v14, %v9180_v25  ;;  %v14389_v15 = vcombine.low %v9304_v4, %v9308_v30  ;;  %v14382_v2 = vcombine.high %v9296_v52, %v9300_v10  ;;  %v9412_v5 = vld [vmem:[%s20944_s20 + $0xda8] sm:$0xff] }
 0x9e2   :  { %v14381_v63 = vcombine.low %v9296_v52, %v9300_v10  ;;  %v9400_v55 = vld [vmem:[%s20944_s20 + $0xd48] sm:$0xff]  ;;  %v14111_v14 = vcombine.low %v9025_v47, %v9029_v26  ;;  %v14104_v30 = vcombine.high %v9017_v9, %v9021_v3  ;;  %v14103_v10 = vcombine.low %v9017_v9, %v9021_v3 }
 0x9e3   :  { %v9404_v8 = vld [vmem:[%s20944_s20 + $0xd68] sm:$0xff] }
 0x9e4   :  { %12318 = vmatpush2.bf16.msra.mxu1 %v14301_v29  ;;  %12359 = vmatpush2.bf16.msra.mxu0 %v14429_v41  ;;  %v9420_v29 = vld [vmem:[%s20944_s20 + $0xde8] sm:$0xff]  ;;  %v9033_v41 = vld [vmem:[%s20944_s20 + $0x1d0] sm:$0xff]  ;;  %v14486_v25 = vcombine.high %v9400_v55, %v9404_v8  ;;  %v14485_v35 = vcombine.low %v9400_v55, %v9404_v8 }
 0x9e5   :  { %12319 = vmatprep.subr.bf16.mxu1 %v14294_v34  ;;  %12360 = vmatprep.subr.bf16.mxu0 %v14422_v32  ;;  %v9037_v34 = vld [vmem:[%s20944_s20 + $0x1f0] sm:$0xff]  ;;  %v9483_v32 = vld [vmem:[%s20945_s21] sm:$0xff] }
 0x9e6   :  { %v9492_v61 = vrot.slane %v9483_v32, %v16309_v43  ;;  %v8977_v55 = vld [vmem:[%s20944_s20 + $0x10] sm:$0xff] }
 0x9e7   :  { %v8981_v8 = vld [vmem:[%s20944_s20 + $0x30] sm:$0xff] }
 0x9e8   :  { %12320 = vmatpush2.bf16.msra.mxu1 %v14293_v0  ;;  %12361 = vmatpush2.bf16.msra.mxu0 %v14421_v42  ;;  %v14502_v0 = vcombine.high %v9416_v27, %v9420_v29  ;;  %v14120_v42 = vcombine.high %v9033_v41, %v9037_v34 }
 0x9e9   :  { %12321 = vmatprep.subr.bf16.mxu1 %v14286_v37  ;;  %12362 = vmatprep.subr.bf16.mxu0 %v14414_v22  ;;  %v9488_v37 = vrot.slane %v9483_v32, %v16297_v38  ;;  %v9408_v22 = vld [vmem:[%s20944_s20 + $0xd88] sm:$0xff]  ;;  %v14501_v38 = vcombine.low %v9416_v27, %v9420_v29 }
 0x9ea   :  { %v9376_v32 = vld [vmem:[%s20944_s20 + $0xc88] sm:$0xff] }
 0x9ec   :  { %12322 = vmatpush2.bf16.msra.mxu1 %v14285_v48  ;;  %12363 = vmatpush2.bf16.msra.mxu0 %v14413_v49  ;;  %v14119_v48 = vcombine.low %v9033_v41, %v9037_v34 }
 0x9ed   :  { %12323 = vmatprep.subr.bf16.mxu1 %v14278_v54  ;;  %12364 = vmatprep.subr.bf16.mxu0 %v14406_v7  ;;  %v14494_v54 = vcombine.high %v9408_v22, %v9412_v5  ;;  %v14112_v7 = vcombine.high %v9025_v47, %v9029_v26  ;;  %v8985_v47 = vld [vmem:[%s20944_s20 + $0x50] sm:$0xff] }
 0x9ee   :  { %v8989_v26 = vld [vmem:[%s20944_s20 + $0x70] sm:$0xff] }
 0x9ef   :  { %v14071_v9 = vcombine.low %v8985_v47, %v8989_v26 }
 0x9f0   :  { %12324 = vmatpush2.bf16.msra.mxu1 %v14277_v1  ;;  %12365 = vmatpush2.bf16.msra.mxu0 %v14405_v11 }
 0x9f1   :  { %12325 = vmatprep.subr.bf16.mxu1 %v14270_v50  ;;  %12366 = vmatprep.subr.bf16.mxu0 %v14398_v46  ;;  %v14493_v50 = vcombine.low %v9408_v22, %v9412_v5  ;;  %v9368_v22 = vld [vmem:[%s20944_s20 + $0xc48] sm:$0xff] }
 0x9f2   :  { %v9372_v5 = vld [vmem:[%s20944_s20 + $0xc68] sm:$0xff] }
 0x9f3   :  { %v12128_v12 = vpop.f32.mrf.mxu0 }
 0x9f4   :  { %12326 = vmatpush2.bf16.msra.mxu1 %v14269_v45  ;;  %12367 = vmatpush2.bf16.msra.mxu0 %v14397_v16  ;;  %v12129_v49 = vadd.f32 %v12128_v12, %v9488_v37  ;;  %v9392_v45 = vld [vmem:[%s20944_s20 + $0xd08] sm:$0xff] }
 0x9f5   :  { %v12130_v36 = vpop.f32.mrf.mxu0  ;;  %12327 = vmatprep.subr.bf16.mxu1 %v14262_v60  ;;  %12368 = vmatprep.subr.bf16.mxu0 %v14390_v23  ;;  %v9396_v16 = vld [vmem:[%s20944_s20 + $0xd28] sm:$0xff]  ;;  %v9009_v23 = vld [vmem:[%s20944_s20 + $0x110] sm:$0xff] }
 0x9f6   :  { %v12131_v1 = vadd.f32 %v12130_v36, %v9492_v61  ;;  %v14478_v12 = vcombine.high %v9392_v45, %v9396_v16  ;;  %v9388_v36 = vld [vmem:[%s20944_s20 + $0xce8] sm:$0xff]  ;;  %v14477_v27 = vcombine.low %v9392_v45, %v9396_v16  ;;  %v14095_v29 = vcombine.low %v9009_v23, %v9013_v28 }
 0x9f7   :  { %v12132_v19 = vpop.f32.mrf.mxu0 }
 0x9f8   :  { %12328 = vmatpush2.bf16.msra.mxu1 %v14261_v58  ;;  %12369 = vmatpush2.bf16.msra.mxu0 %v14389_v15  ;;  %v14096_v58 = vcombine.high %v9009_v23, %v9013_v28  ;;  %v9384_v15 = vld [vmem:[%s20944_s20 + $0xcc8] sm:$0xff] }
 0x9f9   :  { %v12133_v6 = vpop.f32.mrf.mxu0  ;;  %12329 = vmatprep.subr.bf16.mxu1 %v14254_v20  ;;  %12370 = vmatprep.subr.bf16.mxu0 %v14382_v2  ;;  %v9001_v20 = vld [vmem:[%s20944_s20 + $0xd0] sm:$0xff]  ;;  %v14470_v41 = vcombine.high %v9384_v15, %v9388_v36  ;;  %v9380_v19 = vld [vmem:[%s20944_s20 + $0xca8] sm:$0xff] }
 0x9fa   :  { %v9005_v2 = vld [vmem:[%s20944_s20 + $0xf0] sm:$0xff]  ;;  %v14469_v6 = vcombine.low %v9384_v15, %v9388_v36  ;;  %v14461_v61 = vcombine.low %v9376_v32, %v9380_v19  ;;  %v9472_v23 = vld [vmem:[%s20944_s20 + $0xf88] sm:$0xff] }
 0x9fb   :  { %v14088_v34 = vcombine.high %v9001_v20, %v9005_v2  ;;  %v9476_v28 = vld [vmem:[%s20944_s20 + $0xfa8] sm:$0xff] }
 0x9fc   :  { %12330 = vmatpush2.bf16.msra.mxu1 %v14253_v57  ;;  %12371 = vmatpush2.bf16.msra.mxu0 %v14381_v63  ;;  %v8993_v57 = vld [vmem:[%s20944_s20 + $0x90] sm:$0xff]  ;;  %v9464_v36 = vld [vmem:[%s20944_s20 + $0xf48] sm:$0xff] }
 0x9fd   :  { %12381 = vmatprep.subr.bf16.mxu1 %v14502_v0  ;;  %12422 = vmatprep.subr.bf16.mxu0 %v14120_v42  ;;  %v8997_v63 = vld [vmem:[%s20944_s20 + $0xb0] sm:$0xff]  ;;  %v14087_v0 = vcombine.low %v9001_v20, %v9005_v2  ;;  %v14462_v42 = vcombine.high %v9376_v32, %v9380_v19  ;;  %v9468_v20 = vld [vmem:[%s20944_s20 + $0xf68] sm:$0xff] }
 0x9fe   :  { %v14080_v37 = vcombine.high %v8993_v57, %v8997_v63  ;;  %v9081_v2 = vld [vmem:[%s20944_s20 + $0x350] sm:$0xff]  ;;  %v9456_v19 = vld [vmem:[%s20944_s20 + $0xf08] sm:$0xff] }
 0x9ff   :  { %12332 = vmatmul.mubr.bf16.vlgmr.msra.gmra.mxu1 %v19495_v31  ;;  %12373 = vmatmul.mubr.bf16.vlgmr.msra.gmra.mxu0 %v19670_v33  ;;  %v12169_v43 = vpop.f32.mrf.mxu1 }
 0xa00   :  { %v20006_v11 = vadd.f32 %v12169_v43, %v12129_v49  ;;  %12382 = vmatpush1.bf16.msra.mxu1 %v14501_v38  ;;  %14574 = vmatprep.mubr.msk.bf16.mxu1 %vm12065_vm8, %v19782_v40  ;;  %v14079_v38 = vcombine.low %v8993_v57, %v8997_v63  ;;  %v14072_v49 = vcombine.high %v8985_v47, %v8989_v26  ;;  %v9460_v57 = vld [vmem:[%s20944_s20 + $0xf28] sm:$0xff]  ;;  %v9073_v63 = vld [vmem:[%s20944_s20 + $0x310] sm:$0xff] }
 0xa01   :  { %12423 = vmatpush1.bf16.msra.mxu0 %v14119_v48  ;;  %12454 = vmatprep.mubr.bf16.mxu0 %v19305_v44  ;;  %v12171_v46 = vpop.f32.mrf.mxu1  ;;  %v14454_v48 = vcombine.high %v9368_v22, %v9372_v5  ;;  %v14453_v43 = vcombine.low %v9368_v22, %v9372_v5  ;;  %v9448_v5 = vld [vmem:[%s20944_s20 + $0xec8] sm:$0xff]  ;;  %v9065_v26 = vld [vmem:[%s20944_s20 + $0x2d0] sm:$0xff] }
 0xa02   :  { %v20011_v4 = vadd.f32 %v12171_v46, %v12131_v1  ;;  %12383 = vmatprep.subr.bf16.mxu1 %v14494_v54  ;;  %12424 = vmatprep.subr.bf16.mxu0 %v14112_v7  ;;  %v9360_v54 = vld [vmem:[%s20944_s20 + $0xc08] sm:$0xff]  ;;  %v14064_v1 = vcombine.high %v8977_v55, %v8981_v8  ;;  %v9097_v46 = vld [vmem:[%s20944_s20 + $0x3d0] sm:$0xff] }
 0xa03   :  { %v12173_v60 = vpop.f32.mrf.mxu1  ;;  %v9364_v7 = vld [vmem:[%s20944_s20 + $0xc28] sm:$0xff] }
 0xa04   :  { %12384 = vmatpush1.bf16.msra.mxu1 %v14493_v50  ;;  %v14446_v3 = vcombine.high %v9360_v54, %v9364_v7  ;;  %v9480_v50 = vld [vmem:[%s20944_s20 + $0xfc8] sm:$0x33] }
 0xa05   :  { %12425 = vmatpush1.bf16.msra.mxu0 %v14111_v14  ;;  %v12174_v52 = vpop.f32.mrf.mxu1  ;;  %12385 = vmatprep.subr.bf16.mxu1 %v14486_v25  ;;  %v9101_v14 = vld [vmem:[%s20944_s20 + $0x3f0] sm:$0xff]  ;;  %v14445_v25 = vcombine.low %v9360_v54, %v9364_v7  ;;  %v14566_v45 = vcombine.high %v9480_v50, %v9480_v50  ;;  %v14565_v16 = vcombine.low %v9480_v50, %v9480_v50  ;;  %v9452_v47 = vld [vmem:[%s20944_s20 + $0xee8] sm:$0xff] }
 0xa06   :  { %12426 = vmatprep.subr.bf16.mxu0 %v14104_v30  ;;  %v14063_v30 = vcombine.low %v8977_v55, %v8981_v8  ;;  %v14184_v60 = vcombine.high %v9097_v46, %v9101_v14  ;;  %v9093_v52 = vld [vmem:[%s20944_s20 + $0x3b0] sm:$0xff]  ;;  %v9440_v7 = vld [vmem:[%s20944_s20 + $0xe88] sm:$0xff] }
 0xa07   :  { %v9444_v55 = vld [vmem:[%s20944_s20 + $0xea8] sm:$0xff]  ;;  %v9057_v8 = vld [vmem:[%s20944_s20 + $0x290] sm:$0xff] }
 0xa08   :  { %12386 = vmatpush1.bf16.msra.mxu1 %v14485_v35  ;;  %v9089_v35 = vld [vmem:[%s20944_s20 + $0x390] sm:$0xff] }
 0xa09   :  { %12427 = vmatpush1.bf16.msra.mxu0 %v14103_v10  ;;  %12387 = vmatprep.subr.bf16.mxu1 %v14478_v12  ;;  %v14183_v10 = vcombine.low %v9097_v46, %v9101_v14  ;;  %v12077_v12 = vsel %vm12069_vm7, %v14565_v16, 0  ;;  %v14176_v15 = vcombine.high %v9089_v35, %v9093_v52  ;;  %v9432_v46 = vld [vmem:[%s20944_s20 + $0xe48] sm:$0xff] }
 0xa0a   :  { %12428 = vmatprep.subr.bf16.mxu0 %v14096_v58  ;;  %v14558_v58 = vcombine.high %v9472_v23, %v9476_v28  ;;  %v9436_v14 = vld [vmem:[%s20944_s20 + $0xe68] sm:$0xff] }
 0xa0c   :  { %12388 = vmatpush1.bf16.msra.mxu1 %v14477_v27  ;;  %v9085_v27 = vld [vmem:[%s20944_s20 + $0x370] sm:$0xff] }
 0xa0d   :  { %12429 = vmatpush1.bf16.msra.mxu0 %v14095_v29  ;;  %12389 = vmatprep.subr.bf16.mxu1 %v14470_v41  ;;  %v14557_v29 = vcombine.low %v9472_v23, %v9476_v28  ;;  %v14175_v41 = vcombine.low %v9089_v35, %v9093_v52  ;;  %v14168_v32 = vcombine.high %v9081_v2, %v9085_v27  ;;  %v9424_v28 = vld [vmem:[%s20944_s20 + $0xe08] sm:$0xff]  ;;  %v9041_v52 = vld [vmem:[%s20944_s20 + $0x210] sm:$0xff] }
 0xa0e   :  { %12430 = vmatprep.subr.bf16.mxu0 %v14088_v34  ;;  %v14550_v34 = vcombine.high %v9464_v36, %v9468_v20  ;;  %v9428_v35 = vld [vmem:[%s20944_s20 + $0xe28] sm:$0xff] }
 0xa10   :  { %12390 = vmatpush1.bf16.msra.mxu1 %v14469_v6  ;;  %v9077_v6 = vld [vmem:[%s20944_s20 + $0x330] sm:$0xff] }
 0xa11   :  { %12431 = vmatpush1.bf16.msra.mxu0 %v14087_v0  ;;  %12391 = vmatprep.subr.bf16.mxu1 %v14462_v42  ;;  %v14549_v0 = vcombine.low %v9464_v36, %v9468_v20  ;;  %v14167_v42 = vcombine.low %v9081_v2, %v9085_v27  ;;  %v14160_v22 = vcombine.high %v9073_v63, %v9077_v6  ;;  %v9161_v20 = vld [vmem:[%s20944_s20 + $0x5d0] sm:$0xff] }
 0xa12   :  { %12432 = vmatprep.subr.bf16.mxu0 %v14080_v37  ;;  %v14542_v37 = vcombine.high %v9456_v19, %v9460_v57  ;;  %v9165_v2 = vld [vmem:[%s20944_s20 + $0x5f0] sm:$0xff] }
 0xa13   :  { %v9289_v27 = vld [vmem:[%s20944_s20 + $0x9d0] sm:$0xff] }
 0xa14   :  { %12392 = vmatpush1.bf16.msra.mxu1 %v14461_v61  ;;  %v9069_v61 = vld [vmem:[%s20944_s20 + $0x2f0] sm:$0xff] }
 0xa15   :  { %12433 = vmatpush1.bf16.msra.mxu0 %v14079_v38  ;;  %12393 = vmatprep.subr.bf16.mxu1 %v14454_v48  ;;  %v14541_v38 = vcombine.low %v9456_v19, %v9460_v57  ;;  %v14159_v48 = vcombine.low %v9073_v63, %v9077_v6  ;;  %v14152_v54 = vcombine.high %v9065_v26, %v9069_v61  ;;  %v9153_v57 = vld [vmem:[%s20944_s20 + $0x590] sm:$0xff] }
 0xa16   :  { %12434 = vmatprep.subr.bf16.mxu0 %v14072_v49  ;;  %v14534_v49 = vcombine.high %v9448_v5, %v9452_v47  ;;  %v9157_v63 = vld [vmem:[%s20944_s20 + $0x5b0] sm:$0xff]  ;;  %v14247_v6 = vcombine.low %v9161_v20, %v9165_v2 }
 0xa18   :  { %12394 = vmatpush1.bf16.msra.mxu1 %v14453_v43  ;;  %v9061_v43 = vld [vmem:[%s20944_s20 + $0x2b0] sm:$0xff] }
 0xa19   :  { %12435 = vmatpush1.bf16.msra.mxu0 %v14071_v9  ;;  %12395 = vmatprep.subr.bf16.mxu1 %v14446_v3  ;;  %v14533_v9 = vcombine.low %v9448_v5, %v9452_v47  ;;  %v14151_v3 = vcombine.low %v9065_v26, %v9069_v61  ;;  %v14144_v50 = vcombine.high %v9057_v8, %v9061_v43  ;;  %v9145_v5 = vld [vmem:[%s20944_s20 + $0x550] sm:$0xff] }
 0xa1a   :  { %12436 = vmatprep.subr.bf16.mxu0 %v14064_v1  ;;  %v14526_v1 = vcombine.high %v9440_v7, %v9444_v55  ;;  %v14143_v16 = vcombine.low %v9057_v8, %v9061_v43  ;;  %v9149_v47 = vld [vmem:[%s20944_s20 + $0x570] sm:$0xff] }
 0xa1b   :  { %v14232_v8 = vcombine.high %v9145_v5, %v9149_v47 }
 0xa1c   :  { %12396 = vmatpush1.bf16.msra.mxu1 %v14445_v25  ;;  %v9049_v25 = vld [vmem:[%s20944_s20 + $0x250] sm:$0xff] }
 0xa1d   :  { %12437 = vmatpush1.bf16.msra.mxu0 %v14063_v30  ;;  %14573 = vmatprep.subr.msk.bf16.mxu1 %vm12069_vm7, %v14566_v45  ;;  %v9053_v30 = vld [vmem:[%s20944_s20 + $0x270] sm:$0xff]  ;;  %v14525_v45 = vcombine.low %v9440_v7, %v9444_v55 }
 0xa1e   :  { %12438 = vmatprep.subr.bf16.mxu0 %v14184_v60  ;;  %v14518_v60 = vcombine.high %v9432_v46, %v9436_v14  ;;  %v14136_v23 = vcombine.high %v9049_v25, %v9053_v30 }
 0xa20   :  { %12398 = vmatpush2.bf16.msra.mxu1 %v12077_v12  ;;  %v14517_v12 = vcombine.low %v9432_v46, %v9436_v14  ;;  %v14231_v46 = vcombine.low %v9145_v5, %v9149_v47  ;;  %v9233_v5 = vld [vmem:[%s20944_s20 + $0x810] sm:$0xff] }
 0xa21   :  { %12439 = vmatpush2.bf16.msra.mxu0 %v14183_v10  ;;  %12399 = vmatprep.subr.bf16.mxu1 %v14558_v58  ;;  %v9045_v10 = vld [vmem:[%s20944_s20 + $0x230] sm:$0xff]  ;;  %v14135_v58 = vcombine.low %v9049_v25, %v9053_v30 }
 0xa22   :  { %12440 = vmatprep.subr.bf16.mxu0 %v14176_v15  ;;  %v14510_v15 = vcombine.high %v9424_v28, %v9428_v35  ;;  %v14128_v36 = vcombine.high %v9041_v52, %v9045_v10  ;;  %v9237_v47 = vld [vmem:[%s20944_s20 + $0x830] sm:$0xff] }
 0xa24   :  { %12400 = vmatpush2.bf16.msra.mxu1 %v14557_v29  ;;  %v9293_v29 = vld [vmem:[%s20944_s20 + $0x9f0] sm:$0xff] }
 0xa25   :  { %12441 = vmatpush2.bf16.msra.mxu0 %v14175_v41  ;;  %12401 = vmatprep.subr.bf16.mxu1 %v14550_v34  ;;  %v14509_v41 = vcombine.low %v9424_v28, %v9428_v35  ;;  %v14127_v34 = vcombine.low %v9041_v52, %v9045_v10  ;;  %v14376_v19 = vcombine.high %v9289_v27, %v9293_v29  ;;  %v9261_v28 = vld [vmem:[%s20944_s20 + $0x8f0] sm:$0xff] }
 0xa26   :  { %12442 = vmatprep.subr.bf16.mxu0 %v14168_v32  ;;  %v14248_v32 = vcombine.high %v9161_v20, %v9165_v2  ;;  %v9253_v20 = vld [vmem:[%s20944_s20 + $0x8b0] sm:$0xff] }
 0xa28   :  { %12402 = vmatpush2.bf16.msra.mxu1 %v14549_v0  ;;  %v9281_v0 = vld [vmem:[%s20944_s20 + $0x990] sm:$0xff] }
 0xa29   :  { %12443 = vmatpush2.bf16.msra.mxu0 %v14167_v42  ;;  %12403 = vmatprep.subr.bf16.mxu1 %v14542_v37  ;;  %v9285_v42 = vld [vmem:[%s20944_s20 + $0x9b0] sm:$0xff]  ;;  %v14375_v37 = vcombine.low %v9289_v27, %v9293_v29 }
 0xa2a   :  { %12444 = vmatprep.subr.bf16.mxu0 %v14160_v22  ;;  %v14240_v22 = vcombine.high %v9153_v57, %v9157_v63  ;;  %v14368_v61 = vcombine.high %v9281_v0, %v9285_v42  ;;  %v14367_v55 = vcombine.low %v9281_v0, %v9285_v42 }
 0xa2c   :  { %12404 = vmatpush2.bf16.msra.mxu1 %v14541_v38  ;;  %v9273_v38 = vld [vmem:[%s20944_s20 + $0x950] sm:$0xff] }
 0xa2d   :  { %12445 = vmatpush2.bf16.msra.mxu0 %v14159_v48  ;;  %12405 = vmatprep.subr.bf16.mxu1 %v14534_v49  ;;  %v9277_v48 = vld [vmem:[%s20944_s20 + $0x970] sm:$0xff] }
 0xa2e   :  { %12446 = vmatprep.subr.bf16.mxu0 %v14152_v54  ;;  %v14239_v54 = vcombine.low %v9153_v57, %v9157_v63  ;;  %v14359_v25 = vcombine.low %v9273_v38, %v9277_v48  ;;  %v9245_v57 = vld [vmem:[%s20944_s20 + $0x870] sm:$0xff] }
 0xa30   :  { %12406 = vmatpush2.bf16.msra.mxu1 %v14533_v9  ;;  %v14360_v9 = vcombine.high %v9273_v38, %v9277_v48  ;;  %v14320_v48 = vcombine.high %v9233_v5, %v9237_v47 }
 0xa31   :  { %12447 = vmatpush2.bf16.msra.mxu0 %v14151_v3  ;;  %12407 = vmatprep.subr.bf16.mxu1 %v14526_v1  ;;  %v9141_v3 = vld [vmem:[%s20944_s20 + $0x530] sm:$0xff] }
 0xa32   :  { %12448 = vmatprep.subr.bf16.mxu0 %v14144_v50  ;;  %v9265_v50 = vld [vmem:[%s20944_s20 + $0x910] sm:$0xff] }
 0xa34   :  { %12408 = vmatpush2.bf16.msra.mxu1 %v14525_v45 }
 0xa35   :  { %12449 = vmatpush2.bf16.msra.mxu0 %v14143_v16  ;;  %12409 = vmatprep.subr.bf16.mxu1 %v14518_v60  ;;  %v9129_v16 = vld [vmem:[%s20944_s20 + $0x4d0] sm:$0xff] }
 0xa36   :  { %12450 = vmatprep.subr.bf16.mxu0 %v14136_v23  ;;  %v9133_v60 = vld [vmem:[%s20944_s20 + $0x4f0] sm:$0xff] }
 0xa37   :  { %v9257_v23 = vld [vmem:[%s20944_s20 + $0x8d0] sm:$0xff]  ;;  %v14216_v10 = vcombine.high %v9129_v16, %v9133_v60  ;;  %v14215_v2 = vcombine.low %v9129_v16, %v9133_v60 }
 0xa38   :  { %12410 = vmatpush2.bf16.msra.mxu1 %v14517_v12  ;;  %v14344_v12 = vcombine.high %v9257_v23, %v9261_v28  ;;  %v14343_v27 = vcombine.low %v9257_v23, %v9261_v28  ;;  %v9209_v60 = vld [vmem:[%s20944_s20 + $0x750] sm:$0xff] }
 0xa39   :  { %12451 = vmatpush2.bf16.msra.mxu0 %v14135_v58  ;;  %12411 = vmatprep.subr.bf16.mxu1 %v14510_v15  ;;  %v9121_v58 = vld [vmem:[%s20944_s20 + $0x490] sm:$0xff] }
 0xa3a   :  { %12452 = vmatprep.subr.bf16.mxu0 %v14128_v36  ;;  %v9125_v15 = vld [vmem:[%s20944_s20 + $0x4b0] sm:$0xff] }
 0xa3b   :  { %v9249_v36 = vld [vmem:[%s20944_s20 + $0x890] sm:$0xff]  ;;  %v14208_v29 = vcombine.high %v9121_v58, %v9125_v15  ;;  %v14207_v63 = vcombine.low %v9121_v58, %v9125_v15 }
 0xa3c   :  { %12412 = vmatpush2.bf16.msra.mxu1 %v14509_v41  ;;  %v14336_v41 = vcombine.high %v9249_v36, %v9253_v20  ;;  %v9213_v23 = vld [vmem:[%s20944_s20 + $0x770] sm:$0xff] }
 0xa3d   :  { %12453 = vmatpush2.bf16.msra.mxu0 %v14127_v34  ;;  %12463 = vmatprep.subr.bf16.mxu1 %v14248_v32  ;;  %v9113_v34 = vld [vmem:[%s20944_s20 + $0x450] sm:$0xff] }
 0xa3e   :  { %12504 = vmatprep.subr.bf16.mxu0 %v14376_v19  ;;  %v9117_v32 = vld [vmem:[%s20944_s20 + $0x470] sm:$0xff] }
 0xa3f   :  { %12414 = vmatmul.mubr.bf16.vlgmr.msra.gmra.mxu1 %v19784_v13  ;;  %v12210_v26 = vpop.f32.mrf.mxu0  ;;  %v9241_v19 = vld [vmem:[%s20944_s20 + $0x850] sm:$0xff]  ;;  %v14200_v0 = vcombine.high %v9113_v34, %v9117_v32 }
 0xa40   :  { %12455 = vmatmul.mubr.bf16.vlgmr.msra.gmra.mxu0 %v19452_v51  ;;  %v20207_v49 = vadd.f32 %v12210_v26, %v20006_v11  ;;  %12464 = vmatpush1.bf16.msra.mxu1 %v14247_v6  ;;  %v9137_v11 = vld [vmem:[%s20944_s20 + $0x510] sm:$0xff]  ;;  %v14335_v6 = vcombine.low %v9249_v36, %v9253_v20  ;;  %v14328_v42 = vcombine.high %v9241_v19, %v9245_v57 }
 0xa41   :  { %12495 = vmatprep.mubr.bf16.mxu1 %v19481_v24  ;;  %12505 = vmatpush1.bf16.msra.mxu0 %v14375_v37  ;;  %v12212_v7 = vpop.f32.mrf.mxu0  ;;  %v14224_v30 = vcombine.high %v9137_v11, %v9141_v3  ;;  %v14223_v35 = vcombine.low %v9137_v11, %v9141_v3  ;;  %v9105_v37 = vld [vmem:[%s20944_s20 + $0x410] sm:$0xff]  ;;  %v14199_v26 = vcombine.low %v9113_v34, %v9117_v32 }
 0xa42   :  { %12536 = vmatprep.mubr.bf16.mxu0 %v19668_v62  ;;  %v20212_v43 = vadd.f32 %v12212_v7, %v20011_v4  ;;  %12465 = vmatprep.subr.bf16.mxu1 %v14240_v22  ;;  %v9269_v4 = vld [vmem:[%s20944_s20 + $0x930] sm:$0xff]  ;;  %v14319_v11 = vcombine.low %v9233_v5, %v9237_v47 }
 0xa43   :  { %12506 = vmatprep.subr.bf16.mxu0 %v14368_v61  ;;  %v12214_v1 = vpop.f32.mrf.mxu0  ;;  %v14352_v45 = vcombine.high %v9265_v50, %v9269_v4  ;;  %v14351_v52 = vcombine.low %v9265_v50, %v9269_v4  ;;  %v9109_v22 = vld [vmem:[%s20944_s20 + $0x430] sm:$0xff]  ;;  %v14327_v61 = vcombine.low %v9241_v19, %v9245_v57 }
 0xa44   :  { %12466 = vmatpush1.bf16.msra.mxu1 %v14239_v54  ;;  %v14192_v38 = vcombine.high %v9105_v37, %v9109_v22  ;;  %v9225_v54 = vld [vmem:[%s20944_s20 + $0x7d0] sm:$0xff] }
 0xa45   :  { %12507 = vmatpush1.bf16.msra.mxu0 %v14367_v55  ;;  %v12215_v14 = vpop.f32.mrf.mxu0  ;;  %12467 = vmatprep.subr.bf16.mxu1 %v14232_v8  ;;  %v9229_v7 = vld [vmem:[%s20944_s20 + $0x7f0] sm:$0xff] }
 0xa46   :  { %12508 = vmatprep.subr.bf16.mxu0 %v14360_v9  ;;  %v9353_v55 = vld [vmem:[%s20944_s20 + $0xbd0] sm:$0xff]  ;;  %v14191_v9 = vcombine.low %v9105_v37, %v9109_v22  ;;  %v14312_v3 = vcombine.high %v9225_v54, %v9229_v7 }
 0xa47   :  { %v9357_v8 = vld [vmem:[%s20944_s20 + $0xbf0] sm:$0xff] }
 0xa48   :  { %12468 = vmatpush1.bf16.msra.mxu1 %v14231_v46  ;;  %v14440_v1 = vcombine.high %v9353_v55, %v9357_v8  ;;  %v9217_v50 = vld [vmem:[%s20944_s20 + $0x790] sm:$0xff] }
 0xa49   :  { %12509 = vmatpush1.bf16.msra.mxu0 %v14359_v25  ;;  %12469 = vmatprep.subr.bf16.mxu1 %v14224_v30  ;;  %v9221_v4 = vld [vmem:[%s20944_s20 + $0x7b0] sm:$0xff]  ;;  %v14311_v25 = vcombine.low %v9225_v54, %v9229_v7  ;;  %v14439_v30 = vcombine.low %v9353_v55, %v9357_v8 }
 0xa4a   :  { %12510 = vmatprep.subr.bf16.mxu0 %v14352_v45  ;;  %v9345_v46 = vld [vmem:[%s20944_s20 + $0xb90] sm:$0xff]  ;;  %v14304_v45 = vcombine.high %v9217_v50, %v9221_v4 }
 0xa4b   :  { %v9349_v14 = vld [vmem:[%s20944_s20 + $0xbb0] sm:$0xff] }
 0xa4c   :  { %12470 = vmatpush1.bf16.msra.mxu1 %v14223_v35  ;;  %v14432_v16 = vcombine.high %v9345_v46, %v9349_v14  ;;  %v9337_v28 = vld [vmem:[%s20944_s20 + $0xb50] sm:$0xff] }
 0xa4d   :  { %12511 = vmatpush1.bf16.msra.mxu0 %v14351_v52  ;;  %12471 = vmatprep.subr.bf16.mxu1 %v14216_v10  ;;  %v9341_v35 = vld [vmem:[%s20944_s20 + $0xb70] sm:$0xff]  ;;  %v14303_v52 = vcombine.low %v9217_v50, %v9221_v4  ;;  %v14431_v10 = vcombine.low %v9345_v46, %v9349_v14 }
 0xa4e   :  { %12512 = vmatprep.subr.bf16.mxu0 %v14344_v12  ;;  %v14296_v12 = vcombine.high %v9209_v60, %v9213_v23  ;;  %v14424_v58 = vcombine.high %v9337_v28, %v9341_v35  ;;  %v9201_v15 = vld [vmem:[%s20944_s20 + $0x710] sm:$0xff] }
 0xa4f   :  { %v9205_v36 = vld [vmem:[%s20944_s20 + $0x730] sm:$0xff] }
 0xa50   :  { %12472 = vmatpush1.bf16.msra.mxu1 %v14215_v2  ;;  %v9329_v20 = vld [vmem:[%s20944_s20 + $0xb10] sm:$0xff] }
 0xa51   :  { %12513 = vmatpush1.bf16.msra.mxu0 %v14343_v27  ;;  %12473 = vmatprep.subr.bf16.mxu1 %v14208_v29  ;;  %v9333_v2 = vld [vmem:[%s20944_s20 + $0xb30] sm:$0xff]  ;;  %v14295_v27 = vcombine.low %v9209_v60, %v9213_v23  ;;  %v14423_v29 = vcombine.low %v9337_v28, %v9341_v35  ;;  %v9034_v35 = vld [vmem:[%s20944_s20 + $0x1d8] sm:$0xff] }
 0xa52   :  { %12514 = vmatprep.subr.bf16.mxu0 %v14336_v41  ;;  %v14288_v41 = vcombine.high %v9201_v15, %v9205_v36  ;;  %v14416_v34 = vcombine.high %v9329_v20, %v9333_v2  ;;  %v9193_v32 = vld [vmem:[%s20944_s20 + $0x6d0] sm:$0xff] }
 0xa53   :  { %v9197_v19 = vld [vmem:[%s20944_s20 + $0x6f0] sm:$0xff] }
 0xa54   :  { %12474 = vmatpush1.bf16.msra.mxu1 %v14207_v63  ;;  %v9321_v57 = vld [vmem:[%s20944_s20 + $0xad0] sm:$0xff] }
 0xa55   :  { %12515 = vmatpush1.bf16.msra.mxu0 %v14335_v6  ;;  %12475 = vmatprep.subr.bf16.mxu1 %v14200_v0  ;;  %v9325_v63 = vld [vmem:[%s20944_s20 + $0xaf0] sm:$0xff]  ;;  %v14287_v6 = vcombine.low %v9201_v15, %v9205_v36  ;;  %v14415_v0 = vcombine.low %v9329_v20, %v9333_v2 }
 0xa56   :  { %12516 = vmatprep.subr.bf16.mxu0 %v14328_v42  ;;  %v14280_v42 = vcombine.high %v9193_v32, %v9197_v19  ;;  %v14408_v37 = vcombine.high %v9321_v57, %v9325_v63  ;;  %v9185_v22 = vld [vmem:[%s20944_s20 + $0x690] sm:$0xff] }
 0xa57   :  { %v9189_v5 = vld [vmem:[%s20944_s20 + $0x6b0] sm:$0xff] }
 0xa58   :  { %12476 = vmatpush1.bf16.msra.mxu1 %v14199_v26  ;;  %v9313_v47 = vld [vmem:[%s20944_s20 + $0xa90] sm:$0xff] }
 0xa59   :  { %12517 = vmatpush1.bf16.msra.mxu0 %v14327_v61  ;;  %12477 = vmatprep.subr.bf16.mxu1 %v14192_v38  ;;  %v9317_v26 = vld [vmem:[%s20944_s20 + $0xab0] sm:$0xff]  ;;  %v14279_v61 = vcombine.low %v9193_v32, %v9197_v19  ;;  %v14407_v38 = vcombine.low %v9321_v57, %v9325_v63 }
 0xa5a   :  { %12518 = vmatprep.subr.bf16.mxu0 %v14320_v48  ;;  %v14272_v48 = vcombine.high %v9185_v22, %v9189_v5  ;;  %v14400_v54 = vcombine.high %v9313_v47, %v9317_v26  ;;  %v9177_v7 = vld [vmem:[%s20944_s20 + $0x650] sm:$0xff] }
 0xa5b   :  { %v9181_v55 = vld [vmem:[%s20944_s20 + $0x670] sm:$0xff] }
 0xa5c   :  { %12478 = vmatpush1.bf16.msra.mxu1 %v14191_v9  ;;  %v9305_v8 = vld [vmem:[%s20944_s20 + $0xa50] sm:$0xff] }
 0xa5d   :  { %12519 = vmatpush1.bf16.msra.mxu0 %v14319_v11  ;;  %12479 = vmatprep.subr.bf16.mxu1 %v14312_v3  ;;  %v9309_v9 = vld [vmem:[%s20944_s20 + $0xa70] sm:$0xff]  ;;  %v14271_v11 = vcombine.low %v9185_v22, %v9189_v5  ;;  %v14399_v3 = vcombine.low %v9313_v47, %v9317_v26 }
 0xa5e   :  { %12520 = vmatprep.subr.bf16.mxu0 %v14440_v1  ;;  %v14264_v1 = vcombine.high %v9177_v7, %v9181_v55  ;;  %v14392_v50 = vcombine.high %v9305_v8, %v9309_v9  ;;  %v9169_v4 = vld [vmem:[%s20944_s20 + $0x610] sm:$0xff] }
 0xa5f   :  { %v9173_v46 = vld [vmem:[%s20944_s20 + $0x630] sm:$0xff] }
 0xa60   :  { %12480 = vmatpush2.bf16.msra.mxu1 %v14311_v25  ;;  %v9297_v14 = vld [vmem:[%s20944_s20 + $0xa10] sm:$0xff] }
 0xa61   :  { %12521 = vmatpush2.bf16.msra.mxu0 %v14439_v30  ;;  %12481 = vmatprep.subr.bf16.mxu1 %v14304_v45  ;;  %v9301_v25 = vld [vmem:[%s20944_s20 + $0xa30] sm:$0xff]  ;;  %v14263_v30 = vcombine.low %v9177_v7, %v9181_v55  ;;  %v14391_v45 = vcombine.low %v9305_v8, %v9309_v9  ;;  %v9010_v9 = vld [vmem:[%s20944_s20 + $0x118] sm:$0xff] }
 0xa62   :  { %12522 = vmatprep.subr.bf16.mxu0 %v14432_v16  ;;  %v14256_v16 = vcombine.high %v9169_v4, %v9173_v46  ;;  %v14384_v60 = vcombine.high %v9297_v14, %v9301_v25  ;;  %v9417_v23 = vld [vmem:[%s20944_s20 + $0xdd0] sm:$0xff] }
 0xa63   :  { %v9421_v28 = vld [vmem:[%s20944_s20 + $0xdf0] sm:$0xff] }
 0xa64   :  { %12482 = vmatpush2.bf16.msra.mxu1 %v14303_v52  ;;  %v9038_v52 = vld [vmem:[%s20944_s20 + $0x1f8] sm:$0xff]  ;;  %v9409_v36 = vld [vmem:[%s20944_s20 + $0xd90] sm:$0xff]  ;;  %v14503_v2 = vcombine.low %v9417_v23, %v9421_v28 }
 0xa65   :  { %12523 = vmatpush2.bf16.msra.mxu0 %v14431_v10  ;;  %12483 = vmatprep.subr.bf16.mxu1 %v14296_v12  ;;  %v14255_v10 = vcombine.low %v9169_v4, %v9173_v46  ;;  %v14383_v12 = vcombine.low %v9297_v14, %v9301_v25  ;;  %v14122_v15 = vcombine.high %v9034_v35, %v9038_v52  ;;  %v9413_v20 = vld [vmem:[%s20944_s20 + $0xdb0] sm:$0xff] }
 0xa66   :  { %12524 = vmatprep.subr.bf16.mxu0 %v14424_v58  ;;  %v14504_v58 = vcombine.high %v9417_v23, %v9421_v28  ;;  %v9401_v32 = vld [vmem:[%s20944_s20 + $0xd50] sm:$0xff]  ;;  %v14495_v22 = vcombine.low %v9409_v36, %v9413_v20 }
 0xa67   :  { %v9405_v19 = vld [vmem:[%s20944_s20 + $0xd70] sm:$0xff] }
 0xa68   :  { %12484 = vmatpush2.bf16.msra.mxu1 %v14295_v27  ;;  %v9026_v27 = vld [vmem:[%s20944_s20 + $0x198] sm:$0xff]  ;;  %v9397_v7 = vld [vmem:[%s20944_s20 + $0xd30] sm:$0xff] }
 0xa69   :  { %12525 = vmatpush2.bf16.msra.mxu0 %v14423_v29  ;;  %12485 = vmatprep.subr.bf16.mxu1 %v14288_v41  ;;  %v9030_v29 = vld [vmem:[%s20944_s20 + $0x1b8] sm:$0xff]  ;;  %v14121_v41 = vcombine.low %v9034_v35, %v9038_v52  ;;  %v9385_v14 = vld [vmem:[%s20944_s20 + $0xcd0] sm:$0xff] }
 0xa6a   :  { %12526 = vmatprep.subr.bf16.mxu0 %v14416_v34  ;;  %v14496_v34 = vcombine.high %v9409_v36, %v9413_v20  ;;  %v14113_v26 = vcombine.low %v9026_v27, %v9030_v29  ;;  %v9389_v25 = vld [vmem:[%s20944_s20 + $0xcf0] sm:$0xff] }
 0xa6b   :  { %v14472_v23 = vcombine.high %v9385_v14, %v9389_v25  ;;  %v9377_v35 = vld [vmem:[%s20944_s20 + $0xc90] sm:$0xff] }
 0xa6c   :  { %12486 = vmatpush2.bf16.msra.mxu1 %v14287_v6  ;;  %v14114_v6 = vcombine.high %v9026_v27, %v9030_v29  ;;  %v9381_v52 = vld [vmem:[%s20944_s20 + $0xcb0] sm:$0xff]  ;;  %v8986_v29 = vld [vmem:[%s20944_s20 + $0x58] sm:$0xff] }
 0xa6d   :  { %12527 = vmatpush2.bf16.msra.mxu0 %v14415_v0  ;;  %12487 = vmatprep.subr.bf16.mxu1 %v14280_v42  ;;  %v9018_v0 = vld [vmem:[%s20944_s20 + $0x158] sm:$0xff]  ;;  %v14464_v36 = vcombine.high %v9377_v35, %v9381_v52  ;;  %v9373_v27 = vld [vmem:[%s20944_s20 + $0xc70] sm:$0xff] }
 0xa6e   :  { %12528 = vmatprep.subr.bf16.mxu0 %v14408_v37  ;;  %v9022_v42 = vld [vmem:[%s20944_s20 + $0x178] sm:$0xff] }
 0xa70   :  { %12488 = vmatpush2.bf16.msra.mxu1 %v14279_v61  ;;  %v14488_v61 = vcombine.high %v9401_v32, %v9405_v19 }
 0xa71   :  { %12529 = vmatpush2.bf16.msra.mxu0 %v14407_v38  ;;  %12489 = vmatprep.subr.bf16.mxu1 %v14272_v48 }
 0xa72   :  { %12530 = vmatprep.subr.bf16.mxu0 %v14400_v54  ;;  %v14106_v54 = vcombine.high %v9018_v0, %v9022_v42 }
 0xa74   :  { %12490 = vmatpush2.bf16.msra.mxu1 %v14271_v11  ;;  %v14487_v11 = vcombine.low %v9401_v32, %v9405_v19 }
 0xa75   :  { %12531 = vmatpush2.bf16.msra.mxu0 %v14399_v3  ;;  %12491 = vmatprep.subr.bf16.mxu1 %v14264_v1 }
 0xa76   :  { %12532 = vmatprep.subr.bf16.mxu0 %v14392_v50  ;;  %v14105_v50 = vcombine.low %v9018_v0, %v9022_v42  ;;  %v9361_v42 = vld [vmem:[%s20944_s20 + $0xc10] sm:$0xff] }
 0xa78   :  { %12492 = vmatpush2.bf16.msra.mxu1 %v14263_v30  ;;  %v9002_v30 = vld [vmem:[%s20944_s20 + $0xd8] sm:$0xff] }
 0xa79   :  { %12533 = vmatpush2.bf16.msra.mxu0 %v14391_v45  ;;  %12493 = vmatprep.subr.bf16.mxu1 %v14256_v16  ;;  %v9006_v45 = vld [vmem:[%s20944_s20 + $0xf8] sm:$0xff] }
 0xa7a   :  { %12534 = vmatprep.subr.bf16.mxu0 %v14384_v60  ;;  %v14090_v28 = vcombine.high %v9002_v30, %v9006_v45 }
 0xa7c   :  { %12494 = vmatpush2.bf16.msra.mxu1 %v14255_v10  ;;  %v8994_v10 = vld [vmem:[%s20944_s20 + $0x98] sm:$0xff] }
 0xa7d   :  { %12535 = vmatpush2.bf16.msra.mxu0 %v14383_v12  ;;  %12545 = vmatprep.subr.bf16.mxu1 %v14504_v58  ;;  %v8998_v12 = vld [vmem:[%s20944_s20 + $0xb8] sm:$0xff]  ;;  %v14471_v58 = vcombine.low %v9385_v14, %v9389_v25 }
 0xa7e   :  { %12586 = vmatprep.subr.bf16.mxu0 %v14122_v15  ;;  %v14089_v15 = vcombine.low %v9002_v30, %v9006_v45  ;;  %v14082_v20 = vcombine.high %v8994_v10, %v8998_v12  ;;  %v14081_v19 = vcombine.low %v8994_v10, %v8998_v12 }
 0xa7f   :  { %v20400_v57 = vpop.f32.mrf.mxu0  ;;  %12496 = vmatmul.mubr.bf16.vlgmr.msra.gmra.mxu1 %v19495_v31  ;;  %v12251_v63 = vpop.f32.mrf.mxu1 }
 0xa80   :  { %12537 = vmatmul.mubr.bf16.vlgmr.msra.gmra.mxu0 %v19670_v33  ;;  %v12252_v37 = vadd.f32 %v12251_v63, %v20207_v49  ;;  %12546 = vmatpush1.bf16.msra.mxu1 %v14503_v2  ;;  %v9393_v49 = vld [vmem:[%s20944_s20 + $0xd10] sm:$0xff] }
 0xa81   :  { %14576 = vmatprep.mubr.msk.bf16.mxu1 %vm12065_vm8, %v19782_v40  ;;  %12587 = vmatpush1.bf16.msra.mxu0 %v14121_v41  ;;  %v20413_v5 = vpop.f32.mrf.mxu0  ;;  %v12253_v47 = vpop.f32.mrf.mxu1  ;;  %v14480_v4 = vcombine.high %v9393_v49, %v9397_v7  ;;  %v14479_v16 = vcombine.low %v9393_v49, %v9397_v7  ;;  %v9369_v2 = vld [vmem:[%s20944_s20 + $0xc50] sm:$0xff]  ;;  %v8990_v41 = vld [vmem:[%s20944_s20 + $0x78] sm:$0xff] }
 0xa82   :  { %v14579_v38 = vmul.f32 -1.442695, %v12252_v37  ;;  %12618 = vmatprep.mubr.bf16.mxu0 %v19305_v44  ;;  %v12254_v48 = vadd.f32 %v12253_v47, %v20212_v43  ;;  %12547 = vmatprep.subr.bf16.mxu1 %v14496_v34  ;;  %v9014_v44 = vld [vmem:[%s20944_s20 + $0x138] sm:$0xff]  ;;  %v14463_v34 = vcombine.low %v9377_v35, %v9381_v52  ;;  %v14456_v63 = vcombine.high %v9369_v2, %v9373_v27  ;;  %v9365_v37 = vld [vmem:[%s20944_s20 + $0xc30] sm:$0xff] }
 0xa83   :  { %v12296_v55 = vpop.f32.mrf.mxu0  ;;  %12588 = vmatprep.subr.bf16.mxu0 %v14114_v6  ;;  %v12255_v8 = vpop.f32.mrf.mxu1  ;;  %v14098_v46 = vcombine.high %v9010_v9, %v9014_v44  ;;  %v14097_v60 = vcombine.low %v9010_v9, %v9014_v44  ;;  %v14074_v0 = vcombine.high %v8986_v29, %v8990_v41  ;;  %v8978_v47 = vld [vmem:[%s20944_s20 + $0x18] sm:$0xff]  ;;  %v9481_v7 = vld [vmem:[%s20944_s20 + $0xfd0] sm:$0x33]  ;;  %v14447_v9 = vcombine.low %v9361_v42, %v9365_v37 }
 0xa84   :  { %15211 = vpow2.f32 %v14579_v38  ;;  %v14580_v43 = vmul.f32 -1.442695, %v12254_v48  ;;  %12548 = vmatpush1.bf16.msra.mxu1 %v14495_v22  ;;  %v14455_v38 = vcombine.low %v9369_v2, %v9373_v27  ;;  %v14073_v48 = vcombine.low %v8986_v29, %v8990_v41  ;;  %v9098_v55 = vld [vmem:[%s20944_s20 + $0x3d8] sm:$0xff] }
 0xa85   :  { %12589 = vmatpush1.bf16.msra.mxu0 %v14113_v26  ;;  %v12297_v3 = vpop.f32.mrf.mxu0  ;;  %v12256_v1 = vpop.f32.mrf.mxu1  ;;  %12549 = vmatprep.subr.bf16.mxu1 %v14488_v61  ;;  %v8982_v26 = vld [vmem:[%s20944_s20 + $0x38] sm:$0xff] }
 0xa86   :  { %15213 = vpow2.f32 %v14580_v43  ;;  %12590 = vmatprep.subr.bf16.mxu0 %v14106_v54  ;;  %v14448_v54 = vcombine.high %v9361_v42, %v9365_v37  ;;  %v14066_v49 = vcombine.high %v8978_v47, %v8982_v26  ;;  %v9102_v8 = vld [vmem:[%s20944_s20 + $0x3f8] sm:$0xff]  ;;  %v14065_v44 = vcombine.low %v8978_v47, %v8982_v26  ;;  %v9473_v1 = vld [vmem:[%s20944_s20 + $0xf90] sm:$0xff] }
 0xa87   :  { %v14568_v43 = vcombine.high %v9481_v7, %v9481_v7  ;;  %v14186_v3 = vcombine.high %v9098_v55, %v9102_v8  ;;  %v14185_v14 = vcombine.low %v9098_v55, %v9102_v8  ;;  %v9074_v2 = vld [vmem:[%s20944_s20 + $0x318] sm:$0xff] }
 0xa88   :  { %12550 = vmatpush1.bf16.msra.mxu1 %v14487_v11  ;;  %v14567_v11 = vcombine.low %v9481_v7, %v9481_v7  ;;  %v9078_v27 = vld [vmem:[%s20944_s20 + $0x338] sm:$0xff] }
 0xa89   :  { %12591 = vmatpush1.bf16.msra.mxu0 %v14105_v50  ;;  %12551 = vmatprep.subr.bf16.mxu1 %v14480_v4  ;;  %v9477_v50 = vld [vmem:[%s20944_s20 + $0xfb0] sm:$0xff]  ;;  %v9090_v4 = vld [vmem:[%s20944_s20 + $0x398] sm:$0xff] }
 0xa8a   :  { %12592 = vmatprep.subr.bf16.mxu0 %v14098_v46  ;;  %v9094_v46 = vld [vmem:[%s20944_s20 + $0x3b8] sm:$0xff]  ;;  %v12083_v25 = vsel %vm12069_vm7, %v14567_v11, 0  ;;  %v14560_v30 = vcombine.high %v9473_v1, %v9477_v50  ;;  %v14559_v35 = vcombine.low %v9473_v1, %v9477_v50 }
 0xa8b   :  { %v14178_v45 = vcombine.high %v9090_v4, %v9094_v46  ;;  %v14177_v52 = vcombine.low %v9090_v4, %v9094_v46  ;;  %v9070_v42 = vld [vmem:[%s20944_s20 + $0x2f8] sm:$0xff]  ;;  %v9425_v46 = vld [vmem:[%s20944_s20 + $0xe10] sm:$0xff] }
 0xa8c   :  { %12552 = vmatpush1.bf16.msra.mxu1 %v14479_v16  ;;  %v9465_v16 = vld [vmem:[%s20944_s20 + $0xf50] sm:$0xff]  ;;  %v9054_v11 = vld [vmem:[%s20944_s20 + $0x278] sm:$0xff] }
 0xa8d   :  { %12593 = vmatpush1.bf16.msra.mxu0 %v14097_v60  ;;  %12553 = vmatprep.subr.bf16.mxu1 %v14472_v23  ;;  %v9469_v60 = vld [vmem:[%s20944_s20 + $0xf70] sm:$0xff]  ;;  %v9082_v23 = vld [vmem:[%s20944_s20 + $0x358] sm:$0xff] }
 0xa8e   :  { %12594 = vmatprep.subr.bf16.mxu0 %v14090_v28  ;;  %v9086_v28 = vld [vmem:[%s20944_s20 + $0x378] sm:$0xff]  ;;  %v14552_v10 = vcombine.high %v9465_v16, %v9469_v60  ;;  %v14551_v29 = vcombine.low %v9465_v16, %v9469_v60 }
 0xa90   :  { %12554 = vmatpush1.bf16.msra.mxu1 %v14471_v58  ;;  %v14170_v58 = vcombine.high %v9082_v23, %v9086_v28 }
 0xa91   :  { %v15212_v32 = vpop.eup %15211  ;;  %12595 = vmatpush1.bf16.msra.mxu0 %v14089_v15  ;;  %12555 = vmatprep.subr.bf16.mxu1 %v14464_v36  ;;  %v9457_v15 = vld [vmem:[%s20944_s20 + $0xf10] sm:$0xff] }
 0xa92   :  { %v12774_v6 = vadd.f32 1.0, %v15212_v32  ;;  %12596 = vmatprep.subr.bf16.mxu0 %v14082_v20  ;;  %v9461_v36 = vld [vmem:[%s20944_s20 + $0xf30] sm:$0xff] }
 0xa93   :  { %v15214_v22 = vpop.eup %15213  ;;  %v14544_v32 = vcombine.high %v9457_v15, %v9461_v36  ;;  %v14543_v37 = vcombine.low %v9457_v15, %v9461_v36 }
 0xa94   :  { %v12775_v61 = vadd.f32 1.0, %v15214_v22  ;;  %12556 = vmatpush1.bf16.msra.mxu1 %v14463_v34  ;;  %15215 = vrcp.f32 %v12774_v6  ;;  %v14169_v34 = vcombine.low %v9082_v23, %v9086_v28  ;;  %v9453_v6 = vld [vmem:[%s20944_s20 + $0xef0] sm:$0xff]  ;;  %v14161_v22 = vcombine.low %v9074_v2, %v9078_v27  ;;  %v9162_v28 = vld [vmem:[%s20944_s20 + $0x5d8] sm:$0xff] }
 0xa95   :  { %12597 = vmatpush1.bf16.msra.mxu0 %v14081_v19  ;;  %12557 = vmatprep.subr.bf16.mxu1 %v14456_v63  ;;  %v14162_v19 = vcombine.high %v9074_v2, %v9078_v27  ;;  %v9449_v63 = vld [vmem:[%s20944_s20 + $0xed0] sm:$0xff]  ;;  %v20593_v2 = vld [vmem:[%s20945_s21] sm:$0xff] }
 0xa96   :  { %15217 = vrcp.f32 %v12775_v61  ;;  %12598 = vmatprep.subr.bf16.mxu0 %v14074_v0  ;;  %v9066_v0 = vld [vmem:[%s20944_s20 + $0x2d8] sm:$0xff]  ;;  %v14536_v47 = vcombine.high %v9449_v63, %v9453_v6  ;;  %v9441_v61 = vld [vmem:[%s20944_s20 + $0xe90] sm:$0xff]  ;;  %v9496_v27 = vrot.slane %v20593_v2, %v16709_v17 }
 0xa97   :  { %v14154_v26 = vcombine.high %v9066_v0, %v9070_v42  ;;  %v14153_v7 = vcombine.low %v9066_v0, %v9070_v42  ;;  %v9286_v17 = vld [vmem:[%s20944_s20 + $0x9b8] sm:$0xff] }
 0xa98   :  { %12558 = vmatpush1.bf16.msra.mxu1 %v14455_v38  ;;  %v9445_v38 = vld [vmem:[%s20944_s20 + $0xeb0] sm:$0xff]  ;;  %v12293_v0 = vadd.f32 %v20400_v57, %v9496_v27  ;;  %v9278_v57 = vld [vmem:[%s20944_s20 + $0x978] sm:$0xff] }
 0xa99   :  { %12599 = vmatpush1.bf16.msra.mxu0 %v14073_v48  ;;  %12559 = vmatprep.subr.bf16.mxu1 %v14448_v54  ;;  %v9058_v48 = vld [vmem:[%s20944_s20 + $0x298] sm:$0xff]  ;;  %v14528_v55 = vcombine.high %v9441_v61, %v9445_v38 }
 0xa9a   :  { %12600 = vmatprep.subr.bf16.mxu0 %v14066_v49  ;;  %v9062_v54 = vld [vmem:[%s20944_s20 + $0x2b8] sm:$0xff]  ;;  %v14535_v49 = vcombine.low %v9449_v63, %v9453_v6 }
 0xa9b   :  { %v14146_v8 = vcombine.high %v9058_v48, %v9062_v54  ;;  %v14145_v1 = vcombine.low %v9058_v48, %v9062_v54  ;;  %v9282_v63 = vld [vmem:[%s20944_s20 + $0x998] sm:$0xff] }
 0xa9c   :  { %12560 = vmatpush1.bf16.msra.mxu1 %v14447_v9  ;;  %v9433_v9 = vld [vmem:[%s20944_s20 + $0xe50] sm:$0xff] }
 0xa9d   :  { %12601 = vmatpush1.bf16.msra.mxu0 %v14065_v44  ;;  %14575 = vmatprep.subr.msk.bf16.mxu1 %vm12069_vm7, %v14568_v43  ;;  %v9437_v44 = vld [vmem:[%s20944_s20 + $0xe70] sm:$0xff]  ;;  %v9050_v43 = vld [vmem:[%s20944_s20 + $0x258] sm:$0xff] }
 0xa9e   :  { %12602 = vmatprep.subr.bf16.mxu0 %v14186_v3  ;;  %v14527_v3 = vcombine.low %v9441_v61, %v9445_v38  ;;  %v14520_v50 = vcombine.high %v9433_v9, %v9437_v44  ;;  %v14138_v4 = vcombine.high %v9050_v43, %v9054_v11  ;;  %v14137_v16 = vcombine.low %v9050_v43, %v9054_v11  ;;  %v9274_v38 = vld [vmem:[%s20944_s20 + $0x958] sm:$0xff] }
 0xa9f   :  { %v14370_v61 = vcombine.high %v9282_v63, %v9286_v17 }
 0xaa0   :  { %12562 = vmatpush2.bf16.msra.mxu1 %v12083_v25  ;;  %v9042_v25 = vld [vmem:[%s20944_s20 + $0x218] sm:$0xff] }
 0xaa1   :  { %12603 = vmatpush2.bf16.msra.mxu0 %v14185_v14  ;;  %12563 = vmatprep.subr.bf16.mxu1 %v14560_v30  ;;  %v20512_v12 = vpop.eup %15215  ;;  %v9429_v14 = vld [vmem:[%s20944_s20 + $0xe30] sm:$0xff]  ;;  %v9046_v30 = vld [vmem:[%s20944_s20 + $0x238] sm:$0xff] }
 0xaa2   :  { %12604 = vmatprep.subr.bf16.mxu0 %v14178_v45  ;;  %v14519_v45 = vcombine.low %v9433_v9, %v9437_v44  ;;  %v14512_v60 = vcombine.high %v9425_v46, %v9429_v14  ;;  %v14130_v23 = vcombine.high %v9042_v25, %v9046_v30  ;;  %v14129_v15 = vcombine.low %v9042_v25, %v9046_v30  ;;  %v9130_v30 = vld [vmem:[%s20944_s20 + $0x4d8] sm:$0xff] }
 0xaa3   :  { %v20520_v20 = vpop.eup %15217  ;;  %v14362_v44 = vcombine.high %v9274_v38, %v9278_v57 }
 0xaa4   :  { %12564 = vmatpush2.bf16.msra.mxu1 %v14559_v35  ;;  %v12806_v41 = vcombine.low %v20512_v12, %v20520_v20  ;;  %v9166_v35 = vld [vmem:[%s20944_s20 + $0x5f8] sm:$0xff] }
 0xaa5   :  { %12605 = vmatpush2.bf16.msra.mxu0 %v14177_v52  ;;  %12565 = vmatprep.subr.bf16.mxu1 %v14552_v10  ;;  %v9290_v52 = vld [vmem:[%s20944_s20 + $0x9d8] sm:$0xff]  ;;  %v14250_v36 = vcombine.high %v9162_v28, %v9166_v35 }
 0xaa6   :  { %12606 = vmatprep.subr.bf16.mxu0 %v14170_v58  ;;  %v9294_v10 = vld [vmem:[%s20944_s20 + $0x9f8] sm:$0xff]  ;;  %v14511_v58 = vcombine.low %v9425_v46, %v9429_v14  ;;  %v14361_v46 = vcombine.low %v9274_v38, %v9278_v57 }
 0xaa7   :  { %v14377_v6 = vcombine.low %v9290_v52, %v9294_v10  ;;  %v9238_v38 = vld [vmem:[%s20944_s20 + $0x838] sm:$0xff] }
 0xaa8   :  { %12566 = vmatpush2.bf16.msra.mxu1 %v14551_v29  ;;  %v14378_v29 = vcombine.high %v9290_v52, %v9294_v10  ;;  %v9122_v10 = vld [vmem:[%s20944_s20 + $0x498] sm:$0xff] }
 0xaa9   :  { %12607 = vmatpush2.bf16.msra.mxu0 %v14169_v34  ;;  %12567 = vmatprep.subr.bf16.mxu1 %v14544_v32  ;;  %v9154_v34 = vld [vmem:[%s20944_s20 + $0x598] sm:$0xff] }
 0xaaa   :  { %12608 = vmatprep.subr.bf16.mxu0 %v14162_v19  ;;  %v9158_v32 = vld [vmem:[%s20944_s20 + $0x5b8] sm:$0xff]  ;;  %v14249_v19 = vcombine.low %v9162_v28, %v9166_v35 }
 0xaab   :  { %v14242_v42 = vcombine.high %v9154_v34, %v9158_v32  ;;  %v14241_v54 = vcombine.low %v9154_v34, %v9158_v32  ;;  %v9434_v20 = vld [vmem:[%s20944_s20 + $0xe58] sm:$0xff] }
 0xaac   :  { %12568 = vmatpush2.bf16.msra.mxu1 %v14543_v37  ;;  %v9146_v37 = vld [vmem:[%s20944_s20 + $0x558] sm:$0xff] }
 0xaad   :  { %12609 = vmatpush2.bf16.msra.mxu0 %v14161_v22  ;;  %12569 = vmatprep.subr.bf16.mxu1 %v14536_v47  ;;  %v9150_v22 = vld [vmem:[%s20944_s20 + $0x578] sm:$0xff] }
 0xaae   :  { %12610 = vmatprep.subr.bf16.mxu0 %v14154_v26 }
 0xab0   :  { %12570 = vmatpush2.bf16.msra.mxu1 %v14535_v49 }
 0xab1   :  { %12611 = vmatpush2.bf16.msra.mxu0 %v14153_v7  ;;  %12571 = vmatprep.subr.bf16.mxu1 %v14528_v55  ;;  %v14369_v55 = vcombine.low %v9282_v63, %v9286_v17  ;;  %v9118_v63 = vld [vmem:[%s20944_s20 + $0x478] sm:$0xff] }
 0xab2   :  { %12612 = vmatprep.subr.bf16.mxu0 %v14146_v8  ;;  %v14234_v8 = vcombine.high %v9146_v37, %v9150_v22  ;;  %v9242_v17 = vld [vmem:[%s20944_s20 + $0x858] sm:$0xff] }
 0xab4   :  { %12572 = vmatpush2.bf16.msra.mxu1 %v14527_v3  ;;  %v9266_v3 = vld [vmem:[%s20944_s20 + $0x918] sm:$0xff] }
 0xab5   :  { %12613 = vmatpush2.bf16.msra.mxu0 %v14145_v1  ;;  %12573 = vmatprep.subr.bf16.mxu1 %v14520_v50  ;;  %v14233_v1 = vcombine.low %v9146_v37, %v9150_v22 }
 0xab6   :  { %12614 = vmatprep.subr.bf16.mxu0 %v14138_v4 }
 0xab8   :  { %12574 = vmatpush2.bf16.msra.mxu1 %v14519_v45  ;;  %v9134_v45 = vld [vmem:[%s20944_s20 + $0x4f8] sm:$0xff] }
 0xab9   :  { %12615 = vmatpush2.bf16.msra.mxu0 %v14137_v16  ;;  %12575 = vmatprep.subr.bf16.mxu1 %v14512_v60  ;;  %v9258_v16 = vld [vmem:[%s20944_s20 + $0x8d8] sm:$0xff]  ;;  %v14218_v35 = vcombine.high %v9130_v30, %v9134_v45  ;;  %v14217_v27 = vcombine.low %v9130_v30, %v9134_v45 }
 0xaba   :  { %12616 = vmatprep.subr.bf16.mxu0 %v14130_v23  ;;  %v9262_v60 = vld [vmem:[%s20944_s20 + $0x8f8] sm:$0xff] }
 0xabb   :  { %v14346_v52 = vcombine.high %v9258_v16, %v9262_v60 }
 0xabc   :  { %12576 = vmatpush2.bf16.msra.mxu1 %v14511_v58  ;;  %v9126_v58 = vld [vmem:[%s20944_s20 + $0x4b8] sm:$0xff] }
 0xabd   :  { %12617 = vmatpush2.bf16.msra.mxu0 %v14129_v15  ;;  %12627 = vmatprep.subr.bf16.mxu1 %v14250_v36  ;;  %v9250_v15 = vld [vmem:[%s20944_s20 + $0x898] sm:$0xff]  ;;  %v14210_v34 = vcombine.high %v9122_v10, %v9126_v58 }
 0xabe   :  { %12668 = vmatprep.subr.bf16.mxu0 %v14378_v29  ;;  %v9254_v36 = vld [vmem:[%s20944_s20 + $0x8b8] sm:$0xff]  ;;  %v14345_v29 = vcombine.low %v9258_v16, %v9262_v60 }
 0xabf   :  { %v12333_v47 = vpop.f32.mrf.mxu1  ;;  %v12374_v26 = vpop.f32.mrf.mxu0  ;;  %12578 = vmatmul.mubr.bf16.vlgmr.msra.gmra.mxu1 %v19784_v13  ;;  %v14338_v32 = vcombine.high %v9250_v15, %v9254_v36  ;;  %v9210_v16 = vld [vmem:[%s20944_s20 + $0x758] sm:$0xff] }
 0xac0   :  { %v12334_v48 = vadd.f32 %v12333_v47, %v12293_v0  ;;  %12619 = vmatmul.mubr.bf16.vlgmr.msra.gmra.mxu0 %v19452_v51  ;;  %12628 = vmatpush1.bf16.msra.mxu1 %v14249_v19  ;;  %v9138_v51 = vld [vmem:[%s20944_s20 + $0x518] sm:$0xff]  ;;  %v14209_v0 = vcombine.low %v9122_v10, %v9126_v58 }
 0xac1   :  { %12659 = vmatprep.mubr.bf16.mxu1 %v19481_v24  ;;  %12669 = vmatpush1.bf16.msra.mxu0 %v14377_v6  ;;  %v20625_v49 = vpop.f32.mrf.mxu1  ;;  %v20627_v7 = vpop.f32.mrf.mxu0  ;;  %v9142_v24 = vld [vmem:[%s20944_s20 + $0x538] sm:$0xff] }
 0xac2   :  { %v20629_v9 = vadd.f32 %v12374_v26, %v12334_v48  ;;  %12700 = vmatprep.mubr.bf16.mxu0 %v19668_v62  ;;  %12629 = vmatprep.subr.bf16.mxu1 %v14242_v42  ;;  %v9270_v62 = vld [vmem:[%s20944_s20 + $0x938] sm:$0xff]  ;;  %v14226_v14 = vcombine.high %v9138_v51, %v9142_v24  ;;  %v14225_v23 = vcombine.low %v9138_v51, %v9142_v24 }
 0xac3   :  { %v12337_v43 = vpop.f32.mrf.mxu1  ;;  %v12378_v11 = vpop.f32.mrf.mxu0  ;;  %12670 = vmatprep.subr.bf16.mxu0 %v14370_v61  ;;  %v14354_v25 = vcombine.high %v9266_v3, %v9270_v62  ;;  %v14353_v28 = vcombine.low %v9266_v3, %v9270_v62  ;;  %v9114_v19 = vld [vmem:[%s20944_s20 + $0x458] sm:$0xff]  ;;  %v14337_v42 = vcombine.low %v9250_v15, %v9254_v36 }
 0xac4   :  { %12630 = vmatpush1.bf16.msra.mxu1 %v14241_v54  ;;  %v9246_v6 = vld [vmem:[%s20944_s20 + $0x878] sm:$0xff]  ;;  %v14202_v37 = vcombine.high %v9114_v19, %v9118_v63  ;;  %v14201_v57 = vcombine.low %v9114_v19, %v9118_v63 }
 0xac5   :  { %12671 = vmatpush1.bf16.msra.mxu0 %v14369_v55  ;;  %v12338_v50 = vpop.f32.mrf.mxu1  ;;  %v12379_v4 = vpop.f32.mrf.mxu0  ;;  %12631 = vmatprep.subr.bf16.mxu1 %v14234_v8  ;;  %v14330_v22 = vcombine.high %v9242_v17, %v9246_v6  ;;  %v9106_v47 = vld [vmem:[%s20944_s20 + $0x418] sm:$0xff]  ;;  %v14329_v48 = vcombine.low %v9242_v17, %v9246_v6 }
 0xac6   :  { %12672 = vmatprep.subr.bf16.mxu0 %v14362_v44  ;;  %v9110_v26 = vld [vmem:[%s20944_s20 + $0x438] sm:$0xff] }
 0xac7   :  { %v9234_v61 = vld [vmem:[%s20944_s20 + $0x818] sm:$0xff]  ;;  %v14194_v54 = vcombine.high %v9106_v47, %v9110_v26  ;;  %v14193_v43 = vcombine.low %v9106_v47, %v9110_v26 }
 0xac8   :  { %12632 = vmatpush1.bf16.msra.mxu1 %v14233_v1  ;;  %v14322_v55 = vcombine.high %v9234_v61, %v9238_v38  ;;  %v9226_v8 = vld [vmem:[%s20944_s20 + $0x7d8] sm:$0xff]  ;;  %v14321_v11 = vcombine.low %v9234_v61, %v9238_v38 }
 0xac9   :  { %12673 = vmatpush1.bf16.msra.mxu0 %v14361_v46  ;;  %12633 = vmatprep.subr.bf16.mxu1 %v14226_v14  ;;  %v9230_v44 = vld [vmem:[%s20944_s20 + $0x7f8] sm:$0xff] }
 0xaca   :  { %12674 = vmatprep.subr.bf16.mxu0 %v14354_v25  ;;  %v9354_v51 = vld [vmem:[%s20944_s20 + $0xbd8] sm:$0xff]  ;;  %v14314_v3 = vcombine.high %v9226_v8, %v9230_v44  ;;  %v14313_v14 = vcombine.low %v9226_v8, %v9230_v44 }
 0xacb   :  { %v9358_v24 = vld [vmem:[%s20944_s20 + $0xbf8] sm:$0xff] }
 0xacc   :  { %12634 = vmatpush1.bf16.msra.mxu1 %v14225_v23  ;;  %v14442_v62 = vcombine.high %v9354_v51, %v9358_v24  ;;  %v9218_v1 = vld [vmem:[%s20944_s20 + $0x798] sm:$0xff]  ;;  %v14441_v25 = vcombine.low %v9354_v51, %v9358_v24 }
 0xacd   :  { %12675 = vmatpush1.bf16.msra.mxu0 %v14353_v28  ;;  %12635 = vmatprep.subr.bf16.mxu1 %v14218_v35  ;;  %v9222_v50 = vld [vmem:[%s20944_s20 + $0x7b8] sm:$0xff] }
 0xace   :  { %12676 = vmatprep.subr.bf16.mxu0 %v14346_v52  ;;  %v9346_v4 = vld [vmem:[%s20944_s20 + $0xb98] sm:$0xff]  ;;  %v14306_v30 = vcombine.high %v9218_v1, %v9222_v50  ;;  %v14305_v35 = vcombine.low %v9218_v1, %v9222_v50 }
 0xacf   :  { %v9350_v46 = vld [vmem:[%s20944_s20 + $0xbb8] sm:$0xff] }
 0xad0   :  { %12636 = vmatpush1.bf16.msra.mxu1 %v14217_v27  ;;  %v14434_v45 = vcombine.high %v9346_v4, %v9350_v46  ;;  %v9214_v60 = vld [vmem:[%s20944_s20 + $0x778] sm:$0xff]  ;;  %v14433_v52 = vcombine.low %v9346_v4, %v9350_v46 }
 0xad1   :  { %12677 = vmatpush1.bf16.msra.mxu0 %v14345_v29  ;;  %12637 = vmatprep.subr.bf16.mxu1 %v14210_v34  ;;  %v9338_v23 = vld [vmem:[%s20944_s20 + $0xb58] sm:$0xff]  ;;  %v14298_v10 = vcombine.high %v9210_v16, %v9214_v60  ;;  %v14297_v34 = vcombine.low %v9210_v16, %v9214_v60  ;;  %v9500_v60 = vrot.slane %v20593_v2, %v16712_v21 }
 0xad2   :  { %12678 = vmatprep.subr.bf16.mxu0 %v14338_v32  ;;  %v9342_v28 = vld [vmem:[%s20944_s20 + $0xb78] sm:$0xff] }
 0xad3   :  { %v14426_v58 = vcombine.high %v9338_v23, %v9342_v28  ;;  %v9202_v15 = vld [vmem:[%s20944_s20 + $0x718] sm:$0xff]  ;;  %v14425_v32 = vcombine.low %v9338_v23, %v9342_v28 }
 0xad4   :  { %12638 = vmatpush1.bf16.msra.mxu1 %v14209_v0  ;;  %v9206_v36 = vld [vmem:[%s20944_s20 + $0x738] sm:$0xff] }
 0xad5   :  { %12679 = vmatpush1.bf16.msra.mxu0 %v14337_v42  ;;  %12639 = vmatprep.subr.bf16.mxu1 %v14202_v37  ;;  %v9330_v27 = vld [vmem:[%s20944_s20 + $0xb18] sm:$0xff]  ;;  %v14290_v19 = vcombine.high %v9202_v15, %v9206_v36  ;;  %v14289_v37 = vcombine.low %v9202_v15, %v9206_v36  ;;  %v12295_v15 = vadd.f32 %v20413_v5, %v9500_v60 }
 0xad6   :  { %12680 = vmatprep.subr.bf16.mxu0 %v14330_v22  ;;  %v9334_v29 = vld [vmem:[%s20944_s20 + $0xb38] sm:$0xff] }
 0xad7   :  { %v14418_v63 = vcombine.high %v9330_v27, %v9334_v29  ;;  %v9194_v17 = vld [vmem:[%s20944_s20 + $0x6d8] sm:$0xff]  ;;  %v14417_v22 = vcombine.low %v9330_v27, %v9334_v29  ;;  %v12336_v27 = vadd.f32 %v20625_v49, %v12295_v15 }
 0xad8   :  { %12640 = vmatpush1.bf16.msra.mxu1 %v14201_v57  ;;  %v9198_v6 = vld [vmem:[%s20944_s20 + $0x6f8] sm:$0xff] }
 0xad9   :  { %12681 = vmatpush1.bf16.msra.mxu0 %v14329_v48  ;;  %12641 = vmatprep.subr.bf16.mxu1 %v14194_v54  ;;  %v9322_v0 = vld [vmem:[%s20944_s20 + $0xad8] sm:$0xff]  ;;  %v14282_v47 = vcombine.high %v9194_v17, %v9198_v6  ;;  %v14281_v54 = vcombine.low %v9194_v17, %v9198_v6 }
 0xada   :  { %12682 = vmatprep.subr.bf16.mxu0 %v14322_v55  ;;  %v9326_v42 = vld [vmem:[%s20944_s20 + $0xaf8] sm:$0xff] }
 0xadb   :  { %v14410_v26 = vcombine.high %v9322_v0, %v9326_v42  ;;  %v9186_v61 = vld [vmem:[%s20944_s20 + $0x698] sm:$0xff]  ;;  %v14409_v55 = vcombine.low %v9322_v0, %v9326_v42 }
 0xadc   :  { %12642 = vmatpush1.bf16.msra.mxu1 %v14193_v43  ;;  %v9190_v38 = vld [vmem:[%s20944_s20 + $0x6b8] sm:$0xff] }
 0xadd   :  { %12683 = vmatpush1.bf16.msra.mxu0 %v14321_v11  ;;  %12643 = vmatprep.subr.bf16.mxu1 %v14314_v3  ;;  %v9314_v57 = vld [vmem:[%s20944_s20 + $0xa98] sm:$0xff]  ;;  %v14274_v8 = vcombine.high %v9186_v61, %v9190_v38  ;;  %v14273_v3 = vcombine.low %v9186_v61, %v9190_v38 }
 0xade   :  { %12684 = vmatprep.subr.bf16.mxu0 %v14442_v62  ;;  %v9318_v48 = vld [vmem:[%s20944_s20 + $0xab8] sm:$0xff] }
 0xadf   :  { %v14402_v44 = vcombine.high %v9314_v57, %v9318_v48  ;;  %v9178_v51 = vld [vmem:[%s20944_s20 + $0x658] sm:$0xff]  ;;  %v14401_v62 = vcombine.low %v9314_v57, %v9318_v48 }
 0xae0   :  { %12644 = vmatpush2.bf16.msra.mxu1 %v14313_v14  ;;  %v9182_v24 = vld [vmem:[%s20944_s20 + $0x678] sm:$0xff] }
 0xae1   :  { %12685 = vmatpush2.bf16.msra.mxu0 %v14441_v25  ;;  %12645 = vmatprep.subr.bf16.mxu1 %v14306_v30  ;;  %v9306_v43 = vld [vmem:[%s20944_s20 + $0xa58] sm:$0xff]  ;;  %v14266_v1 = vcombine.high %v9178_v51, %v9182_v24  ;;  %v14265_v30 = vcombine.low %v9178_v51, %v9182_v24 }
 0xae2   :  { %12686 = vmatprep.subr.bf16.mxu0 %v14434_v45  ;;  %v9310_v11 = vld [vmem:[%s20944_s20 + $0xa78] sm:$0xff] }
 0xae3   :  { %v14394_v50 = vcombine.high %v9306_v43, %v9310_v11  ;;  %v9170_v4 = vld [vmem:[%s20944_s20 + $0x618] sm:$0xff]  ;;  %v14393_v45 = vcombine.low %v9306_v43, %v9310_v11 }
 0xae4   :  { %12646 = vmatpush2.bf16.msra.mxu1 %v14305_v35  ;;  %v9174_v46 = vld [vmem:[%s20944_s20 + $0x638] sm:$0xff] }
 0xae5   :  { %12687 = vmatpush2.bf16.msra.mxu0 %v14433_v52  ;;  %12647 = vmatprep.subr.bf16.mxu1 %v14298_v10  ;;  %v9298_v14 = vld [vmem:[%s20944_s20 + $0xa18] sm:$0xff]  ;;  %v14258_v16 = vcombine.high %v9170_v4, %v9174_v46  ;;  %v14257_v52 = vcombine.low %v9170_v4, %v9174_v46 }
 0xae6   :  { %12688 = vmatprep.subr.bf16.mxu0 %v14426_v58  ;;  %v9302_v25 = vld [vmem:[%s20944_s20 + $0xa38] sm:$0xff] }
 0xae7   :  { %v14386_v23 = vcombine.high %v9298_v14, %v9302_v25  ;;  %v9418_v28 = vld [vmem:[%s20944_s20 + $0xdd8] sm:$0xff]  ;;  %v14385_v10 = vcombine.low %v9298_v14, %v9302_v25 }
 0xae8   :  { %12648 = vmatpush2.bf16.msra.mxu1 %v14297_v34  ;;  %v9422_v35 = vld [vmem:[%s20944_s20 + $0xdf8] sm:$0xff] }
 0xae9   :  { %12689 = vmatpush2.bf16.msra.mxu0 %v14425_v32  ;;  %12649 = vmatprep.subr.bf16.mxu1 %v14290_v19  ;;  %v14506_v58 = vcombine.high %v9418_v28, %v9422_v35  ;;  %v9410_v21 = vld [vmem:[%s20944_s20 + $0xd98] sm:$0xff]  ;;  %v14505_v29 = vcombine.low %v9418_v28, %v9422_v35 }
 0xaea   :  { %12690 = vmatprep.subr.bf16.mxu0 %v14418_v63  ;;  %v9414_v36 = vld [vmem:[%s20944_s20 + $0xdb8] sm:$0xff]  ;;  %v12377_v63 = vadd.f32 %v20627_v7, %v12336_v27 }
 0xaeb   :  { %v14498_v34 = vcombine.high %v9410_v21, %v9414_v36  ;;  %v9402_v5 = vld [vmem:[%s20944_s20 + $0xd58] sm:$0xff]  ;;  %v14497_v6 = vcombine.low %v9410_v21, %v9414_v36 }
 0xaec   :  { %12650 = vmatpush2.bf16.msra.mxu1 %v14289_v37  ;;  %v9406_v32 = vld [vmem:[%s20944_s20 + $0xd78] sm:$0xff] }
 0xaed   :  { %12691 = vmatpush2.bf16.msra.mxu0 %v14417_v22  ;;  %12651 = vmatprep.subr.bf16.mxu1 %v14282_v47  ;;  %v14490_v42 = vcombine.high %v9402_v5, %v9406_v32  ;;  %v9386_v48 = vld [vmem:[%s20944_s20 + $0xcd8] sm:$0xff] }
 0xaee   :  { %12692 = vmatprep.subr.bf16.mxu0 %v14410_v26  ;;  %v9382_v51 = vld [vmem:[%s20944_s20 + $0xcb8] sm:$0xff] }
 0xaef   :  { %v9370_v11 = vld [vmem:[%s20944_s20 + $0xc58] sm:$0xff] }
 0xaf0   :  { %12652 = vmatpush2.bf16.msra.mxu1 %v14281_v54  ;;  %v9390_v54 = vld [vmem:[%s20944_s20 + $0xcf8] sm:$0xff] }
 0xaf1   :  { %12693 = vmatpush2.bf16.msra.mxu0 %v14409_v55  ;;  %12653 = vmatprep.subr.bf16.mxu1 %v14274_v8  ;;  %v14474_v8 = vcombine.high %v9386_v48, %v9390_v54  ;;  %v14473_v24 = vcombine.low %v9386_v48, %v9390_v54  ;;  %v9362_v46 = vld [vmem:[%s20944_s20 + $0xc18] sm:$0xff] }
 0xaf2   :  { %12694 = vmatprep.subr.bf16.mxu0 %v14402_v44  ;;  %v9378_v44 = vld [vmem:[%s20944_s20 + $0xc98] sm:$0xff] }
 0xaf3   :  { %v14466_v43 = vcombine.high %v9378_v44, %v9382_v51  ;;  %v9366_v14 = vld [vmem:[%s20944_s20 + $0xc38] sm:$0xff] }
 0xaf4   :  { %12654 = vmatpush2.bf16.msra.mxu1 %v14273_v3  ;;  %v9374_v3 = vld [vmem:[%s20944_s20 + $0xc78] sm:$0xff] }
 0xaf5   :  { %12695 = vmatpush2.bf16.msra.mxu0 %v14401_v62  ;;  %12655 = vmatprep.subr.bf16.mxu1 %v14266_v1  ;;  %v14465_v62 = vcombine.low %v9378_v44, %v9382_v51  ;;  %v9482_v60 = vld [vmem:[%s20944_s20 + $0xfd8] sm:$0x33]  ;;  %v9504_v44 = vrot.slane %v20593_v2, %v17113_v56  ;;  %v9508_v51 = vrot.slane %v20593_v2, %v17312_v18 }
 0xaf6   :  { %12696 = vmatprep.subr.bf16.mxu0 %v14394_v50  ;;  %v14458_v50 = vcombine.high %v9370_v11, %v9374_v3  ;;  %v14570_v28 = vcombine.high %v9482_v60, %v9482_v60  ;;  %v14569_v35 = vcombine.low %v9482_v60, %v9482_v60  ;;  %v9466_v21 = vld [vmem:[%s20944_s20 + $0xf58] sm:$0xff] }
 0xaf7   :  { %v9470_v36 = vld [vmem:[%s20944_s20 + $0xf78] sm:$0xff] }
 0xaf8   :  { %12656 = vmatpush2.bf16.msra.mxu1 %v14265_v30  ;;  %v9430_v48 = vld [vmem:[%s20944_s20 + $0xe38] sm:$0xff] }
 0xaf9   :  { %12697 = vmatpush2.bf16.msra.mxu0 %v14393_v45  ;;  %12657 = vmatprep.subr.bf16.mxu1 %v14258_v16  ;;  %v14457_v45 = vcombine.low %v9370_v11, %v9374_v3  ;;  %v14450_v16 = vcombine.high %v9362_v46, %v9366_v14 }
 0xafa   :  { %12698 = vmatprep.subr.bf16.mxu0 %v14386_v23  ;;  %v14449_v23 = vcombine.low %v9362_v46, %v9366_v14 }
 0xafc   :  { %12658 = vmatpush2.bf16.msra.mxu1 %v14257_v52  ;;  %v9474_v52 = vld [vmem:[%s20944_s20 + $0xf98] sm:$0xff] }
 0xafd   :  { %12699 = vmatpush2.bf16.msra.mxu0 %v14385_v10  ;;  %12709 = vmatprep.subr.bf16.mxu1 %v14506_v58  ;;  %v9478_v10 = vld [vmem:[%s20944_s20 + $0xfb8] sm:$0xff]  ;;  %v12089_v58 = vsel %vm12069_vm7, %v14569_v35, 0 }
 0xafe   :  { %v14562_v15 = vcombine.high %v9474_v52, %v9478_v10  ;;  %v14561_v27 = vcombine.low %v9474_v52, %v9478_v10 }
 0xaff   :  { %v12415_v19 = vpop.f32.mrf.mxu1  ;;  %12660 = vmatmul.mubr.bf16.vlgmr.msra.gmra.mxu1 %v19495_v31  ;;  %v9394_v31 = vld [vmem:[%s20944_s20 + $0xd18] sm:$0xff] }
 0xb00   :  { %v12416_v49 = vadd.f32 %v12415_v19, %v20629_v9  ;;  %v20813_v17 = vpop.f32.mrf.mxu0  ;;  %12701 = vmatmul.mubr.bf16.vlgmr.msra.gmra.mxu0 %v19670_v33  ;;  %12710 = vmatpush1.bf16.msra.mxu1 %v14505_v29  ;;  %v9398_v33 = vld [vmem:[%s20944_s20 + $0xd38] sm:$0xff]  ;;  %v14554_v29 = vcombine.high %v9466_v21, %v9470_v36 }
 0xb01   :  { %14578 = vmatprep.mubr.msk.bf16.mxu1 %vm12065_vm8, %v19782_v40  ;;  %v12417_v0 = vpop.f32.mrf.mxu1  ;;  %12711 = vmatprep.subr.bf16.mxu1 %v14498_v34  ;;  %v14489_v40 = vcombine.low %v9402_v5, %v9406_v32  ;;  %v14482_v38 = vcombine.high %v9394_v31, %v9398_v33  ;;  %v14481_v55 = vcombine.low %v9394_v31, %v9398_v33  ;;  %v9458_v5 = vld [vmem:[%s20944_s20 + $0xf18] sm:$0xff] }
 0xb02   :  { %v14581_v37 = vmul.f32 -1.442695, %v12416_v49  ;;  %v12418_v22 = vadd.f32 %v12417_v0, %v12377_v63  ;;  %v20818_v47 = vpop.f32.mrf.mxu0  ;;  %v9462_v32 = vld [vmem:[%s20944_s20 + $0xf38] sm:$0xff]  ;;  %v14553_v63 = vcombine.low %v9466_v21, %v9470_v36 }
 0xb03   :  { %v12419_v7 = vpop.f32.mrf.mxu1  ;;  %v9450_v0 = vld [vmem:[%s20944_s20 + $0xed8] sm:$0xff]  ;;  %v14545_v31 = vcombine.low %v9458_v5, %v9462_v32  ;;  %v12459_v11 = vadd.f32 %v20818_v47, %v9508_v51 }
 0xb04   :  { %15219 = vpow2.f32 %v14581_v37  ;;  %v14582_v9 = vmul.f32 -1.442695, %v12418_v22  ;;  %v12460_v26 = vpop.f32.mrf.mxu0  ;;  %12712 = vmatpush1.bf16.msra.mxu1 %v14497_v6  ;;  %v14546_v6 = vcombine.high %v9458_v5, %v9462_v32  ;;  %v12814_v37 = vrot.slane %v12806_v41, %v15523_v53  ;;  %v9438_v41 = vld [vmem:[%s20944_s20 + $0xe78] sm:$0xff] }
 0xb05   :  { %v12420_v61 = vpop.f32.mrf.mxu1  ;;  %12713 = vmatprep.subr.bf16.mxu1 %v14490_v42  ;;  %v9454_v42 = vld [vmem:[%s20944_s20 + $0xef8] sm:$0xff]  ;;  %v14521_v54 = vcombine.low %v9434_v20, %v9438_v41 }
 0xb06   :  { %15221 = vpow2.f32 %v14582_v9  ;;  %v12461_v57 = vpop.f32.mrf.mxu0  ;;  %v14538_v7 = vcombine.high %v9450_v0, %v9454_v42  ;;  %v9442_v9 = vld [vmem:[%s20944_s20 + $0xe98] sm:$0xff] }
 0xb07   :  { %v9446_v26 = vld [vmem:[%s20944_s20 + $0xeb8] sm:$0xff] }
 0xb08   :  { %12714 = vmatpush1.bf16.msra.mxu1 %v14489_v40  ;;  %v14537_v40 = vcombine.low %v9450_v0, %v9454_v42  ;;  %v14530_v12 = vcombine.high %v9442_v9, %v9446_v26  ;;  %v14529_v61 = vcombine.low %v9442_v9, %v9446_v26  ;;  %v9426_v57 = vld [vmem:[%s20944_s20 + $0xe18] sm:$0xff]  ;;  %s15314_s20 = smov [#allocation4]  }
 0xb09   :  { %12715 = vmatprep.subr.bf16.mxu1 %v14482_v38  ;;  %v14522_v38 = vcombine.high %v9434_v20, %v9438_v41  ;;  %s12860_s16 = sshll.u32 %s15314_s20, 4  ;;  %s12861_s16 = int_to_ptr.vmem [resolvable:$true] %s12860_s16 }
 0xb0a   :  { %s15246_s13 = scalar_lea.vmem %s12861_s16, 32  ;;  %p15251_p1 = scmp.lt.s32.totalorder %s12861_s16, %s12861_s16 }
 0xb0b   :  { %p15247_p0 = scmp.ne.s32.totalorder %s12861_s16, %s15246_s13  ;;  %p15252_p2 = scmp.lt.s32.totalorder %s15246_s13, %s15246_s13 }
 0xb0c   :  { %12716 = vmatpush1.bf16.msra.mxu1 %v14481_v55  ;;  %v14514_v55 = vcombine.high %v9426_v57, %v9430_v48 }
 0xb0d   :  { %12717 = vmatprep.subr.bf16.mxu1 %v14474_v8  ;;  %v14513_v8 = vcombine.low %v9426_v57, %v9430_v48  ;;  %p15253_p3 = por %p15252_p2, %p15251_p1 }
 0xb0f   :  { %p15254_p4 = pnand %p15253_p3, %p15247_p0 }
 0xb10   :  { %12718 = vmatpush1.bf16.msra.mxu1 %v14473_v24  ;;  %v12457_v24 = vadd.f32 %v20813_v17, %v9504_v44 }
 0xb11   :  { %v15220_v1 = vpop.eup %15219  ;;  %12719 = vmatprep.subr.bf16.mxu1 %v14466_v43 }
 0xb12   :  { %v12776_v4 = vadd.f32 1.0, %v15220_v1 }
 0xb13   :  { %v15222_v25 = vpop.eup %15221 }
 0xb14   :  { %v12777_v30 = vadd.f32 1.0, %v15222_v25  ;;  %12720 = vmatpush1.bf16.msra.mxu1 %v14465_v62  ;;  %15223 = vrcp.f32 %v12776_v4 }
 0xb15   :  { %12721 = vmatprep.subr.bf16.mxu1 %v14458_v50 }
 0xb16   :  { %15225 = vrcp.f32 %v12777_v30 }
 0xb18   :  { %12722 = vmatpush1.bf16.msra.mxu1 %v14457_v45 }
 0xb19   :  { %12723 = vmatprep.subr.bf16.mxu1 %v14450_v16 }
 0xb1c   :  { %12724 = vmatpush1.bf16.msra.mxu1 %v14449_v23 }
 0xb1d   :  { %14577 = vmatprep.subr.msk.bf16.mxu1 %vm12069_vm7, %v14570_v28 }
 0xb20   :  { %12726 = vmatpush2.bf16.msra.mxu1 %v12089_v58 }
 0xb21   :  { %12727 = vmatprep.subr.bf16.mxu1 %v14562_v15  ;;  %v15224_v34 = vpop.eup %15223 }
 0xb23   :  { %v15226_v19 = vpop.eup %15225 }
 0xb24   :  { %12728 = vmatpush2.bf16.msra.mxu1 %v14561_v27  ;;  %v12807_v49 = vcombine.low %v15224_v34, %v15226_v19 }
 0xb25   :  { %12729 = vmatprep.subr.bf16.mxu1 %v14554_v29 }
 0xb26   :  { %v12821_v22 = vrot.slane %v12807_v49, %v15523_v53 }
 0xb28   :  { %12730 = vmatpush2.bf16.msra.mxu1 %v14553_v63  ;;  %v12822_v33 = vcombine.low %v12814_v37, %v12821_v22 }
 0xb29   :  { %12731 = vmatprep.subr.bf16.mxu1 %v14546_v6 }
 0xb2a   :  { %12842 = vst [vmem:[#allocation2] sm:$0xff] %v12822_v33 }
 0xb2c   :  { %12732 = vmatpush2.bf16.msra.mxu1 %v14545_v31 }
 0xb2d   :  { %12733 = vmatprep.subr.bf16.mxu1 %v14538_v7 }
 0xb30   :  { %12734 = vmatpush2.bf16.msra.mxu1 %v14537_v40 }
 0xb31   :  { %12735 = vmatprep.subr.bf16.mxu1 %v14530_v12 }
 0xb34   :  { %12736 = vmatpush2.bf16.msra.mxu1 %v14529_v61 }
 0xb35   :  { %12737 = vmatprep.subr.bf16.mxu1 %v14522_v38 }
 0xb38   :  { %12738 = vmatpush2.bf16.msra.mxu1 %v14521_v54 }
 0xb39   :  { %12739 = vmatprep.subr.bf16.mxu1 %v14514_v55 }
 0xb3c   :  { %12740 = vmatpush2.bf16.msra.mxu1 %v14513_v8 }
 0xb3f   :  { %v12497_v43 = vpop.f32.mrf.mxu1  ;;  %12742 = vmatmul.mubr.bf16.vlgmr.msra.gmra.mxu1 %v19784_v13 }
 0xb40   :  { %v12498_v3 = vadd.f32 %v12497_v43, %v12457_v24  ;;  %v12538_v62 = vpop.f32.mrf.mxu0 }
 0xb41   :  { %v12499_v1 = vpop.f32.mrf.mxu1 }
 0xb42   :  { %v12539_v50 = vadd.f32 %v12538_v62, %v12498_v3  ;;  %v12500_v4 = vadd.f32 %v12499_v1, %v12459_v11  ;;  %v12540_v46 = vpop.f32.mrf.mxu0 }
 0xb43   :  { %v12501_v14 = vpop.f32.mrf.mxu1 }
 0xb44   :  { %v12541_v25 = vadd.f32 %v12540_v46, %v12500_v4  ;;  %v12542_v56 = vpop.f32.mrf.mxu0 }
 0xb45   :  { %v12502_v30 = vpop.f32.mrf.mxu1 }
 0xb46   :  { %v12543_v45 = vpop.f32.mrf.mxu0 }
 0xb7f   :  { %v12579_v18 = vpop.f32.mrf.mxu1 }
 0xb80   :  { %v12580_v16 = vadd.f32 %v12579_v18, %v12539_v50  ;;  %v12620_v60 = vpop.f32.mrf.mxu0 }
 0xb81   :  { %v12581_v17 = vpop.f32.mrf.mxu1 }
 0xb82   :  { %v14583_v23 = vmul.f32 -1.442695, %v12580_v16  ;;  %v12582_v28 = vadd.f32 %v12581_v17, %v12541_v25  ;;  %v12622_v13 = vpop.f32.mrf.mxu0 }
 0xb83   :  { %v12583_v35 = vpop.f32.mrf.mxu1 }
 0xb84   :  { %15227 = vpow2.f32 %v14583_v23  ;;  %v14584_v47 = vmul.f32 -1.442695, %v12582_v28  ;;  %v12624_v52 = vpop.f32.mrf.mxu0 }
 0xb85   :  { %v12584_v10 = vpop.f32.mrf.mxu1 }
 0xb86   :  { %15229 = vpow2.f32 %v14584_v47  ;;  %v12625_v58 = vpop.f32.mrf.mxu0 }
 0xb91   :  { %v15228_v15 = vpop.eup %15227 }
 0xb92   :  { %v12778_v21 = vadd.f32 1.0, %v15228_v15 }
 0xb93   :  { %v15230_v36 = vpop.eup %15229 }
 0xb94   :  { %v12779_v27 = vadd.f32 1.0, %v15230_v36  ;;  %15231 = vrcp.f32 %v12778_v21 }
 0xb96   :  { %15233 = vrcp.f32 %v12779_v27 }
 0xb97   :  { %15257 = shalt.err (!%p15254_p4)
}
 0xb98   :  { %12863 = dma.vmem_to_hbm [thread:$0]  %s12861_s16, 32, %s20947_s23, [#allocation5]  }
 0xb99   :  { %s15315_s7 = smov [#allocation6]  }
 0xb9a   :  { %s12870_s4 = sshll.u32 %s15315_s7, 4  ;;  %s12871_s4 = int_to_ptr.vmem [resolvable:$true] %s12870_s4 }
 0xb9b   :  { %s15266_s26 = scalar_lea.vmem %s12871_s4, 32  ;;  %p15271_p6 = scmp.lt.s32.totalorder %s12871_s4, %s12871_s4 }
 0xb9c   :  { %p15267_p5 = scmp.ne.s32.totalorder %s12871_s4, %s15266_s26  ;;  %p15272_p7 = scmp.lt.s32.totalorder %s15266_s26, %s15266_s26 }
 0xb9e   :  { %p15273_p8 = por %p15272_p7, %p15271_p6 }
 0xba0   :  { %p15274_p9 = pnand %p15273_p8, %p15267_p5 }
 0xba1   :  { %v15232_v29 = vpop.eup %15231 }
 0xba3   :  { %v15234_v34 = vpop.eup %15233 }
 0xba4   :  { %v12823_v5 = vcombine.low %v15232_v29, %v15234_v34 }
 0xba5   :  { %15277 = shalt.err (!%p15274_p9)
}
 0xba6   :  { %12873 = dma.vmem_to_hbm [thread:$0]  %s12871_s4, 32, %s20948_s24, [#allocation5]   ;;  %v9512_v22 = vrot.slane %v20593_v2, %v17648_v39  ;;  %v9516_v31 = vrot.slane %v20593_v2, %v17651_v59  ;;  %v12831_v43 = vrot.slane %v12823_v5, %v15523_v53 }
 0xba7   :  { %s15316_s23 = smov [#allocation2]  }
 0xba8   :  { %v12621_v33 = vadd.f32 %v12620_v60, %v9512_v22  ;;  %v12623_v7 = vadd.f32 %v12622_v13, %v9516_v31  ;;  %s12850_s24 = sshll.u32 %s15316_s23, 4  ;;  %s12851_s24 = int_to_ptr.vmem [resolvable:$true] %s12850_s24 }
 0xba9   :  { %s15286_s6 = scalar_lea.vmem %s12851_s24, 256  ;;  %p15291_p11 = scmp.lt.s32.totalorder %s12851_s24, %s12851_s24 }
 0xbaa   :  { %p15287_p10 = scmp.ne.s32.totalorder %s12851_s24, %s15286_s6  ;;  %p15292_p12 = scmp.lt.s32.totalorder %s15286_s6, %s15286_s6 }
 0xbac   :  { %p15293_p13 = por %p15292_p12, %p15291_p11 }
 0xbae   :  { %p15294_p0 = pnand %p15293_p13, %p15287_p10 }
 0xbbf   :  { %v12661_v32 = vpop.f32.mrf.mxu1 }
 0xbc0   :  { %v12702_v19 = vpop.f32.mrf.mxu0  ;;  %v12662_v9 = vadd.f32 %v12661_v32, %v12621_v33 }
 0xbc1   :  { %v12663_v63 = vpop.f32.mrf.mxu1 }
 0xbc2   :  { %v12704_v49 = vpop.f32.mrf.mxu0  ;;  %v12664_v26 = vadd.f32 %v12663_v63, %v12623_v7  ;;  %v12703_v40 = vadd.f32 %v12702_v19, %v12662_v9 }
 0xbc3   :  { %v12665_v6 = vpop.f32.mrf.mxu1 }
 0xbc4   :  { %v12706_v0 = vpop.f32.mrf.mxu0  ;;  %v12705_v20 = vadd.f32 %v12704_v49, %v12664_v26 }
 0xbc5   :  { %v12666_v42 = vpop.f32.mrf.mxu1 }
 0xbc6   :  { %v12707_v37 = vpop.f32.mrf.mxu0 }
 0xbff   :  { %v12743_v12 = vpop.f32.mrf.mxu1 }
 0xc00   :  { %v12744_v41 = vadd.f32 %v12743_v12, %v12703_v40 }
 0xc01   :  { %v12745_v61 = vpop.f32.mrf.mxu1 }
 0xc02   :  { %v14585_v38 = vmul.f32 -1.442695, %v12744_v41  ;;  %v12746_v57 = vadd.f32 %v12745_v61, %v12705_v20 }
 0xc03   :  { %v12747_v48 = vpop.f32.mrf.mxu1 }
 0xc04   :  { %15235 = vpow2.f32 %v14585_v38  ;;  %v14586_v54 = vmul.f32 -1.442695, %v12746_v57 }
 0xc05   :  { %v12748_v55 = vpop.f32.mrf.mxu1 }
 0xc06   :  { %15237 = vpow2.f32 %v14586_v54 }
 0xc11   :  { %v15236_v39 = vpop.eup %15235 }
 0xc12   :  { %v12780_v8 = vadd.f32 1.0, %v15236_v39 }
 0xc13   :  { %v15238_v44 = vpop.eup %15237 }
 0xc14   :  { %v12781_v59 = vadd.f32 1.0, %v15238_v44  ;;  %15239 = vrcp.f32 %v12780_v8 }
 0xc16   :  { %15241 = vrcp.f32 %v12781_v59 }
 0xc21   :  { %v15240_v2 = vpop.eup %15239 }
 0xc23   :  { %v15242_v51 = vpop.eup %15241 }
 0xc24   :  { %v12824_v24 = vcombine.low %v15240_v2, %v15242_v51 }
 0xc26   :  { %v12838_v11 = vrot.slane %v12824_v24, %v15523_v53 }
 0xc28   :  { %v12839_v3 = vcombine.low %v12831_v43, %v12838_v11 }
 0xc2a   :  { %12843 = vst [vmem:[#allocation2 + $0x8] sm:$0xff] %v12839_v3 }
 0xc2b   :  { %15297 = shalt.err (!%p15294_p0)
}
 0xc2c   :  { %12853 = dma.vmem_to_hbm [thread:$0]  %s12851_s24, 256, %s20946_s22, [#allocation3]  }
 0xc2d   :  { %15306 = dma.done.wait [#allocation3], 256  }
 0xc2e   :  { %15307 = vsyncadd [#allocation3], 4294967040 }
 0xc2f   :  { %15308 = dma.done.wait [#allocation5], 64  }
 0xc30   :  { %15309 = vsyncadd [#allocation5], 4294967232 }
 0xc31   :  { %12883 = vsyncpa [#allocation3], 1 }
 0xc32   :  { %12884 = vsyncpa [#allocation5], 1 }

</bundles_post_ra>
